<compile_context>
chip_gen: v7x
topology: tpu7x:2x2x1
jax: 0.10.0
libtpu: 0.0.40
codegen_flags: <defaults>
</compile_context>

<pallas_src>
from functools import partial

import jax
import jax.numpy as jnp
from jax.experimental import pallas as pl
from jax.experimental.pallas import tpu as pltpu


def _round_up(v, m):
    return (v + m - 1) // m * m


def _make_dense_lstm_kernel(seq_len, b_pad, emb_pad, hid_pad, layer_num,
                            mm_dtype, unroll):
    """Build the fused DenseRNN kernel for static shapes."""
    three_hp = 3 * hid_pad

    def kernel(*refs):
        x_ref = refs[0]
        wih_refs = refs[1:1 + layer_num]                 # ragged, one per layer
        whh_ref, bias_ref, out_ref, h_scr, c_scr, gproj_scr = refs[1 + layer_num:]

        # Place x into its lane-aligned slot of the output slab.  Every other
        # slab column is fully written by the per-step stores below, so no
        # zero-init / full-slab copy is needed.
        out_ref[:, :emb_pad] = x_ref[...]

        for layer in range(layer_num):          # static, unrolled layer loop
            d_in = emb_pad + layer * hid_pad    # 128-aligned ragged input width
            out_col = d_in                      # this layer's 128-aligned slot

            # Non-recurrent input projection for ALL timesteps in one MXU
            # matmul: (T*B_pad, d_in) @ (d_in, 4*Hp) + bias, f32 accumulate.
            gproj_scr[...] = (
                jnp.dot(out_ref[:, :d_in].astype(mm_dtype),
                        wih_refs[layer][...],
                        preferred_element_type=jnp.float32)
                + bias_ref[layer])

            # W_hh loaded once per layer; loop-invariant inside fori_loop.
            # TODO(synk): could pin it in the MXU via matmul_push_rhs/acc_lhs.
            w_hh = whh_ref[layer]               # (Hp, 4*Hp)
            h_scr[...] = jnp.zeros_like(h_scr)
            c_scr[...] = jnp.zeros_like(c_scr)

            def step(t, carry, w_hh=w_hh, out_col=out_col):
                row = pl.multiple_of(t * b_pad, b_pad)
                gates = (gproj_scr[pl.ds(row, b_pad), :]
                         + jnp.dot(h_scr[...].astype(mm_dtype), w_hh,
                                   preferred_element_type=jnp.float32))
                # Gate layout [i | f | o | g], each block 128-lane aligned:
                # one sigmoid over the first 3 blocks, tanh over the last;
                # all slices are free lane-aligned vreg sub-views.
                sig = jax.nn.sigmoid(gates[:, :three_hp])
                g_g = jnp.tanh(gates[:, three_hp:])
                i_g = sig[:, 0:hid_pad]
                f_g = sig[:, hid_pad:2 * hid_pad]
                o_g = sig[:, 2 * hid_pad:three_hp]
                c_new = f_g * c_scr[...] + i_g * g_g
                h_new = o_g * jnp.tanh(c_new)
                c_scr[...] = c_new
                h_scr[...] = h_new
                # Lane-aligned per-step store straight into the output slab.
                out_ref[pl.ds(row, b_pad), out_col:out_col + hid_pad] = h_new
                return carry

            jax.lax.fori_loop(0, seq_len, step, 0, unroll=unroll)

    return kernel


@partial(jax.jit, static_argnames=("matmul_dtype", "unroll"))
def dense_rnn_forward(x, params, *, matmul_dtype=jnp.bfloat16, unroll=8):
    """DenseRNN.forward: each layer concatenates its LSTM output to its input."""
    seq_len, batch, emb_dim = x.shape
    layer_num = len(params)
    hid_dim = params[0]["w_hh_t"].shape[0]

    b_pad = _round_up(batch, 8)                      # f32 sublane multiple
    emb_pad = _round_up(emb_dim, 128)                # lane-aligned x slot
    hid_pad = _round_up(hid_dim, 128)                # lane-aligned layer slots
    four_hp = 4 * hid_pad
    d_slab = emb_pad + layer_num * hid_pad
    d_total = emb_dim + layer_num * hid_dim

    # Kernel gate order [i, f, o, g]  <-  PyTorch order [i, f, g, o].
    gate_src = (0, 1, 3, 2)

    # Input: only x, padded to (T*B_pad, emb_pad).  No zero slab from HBM.
    x_in = jnp.zeros((seq_len, b_pad, emb_pad), jnp.float32)
    x_in = x_in.at[:, :batch, :emb_dim].set(x.astype(jnp.float32))
    x_in = x_in.reshape(seq_len * b_pad, emb_pad)

    # Pack weights into the lane-aligned, gate-reordered layout.
    # W_ih is ragged per layer (rows = emb_pad + l*hid_pad); rows/cols that
    # correspond to padding stay zero and contribute nothing.
    wih_list = []
    whh = jnp.zeros((layer_num, hid_pad, four_hp), matmul_dtype)
    bias = jnp.zeros((layer_num, 1, four_hp), jnp.float32)
    for l, p in enumerate(params):
        d_in_pad = emb_pad + l * hid_pad
        w = jnp.zeros((d_in_pad, four_hp), jnp.float32)
        # Map original feature rows -> padded slab rows.
        row_blocks = [(0, 0, emb_dim)] + [
            (emb_dim + m * hid_dim, emb_pad + m * hid_pad, hid_dim)
            for m in range(l)]
        b_flat = p["bias"].reshape(-1)
        for kb, src in enumerate(gate_src):
            src_cols = slice(src * hid_dim, (src + 1) * hid_dim)
            dst_cols = slice(kb * hid_pad, kb * hid_pad + hid_dim)
            for (src_r, dst_r, nr) in row_blocks:
                w = w.at[dst_r:dst_r + nr, dst_cols].set(
                    p["w_ih_t"][src_r:src_r + nr, src_cols])
            whh = whh.at[l, :hid_dim, dst_cols].set(
                p["w_hh_t"][:, src_cols].astype(matmul_dtype))
            bias = bias.at[l, 0, dst_cols].set(b_flat[src_cols])
        wih_list.append(w.astype(matmul_dtype))

    kernel = _make_dense_lstm_kernel(seq_len, b_pad, emb_pad, hid_pad,
                                     layer_num, matmul_dtype,
                                     min(unroll, seq_len))

    # Scoped-VMEM budget from the actual resident buffers (+2x / headroom),
    # clamped to the smallest physical VMEM across generations (v7x: 64 MiB).
    resident_bytes = (
        x_in.size * 4
        + sum(w.size for w in wih_list) * 4
        + whh.size * 4 + bias.size * 4
        + seq_len * b_pad * d_slab * 4                      # output slab
        + (2 * b_pad * hid_pad + seq_len * b_pad * four_hp) * 4)  # scratch
    vmem_limit = min(int(resident_bytes * 2) + (4 << 20), 64 << 20)

    out_slab = pl.pallas_call(
        kernel,
        out_shape=jax.ShapeDtypeStruct((seq_len * b_pad, d_slab), jnp.float32),
        scratch_shapes=[
            pltpu.VMEM((b_pad, hid_pad), jnp.float32),             # h_t
            pltpu.VMEM((b_pad, hid_pad), jnp.float32),             # c_t
            pltpu.VMEM((seq_len * b_pad, four_hp), jnp.float32),   # x@W_ih + b
        ],
        compiler_params=pltpu.CompilerParams(vmem_limit_bytes=vmem_limit),
    )(x_in, *wih_list, whh, bias)

    # Re-assemble the dense [x | out_0 | ... | out_{L-1}] layout (drops the
    # 128-lane alignment padding and the padded batch rows).
    out_slab = out_slab.reshape(seq_len, b_pad, d_slab)[:, :batch, :]
    pieces = [out_slab[:, :, :emb_dim]]
    for l in range(layer_num):
        off = emb_pad + l * hid_pad
        pieces.append(out_slab[:, :, off:off + hid_dim])
    out = jnp.concatenate(pieces, axis=-1)
    assert out.shape == (seq_len, batch, d_total)
    return out


def make_dense_rnn_params(key, layer_num, emb_dim, hid_dim):
    """Deterministic parameter init mimicking nn.LSTM's U(-1/sqrt(H), 1/sqrt(H))."""
    params = []
    bound = 1.0 / jnp.sqrt(jnp.float32(hid_dim))
    for i in range(layer_num):
        d_in = emb_dim + i * hid_dim
        key, k1, k2, k3, k4 = jax.random.split(key, 5)
        w_ih = jax.random.uniform(k1, (4 * hid_dim, d_in), jnp.float32, -bound, bound)
        w_hh = jax.random.uniform(k2, (4 * hid_dim, hid_dim), jnp.float32, -bound, bound)
        b_ih = jax.random.uniform(k3, (4 * hid_dim,), jnp.float32, -bound, bound)
        b_hh = jax.random.uniform(k4, (4 * hid_dim,), jnp.float32, -bound, bound)
        params.append({
            "w_ih_t": w_ih.T,                # (D_in, 4H), PyTorch [i,f,g,o] cols
            "w_hh_t": w_hh.T,                # (H,   4H)
            "bias": (b_ih + b_hh)[None, :],  # (1,   4H)
        })
    return params


# ---------------- pure-JAX reference (for correctness check) ----------------
def _lstm_layer_ref(x, w_ih_t, w_hh_t, bias):
    hdim = w_hh_t.shape[0]
    batch = x.shape[1]

    def step(carry, x_t):
        h, c = carry
        gates = x_t @ w_ih_t + h @ w_hh_t + bias
        i_g = jax.nn.sigmoid(gates[:, 0 * hdim:1 * hdim])
        f_g = jax.nn.sigmoid(gates[:, 1 * hdim:2 * hdim])
        g_g = jnp.tanh(gates[:, 2 * hdim:3 * hdim])
        o_g = jax.nn.sigmoid(gates[:, 3 * hdim:4 * hdim])
        c_new = f_g * c + i_g * g_g
        h_new = o_g * jnp.tanh(c_new)
        return (h_new, c_new), h_new

    init = (jnp.zeros((batch, hdim), jnp.float32),
            jnp.zeros((batch, hdim), jnp.float32))
    _, outs = jax.lax.scan(step, init, x)
    return outs


def dense_rnn_ref(x, params):
    cur = x
    for p in params:
        out = _lstm_layer_ref(cur, p["w_ih_t"], p["w_hh_t"], p["bias"])
        cur = jnp.concatenate([cur, out], axis=2)
    return cur


if __name__ == "__main__":
    layer_num = 3
    emb_dim = 16
    hid_dim = 32
    seq_len = 8
    batch = 4

    key = jax.random.PRNGKey(0)
    key, xkey = jax.random.split(key)
    x = jax.random.normal(xkey, (seq_len, batch, emb_dim), jnp.float32)

    params = make_dense_rnn_params(key, layer_num, emb_dim, hid_dim)
    y_ref = dense_rnn_ref(x, params)
    expected_dim = emb_dim + layer_num * hid_dim

    # f32 matmul path: tight check against the pure-JAX f32 reference.
    y32 = jax.block_until_ready(
        dense_rnn_forward(x, params, matmul_dtype=jnp.float32))
    assert y32.shape == (seq_len, batch, expected_dim), y32.shape
    assert jnp.allclose(y32, y_ref, rtol=1e-3, atol=1e-3), (
        float(jnp.max(jnp.abs(y32 - y_ref))))

    # bf16 matmul-input path (perf default): looser tolerance (f32 gates/h/c).
    y16 = jax.block_until_ready(dense_rnn_forward(x, params))
    assert y16.shape == (seq_len, batch, expected_dim), y16.shape
    assert jnp.allclose(y16, y_ref, rtol=3e-2, atol=3e-2), (
        float(jnp.max(jnp.abs(y16 - y_ref))))

    print("KERNEL_OK")
</pallas_src>

<mosaic_0001>
module attributes {stable_mosaic.version = 11 : i64} {
  func.func @kernel(%arg0: memref<64x128xf32, #tpu.memory_space<vmem>>, %arg1: memref<128x512xf32, #tpu.memory_space<vmem>>, %arg2: memref<256x512xf32, #tpu.memory_space<vmem>>, %arg3: memref<384x512xf32, #tpu.memory_space<vmem>>, %arg4: memref<3x128x512xf32, #tpu.memory_space<vmem>>, %arg5: memref<3x1x512xf32, #tpu.memory_space<vmem>>, %arg6: memref<64x512xf32, #tpu.memory_space<vmem>>, %arg7: memref<8x128xf32, #tpu.memory_space<vmem>>, %arg8: memref<8x128xf32, #tpu.memory_space<vmem>>, %arg9: memref<64x512xf32, #tpu.memory_space<vmem>>) attributes {dimension_semantics = [], scalar_prefetch = 0 : i64, scratch_operands = 3 : i64, tpu.core_type = #tpu.core_type<tc>} {
    %c0 = arith.constant 0 : index
    %c0_0 = arith.constant 0 : index
    %0 = vector.load %arg0[%c0, %c0_0] : memref<64x128xf32, #tpu.memory_space<vmem>>, vector<64x128xf32>
    %c0_1 = arith.constant 0 : index
    %c0_2 = arith.constant 0 : index
    %1 = vector.load %arg6[%c0_1, %c0_2] : memref<64x512xf32, #tpu.memory_space<vmem>>, vector<64x128xf32>
    tpu.vector_store %arg6[%c0_1, %c0_2], %0 {strides = array<i32>} : memref<64x512xf32, #tpu.memory_space<vmem>>, vector<64x128xf32>,
    %c0_3 = arith.constant 0 : index
    %c0_4 = arith.constant 0 : index
    %2 = vector.load %arg6[%c0_3, %c0_4] : memref<64x512xf32, #tpu.memory_space<vmem>>, vector<64x128xf32>
    %c0_5 = arith.constant 0 : index
    %c0_6 = arith.constant 0 : index
    %3 = vector.load %arg1[%c0_5, %c0_6] : memref<128x512xf32, #tpu.memory_space<vmem>>, vector<128x512xf32>
    %cst = arith.constant dense<0.000000e+00> : vector<64x512xf32>
    %4 = tpu.matmul %2, %3, %cst {dimension_numbers = #tpu.dot_dimension_numbers<[1], [0], [0], [1], [0, 0, 1, 1], [], []>} : vector<64x128xf32>, vector<128x512xf32>, vector<64x512xf32> -> vector<64x512xf32>
    %c0_7 = arith.constant 0 : index
    %c0_8 = arith.constant 0 : index
    %c0_9 = arith.constant 0 : index
    %5 = vector.load %arg5[%c0_7, %c0_8, %c0_9] : memref<3x1x512xf32, #tpu.memory_space<vmem>>, vector<1x1x512xf32>
    %6 = vector.shape_cast %5 : vector<1x1x512xf32> to vector<1x512xf32>
    %7 = vector.broadcast %6 : vector<1x512xf32> to vector<64x512xf32>
    %8 = arith.addf %4, %7 : vector<64x512xf32>
    %c0_10 = arith.constant 0 : index
    %c0_11 = arith.constant 0 : index
    %9 = vector.load %arg9[%c0_10, %c0_11] : memref<64x512xf32, #tpu.memory_space<vmem>>, vector<64x512xf32>
    tpu.vector_store %arg9[%c0_10, %c0_11], %8 {strides = array<i32>} : memref<64x512xf32, #tpu.memory_space<vmem>>, vector<64x512xf32>,
    %c0_12 = arith.constant 0 : index
    %c0_13 = arith.constant 0 : index
    %c0_14 = arith.constant 0 : index
    %10 = vector.load %arg4[%c0_12, %c0_13, %c0_14] : memref<3x128x512xf32, #tpu.memory_space<vmem>>, vector<1x128x512xf32>
    %11 = vector.shape_cast %10 : vector<1x128x512xf32> to vector<128x512xf32>
    %cst_15 = arith.constant 0.000000e+00 : f32
    %12 = vector.broadcast %cst_15 : f32 to vector<8x128xf32>
    %c0_16 = arith.constant 0 : index
    %c0_17 = arith.constant 0 : index
    %13 = vector.load %arg7[%c0_16, %c0_17] : memref<8x128xf32, #tpu.memory_space<vmem>>, vector<8x128xf32>
    tpu.vector_store %arg7[%c0_16, %c0_17], %12 {strides = array<i32>} : memref<8x128xf32, #tpu.memory_space<vmem>>, vector<8x128xf32>,
    %cst_18 = arith.constant 0.000000e+00 : f32
    %14 = vector.broadcast %cst_18 : f32 to vector<8x128xf32>
    %c0_19 = arith.constant 0 : index
    %c0_20 = arith.constant 0 : index
    %15 = vector.load %arg8[%c0_19, %c0_20] : memref<8x128xf32, #tpu.memory_space<vmem>>, vector<8x128xf32>
    tpu.vector_store %arg8[%c0_19, %c0_20], %14 {strides = array<i32>} : memref<8x128xf32, #tpu.memory_space<vmem>>, vector<8x128xf32>,
    %c0_i32 = arith.constant 0 : i32
    %c8_i32 = arith.constant 8 : i32
    %16 = arith.muli %c0_i32, %c8_i32 : i32
    %17 = tpu.assume_multiple %16, 8 : i32
    %18 = arith.index_cast %17 : i32 to index
    %c0_21 = arith.constant 0 : index
    %19 = vector.load %arg9[%18, %c0_21] : memref<64x512xf32, #tpu.memory_space<vmem>>, vector<8x512xf32>
    %c0_22 = arith.constant 0 : index
    %c0_23 = arith.constant 0 : index
    %20 = vector.load %arg7[%c0_22, %c0_23] : memref<8x128xf32, #tpu.memory_space<vmem>>, vector<8x128xf32>
    %cst_24 = arith.constant dense<0.000000e+00> : vector<8x512xf32>
    %21 = tpu.matmul %20, %11, %cst_24 {dimension_numbers = #tpu.dot_dimension_numbers<[1], [0], [0], [1], [0, 0, 1, 1], [], []>} : vector<8x128xf32>, vector<128x512xf32>, vector<8x512xf32> -> vector<8x512xf32>
    %22 = arith.addf %19, %21 : vector<8x512xf32>
    %23 = vector.extract_strided_slice %22 {offsets = [0, 0], sizes = [8, 384], strides = [1, 1]} : vector<8x512xf32> to vector<8x384xf32>
    %24 = arith.negf %23 : vector<8x384xf32>
    %25 = math.exp %24 : vector<8x384xf32>
    %cst_25 = arith.constant 1.000000e+00 : f32
    %26 = vector.broadcast %cst_25 : f32 to vector<8x384xf32>
    %27 = arith.addf %26, %25 : vector<8x384xf32>
    %28 = arith.divf %26, %27 : vector<8x384xf32>
    %29 = vector.extract_strided_slice %22 {offsets = [0, 384], sizes = [8, 128], strides = [1, 1]} : vector<8x512xf32> to vector<8x128xf32>
    %30 = math.tanh %29 : vector<8x128xf32>
    %31 = vector.extract_strided_slice %28 {offsets = [0, 0], sizes = [8, 128], strides = [1, 1]} : vector<8x384xf32> to vector<8x128xf32>
    %32 = vector.extract_strided_slice %28 {offsets = [0, 128], sizes = [8, 128], strides = [1, 1]} : vector<8x384xf32> to vector<8x128xf32>
    %33 = vector.extract_strided_slice %28 {offsets = [0, 256], sizes = [8, 128], strides = [1, 1]} : vector<8x384xf32> to vector<8x128xf32>
    %c0_26 = arith.constant 0 : index
    %c0_27 = arith.constant 0 : index
    %34 = vector.load %arg8[%c0_26, %c0_27] : memref<8x128xf32, #tpu.memory_space<vmem>>, vector<8x128xf32>
    %35 = arith.mulf %32, %34 : vector<8x128xf32>
    %36 = arith.mulf %31, %30 : vector<8x128xf32>
    %37 = arith.addf %35, %36 : vector<8x128xf32>
    %38 = math.tanh %37 : vector<8x128xf32>
    %39 = arith.mulf %33, %38 : vector<8x128xf32>
    %c0_28 = arith.constant 0 : index
    %c0_29 = arith.constant 0 : index
    %40 = vector.load %arg8[%c0_28, %c0_29] : memref<8x128xf32, #tpu.memory_space<vmem>>, vector<8x128xf32>
    tpu.vector_store %arg8[%c0_28, %c0_29], %37 {strides = array<i32>} : memref<8x128xf32, #tpu.memory_space<vmem>>, vector<8x128xf32>,
    %c0_30 = arith.constant 0 : index
    %c0_31 = arith.constant 0 : index
    %41 = vector.load %arg7[%c0_30, %c0_31] : memref<8x128xf32, #tpu.memory_space<vmem>>, vector<8x128xf32>
    tpu.vector_store %arg7[%c0_30, %c0_31], %39 {strides = array<i32>} : memref<8x128xf32, #tpu.memory_space<vmem>>, vector<8x128xf32>,
    %42 = arith.index_cast %17 : i32 to index
    %c128 = arith.constant 128 : index
    %43 = vector.load %arg6[%42, %c128] : memref<64x512xf32, #tpu.memory_space<vmem>>, vector<8x128xf32>
    tpu.vector_store %arg6[%42, %c128], %39 {strides = array<i32>} : memref<64x512xf32, #tpu.memory_space<vmem>>, vector<8x128xf32>,
    %c1_i32 = arith.constant 1 : i32
    %c8_i32_32 = arith.constant 8 : i32
    %44 = arith.muli %c1_i32, %c8_i32_32 : i32
    %45 = tpu.assume_multiple %44, 8 : i32
    %46 = arith.index_cast %45 : i32 to index
    %c0_33 = arith.constant 0 : index
    %47 = vector.load %arg9[%46, %c0_33] : memref<64x512xf32, #tpu.memory_space<vmem>>, vector<8x512xf32>
    %c0_34 = arith.constant 0 : index
    %c0_35 = arith.constant 0 : index
    %48 = vector.load %arg7[%c0_34, %c0_35] : memref<8x128xf32, #tpu.memory_space<vmem>>, vector<8x128xf32>
    %cst_36 = arith.constant dense<0.000000e+00> : vector<8x512xf32>
    %49 = tpu.matmul %48, %11, %cst_36 {dimension_numbers = #tpu.dot_dimension_numbers<[1], [0], [0], [1], [0, 0, 1, 1], [], []>} : vector<8x128xf32>, vector<128x512xf32>, vector<8x512xf32> -> vector<8x512xf32>
    %50 = arith.addf %47, %49 : vector<8x512xf32>
    %51 = vector.extract_strided_slice %50 {offsets = [0, 0], sizes = [8, 384], strides = [1, 1]} : vector<8x512xf32> to vector<8x384xf32>
    %52 = arith.negf %51 : vector<8x384xf32>
    %53 = math.exp %52 : vector<8x384xf32>
    %cst_37 = arith.constant 1.000000e+00 : f32
    %54 = vector.broadcast %cst_37 : f32 to vector<8x384xf32>
    %55 = arith.addf %54, %53 : vector<8x384xf32>
    %56 = arith.divf %54, %55 : vector<8x384xf32>
    %57 = vector.extract_strided_slice %50 {offsets = [0, 384], sizes = [8, 128], strides = [1, 1]} : vector<8x512xf32> to vector<8x128xf32>
    %58 = math.tanh %57 : vector<8x128xf32>
    %59 = vector.extract_strided_slice %56 {offsets = [0, 0], sizes = [8, 128], strides = [1, 1]} : vector<8x384xf32> to vector<8x128xf32>
    %60 = vector.extract_strided_slice %56 {offsets = [0, 128], sizes = [8, 128], strides = [1, 1]} : vector<8x384xf32> to vector<8x128xf32>
    %61 = vector.extract_strided_slice %56 {offsets = [0, 256], sizes = [8, 128], strides = [1, 1]} : vector<8x384xf32> to vector<8x128xf32>
    %c0_38 = arith.constant 0 : index
    %c0_39 = arith.constant 0 : index
    %62 = vector.load %arg8[%c0_38, %c0_39] : memref<8x128xf32, #tpu.memory_space<vmem>>, vector<8x128xf32>
    %63 = arith.mulf %60, %62 : vector<8x128xf32>
    %64 = arith.mulf %59, %58 : vector<8x128xf32>
    %65 = arith.addf %63, %64 : vector<8x128xf32>
    %66 = math.tanh %65 : vector<8x128xf32>
    %67 = arith.mulf %61, %66 : vector<8x128xf32>
    %c0_40 = arith.constant 0 : index
    %c0_41 = arith.constant 0 : index
    %68 = vector.load %arg8[%c0_40, %c0_41] : memref<8x128xf32, #tpu.memory_space<vmem>>, vector<8x128xf32>
    tpu.vector_store %arg8[%c0_40, %c0_41], %65 {strides = array<i32>} : memref<8x128xf32, #tpu.memory_space<vmem>>, vector<8x128xf32>,
    %c0_42 = arith.constant 0 : index
    %c0_43 = arith.constant 0 : index
    %69 = vector.load %arg7[%c0_42, %c0_43] : memref<8x128xf32, #tpu.memory_space<vmem>>, vector<8x128xf32>
    tpu.vector_store %arg7[%c0_42, %c0_43], %67 {strides = array<i32>} : memref<8x128xf32, #tpu.memory_space<vmem>>, vector<8x128xf32>,
    %70 = arith.index_cast %45 : i32 to index
    %c128_44 = arith.constant 128 : index
    %71 = vector.load %arg6[%70, %c128_44] : memref<64x512xf32, #tpu.memory_space<vmem>>, vector<8x128xf32>
    tpu.vector_store %arg6[%70, %c128_44], %67 {strides = array<i32>} : memref<64x512xf32, #tpu.memory_space<vmem>>, vector<8x128xf32>,
    %c2_i32 = arith.constant 2 : i32
    %c8_i32_45 = arith.constant 8 : i32
    %72 = arith.muli %c2_i32, %c8_i32_45 : i32
    %73 = tpu.assume_multiple %72, 8 : i32
    %74 = arith.index_cast %73 : i32 to index
    %c0_46 = arith.constant 0 : index
    %75 = vector.load %arg9[%74, %c0_46] : memref<64x512xf32, #tpu.memory_space<vmem>>, vector<8x512xf32>
    %c0_47 = arith.constant 0 : index
    %c0_48 = arith.constant 0 : index
    %76 = vector.load %arg7[%c0_47, %c0_48] : memref<8x128xf32, #tpu.memory_space<vmem>>, vector<8x128xf32>
    %cst_49 = arith.constant dense<0.000000e+00> : vector<8x512xf32>
    %77 = tpu.matmul %76, %11, %cst_49 {dimension_numbers = #tpu.dot_dimension_numbers<[1], [0], [0], [1], [0, 0, 1, 1], [], []>} : vector<8x128xf32>, vector<128x512xf32>, vector<8x512xf32> -> vector<8x512xf32>
    %78 = arith.addf %75, %77 : vector<8x512xf32>
    %79 = vector.extract_strided_slice %78 {offsets = [0, 0], sizes = [8, 384], strides = [1, 1]} : vector<8x512xf32> to vector<8x384xf32>
    %80 = arith.negf %79 : vector<8x384xf32>
    %81 = math.exp %80 : vector<8x384xf32>
    %cst_50 = arith.constant 1.000000e+00 : f32
    %82 = vector.broadcast %cst_50 : f32 to vector<8x384xf32>
    %83 = arith.addf %82, %81 : vector<8x384xf32>
    %84 = arith.divf %82, %83 : vector<8x384xf32>
    %85 = vector.extract_strided_slice %78 {offsets = [0, 384], sizes = [8, 128], strides = [1, 1]} : vector<8x512xf32> to vector<8x128xf32>
    %86 = math.tanh %85 : vector<8x128xf32>
    %87 = vector.extract_strided_slice %84 {offsets = [0, 0], sizes = [8, 128], strides = [1, 1]} : vector<8x384xf32> to vector<8x128xf32>
    %88 = vector.extract_strided_slice %84 {offsets = [0, 128], sizes = [8, 128], strides = [1, 1]} : vector<8x384xf32> to vector<8x128xf32>
    %89 = vector.extract_strided_slice %84 {offsets = [0, 256], sizes = [8, 128], strides = [1, 1]} : vector<8x384xf32> to vector<8x128xf32>
    %c0_51 = arith.constant 0 : index
    %c0_52 = arith.constant 0 : index
    %90 = vector.load %arg8[%c0_51, %c0_52] : memref<8x128xf32, #tpu.memory_space<vmem>>, vector<8x128xf32>
    %91 = arith.mulf %88, %90 : vector<8x128xf32>
    %92 = arith.mulf %87, %86 : vector<8x128xf32>
    %93 = arith.addf %91, %92 : vector<8x128xf32>
    %94 = math.tanh %93 : vector<8x128xf32>
    %95 = arith.mulf %89, %94 : vector<8x128xf32>
    %c0_53 = arith.constant 0 : index
    %c0_54 = arith.constant 0 : index
    %96 = vector.load %arg8[%c0_53, %c0_54] : memref<8x128xf32, #tpu.memory_space<vmem>>, vector<8x128xf32>
    tpu.vector_store %arg8[%c0_53, %c0_54], %93 {strides = array<i32>} : memref<8x128xf32, #tpu.memory_space<vmem>>, vector<8x128xf32>,
    %c0_55 = arith.constant 0 : index
    %c0_56 = arith.constant 0 : index
    %97 = vector.load %arg7[%c0_55, %c0_56] : memref<8x128xf32, #tpu.memory_space<vmem>>, vector<8x128xf32>
    tpu.vector_store %arg7[%c0_55, %c0_56], %95 {strides = array<i32>} : memref<8x128xf32, #tpu.memory_space<vmem>>, vector<8x128xf32>,
    %98 = arith.index_cast %73 : i32 to index
    %c128_57 = arith.constant 128 : index
    %99 = vector.load %arg6[%98, %c128_57] : memref<64x512xf32, #tpu.memory_space<vmem>>, vector<8x128xf32>
    tpu.vector_store %arg6[%98, %c128_57], %95 {strides = array<i32>} : memref<64x512xf32, #tpu.memory_space<vmem>>, vector<8x128xf32>,
    %c3_i32 = arith.constant 3 : i32
    %c8_i32_58 = arith.constant 8 : i32
    %100 = arith.muli %c3_i32, %c8_i32_58 : i32
    %101 = tpu.assume_multiple %100, 8 : i32
    %102 = arith.index_cast %101 : i32 to index
    %c0_59 = arith.constant 0 : index
    %103 = vector.load %arg9[%102, %c0_59] : memref<64x512xf32, #tpu.memory_space<vmem>>, vector<8x512xf32>
    %c0_60 = arith.constant 0 : index
    %c0_61 = arith.constant 0 : index
    %104 = vector.load %arg7[%c0_60, %c0_61] : memref<8x128xf32, #tpu.memory_space<vmem>>, vector<8x128xf32>
    %cst_62 = arith.constant dense<0.000000e+00> : vector<8x512xf32>
    %105 = tpu.matmul %104, %11, %cst_62 {dimension_numbers = #tpu.dot_dimension_numbers<[1], [0], [0], [1], [0, 0, 1, 1], [], []>} : vector<8x128xf32>, vector<128x512xf32>, vector<8x512xf32> -> vector<8x512xf32>
    %106 = arith.addf %103, %105 : vector<8x512xf32>
    %107 = vector.extract_strided_slice %106 {offsets = [0, 0], sizes = [8, 384], strides = [1, 1]} : vector<8x512xf32> to vector<8x384xf32>
    %108 = arith.negf %107 : vector<8x384xf32>
    %109 = math.exp %108 : vector<8x384xf32>
    %cst_63 = arith.constant 1.000000e+00 : f32
    %110 = vector.broadcast %cst_63 : f32 to vector<8x384xf32>
    %111 = arith.addf %110, %109 : vector<8x384xf32>
    %112 = arith.divf %110, %111 : vector<8x384xf32>
    %113 = vector.extract_strided_slice %106 {offsets = [0, 384], sizes = [8, 128], strides = [1, 1]} : vector<8x512xf32> to vector<8x128xf32>
    %114 = math.tanh %113 : vector<8x128xf32>
    %115 = vector.extract_strided_slice %112 {offsets = [0, 0], sizes = [8, 128], strides = [1, 1]} : vector<8x384xf32> to vector<8x128xf32>
    %116 = vector.extract_strided_slice %112 {offsets = [0, 128], sizes = [8, 128], strides = [1, 1]} : vector<8x384xf32> to vector<8x128xf32>
    %117 = vector.extract_strided_slice %112 {offsets = [0, 256], sizes = [8, 128], strides = [1, 1]} : vector<8x384xf32> to vector<8x128xf32>
    %c0_64 = arith.constant 0 : index
    %c0_65 = arith.constant 0 : index
    %118 = vector.load %arg8[%c0_64, %c0_65] : memref<8x128xf32, #tpu.memory_space<vmem>>, vector<8x128xf32>
    %119 = arith.mulf %116, %118 : vector<8x128xf32>
    %120 = arith.mulf %115, %114 : vector<8x128xf32>
    %121 = arith.addf %119, %120 : vector<8x128xf32>
    %122 = math.tanh %121 : vector<8x128xf32>
    %123 = arith.mulf %117, %122 : vector<8x128xf32>
    %c0_66 = arith.constant 0 : index
    %c0_67 = arith.constant 0 : index
    %124 = vector.load %arg8[%c0_66, %c0_67] : memref<8x128xf32, #tpu.memory_space<vmem>>, vector<8x128xf32>
    tpu.vector_store %arg8[%c0_66, %c0_67], %121 {strides = array<i32>} : memref<8x128xf32, #tpu.memory_space<vmem>>, vector<8x128xf32>,
    %c0_68 = arith.constant 0 : index
    %c0_69 = arith.constant 0 : index
    %125 = vector.load %arg7[%c0_68, %c0_69] : memref<8x128xf32, #tpu.memory_space<vmem>>, vector<8x128xf32>
    tpu.vector_store %arg7[%c0_68, %c0_69], %123 {strides = array<i32>} : memref<8x128xf32, #tpu.memory_space<vmem>>, vector<8x128xf32>,
    %126 = arith.index_cast %101 : i32 to index
    %c128_70 = arith.constant 128 : index
    %127 = vector.load %arg6[%126, %c128_70] : memref<64x512xf32, #tpu.memory_space<vmem>>, vector<8x128xf32>
    tpu.vector_store %arg6[%126, %c128_70], %123 {strides = array<i32>} : memref<64x512xf32, #tpu.memory_space<vmem>>, vector<8x128xf32>,
    %c4_i32 = arith.constant 4 : i32
    %c8_i32_71 = arith.constant 8 : i32
    %128 = arith.muli %c4_i32, %c8_i32_71 : i32
    %129 = tpu.assume_multiple %128, 8 : i32
    %130 = arith.index_cast %129 : i32 to index
    %c0_72 = arith.constant 0 : index
    %131 = vector.load %arg9[%130, %c0_72] : memref<64x512xf32, #tpu.memory_space<vmem>>, vector<8x512xf32>
    %c0_73 = arith.constant 0 : index
    %c0_74 = arith.constant 0 : index
    %132 = vector.load %arg7[%c0_73, %c0_74] : memref<8x128xf32, #tpu.memory_space<vmem>>, vector<8x128xf32>
    %cst_75 = arith.constant dense<0.000000e+00> : vector<8x512xf32>
    %133 = tpu.matmul %132, %11, %cst_75 {dimension_numbers = #tpu.dot_dimension_numbers<[1], [0], [0], [1], [0, 0, 1, 1], [], []>} : vector<8x128xf32>, vector<128x512xf32>, vector<8x512xf32> -> vector<8x512xf32>
    %134 = arith.addf %131, %133 : vector<8x512xf32>
    %135 = vector.extract_strided_slice %134 {offsets = [0, 0], sizes = [8, 384], strides = [1, 1]} : vector<8x512xf32> to vector<8x384xf32>
    %136 = arith.negf %135 : vector<8x384xf32>
    %137 = math.exp %136 : vector<8x384xf32>
    %cst_76 = arith.constant 1.000000e+00 : f32
    %138 = vector.broadcast %cst_76 : f32 to vector<8x384xf32>
    %139 = arith.addf %138, %137 : vector<8x384xf32>
    %140 = arith.divf %138, %139 : vector<8x384xf32>
    %141 = vector.extract_strided_slice %134 {offsets = [0, 384], sizes = [8, 128], strides = [1, 1]} : vector<8x512xf32> to vector<8x128xf32>
    %142 = math.tanh %141 : vector<8x128xf32>
    %143 = vector.extract_strided_slice %140 {offsets = [0, 0], sizes = [8, 128], strides = [1, 1]} : vector<8x384xf32> to vector<8x128xf32>
    %144 = vector.extract_strided_slice %140 {offsets = [0, 128], sizes = [8, 128], strides = [1, 1]} : vector<8x384xf32> to vector<8x128xf32>
    %145 = vector.extract_strided_slice %140 {offsets = [0, 256], sizes = [8, 128], strides = [1, 1]} : vector<8x384xf32> to vector<8x128xf32>
    %c0_77 = arith.constant 0 : index
    %c0_78 = arith.constant 0 : index
    %146 = vector.load %arg8[%c0_77, %c0_78] : memref<8x128xf32, #tpu.memory_space<vmem>>, vector<8x128xf32>
    %147 = arith.mulf %144, %146 : vector<8x128xf32>
    %148 = arith.mulf %143, %142 : vector<8x128xf32>
    %149 = arith.addf %147, %148 : vector<8x128xf32>
    %150 = math.tanh %149 : vector<8x128xf32>
    %151 = arith.mulf %145, %150 : vector<8x128xf32>
    %c0_79 = arith.constant 0 : index
    %c0_80 = arith.constant 0 : index
    %152 = vector.load %arg8[%c0_79, %c0_80] : memref<8x128xf32, #tpu.memory_space<vmem>>, vector<8x128xf32>
    tpu.vector_store %arg8[%c0_79, %c0_80], %149 {strides = array<i32>} : memref<8x128xf32, #tpu.memory_space<vmem>>, vector<8x128xf32>,
    %c0_81 = arith.constant 0 : index
    %c0_82 = arith.constant 0 : index
    %153 = vector.load %arg7[%c0_81, %c0_82] : memref<8x128xf32, #tpu.memory_space<vmem>>, vector<8x128xf32>
    tpu.vector_store %arg7[%c0_81, %c0_82], %151 {strides = array<i32>} : memref<8x128xf32, #tpu.memory_space<vmem>>, vector<8x128xf32>,
    %154 = arith.index_cast %129 : i32 to index
    %c128_83 = arith.constant 128 : index
    %155 = vector.load %arg6[%154, %c128_83] : memref<64x512xf32, #tpu.memory_space<vmem>>, vector<8x128xf32>
    tpu.vector_store %arg6[%154, %c128_83], %151 {strides = array<i32>} : memref<64x512xf32, #tpu.memory_space<vmem>>, vector<8x128xf32>,
    %c5_i32 = arith.constant 5 : i32
    %c8_i32_84 = arith.constant 8 : i32
    %156 = arith.muli %c5_i32, %c8_i32_84 : i32
    %157 = tpu.assume_multiple %156, 8 : i32
    %158 = arith.index_cast %157 : i32 to index
    %c0_85 = arith.constant 0 : index
    %159 = vector.load %arg9[%158, %c0_85] : memref<64x512xf32, #tpu.memory_space<vmem>>, vector<8x512xf32>
    %c0_86 = arith.constant 0 : index
    %c0_87 = arith.constant 0 : index
    %160 = vector.load %arg7[%c0_86, %c0_87] : memref<8x128xf32, #tpu.memory_space<vmem>>, vector<8x128xf32>
    %cst_88 = arith.constant dense<0.000000e+00> : vector<8x512xf32>
    %161 = tpu.matmul %160, %11, %cst_88 {dimension_numbers = #tpu.dot_dimension_numbers<[1], [0], [0], [1], [0, 0, 1, 1], [], []>} : vector<8x128xf32>, vector<128x512xf32>, vector<8x512xf32> -> vector<8x512xf32>
    %162 = arith.addf %159, %161 : vector<8x512xf32>
    %163 = vector.extract_strided_slice %162 {offsets = [0, 0], sizes = [8, 384], strides = [1, 1]} : vector<8x512xf32> to vector<8x384xf32>
    %164 = arith.negf %163 : vector<8x384xf32>
    %165 = math.exp %164 : vector<8x384xf32>
    %cst_89 = arith.constant 1.000000e+00 : f32
    %166 = vector.broadcast %cst_89 : f32 to vector<8x384xf32>
    %167 = arith.addf %166, %165 : vector<8x384xf32>
    %168 = arith.divf %166, %167 : vector<8x384xf32>
    %169 = vector.extract_strided_slice %162 {offsets = [0, 384], sizes = [8, 128], strides = [1, 1]} : vector<8x512xf32> to vector<8x128xf32>
    %170 = math.tanh %169 : vector<8x128xf32>
    %171 = vector.extract_strided_slice %168 {offsets = [0, 0], sizes = [8, 128], strides = [1, 1]} : vector<8x384xf32> to vector<8x128xf32>
    %172 = vector.extract_strided_slice %168 {offsets = [0, 128], sizes = [8, 128], strides = [1, 1]} : vector<8x384xf32> to vector<8x128xf32>
    %173 = vector.extract_strided_slice %168 {offsets = [0, 256], sizes = [8, 128], strides = [1, 1]} : vector<8x384xf32> to vector<8x128xf32>
    %c0_90 = arith.constant 0 : index
    %c0_91 = arith.constant 0 : index
    %174 = vector.load %arg8[%c0_90, %c0_91] : memref<8x128xf32, #tpu.memory_space<vmem>>, vector<8x128xf32>
    %175 = arith.mulf %172, %174 : vector<8x128xf32>
    %176 = arith.mulf %171, %170 : vector<8x128xf32>
    %177 = arith.addf %175, %176 : vector<8x128xf32>
    %178 = math.tanh %177 : vector<8x128xf32>
    %179 = arith.mulf %173, %178 : vector<8x128xf32>
    %c0_92 = arith.constant 0 : index
    %c0_93 = arith.constant 0 : index
    %180 = vector.load %arg8[%c0_92, %c0_93] : memref<8x128xf32, #tpu.memory_space<vmem>>, vector<8x128xf32>
    tpu.vector_store %arg8[%c0_92, %c0_93], %177 {strides = array<i32>} : memref<8x128xf32, #tpu.memory_space<vmem>>, vector<8x128xf32>,
    %c0_94 = arith.constant 0 : index
    %c0_95 = arith.constant 0 : index
    %181 = vector.load %arg7[%c0_94, %c0_95] : memref<8x128xf32, #tpu.memory_space<vmem>>, vector<8x128xf32>
    tpu.vector_store %arg7[%c0_94, %c0_95], %179 {strides = array<i32>} : memref<8x128xf32, #tpu.memory_space<vmem>>, vector<8x128xf32>,
    %182 = arith.index_cast %157 : i32 to index
    %c128_96 = arith.constant 128 : index
    %183 = vector.load %arg6[%182, %c128_96] : memref<64x512xf32, #tpu.memory_space<vmem>>, vector<8x128xf32>
    tpu.vector_store %arg6[%182, %c128_96], %179 {strides = array<i32>} : memref<64x512xf32, #tpu.memory_space<vmem>>, vector<8x128xf32>,
    %c6_i32 = arith.constant 6 : i32
    %c8_i32_97 = arith.constant 8 : i32
    %184 = arith.muli %c6_i32, %c8_i32_97 : i32
    %185 = tpu.assume_multiple %184, 8 : i32
    %186 = arith.index_cast %185 : i32 to index
    %c0_98 = arith.constant 0 : index
    %187 = vector.load %arg9[%186, %c0_98] : memref<64x512xf32, #tpu.memory_space<vmem>>, vector<8x512xf32>
    %c0_99 = arith.constant 0 : index
    %c0_100 = arith.constant 0 : index
    %188 = vector.load %arg7[%c0_99, %c0_100] : memref<8x128xf32, #tpu.memory_space<vmem>>, vector<8x128xf32>
    %cst_101 = arith.constant dense<0.000000e+00> : vector<8x512xf32>
    %189 = tpu.matmul %188, %11, %cst_101 {dimension_numbers = #tpu.dot_dimension_numbers<[1], [0], [0], [1], [0, 0, 1, 1], [], []>} : vector<8x128xf32>, vector<128x512xf32>, vector<8x512xf32> -> vector<8x512xf32>
    %190 = arith.addf %187, %189 : vector<8x512xf32>
    %191 = vector.extract_strided_slice %190 {offsets = [0, 0], sizes = [8, 384], strides = [1, 1]} : vector<8x512xf32> to vector<8x384xf32>
    %192 = arith.negf %191 : vector<8x384xf32>
    %193 = math.exp %192 : vector<8x384xf32>
    %cst_102 = arith.constant 1.000000e+00 : f32
    %194 = vector.broadcast %cst_102 : f32 to vector<8x384xf32>
    %195 = arith.addf %194, %193 : vector<8x384xf32>
    %196 = arith.divf %194, %195 : vector<8x384xf32>
    %197 = vector.extract_strided_slice %190 {offsets = [0, 384], sizes = [8, 128], strides = [1, 1]} : vector<8x512xf32> to vector<8x128xf32>
    %198 = math.tanh %197 : vector<8x128xf32>
    %199 = vector.extract_strided_slice %196 {offsets = [0, 0], sizes = [8, 128], strides = [1, 1]} : vector<8x384xf32> to vector<8x128xf32>
    %200 = vector.extract_strided_slice %196 {offsets = [0, 128], sizes = [8, 128], strides = [1, 1]} : vector<8x384xf32> to vector<8x128xf32>
    %201 = vector.extract_strided_slice %196 {offsets = [0, 256], sizes = [8, 128], strides = [1, 1]} : vector<8x384xf32> to vector<8x128xf32>
    %c0_103 = arith.constant 0 : index
    %c0_104 = arith.constant 0 : index
    %202 = vector.load %arg8[%c0_103, %c0_104] : memref<8x128xf32, #tpu.memory_space<vmem>>, vector<8x128xf32>
    %203 = arith.mulf %200, %202 : vector<8x128xf32>
    %204 = arith.mulf %199, %198 : vector<8x128xf32>
    %205 = arith.addf %203, %204 : vector<8x128xf32>
    %206 = math.tanh %205 : vector<8x128xf32>
    %207 = arith.mulf %201, %206 : vector<8x128xf32>
    %c0_105 = arith.constant 0 : index
    %c0_106 = arith.constant 0 : index
    %208 = vector.load %arg8[%c0_105, %c0_106] : memref<8x128xf32, #tpu.memory_space<vmem>>, vector<8x128xf32>
    tpu.vector_store %arg8[%c0_105, %c0_106], %205 {strides = array<i32>} : memref<8x128xf32, #tpu.memory_space<vmem>>, vector<8x128xf32>,
    %c0_107 = arith.constant 0 : index
    %c0_108 = arith.constant 0 : index
    %209 = vector.load %arg7[%c0_107, %c0_108] : memref<8x128xf32, #tpu.memory_space<vmem>>, vector<8x128xf32>
    tpu.vector_store %arg7[%c0_107, %c0_108], %207 {strides = array<i32>} : memref<8x128xf32, #tpu.memory_space<vmem>>, vector<8x128xf32>,
    %210 = arith.index_cast %185 : i32 to index
    %c128_109 = arith.constant 128 : index
    %211 = vector.load %arg6[%210, %c128_109] : memref<64x512xf32, #tpu.memory_space<vmem>>, vector<8x128xf32>
    tpu.vector_store %arg6[%210, %c128_109], %207 {strides = array<i32>} : memref<64x512xf32, #tpu.memory_space<vmem>>, vector<8x128xf32>,
    %c7_i32 = arith.constant 7 : i32
    %c8_i32_110 = arith.constant 8 : i32
    %212 = arith.muli %c7_i32, %c8_i32_110 : i32
    %213 = tpu.assume_multiple %212, 8 : i32
    %214 = arith.index_cast %213 : i32 to index
    %c0_111 = arith.constant 0 : index
    %215 = vector.load %arg9[%214, %c0_111] : memref<64x512xf32, #tpu.memory_space<vmem>>, vector<8x512xf32>
    %c0_112 = arith.constant 0 : index
    %c0_113 = arith.constant 0 : index
    %216 = vector.load %arg7[%c0_112, %c0_113] : memref<8x128xf32, #tpu.memory_space<vmem>>, vector<8x128xf32>
    %cst_114 = arith.constant dense<0.000000e+00> : vector<8x512xf32>
    %217 = tpu.matmul %216, %11, %cst_114 {dimension_numbers = #tpu.dot_dimension_numbers<[1], [0], [0], [1], [0, 0, 1, 1], [], []>} : vector<8x128xf32>, vector<128x512xf32>, vector<8x512xf32> -> vector<8x512xf32>
    %218 = arith.addf %215, %217 : vector<8x512xf32>
    %219 = vector.extract_strided_slice %218 {offsets = [0, 0], sizes = [8, 384], strides = [1, 1]} : vector<8x512xf32> to vector<8x384xf32>
    %220 = arith.negf %219 : vector<8x384xf32>
    %221 = math.exp %220 : vector<8x384xf32>
    %cst_115 = arith.constant 1.000000e+00 : f32
    %222 = vector.broadcast %cst_115 : f32 to vector<8x384xf32>
    %223 = arith.addf %222, %221 : vector<8x384xf32>
    %224 = arith.divf %222, %223 : vector<8x384xf32>
    %225 = vector.extract_strided_slice %218 {offsets = [0, 384], sizes = [8, 128], strides = [1, 1]} : vector<8x512xf32> to vector<8x128xf32>
    %226 = math.tanh %225 : vector<8x128xf32>
    %227 = vector.extract_strided_slice %224 {offsets = [0, 0], sizes = [8, 128], strides = [1, 1]} : vector<8x384xf32> to vector<8x128xf32>
    %228 = vector.extract_strided_slice %224 {offsets = [0, 128], sizes = [8, 128], strides = [1, 1]} : vector<8x384xf32> to vector<8x128xf32>
    %229 = vector.extract_strided_slice %224 {offsets = [0, 256], sizes = [8, 128], strides = [1, 1]} : vector<8x384xf32> to vector<8x128xf32>
    %c0_116 = arith.constant 0 : index
    %c0_117 = arith.constant 0 : index
    %230 = vector.load %arg8[%c0_116, %c0_117] : memref<8x128xf32, #tpu.memory_space<vmem>>, vector<8x128xf32>
    %231 = arith.mulf %228, %230 : vector<8x128xf32>
    %232 = arith.mulf %227, %226 : vector<8x128xf32>
    %233 = arith.addf %231, %232 : vector<8x128xf32>
    %234 = math.tanh %233 : vector<8x128xf32>
    %235 = arith.mulf %229, %234 : vector<8x128xf32>
    %c0_118 = arith.constant 0 : index
    %c0_119 = arith.constant 0 : index
    %236 = vector.load %arg8[%c0_118, %c0_119] : memref<8x128xf32, #tpu.memory_space<vmem>>, vector<8x128xf32>
    tpu.vector_store %arg8[%c0_118, %c0_119], %233 {strides = array<i32>} : memref<8x128xf32, #tpu.memory_space<vmem>>, vector<8x128xf32>,
    %c0_120 = arith.constant 0 : index
    %c0_121 = arith.constant 0 : index
    %237 = vector.load %arg7[%c0_120, %c0_121] : memref<8x128xf32, #tpu.memory_space<vmem>>, vector<8x128xf32>
    tpu.vector_store %arg7[%c0_120, %c0_121], %235 {strides = array<i32>} : memref<8x128xf32, #tpu.memory_space<vmem>>, vector<8x128xf32>,
    %238 = arith.index_cast %213 : i32 to index
    %c128_122 = arith.constant 128 : index
    %239 = vector.load %arg6[%238, %c128_122] : memref<64x512xf32, #tpu.memory_space<vmem>>, vector<8x128xf32>
    tpu.vector_store %arg6[%238, %c128_122], %235 {strides = array<i32>} : memref<64x512xf32, #tpu.memory_space<vmem>>, vector<8x128xf32>,
    %c8_i32_123 = arith.constant 8 : i32
    %c0_124 = arith.constant 0 : index
    %c0_125 = arith.constant 0 : index
    %240 = vector.load %arg6[%c0_124, %c0_125] : memref<64x512xf32, #tpu.memory_space<vmem>>, vector<64x256xf32>
    %c0_126 = arith.constant 0 : index
    %c0_127 = arith.constant 0 : index
    %241 = vector.load %arg2[%c0_126, %c0_127] : memref<256x512xf32, #tpu.memory_space<vmem>>, vector<256x512xf32>
    %cst_128 = arith.constant dense<0.000000e+00> : vector<64x512xf32>
    %242 = tpu.matmul %240, %241, %cst_128 {dimension_numbers = #tpu.dot_dimension_numbers<[1], [0], [0], [1], [0, 0, 1, 1], [], []>} : vector<64x256xf32>, vector<256x512xf32>, vector<64x512xf32> -> vector<64x512xf32>
    %c1 = arith.constant 1 : index
    %c0_129 = arith.constant 0 : index
    %c0_130 = arith.constant 0 : index
    %243 = vector.load %arg5[%c1, %c0_129, %c0_130] : memref<3x1x512xf32, #tpu.memory_space<vmem>>, vector<1x1x512xf32>
    %244 = vector.shape_cast %243 : vector<1x1x512xf32> to vector<1x512xf32>
    %245 = vector.broadcast %244 : vector<1x512xf32> to vector<64x512xf32>
    %246 = arith.addf %242, %245 : vector<64x512xf32>
    %c0_131 = arith.constant 0 : index
    %c0_132 = arith.constant 0 : index
    %247 = vector.load %arg9[%c0_131, %c0_132] : memref<64x512xf32, #tpu.memory_space<vmem>>, vector<64x512xf32>
    tpu.vector_store %arg9[%c0_131, %c0_132], %246 {strides = array<i32>} : memref<64x512xf32, #tpu.memory_space<vmem>>, vector<64x512xf32>,
    %c1_133 = arith.constant 1 : index
    %c0_134 = arith.constant 0 : index
    %c0_135 = arith.constant 0 : index
    %248 = vector.load %arg4[%c1_133, %c0_134, %c0_135] : memref<3x128x512xf32, #tpu.memory_space<vmem>>, vector<1x128x512xf32>
    %249 = vector.shape_cast %248 : vector<1x128x512xf32> to vector<128x512xf32>
    %cst_136 = arith.constant 0.000000e+00 : f32
    %250 = vector.broadcast %cst_136 : f32 to vector<8x128xf32>
    %c0_137 = arith.constant 0 : index
    %c0_138 = arith.constant 0 : index
    %251 = vector.load %arg7[%c0_137, %c0_138] : memref<8x128xf32, #tpu.memory_space<vmem>>, vector<8x128xf32>
    tpu.vector_store %arg7[%c0_137, %c0_138], %250 {strides = array<i32>} : memref<8x128xf32, #tpu.memory_space<vmem>>, vector<8x128xf32>,
    %cst_139 = arith.constant 0.000000e+00 : f32
    %252 = vector.broadcast %cst_139 : f32 to vector<8x128xf32>
    %c0_140 = arith.constant 0 : index
    %c0_141 = arith.constant 0 : index
    %253 = vector.load %arg8[%c0_140, %c0_141] : memref<8x128xf32, #tpu.memory_space<vmem>>, vector<8x128xf32>
    tpu.vector_store %arg8[%c0_140, %c0_141], %252 {strides = array<i32>} : memref<8x128xf32, #tpu.memory_space<vmem>>, vector<8x128xf32>,
    %c0_i32_142 = arith.constant 0 : i32
    %c8_i32_143 = arith.constant 8 : i32
    %254 = arith.muli %c0_i32_142, %c8_i32_143 : i32
    %255 = tpu.assume_multiple %254, 8 : i32
    %256 = arith.index_cast %255 : i32 to index
    %c0_144 = arith.constant 0 : index
    %257 = vector.load %arg9[%256, %c0_144] : memref<64x512xf32, #tpu.memory_space<vmem>>, vector<8x512xf32>
    %c0_145 = arith.constant 0 : index
    %c0_146 = arith.constant 0 : index
    %258 = vector.load %arg7[%c0_145, %c0_146] : memref<8x128xf32, #tpu.memory_space<vmem>>, vector<8x128xf32>
    %cst_147 = arith.constant dense<0.000000e+00> : vector<8x512xf32>
    %259 = tpu.matmul %258, %249, %cst_147 {dimension_numbers = #tpu.dot_dimension_numbers<[1], [0], [0], [1], [0, 0, 1, 1], [], []>} : vector<8x128xf32>, vector<128x512xf32>, vector<8x512xf32> -> vector<8x512xf32>
    %260 = arith.addf %257, %259 : vector<8x512xf32>
    %261 = vector.extract_strided_slice %260 {offsets = [0, 0], sizes = [8, 384], strides = [1, 1]} : vector<8x512xf32> to vector<8x384xf32>
    %262 = arith.negf %261 : vector<8x384xf32>
    %263 = math.exp %262 : vector<8x384xf32>
    %cst_148 = arith.constant 1.000000e+00 : f32
    %264 = vector.broadcast %cst_148 : f32 to vector<8x384xf32>
    %265 = arith.addf %264, %263 : vector<8x384xf32>
    %266 = arith.divf %264, %265 : vector<8x384xf32>
    %267 = vector.extract_strided_slice %260 {offsets = [0, 384], sizes = [8, 128], strides = [1, 1]} : vector<8x512xf32> to vector<8x128xf32>
    %268 = math.tanh %267 : vector<8x128xf32>
    %269 = vector.extract_strided_slice %266 {offsets = [0, 0], sizes = [8, 128], strides = [1, 1]} : vector<8x384xf32> to vector<8x128xf32>
    %270 = vector.extract_strided_slice %266 {offsets = [0, 128], sizes = [8, 128], strides = [1, 1]} : vector<8x384xf32> to vector<8x128xf32>
    %271 = vector.extract_strided_slice %266 {offsets = [0, 256], sizes = [8, 128], strides = [1, 1]} : vector<8x384xf32> to vector<8x128xf32>
    %c0_149 = arith.constant 0 : index
    %c0_150 = arith.constant 0 : index
    %272 = vector.load %arg8[%c0_149, %c0_150] : memref<8x128xf32, #tpu.memory_space<vmem>>, vector<8x128xf32>
    %273 = arith.mulf %270, %272 : vector<8x128xf32>
    %274 = arith.mulf %269, %268 : vector<8x128xf32>
    %275 = arith.addf %273, %274 : vector<8x128xf32>
    %276 = math.tanh %275 : vector<8x128xf32>
    %277 = arith.mulf %271, %276 : vector<8x128xf32>
    %c0_151 = arith.constant 0 : index
    %c0_152 = arith.constant 0 : index
    %278 = vector.load %arg8[%c0_151, %c0_152] : memref<8x128xf32, #tpu.memory_space<vmem>>, vector<8x128xf32>
    tpu.vector_store %arg8[%c0_151, %c0_152], %275 {strides = array<i32>} : memref<8x128xf32, #tpu.memory_space<vmem>>, vector<8x128xf32>,
    %c0_153 = arith.constant 0 : index
    %c0_154 = arith.constant 0 : index
    %279 = vector.load %arg7[%c0_153, %c0_154] : memref<8x128xf32, #tpu.memory_space<vmem>>, vector<8x128xf32>
    tpu.vector_store %arg7[%c0_153, %c0_154], %277 {strides = array<i32>} : memref<8x128xf32, #tpu.memory_space<vmem>>, vector<8x128xf32>,
    %280 = arith.index_cast %255 : i32 to index
    %c256 = arith.constant 256 : index
    %281 = vector.load %arg6[%280, %c256] : memref<64x512xf32, #tpu.memory_space<vmem>>, vector<8x128xf32>
    tpu.vector_store %arg6[%280, %c256], %277 {strides = array<i32>} : memref<64x512xf32, #tpu.memory_space<vmem>>, vector<8x128xf32>,
    %c1_i32_155 = arith.constant 1 : i32
    %c8_i32_156 = arith.constant 8 : i32
    %282 = arith.muli %c1_i32_155, %c8_i32_156 : i32
    %283 = tpu.assume_multiple %282, 8 : i32
    %284 = arith.index_cast %283 : i32 to index
    %c0_157 = arith.constant 0 : index
    %285 = vector.load %arg9[%284, %c0_157] : memref<64x512xf32, #tpu.memory_space<vmem>>, vector<8x512xf32>
    %c0_158 = arith.constant 0 : index
    %c0_159 = arith.constant 0 : index
    %286 = vector.load %arg7[%c0_158, %c0_159] : memref<8x128xf32, #tpu.memory_space<vmem>>, vector<8x128xf32>
    %cst_160 = arith.constant dense<0.000000e+00> : vector<8x512xf32>
    %287 = tpu.matmul %286, %249, %cst_160 {dimension_numbers = #tpu.dot_dimension_numbers<[1], [0], [0], [1], [0, 0, 1, 1], [], []>} : vector<8x128xf32>, vector<128x512xf32>, vector<8x512xf32> -> vector<8x512xf32>
    %288 = arith.addf %285, %287 : vector<8x512xf32>
    %289 = vector.extract_strided_slice %288 {offsets = [0, 0], sizes = [8, 384], strides = [1, 1]} : vector<8x512xf32> to vector<8x384xf32>
    %290 = arith.negf %289 : vector<8x384xf32>
    %291 = math.exp %290 : vector<8x384xf32>
    %cst_161 = arith.constant 1.000000e+00 : f32
    %292 = vector.broadcast %cst_161 : f32 to vector<8x384xf32>
    %293 = arith.addf %292, %291 : vector<8x384xf32>
    %294 = arith.divf %292, %293 : vector<8x384xf32>
    %295 = vector.extract_strided_slice %288 {offsets = [0, 384], sizes = [8, 128], strides = [1, 1]} : vector<8x512xf32> to vector<8x128xf32>
    %296 = math.tanh %295 : vector<8x128xf32>
    %297 = vector.extract_strided_slice %294 {offsets = [0, 0], sizes = [8, 128], strides = [1, 1]} : vector<8x384xf32> to vector<8x128xf32>
    %298 = vector.extract_strided_slice %294 {offsets = [0, 128], sizes = [8, 128], strides = [1, 1]} : vector<8x384xf32> to vector<8x128xf32>
    %299 = vector.extract_strided_slice %294 {offsets = [0, 256], sizes = [8, 128], strides = [1, 1]} : vector<8x384xf32> to vector<8x128xf32>
    %c0_162 = arith.constant 0 : index
    %c0_163 = arith.constant 0 : index
    %300 = vector.load %arg8[%c0_162, %c0_163] : memref<8x128xf32, #tpu.memory_space<vmem>>, vector<8x128xf32>
    %301 = arith.mulf %298, %300 : vector<8x128xf32>
    %302 = arith.mulf %297, %296 : vector<8x128xf32>
    %303 = arith.addf %301, %302 : vector<8x128xf32>
    %304 = math.tanh %303 : vector<8x128xf32>
    %305 = arith.mulf %299, %304 : vector<8x128xf32>
    %c0_164 = arith.constant 0 : index
    %c0_165 = arith.constant 0 : index
    %306 = vector.load %arg8[%c0_164, %c0_165] : memref<8x128xf32, #tpu.memory_space<vmem>>, vector<8x128xf32>
    tpu.vector_store %arg8[%c0_164, %c0_165], %303 {strides = array<i32>} : memref<8x128xf32, #tpu.memory_space<vmem>>, vector<8x128xf32>,
    %c0_166 = arith.constant 0 : index
    %c0_167 = arith.constant 0 : index
    %307 = vector.load %arg7[%c0_166, %c0_167] : memref<8x128xf32, #tpu.memory_space<vmem>>, vector<8x128xf32>
    tpu.vector_store %arg7[%c0_166, %c0_167], %305 {strides = array<i32>} : memref<8x128xf32, #tpu.memory_space<vmem>>, vector<8x128xf32>,
    %308 = arith.index_cast %283 : i32 to index
    %c256_168 = arith.constant 256 : index
    %309 = vector.load %arg6[%308, %c256_168] : memref<64x512xf32, #tpu.memory_space<vmem>>, vector<8x128xf32>
    tpu.vector_store %arg6[%308, %c256_168], %305 {strides = array<i32>} : memref<64x512xf32, #tpu.memory_space<vmem>>, vector<8x128xf32>,
    %c2_i32_169 = arith.constant 2 : i32
    %c8_i32_170 = arith.constant 8 : i32
    %310 = arith.muli %c2_i32_169, %c8_i32_170 : i32
    %311 = tpu.assume_multiple %310, 8 : i32
    %312 = arith.index_cast %311 : i32 to index
    %c0_171 = arith.constant 0 : index
    %313 = vector.load %arg9[%312, %c0_171] : memref<64x512xf32, #tpu.memory_space<vmem>>, vector<8x512xf32>
    %c0_172 = arith.constant 0 : index
    %c0_173 = arith.constant 0 : index
    %314 = vector.load %arg7[%c0_172, %c0_173] : memref<8x128xf32, #tpu.memory_space<vmem>>, vector<8x128xf32>
    %cst_174 = arith.constant dense<0.000000e+00> : vector<8x512xf32>
    %315 = tpu.matmul %314, %249, %cst_174 {dimension_numbers = #tpu.dot_dimension_numbers<[1], [0], [0], [1], [0, 0, 1, 1], [], []>} : vector<8x128xf32>, vector<128x512xf32>, vector<8x512xf32> -> vector<8x512xf32>
    %316 = arith.addf %313, %315 : vector<8x512xf32>
    %317 = vector.extract_strided_slice %316 {offsets = [0, 0], sizes = [8, 384], strides = [1, 1]} : vector<8x512xf32> to vector<8x384xf32>
    %318 = arith.negf %317 : vector<8x384xf32>
    %319 = math.exp %318 : vector<8x384xf32>
    %cst_175 = arith.constant 1.000000e+00 : f32
    %320 = vector.broadcast %cst_175 : f32 to vector<8x384xf32>
    %321 = arith.addf %320, %319 : vector<8x384xf32>
    %322 = arith.divf %320, %321 : vector<8x384xf32>
    %323 = vector.extract_strided_slice %316 {offsets = [0, 384], sizes = [8, 128], strides = [1, 1]} : vector<8x512xf32> to vector<8x128xf32>
    %324 = math.tanh %323 : vector<8x128xf32>
    %325 = vector.extract_strided_slice %322 {offsets = [0, 0], sizes = [8, 128], strides = [1, 1]} : vector<8x384xf32> to vector<8x128xf32>
    %326 = vector.extract_strided_slice %322 {offsets = [0, 128], sizes = [8, 128], strides = [1, 1]} : vector<8x384xf32> to vector<8x128xf32>
    %327 = vector.extract_strided_slice %322 {offsets = [0, 256], sizes = [8, 128], strides = [1, 1]} : vector<8x384xf32> to vector<8x128xf32>
    %c0_176 = arith.constant 0 : index
    %c0_177 = arith.constant 0 : index
    %328 = vector.load %arg8[%c0_176, %c0_177] : memref<8x128xf32, #tpu.memory_space<vmem>>, vector<8x128xf32>
    %329 = arith.mulf %326, %328 : vector<8x128xf32>
    %330 = arith.mulf %325, %324 : vector<8x128xf32>
    %331 = arith.addf %329, %330 : vector<8x128xf32>
    %332 = math.tanh %331 : vector<8x128xf32>
    %333 = arith.mulf %327, %332 : vector<8x128xf32>
    %c0_178 = arith.constant 0 : index
    %c0_179 = arith.constant 0 : index
    %334 = vector.load %arg8[%c0_178, %c0_179] : memref<8x128xf32, #tpu.memory_space<vmem>>, vector<8x128xf32>
    tpu.vector_store %arg8[%c0_178, %c0_179], %331 {strides = array<i32>} : memref<8x128xf32, #tpu.memory_space<vmem>>, vector<8x128xf32>,
    %c0_180 = arith.constant 0 : index
    %c0_181 = arith.constant 0 : index
    %335 = vector.load %arg7[%c0_180, %c0_181] : memref<8x128xf32, #tpu.memory_space<vmem>>, vector<8x128xf32>
    tpu.vector_store %arg7[%c0_180, %c0_181], %333 {strides = array<i32>} : memref<8x128xf32, #tpu.memory_space<vmem>>, vector<8x128xf32>,
    %336 = arith.index_cast %311 : i32 to index
    %c256_182 = arith.constant 256 : index
    %337 = vector.load %arg6[%336, %c256_182] : memref<64x512xf32, #tpu.memory_space<vmem>>, vector<8x128xf32>
    tpu.vector_store %arg6[%336, %c256_182], %333 {strides = array<i32>} : memref<64x512xf32, #tpu.memory_space<vmem>>, vector<8x128xf32>,
    %c3_i32_183 = arith.constant 3 : i32
    %c8_i32_184 = arith.constant 8 : i32
    %338 = arith.muli %c3_i32_183, %c8_i32_184 : i32
    %339 = tpu.assume_multiple %338, 8 : i32
    %340 = arith.index_cast %339 : i32 to index
    %c0_185 = arith.constant 0 : index
    %341 = vector.load %arg9[%340, %c0_185] : memref<64x512xf32, #tpu.memory_space<vmem>>, vector<8x512xf32>
    %c0_186 = arith.constant 0 : index
    %c0_187 = arith.constant 0 : index
    %342 = vector.load %arg7[%c0_186, %c0_187] : memref<8x128xf32, #tpu.memory_space<vmem>>, vector<8x128xf32>
    %cst_188 = arith.constant dense<0.000000e+00> : vector<8x512xf32>
    %343 = tpu.matmul %342, %249, %cst_188 {dimension_numbers = #tpu.dot_dimension_numbers<[1], [0], [0], [1], [0, 0, 1, 1], [], []>} : vector<8x128xf32>, vector<128x512xf32>, vector<8x512xf32> -> vector<8x512xf32>
    %344 = arith.addf %341, %343 : vector<8x512xf32>
    %345 = vector.extract_strided_slice %344 {offsets = [0, 0], sizes = [8, 384], strides = [1, 1]} : vector<8x512xf32> to vector<8x384xf32>
    %346 = arith.negf %345 : vector<8x384xf32>
    %347 = math.exp %346 : vector<8x384xf32>
    %cst_189 = arith.constant 1.000000e+00 : f32
    %348 = vector.broadcast %cst_189 : f32 to vector<8x384xf32>
    %349 = arith.addf %348, %347 : vector<8x384xf32>
    %350 = arith.divf %348, %349 : vector<8x384xf32>
    %351 = vector.extract_strided_slice %344 {offsets = [0, 384], sizes = [8, 128], strides = [1, 1]} : vector<8x512xf32> to vector<8x128xf32>
    %352 = math.tanh %351 : vector<8x128xf32>
    %353 = vector.extract_strided_slice %350 {offsets = [0, 0], sizes = [8, 128], strides = [1, 1]} : vector<8x384xf32> to vector<8x128xf32>
    %354 = vector.extract_strided_slice %350 {offsets = [0, 128], sizes = [8, 128], strides = [1, 1]} : vector<8x384xf32> to vector<8x128xf32>
    %355 = vector.extract_strided_slice %350 {offsets = [0, 256], sizes = [8, 128], strides = [1, 1]} : vector<8x384xf32> to vector<8x128xf32>
    %c0_190 = arith.constant 0 : index
    %c0_191 = arith.constant 0 : index
    %356 = vector.load %arg8[%c0_190, %c0_191] : memref<8x128xf32, #tpu.memory_space<vmem>>, vector<8x128xf32>
    %357 = arith.mulf %354, %356 : vector<8x128xf32>
    %358 = arith.mulf %353, %352 : vector<8x128xf32>
    %359 = arith.addf %357, %358 : vector<8x128xf32>
    %360 = math.tanh %359 : vector<8x128xf32>
    %361 = arith.mulf %355, %360 : vector<8x128xf32>
    %c0_192 = arith.constant 0 : index
    %c0_193 = arith.constant 0 : index
    %362 = vector.load %arg8[%c0_192, %c0_193] : memref<8x128xf32, #tpu.memory_space<vmem>>, vector<8x128xf32>
    tpu.vector_store %arg8[%c0_192, %c0_193], %359 {strides = array<i32>} : memref<8x128xf32, #tpu.memory_space<vmem>>, vector<8x128xf32>,
    %c0_194 = arith.constant 0 : index
    %c0_195 = arith.constant 0 : index
    %363 = vector.load %arg7[%c0_194, %c0_195] : memref<8x128xf32, #tpu.memory_space<vmem>>, vector<8x128xf32>
    tpu.vector_store %arg7[%c0_194, %c0_195], %361 {strides = array<i32>} : memref<8x128xf32, #tpu.memory_space<vmem>>, vector<8x128xf32>,
    %364 = arith.index_cast %339 : i32 to index
    %c256_196 = arith.constant 256 : index
    %365 = vector.load %arg6[%364, %c256_196] : memref<64x512xf32, #tpu.memory_space<vmem>>, vector<8x128xf32>
    tpu.vector_store %arg6[%364, %c256_196], %361 {strides = array<i32>} : memref<64x512xf32, #tpu.memory_space<vmem>>, vector<8x128xf32>,
    %c4_i32_197 = arith.constant 4 : i32
    %c8_i32_198 = arith.constant 8 : i32
    %366 = arith.muli %c4_i32_197, %c8_i32_198 : i32
    %367 = tpu.assume_multiple %366, 8 : i32
    %368 = arith.index_cast %367 : i32 to index
    %c0_199 = arith.constant 0 : index
    %369 = vector.load %arg9[%368, %c0_199] : memref<64x512xf32, #tpu.memory_space<vmem>>, vector<8x512xf32>
    %c0_200 = arith.constant 0 : index
    %c0_201 = arith.constant 0 : index
    %370 = vector.load %arg7[%c0_200, %c0_201] : memref<8x128xf32, #tpu.memory_space<vmem>>, vector<8x128xf32>
    %cst_202 = arith.constant dense<0.000000e+00> : vector<8x512xf32>
    %371 = tpu.matmul %370, %249, %cst_202 {dimension_numbers = #tpu.dot_dimension_numbers<[1], [0], [0], [1], [0, 0, 1, 1], [], []>} : vector<8x128xf32>, vector<128x512xf32>, vector<8x512xf32> -> vector<8x512xf32>
    %372 = arith.addf %369, %371 : vector<8x512xf32>
    %373 = vector.extract_strided_slice %372 {offsets = [0, 0], sizes = [8, 384], strides = [1, 1]} : vector<8x512xf32> to vector<8x384xf32>
    %374 = arith.negf %373 : vector<8x384xf32>
    %375 = math.exp %374 : vector<8x384xf32>
    %cst_203 = arith.constant 1.000000e+00 : f32
    %376 = vector.broadcast %cst_203 : f32 to vector<8x384xf32>
    %377 = arith.addf %376, %375 : vector<8x384xf32>
    %378 = arith.divf %376, %377 : vector<8x384xf32>
    %379 = vector.extract_strided_slice %372 {offsets = [0, 384], sizes = [8, 128], strides = [1, 1]} : vector<8x512xf32> to vector<8x128xf32>
    %380 = math.tanh %379 : vector<8x128xf32>
    %381 = vector.extract_strided_slice %378 {offsets = [0, 0], sizes = [8, 128], strides = [1, 1]} : vector<8x384xf32> to vector<8x128xf32>
    %382 = vector.extract_strided_slice %378 {offsets = [0, 128], sizes = [8, 128], strides = [1, 1]} : vector<8x384xf32> to vector<8x128xf32>
    %383 = vector.extract_strided_slice %378 {offsets = [0, 256], sizes = [8, 128], strides = [1, 1]} : vector<8x384xf32> to vector<8x128xf32>
    %c0_204 = arith.constant 0 : index
    %c0_205 = arith.constant 0 : index
    %384 = vector.load %arg8[%c0_204, %c0_205] : memref<8x128xf32, #tpu.memory_space<vmem>>, vector<8x128xf32>
    %385 = arith.mulf %382, %384 : vector<8x128xf32>
    %386 = arith.mulf %381, %380 : vector<8x128xf32>
    %387 = arith.addf %385, %386 : vector<8x128xf32>
    %388 = math.tanh %387 : vector<8x128xf32>
    %389 = arith.mulf %383, %388 : vector<8x128xf32>
    %c0_206 = arith.constant 0 : index
    %c0_207 = arith.constant 0 : index
    %390 = vector.load %arg8[%c0_206, %c0_207] : memref<8x128xf32, #tpu.memory_space<vmem>>, vector<8x128xf32>
    tpu.vector_store %arg8[%c0_206, %c0_207], %387 {strides = array<i32>} : memref<8x128xf32, #tpu.memory_space<vmem>>, vector<8x128xf32>,
    %c0_208 = arith.constant 0 : index
    %c0_209 = arith.constant 0 : index
    %391 = vector.load %arg7[%c0_208, %c0_209] : memref<8x128xf32, #tpu.memory_space<vmem>>, vector<8x128xf32>
    tpu.vector_store %arg7[%c0_208, %c0_209], %389 {strides = array<i32>} : memref<8x128xf32, #tpu.memory_space<vmem>>, vector<8x128xf32>,
    %392 = arith.index_cast %367 : i32 to index
    %c256_210 = arith.constant 256 : index
    %393 = vector.load %arg6[%392, %c256_210] : memref<64x512xf32, #tpu.memory_space<vmem>>, vector<8x128xf32>
    tpu.vector_store %arg6[%392, %c256_210], %389 {strides = array<i32>} : memref<64x512xf32, #tpu.memory_space<vmem>>, vector<8x128xf32>,
    %c5_i32_211 = arith.constant 5 : i32
    %c8_i32_212 = arith.constant 8 : i32
    %394 = arith.muli %c5_i32_211, %c8_i32_212 : i32
    %395 = tpu.assume_multiple %394, 8 : i32
    %396 = arith.index_cast %395 : i32 to index
    %c0_213 = arith.constant 0 : index
    %397 = vector.load %arg9[%396, %c0_213] : memref<64x512xf32, #tpu.memory_space<vmem>>, vector<8x512xf32>
    %c0_214 = arith.constant 0 : index
    %c0_215 = arith.constant 0 : index
    %398 = vector.load %arg7[%c0_214, %c0_215] : memref<8x128xf32, #tpu.memory_space<vmem>>, vector<8x128xf32>
    %cst_216 = arith.constant dense<0.000000e+00> : vector<8x512xf32>
    %399 = tpu.matmul %398, %249, %cst_216 {dimension_numbers = #tpu.dot_dimension_numbers<[1], [0], [0], [1], [0, 0, 1, 1], [], []>} : vector<8x128xf32>, vector<128x512xf32>, vector<8x512xf32> -> vector<8x512xf32>
    %400 = arith.addf %397, %399 : vector<8x512xf32>
    %401 = vector.extract_strided_slice %400 {offsets = [0, 0], sizes = [8, 384], strides = [1, 1]} : vector<8x512xf32> to vector<8x384xf32>
    %402 = arith.negf %401 : vector<8x384xf32>
    %403 = math.exp %402 : vector<8x384xf32>
    %cst_217 = arith.constant 1.000000e+00 : f32
    %404 = vector.broadcast %cst_217 : f32 to vector<8x384xf32>
    %405 = arith.addf %404, %403 : vector<8x384xf32>
    %406 = arith.divf %404, %405 : vector<8x384xf32>
    %407 = vector.extract_strided_slice %400 {offsets = [0, 384], sizes = [8, 128], strides = [1, 1]} : vector<8x512xf32> to vector<8x128xf32>
    %408 = math.tanh %407 : vector<8x128xf32>
    %409 = vector.extract_strided_slice %406 {offsets = [0, 0], sizes = [8, 128], strides = [1, 1]} : vector<8x384xf32> to vector<8x128xf32>
    %410 = vector.extract_strided_slice %406 {offsets = [0, 128], sizes = [8, 128], strides = [1, 1]} : vector<8x384xf32> to vector<8x128xf32>
    %411 = vector.extract_strided_slice %406 {offsets = [0, 256], sizes = [8, 128], strides = [1, 1]} : vector<8x384xf32> to vector<8x128xf32>
    %c0_218 = arith.constant 0 : index
    %c0_219 = arith.constant 0 : index
    %412 = vector.load %arg8[%c0_218, %c0_219] : memref<8x128xf32, #tpu.memory_space<vmem>>, vector<8x128xf32>
    %413 = arith.mulf %410, %412 : vector<8x128xf32>
    %414 = arith.mulf %409, %408 : vector<8x128xf32>
    %415 = arith.addf %413, %414 : vector<8x128xf32>
    %416 = math.tanh %415 : vector<8x128xf32>
    %417 = arith.mulf %411, %416 : vector<8x128xf32>
    %c0_220 = arith.constant 0 : index
    %c0_221 = arith.constant 0 : index
    %418 = vector.load %arg8[%c0_220, %c0_221] : memref<8x128xf32, #tpu.memory_space<vmem>>, vector<8x128xf32>
    tpu.vector_store %arg8[%c0_220, %c0_221], %415 {strides = array<i32>} : memref<8x128xf32, #tpu.memory_space<vmem>>, vector<8x128xf32>,
    %c0_222 = arith.constant 0 : index
    %c0_223 = arith.constant 0 : index
    %419 = vector.load %arg7[%c0_222, %c0_223] : memref<8x128xf32, #tpu.memory_space<vmem>>, vector<8x128xf32>
    tpu.vector_store %arg7[%c0_222, %c0_223], %417 {strides = array<i32>} : memref<8x128xf32, #tpu.memory_space<vmem>>, vector<8x128xf32>,
    %420 = arith.index_cast %395 : i32 to index
    %c256_224 = arith.constant 256 : index
    %421 = vector.load %arg6[%420, %c256_224] : memref<64x512xf32, #tpu.memory_space<vmem>>, vector<8x128xf32>
    tpu.vector_store %arg6[%420, %c256_224], %417 {strides = array<i32>} : memref<64x512xf32, #tpu.memory_space<vmem>>, vector<8x128xf32>,
    %c6_i32_225 = arith.constant 6 : i32
    %c8_i32_226 = arith.constant 8 : i32
    %422 = arith.muli %c6_i32_225, %c8_i32_226 : i32
    %423 = tpu.assume_multiple %422, 8 : i32
    %424 = arith.index_cast %423 : i32 to index
    %c0_227 = arith.constant 0 : index
    %425 = vector.load %arg9[%424, %c0_227] : memref<64x512xf32, #tpu.memory_space<vmem>>, vector<8x512xf32>
    %c0_228 = arith.constant 0 : index
    %c0_229 = arith.constant 0 : index
    %426 = vector.load %arg7[%c0_228, %c0_229] : memref<8x128xf32, #tpu.memory_space<vmem>>, vector<8x128xf32>
    %cst_230 = arith.constant dense<0.000000e+00> : vector<8x512xf32>
    %427 = tpu.matmul %426, %249, %cst_230 {dimension_numbers = #tpu.dot_dimension_numbers<[1], [0], [0], [1], [0, 0, 1, 1], [], []>} : vector<8x128xf32>, vector<128x512xf32>, vector<8x512xf32> -> vector<8x512xf32>
    %428 = arith.addf %425, %427 : vector<8x512xf32>
    %429 = vector.extract_strided_slice %428 {offsets = [0, 0], sizes = [8, 384], strides = [1, 1]} : vector<8x512xf32> to vector<8x384xf32>
    %430 = arith.negf %429 : vector<8x384xf32>
    %431 = math.exp %430 : vector<8x384xf32>
    %cst_231 = arith.constant 1.000000e+00 : f32
    %432 = vector.broadcast %cst_231 : f32 to vector<8x384xf32>
    %433 = arith.addf %432, %431 : vector<8x384xf32>
    %434 = arith.divf %432, %433 : vector<8x384xf32>
    %435 = vector.extract_strided_slice %428 {offsets = [0, 384], sizes = [8, 128], strides = [1, 1]} : vector<8x512xf32> to vector<8x128xf32>
    %436 = math.tanh %435 : vector<8x128xf32>
    %437 = vector.extract_strided_slice %434 {offsets = [0, 0], sizes = [8, 128], strides = [1, 1]} : vector<8x384xf32> to vector<8x128xf32>
    %438 = vector.extract_strided_slice %434 {offsets = [0, 128], sizes = [8, 128], strides = [1, 1]} : vector<8x384xf32> to vector<8x128xf32>
    %439 = vector.extract_strided_slice %434 {offsets = [0, 256], sizes = [8, 128], strides = [1, 1]} : vector<8x384xf32> to vector<8x128xf32>
    %c0_232 = arith.constant 0 : index
    %c0_233 = arith.constant 0 : index
    %440 = vector.load %arg8[%c0_232, %c0_233] : memref<8x128xf32, #tpu.memory_space<vmem>>, vector<8x128xf32>
    %441 = arith.mulf %438, %440 : vector<8x128xf32>
    %442 = arith.mulf %437, %436 : vector<8x128xf32>
    %443 = arith.addf %441, %442 : vector<8x128xf32>
    %444 = math.tanh %443 : vector<8x128xf32>
    %445 = arith.mulf %439, %444 : vector<8x128xf32>
    %c0_234 = arith.constant 0 : index
    %c0_235 = arith.constant 0 : index
    %446 = vector.load %arg8[%c0_234, %c0_235] : memref<8x128xf32, #tpu.memory_space<vmem>>, vector<8x128xf32>
    tpu.vector_store %arg8[%c0_234, %c0_235], %443 {strides = array<i32>} : memref<8x128xf32, #tpu.memory_space<vmem>>, vector<8x128xf32>,
    %c0_236 = arith.constant 0 : index
    %c0_237 = arith.constant 0 : index
    %447 = vector.load %arg7[%c0_236, %c0_237] : memref<8x128xf32, #tpu.memory_space<vmem>>, vector<8x128xf32>
    tpu.vector_store %arg7[%c0_236, %c0_237], %445 {strides = array<i32>} : memref<8x128xf32, #tpu.memory_space<vmem>>, vector<8x128xf32>,
    %448 = arith.index_cast %423 : i32 to index
    %c256_238 = arith.constant 256 : index
    %449 = vector.load %arg6[%448, %c256_238] : memref<64x512xf32, #tpu.memory_space<vmem>>, vector<8x128xf32>
    tpu.vector_store %arg6[%448, %c256_238], %445 {strides = array<i32>} : memref<64x512xf32, #tpu.memory_space<vmem>>, vector<8x128xf32>,
    %c7_i32_239 = arith.constant 7 : i32
    %c8_i32_240 = arith.constant 8 : i32
    %450 = arith.muli %c7_i32_239, %c8_i32_240 : i32
    %451 = tpu.assume_multiple %450, 8 : i32
    %452 = arith.index_cast %451 : i32 to index
    %c0_241 = arith.constant 0 : index
    %453 = vector.load %arg9[%452, %c0_241] : memref<64x512xf32, #tpu.memory_space<vmem>>, vector<8x512xf32>
    %c0_242 = arith.constant 0 : index
    %c0_243 = arith.constant 0 : index
    %454 = vector.load %arg7[%c0_242, %c0_243] : memref<8x128xf32, #tpu.memory_space<vmem>>, vector<8x128xf32>
    %cst_244 = arith.constant dense<0.000000e+00> : vector<8x512xf32>
    %455 = tpu.matmul %454, %249, %cst_244 {dimension_numbers = #tpu.dot_dimension_numbers<[1], [0], [0], [1], [0, 0, 1, 1], [], []>} : vector<8x128xf32>, vector<128x512xf32>, vector<8x512xf32> -> vector<8x512xf32>
    %456 = arith.addf %453, %455 : vector<8x512xf32>
    %457 = vector.extract_strided_slice %456 {offsets = [0, 0], sizes = [8, 384], strides = [1, 1]} : vector<8x512xf32> to vector<8x384xf32>
    %458 = arith.negf %457 : vector<8x384xf32>
    %459 = math.exp %458 : vector<8x384xf32>
    %cst_245 = arith.constant 1.000000e+00 : f32
    %460 = vector.broadcast %cst_245 : f32 to vector<8x384xf32>
    %461 = arith.addf %460, %459 : vector<8x384xf32>
    %462 = arith.divf %460, %461 : vector<8x384xf32>
    %463 = vector.extract_strided_slice %456 {offsets = [0, 384], sizes = [8, 128], strides = [1, 1]} : vector<8x512xf32> to vector<8x128xf32>
    %464 = math.tanh %463 : vector<8x128xf32>
    %465 = vector.extract_strided_slice %462 {offsets = [0, 0], sizes = [8, 128], strides = [1, 1]} : vector<8x384xf32> to vector<8x128xf32>
    %466 = vector.extract_strided_slice %462 {offsets = [0, 128], sizes = [8, 128], strides = [1, 1]} : vector<8x384xf32> to vector<8x128xf32>
    %467 = vector.extract_strided_slice %462 {offsets = [0, 256], sizes = [8, 128], strides = [1, 1]} : vector<8x384xf32> to vector<8x128xf32>
    %c0_246 = arith.constant 0 : index
    %c0_247 = arith.constant 0 : index
    %468 = vector.load %arg8[%c0_246, %c0_247] : memref<8x128xf32, #tpu.memory_space<vmem>>, vector<8x128xf32>
    %469 = arith.mulf %466, %468 : vector<8x128xf32>
    %470 = arith.mulf %465, %464 : vector<8x128xf32>
    %471 = arith.addf %469, %470 : vector<8x128xf32>
    %472 = math.tanh %471 : vector<8x128xf32>
    %473 = arith.mulf %467, %472 : vector<8x128xf32>
    %c0_248 = arith.constant 0 : index
    %c0_249 = arith.constant 0 : index
    %474 = vector.load %arg8[%c0_248, %c0_249] : memref<8x128xf32, #tpu.memory_space<vmem>>, vector<8x128xf32>
    tpu.vector_store %arg8[%c0_248, %c0_249], %471 {strides = array<i32>} : memref<8x128xf32, #tpu.memory_space<vmem>>, vector<8x128xf32>,
    %c0_250 = arith.constant 0 : index
    %c0_251 = arith.constant 0 : index
    %475 = vector.load %arg7[%c0_250, %c0_251] : memref<8x128xf32, #tpu.memory_space<vmem>>, vector<8x128xf32>
    tpu.vector_store %arg7[%c0_250, %c0_251], %473 {strides = array<i32>} : memref<8x128xf32, #tpu.memory_space<vmem>>, vector<8x128xf32>,
    %476 = arith.index_cast %451 : i32 to index
    %c256_252 = arith.constant 256 : index
    %477 = vector.load %arg6[%476, %c256_252] : memref<64x512xf32, #tpu.memory_space<vmem>>, vector<8x128xf32>
    tpu.vector_store %arg6[%476, %c256_252], %473 {strides = array<i32>} : memref<64x512xf32, #tpu.memory_space<vmem>>, vector<8x128xf32>,
    %c8_i32_253 = arith.constant 8 : i32
    %c0_254 = arith.constant 0 : index
    %c0_255 = arith.constant 0 : index
    %478 = vector.load %arg6[%c0_254, %c0_255] : memref<64x512xf32, #tpu.memory_space<vmem>>, vector<64x384xf32>
    %c0_256 = arith.constant 0 : index
    %c0_257 = arith.constant 0 : index
    %479 = vector.load %arg3[%c0_256, %c0_257] : memref<384x512xf32, #tpu.memory_space<vmem>>, vector<384x512xf32>
    %cst_258 = arith.constant dense<0.000000e+00> : vector<64x512xf32>
    %480 = tpu.matmul %478, %479, %cst_258 {dimension_numbers = #tpu.dot_dimension_numbers<[1], [0], [0], [1], [0, 0, 1, 1], [], []>} : vector<64x384xf32>, vector<384x512xf32>, vector<64x512xf32> -> vector<64x512xf32>
    %c2 = arith.constant 2 : index
    %c0_259 = arith.constant 0 : index
    %c0_260 = arith.constant 0 : index
    %481 = vector.load %arg5[%c2, %c0_259, %c0_260] : memref<3x1x512xf32, #tpu.memory_space<vmem>>, vector<1x1x512xf32>
    %482 = vector.shape_cast %481 : vector<1x1x512xf32> to vector<1x512xf32>
    %483 = vector.broadcast %482 : vector<1x512xf32> to vector<64x512xf32>
    %484 = arith.addf %480, %483 : vector<64x512xf32>
    %c0_261 = arith.constant 0 : index
    %c0_262 = arith.constant 0 : index
    %485 = vector.load %arg9[%c0_261, %c0_262] : memref<64x512xf32, #tpu.memory_space<vmem>>, vector<64x512xf32>
    tpu.vector_store %arg9[%c0_261, %c0_262], %484 {strides = array<i32>} : memref<64x512xf32, #tpu.memory_space<vmem>>, vector<64x512xf32>,
    %c2_263 = arith.constant 2 : index
    %c0_264 = arith.constant 0 : index
    %c0_265 = arith.constant 0 : index
    %486 = vector.load %arg4[%c2_263, %c0_264, %c0_265] : memref<3x128x512xf32, #tpu.memory_space<vmem>>, vector<1x128x512xf32>
    %487 = vector.shape_cast %486 : vector<1x128x512xf32> to vector<128x512xf32>
    %cst_266 = arith.constant 0.000000e+00 : f32
    %488 = vector.broadcast %cst_266 : f32 to vector<8x128xf32>
    %c0_267 = arith.constant 0 : index
    %c0_268 = arith.constant 0 : index
    %489 = vector.load %arg7[%c0_267, %c0_268] : memref<8x128xf32, #tpu.memory_space<vmem>>, vector<8x128xf32>
    tpu.vector_store %arg7[%c0_267, %c0_268], %488 {strides = array<i32>} : memref<8x128xf32, #tpu.memory_space<vmem>>, vector<8x128xf32>,
    %cst_269 = arith.constant 0.000000e+00 : f32
    %490 = vector.broadcast %cst_269 : f32 to vector<8x128xf32>
    %c0_270 = arith.constant 0 : index
    %c0_271 = arith.constant 0 : index
    %491 = vector.load %arg8[%c0_270, %c0_271] : memref<8x128xf32, #tpu.memory_space<vmem>>, vector<8x128xf32>
    tpu.vector_store %arg8[%c0_270, %c0_271], %490 {strides = array<i32>} : memref<8x128xf32, #tpu.memory_space<vmem>>, vector<8x128xf32>,
    %c0_i32_272 = arith.constant 0 : i32
    %c8_i32_273 = arith.constant 8 : i32
    %492 = arith.muli %c0_i32_272, %c8_i32_273 : i32
    %493 = tpu.assume_multiple %492, 8 : i32
    %494 = arith.index_cast %493 : i32 to index
    %c0_274 = arith.constant 0 : index
    %495 = vector.load %arg9[%494, %c0_274] : memref<64x512xf32, #tpu.memory_space<vmem>>, vector<8x512xf32>
    %c0_275 = arith.constant 0 : index
    %c0_276 = arith.constant 0 : index
    %496 = vector.load %arg7[%c0_275, %c0_276] : memref<8x128xf32, #tpu.memory_space<vmem>>, vector<8x128xf32>
    %cst_277 = arith.constant dense<0.000000e+00> : vector<8x512xf32>
    %497 = tpu.matmul %496, %487, %cst_277 {dimension_numbers = #tpu.dot_dimension_numbers<[1], [0], [0], [1], [0, 0, 1, 1], [], []>} : vector<8x128xf32>, vector<128x512xf32>, vector<8x512xf32> -> vector<8x512xf32>
    %498 = arith.addf %495, %497 : vector<8x512xf32>
    %499 = vector.extract_strided_slice %498 {offsets = [0, 0], sizes = [8, 384], strides = [1, 1]} : vector<8x512xf32> to vector<8x384xf32>
    %500 = arith.negf %499 : vector<8x384xf32>
    %501 = math.exp %500 : vector<8x384xf32>
    %cst_278 = arith.constant 1.000000e+00 : f32
    %502 = vector.broadcast %cst_278 : f32 to vector<8x384xf32>
    %503 = arith.addf %502, %501 : vector<8x384xf32>
    %504 = arith.divf %502, %503 : vector<8x384xf32>
    %505 = vector.extract_strided_slice %498 {offsets = [0, 384], sizes = [8, 128], strides = [1, 1]} : vector<8x512xf32> to vector<8x128xf32>
    %506 = math.tanh %505 : vector<8x128xf32>
    %507 = vector.extract_strided_slice %504 {offsets = [0, 0], sizes = [8, 128], strides = [1, 1]} : vector<8x384xf32> to vector<8x128xf32>
    %508 = vector.extract_strided_slice %504 {offsets = [0, 128], sizes = [8, 128], strides = [1, 1]} : vector<8x384xf32> to vector<8x128xf32>
    %509 = vector.extract_strided_slice %504 {offsets = [0, 256], sizes = [8, 128], strides = [1, 1]} : vector<8x384xf32> to vector<8x128xf32>
    %c0_279 = arith.constant 0 : index
    %c0_280 = arith.constant 0 : index
    %510 = vector.load %arg8[%c0_279, %c0_280] : memref<8x128xf32, #tpu.memory_space<vmem>>, vector<8x128xf32>
    %511 = arith.mulf %508, %510 : vector<8x128xf32>
    %512 = arith.mulf %507, %506 : vector<8x128xf32>
    %513 = arith.addf %511, %512 : vector<8x128xf32>
    %514 = math.tanh %513 : vector<8x128xf32>
    %515 = arith.mulf %509, %514 : vector<8x128xf32>
    %c0_281 = arith.constant 0 : index
    %c0_282 = arith.constant 0 : index
    %516 = vector.load %arg8[%c0_281, %c0_282] : memref<8x128xf32, #tpu.memory_space<vmem>>, vector<8x128xf32>
    tpu.vector_store %arg8[%c0_281, %c0_282], %513 {strides = array<i32>} : memref<8x128xf32, #tpu.memory_space<vmem>>, vector<8x128xf32>,
    %c0_283 = arith.constant 0 : index
    %c0_284 = arith.constant 0 : index
    %517 = vector.load %arg7[%c0_283, %c0_284] : memref<8x128xf32, #tpu.memory_space<vmem>>, vector<8x128xf32>
    tpu.vector_store %arg7[%c0_283, %c0_284], %515 {strides = array<i32>} : memref<8x128xf32, #tpu.memory_space<vmem>>, vector<8x128xf32>,
    %518 = arith.index_cast %493 : i32 to index
    %c384 = arith.constant 384 : index
    %519 = vector.load %arg6[%518, %c384] : memref<64x512xf32, #tpu.memory_space<vmem>>, vector<8x128xf32>
    tpu.vector_store %arg6[%518, %c384], %515 {strides = array<i32>} : memref<64x512xf32, #tpu.memory_space<vmem>>, vector<8x128xf32>,
    %c1_i32_285 = arith.constant 1 : i32
    %c8_i32_286 = arith.constant 8 : i32
    %520 = arith.muli %c1_i32_285, %c8_i32_286 : i32
    %521 = tpu.assume_multiple %520, 8 : i32
    %522 = arith.index_cast %521 : i32 to index
    %c0_287 = arith.constant 0 : index
    %523 = vector.load %arg9[%522, %c0_287] : memref<64x512xf32, #tpu.memory_space<vmem>>, vector<8x512xf32>
    %c0_288 = arith.constant 0 : index
    %c0_289 = arith.constant 0 : index
    %524 = vector.load %arg7[%c0_288, %c0_289] : memref<8x128xf32, #tpu.memory_space<vmem>>, vector<8x128xf32>
    %cst_290 = arith.constant dense<0.000000e+00> : vector<8x512xf32>
    %525 = tpu.matmul %524, %487, %cst_290 {dimension_numbers = #tpu.dot_dimension_numbers<[1], [0], [0], [1], [0, 0, 1, 1], [], []>} : vector<8x128xf32>, vector<128x512xf32>, vector<8x512xf32> -> vector<8x512xf32>
    %526 = arith.addf %523, %525 : vector<8x512xf32>
    %527 = vector.extract_strided_slice %526 {offsets = [0, 0], sizes = [8, 384], strides = [1, 1]} : vector<8x512xf32> to vector<8x384xf32>
    %528 = arith.negf %527 : vector<8x384xf32>
    %529 = math.exp %528 : vector<8x384xf32>
    %cst_291 = arith.constant 1.000000e+00 : f32
    %530 = vector.broadcast %cst_291 : f32 to vector<8x384xf32>
    %531 = arith.addf %530, %529 : vector<8x384xf32>
    %532 = arith.divf %530, %531 : vector<8x384xf32>
    %533 = vector.extract_strided_slice %526 {offsets = [0, 384], sizes = [8, 128], strides = [1, 1]} : vector<8x512xf32> to vector<8x128xf32>
    %534 = math.tanh %533 : vector<8x128xf32>
    %535 = vector.extract_strided_slice %532 {offsets = [0, 0], sizes = [8, 128], strides = [1, 1]} : vector<8x384xf32> to vector<8x128xf32>
    %536 = vector.extract_strided_slice %532 {offsets = [0, 128], sizes = [8, 128], strides = [1, 1]} : vector<8x384xf32> to vector<8x128xf32>
    %537 = vector.extract_strided_slice %532 {offsets = [0, 256], sizes = [8, 128], strides = [1, 1]} : vector<8x384xf32> to vector<8x128xf32>
    %c0_292 = arith.constant 0 : index
    %c0_293 = arith.constant 0 : index
    %538 = vector.load %arg8[%c0_292, %c0_293] : memref<8x128xf32, #tpu.memory_space<vmem>>, vector<8x128xf32>
    %539 = arith.mulf %536, %538 : vector<8x128xf32>
    %540 = arith.mulf %535, %534 : vector<8x128xf32>
    %541 = arith.addf %539, %540 : vector<8x128xf32>
    %542 = math.tanh %541 : vector<8x128xf32>
    %543 = arith.mulf %537, %542 : vector<8x128xf32>
    %c0_294 = arith.constant 0 : index
    %c0_295 = arith.constant 0 : index
    %544 = vector.load %arg8[%c0_294, %c0_295] : memref<8x128xf32, #tpu.memory_space<vmem>>, vector<8x128xf32>
    tpu.vector_store %arg8[%c0_294, %c0_295], %541 {strides = array<i32>} : memref<8x128xf32, #tpu.memory_space<vmem>>, vector<8x128xf32>,
    %c0_296 = arith.constant 0 : index
    %c0_297 = arith.constant 0 : index
    %545 = vector.load %arg7[%c0_296, %c0_297] : memref<8x128xf32, #tpu.memory_space<vmem>>, vector<8x128xf32>
    tpu.vector_store %arg7[%c0_296, %c0_297], %543 {strides = array<i32>} : memref<8x128xf32, #tpu.memory_space<vmem>>, vector<8x128xf32>,
    %546 = arith.index_cast %521 : i32 to index
    %c384_298 = arith.constant 384 : index
    %547 = vector.load %arg6[%546, %c384_298] : memref<64x512xf32, #tpu.memory_space<vmem>>, vector<8x128xf32>
    tpu.vector_store %arg6[%546, %c384_298], %543 {strides = array<i32>} : memref<64x512xf32, #tpu.memory_space<vmem>>, vector<8x128xf32>,
    %c2_i32_299 = arith.constant 2 : i32
    %c8_i32_300 = arith.constant 8 : i32
    %548 = arith.muli %c2_i32_299, %c8_i32_300 : i32
    %549 = tpu.assume_multiple %548, 8 : i32
    %550 = arith.index_cast %549 : i32 to index
    %c0_301 = arith.constant 0 : index
    %551 = vector.load %arg9[%550, %c0_301] : memref<64x512xf32, #tpu.memory_space<vmem>>, vector<8x512xf32>
    %c0_302 = arith.constant 0 : index
    %c0_303 = arith.constant 0 : index
    %552 = vector.load %arg7[%c0_302, %c0_303] : memref<8x128xf32, #tpu.memory_space<vmem>>, vector<8x128xf32>
    %cst_304 = arith.constant dense<0.000000e+00> : vector<8x512xf32>
    %553 = tpu.matmul %552, %487, %cst_304 {dimension_numbers = #tpu.dot_dimension_numbers<[1], [0], [0], [1], [0, 0, 1, 1], [], []>} : vector<8x128xf32>, vector<128x512xf32>, vector<8x512xf32> -> vector<8x512xf32>
    %554 = arith.addf %551, %553 : vector<8x512xf32>
    %555 = vector.extract_strided_slice %554 {offsets = [0, 0], sizes = [8, 384], strides = [1, 1]} : vector<8x512xf32> to vector<8x384xf32>
    %556 = arith.negf %555 : vector<8x384xf32>
    %557 = math.exp %556 : vector<8x384xf32>
    %cst_305 = arith.constant 1.000000e+00 : f32
    %558 = vector.broadcast %cst_305 : f32 to vector<8x384xf32>
    %559 = arith.addf %558, %557 : vector<8x384xf32>
    %560 = arith.divf %558, %559 : vector<8x384xf32>
    %561 = vector.extract_strided_slice %554 {offsets = [0, 384], sizes = [8, 128], strides = [1, 1]} : vector<8x512xf32> to vector<8x128xf32>
    %562 = math.tanh %561 : vector<8x128xf32>
    %563 = vector.extract_strided_slice %560 {offsets = [0, 0], sizes = [8, 128], strides = [1, 1]} : vector<8x384xf32> to vector<8x128xf32>
    %564 = vector.extract_strided_slice %560 {offsets = [0, 128], sizes = [8, 128], strides = [1, 1]} : vector<8x384xf32> to vector<8x128xf32>
    %565 = vector.extract_strided_slice %560 {offsets = [0, 256], sizes = [8, 128], strides = [1, 1]} : vector<8x384xf32> to vector<8x128xf32>
    %c0_306 = arith.constant 0 : index
    %c0_307 = arith.constant 0 : index
    %566 = vector.load %arg8[%c0_306, %c0_307] : memref<8x128xf32, #tpu.memory_space<vmem>>, vector<8x128xf32>
    %567 = arith.mulf %564, %566 : vector<8x128xf32>
    %568 = arith.mulf %563, %562 : vector<8x128xf32>
    %569 = arith.addf %567, %568 : vector<8x128xf32>
    %570 = math.tanh %569 : vector<8x128xf32>
    %571 = arith.mulf %565, %570 : vector<8x128xf32>
    %c0_308 = arith.constant 0 : index
    %c0_309 = arith.constant 0 : index
    %572 = vector.load %arg8[%c0_308, %c0_309] : memref<8x128xf32, #tpu.memory_space<vmem>>, vector<8x128xf32>
    tpu.vector_store %arg8[%c0_308, %c0_309], %569 {strides = array<i32>} : memref<8x128xf32, #tpu.memory_space<vmem>>, vector<8x128xf32>,
    %c0_310 = arith.constant 0 : index
    %c0_311 = arith.constant 0 : index
    %573 = vector.load %arg7[%c0_310, %c0_311] : memref<8x128xf32, #tpu.memory_space<vmem>>, vector<8x128xf32>
    tpu.vector_store %arg7[%c0_310, %c0_311], %571 {strides = array<i32>} : memref<8x128xf32, #tpu.memory_space<vmem>>, vector<8x128xf32>,
    %574 = arith.index_cast %549 : i32 to index
    %c384_312 = arith.constant 384 : index
    %575 = vector.load %arg6[%574, %c384_312] : memref<64x512xf32, #tpu.memory_space<vmem>>, vector<8x128xf32>
    tpu.vector_store %arg6[%574, %c384_312], %571 {strides = array<i32>} : memref<64x512xf32, #tpu.memory_space<vmem>>, vector<8x128xf32>,
    %c3_i32_313 = arith.constant 3 : i32
    %c8_i32_314 = arith.constant 8 : i32
    %576 = arith.muli %c3_i32_313, %c8_i32_314 : i32
    %577 = tpu.assume_multiple %576, 8 : i32
    %578 = arith.index_cast %577 : i32 to index
    %c0_315 = arith.constant 0 : index
    %579 = vector.load %arg9[%578, %c0_315] : memref<64x512xf32, #tpu.memory_space<vmem>>, vector<8x512xf32>
    %c0_316 = arith.constant 0 : index
    %c0_317 = arith.constant 0 : index
    %580 = vector.load %arg7[%c0_316, %c0_317] : memref<8x128xf32, #tpu.memory_space<vmem>>, vector<8x128xf32>
    %cst_318 = arith.constant dense<0.000000e+00> : vector<8x512xf32>
    %581 = tpu.matmul %580, %487, %cst_318 {dimension_numbers = #tpu.dot_dimension_numbers<[1], [0], [0], [1], [0, 0, 1, 1], [], []>} : vector<8x128xf32>, vector<128x512xf32>, vector<8x512xf32> -> vector<8x512xf32>
    %582 = arith.addf %579, %581 : vector<8x512xf32>
    %583 = vector.extract_strided_slice %582 {offsets = [0, 0], sizes = [8, 384], strides = [1, 1]} : vector<8x512xf32> to vector<8x384xf32>
    %584 = arith.negf %583 : vector<8x384xf32>
    %585 = math.exp %584 : vector<8x384xf32>
    %cst_319 = arith.constant 1.000000e+00 : f32
    %586 = vector.broadcast %cst_319 : f32 to vector<8x384xf32>
    %587 = arith.addf %586, %585 : vector<8x384xf32>
    %588 = arith.divf %586, %587 : vector<8x384xf32>
    %589 = vector.extract_strided_slice %582 {offsets = [0, 384], sizes = [8, 128], strides = [1, 1]} : vector<8x512xf32> to vector<8x128xf32>
    %590 = math.tanh %589 : vector<8x128xf32>
    %591 = vector.extract_strided_slice %588 {offsets = [0, 0], sizes = [8, 128], strides = [1, 1]} : vector<8x384xf32> to vector<8x128xf32>
    %592 = vector.extract_strided_slice %588 {offsets = [0, 128], sizes = [8, 128], strides = [1, 1]} : vector<8x384xf32> to vector<8x128xf32>
    %593 = vector.extract_strided_slice %588 {offsets = [0, 256], sizes = [8, 128], strides = [1, 1]} : vector<8x384xf32> to vector<8x128xf32>
    %c0_320 = arith.constant 0 : index
    %c0_321 = arith.constant 0 : index
    %594 = vector.load %arg8[%c0_320, %c0_321] : memref<8x128xf32, #tpu.memory_space<vmem>>, vector<8x128xf32>
    %595 = arith.mulf %592, %594 : vector<8x128xf32>
    %596 = arith.mulf %591, %590 : vector<8x128xf32>
    %597 = arith.addf %595, %596 : vector<8x128xf32>
    %598 = math.tanh %597 : vector<8x128xf32>
    %599 = arith.mulf %593, %598 : vector<8x128xf32>
    %c0_322 = arith.constant 0 : index
    %c0_323 = arith.constant 0 : index
    %600 = vector.load %arg8[%c0_322, %c0_323] : memref<8x128xf32, #tpu.memory_space<vmem>>, vector<8x128xf32>
    tpu.vector_store %arg8[%c0_322, %c0_323], %597 {strides = array<i32>} : memref<8x128xf32, #tpu.memory_space<vmem>>, vector<8x128xf32>,
    %c0_324 = arith.constant 0 : index
    %c0_325 = arith.constant 0 : index
    %601 = vector.load %arg7[%c0_324, %c0_325] : memref<8x128xf32, #tpu.memory_space<vmem>>, vector<8x128xf32>
    tpu.vector_store %arg7[%c0_324, %c0_325], %599 {strides = array<i32>} : memref<8x128xf32, #tpu.memory_space<vmem>>, vector<8x128xf32>,
    %602 = arith.index_cast %577 : i32 to index
    %c384_326 = arith.constant 384 : index
    %603 = vector.load %arg6[%602, %c384_326] : memref<64x512xf32, #tpu.memory_space<vmem>>, vector<8x128xf32>
    tpu.vector_store %arg6[%602, %c384_326], %599 {strides = array<i32>} : memref<64x512xf32, #tpu.memory_space<vmem>>, vector<8x128xf32>,
    %c4_i32_327 = arith.constant 4 : i32
    %c8_i32_328 = arith.constant 8 : i32
    %604 = arith.muli %c4_i32_327, %c8_i32_328 : i32
    %605 = tpu.assume_multiple %604, 8 : i32
    %606 = arith.index_cast %605 : i32 to index
    %c0_329 = arith.constant 0 : index
    %607 = vector.load %arg9[%606, %c0_329] : memref<64x512xf32, #tpu.memory_space<vmem>>, vector<8x512xf32>
    %c0_330 = arith.constant 0 : index
    %c0_331 = arith.constant 0 : index
    %608 = vector.load %arg7[%c0_330, %c0_331] : memref<8x128xf32, #tpu.memory_space<vmem>>, vector<8x128xf32>
    %cst_332 = arith.constant dense<0.000000e+00> : vector<8x512xf32>
    %609 = tpu.matmul %608, %487, %cst_332 {dimension_numbers = #tpu.dot_dimension_numbers<[1], [0], [0], [1], [0, 0, 1, 1], [], []>} : vector<8x128xf32>, vector<128x512xf32>, vector<8x512xf32> -> vector<8x512xf32>
    %610 = arith.addf %607, %609 : vector<8x512xf32>
    %611 = vector.extract_strided_slice %610 {offsets = [0, 0], sizes = [8, 384], strides = [1, 1]} : vector<8x512xf32> to vector<8x384xf32>
    %612 = arith.negf %611 : vector<8x384xf32>
    %613 = math.exp %612 : vector<8x384xf32>
    %cst_333 = arith.constant 1.000000e+00 : f32
    %614 = vector.broadcast %cst_333 : f32 to vector<8x384xf32>
    %615 = arith.addf %614, %613 : vector<8x384xf32>
    %616 = arith.divf %614, %615 : vector<8x384xf32>
    %617 = vector.extract_strided_slice %610 {offsets = [0, 384], sizes = [8, 128], strides = [1, 1]} : vector<8x512xf32> to vector<8x128xf32>
    %618 = math.tanh %617 : vector<8x128xf32>
    %619 = vector.extract_strided_slice %616 {offsets = [0, 0], sizes = [8, 128], strides = [1, 1]} : vector<8x384xf32> to vector<8x128xf32>
    %620 = vector.extract_strided_slice %616 {offsets = [0, 128], sizes = [8, 128], strides = [1, 1]} : vector<8x384xf32> to vector<8x128xf32>
    %621 = vector.extract_strided_slice %616 {offsets = [0, 256], sizes = [8, 128], strides = [1, 1]} : vector<8x384xf32> to vector<8x128xf32>
    %c0_334 = arith.constant 0 : index
    %c0_335 = arith.constant 0 : index
    %622 = vector.load %arg8[%c0_334, %c0_335] : memref<8x128xf32, #tpu.memory_space<vmem>>, vector<8x128xf32>
    %623 = arith.mulf %620, %622 : vector<8x128xf32>
    %624 = arith.mulf %619, %618 : vector<8x128xf32>
    %625 = arith.addf %623, %624 : vector<8x128xf32>
    %626 = math.tanh %625 : vector<8x128xf32>
    %627 = arith.mulf %621, %626 : vector<8x128xf32>
    %c0_336 = arith.constant 0 : index
    %c0_337 = arith.constant 0 : index
    %628 = vector.load %arg8[%c0_336, %c0_337] : memref<8x128xf32, #tpu.memory_space<vmem>>, vector<8x128xf32>
    tpu.vector_store %arg8[%c0_336, %c0_337], %625 {strides = array<i32>} : memref<8x128xf32, #tpu.memory_space<vmem>>, vector<8x128xf32>,
    %c0_338 = arith.constant 0 : index
    %c0_339 = arith.constant 0 : index
    %629 = vector.load %arg7[%c0_338, %c0_339] : memref<8x128xf32, #tpu.memory_space<vmem>>, vector<8x128xf32>
    tpu.vector_store %arg7[%c0_338, %c0_339], %627 {strides = array<i32>} : memref<8x128xf32, #tpu.memory_space<vmem>>, vector<8x128xf32>,
    %630 = arith.index_cast %605 : i32 to index
    %c384_340 = arith.constant 384 : index
    %631 = vector.load %arg6[%630, %c384_340] : memref<64x512xf32, #tpu.memory_space<vmem>>, vector<8x128xf32>
    tpu.vector_store %arg6[%630, %c384_340], %627 {strides = array<i32>} : memref<64x512xf32, #tpu.memory_space<vmem>>, vector<8x128xf32>,
    %c5_i32_341 = arith.constant 5 : i32
    %c8_i32_342 = arith.constant 8 : i32
    %632 = arith.muli %c5_i32_341, %c8_i32_342 : i32
    %633 = tpu.assume_multiple %632, 8 : i32
    %634 = arith.index_cast %633 : i32 to index
    %c0_343 = arith.constant 0 : index
    %635 = vector.load %arg9[%634, %c0_343] : memref<64x512xf32, #tpu.memory_space<vmem>>, vector<8x512xf32>
    %c0_344 = arith.constant 0 : index
    %c0_345 = arith.constant 0 : index
    %636 = vector.load %arg7[%c0_344, %c0_345] : memref<8x128xf32, #tpu.memory_space<vmem>>, vector<8x128xf32>
    %cst_346 = arith.constant dense<0.000000e+00> : vector<8x512xf32>
    %637 = tpu.matmul %636, %487, %cst_346 {dimension_numbers = #tpu.dot_dimension_numbers<[1], [0], [0], [1], [0, 0, 1, 1], [], []>} : vector<8x128xf32>, vector<128x512xf32>, vector<8x512xf32> -> vector<8x512xf32>
    %638 = arith.addf %635, %637 : vector<8x512xf32>
    %639 = vector.extract_strided_slice %638 {offsets = [0, 0], sizes = [8, 384], strides = [1, 1]} : vector<8x512xf32> to vector<8x384xf32>
    %640 = arith.negf %639 : vector<8x384xf32>
    %641 = math.exp %640 : vector<8x384xf32>
    %cst_347 = arith.constant 1.000000e+00 : f32
    %642 = vector.broadcast %cst_347 : f32 to vector<8x384xf32>
    %643 = arith.addf %642, %641 : vector<8x384xf32>
    %644 = arith.divf %642, %643 : vector<8x384xf32>
    %645 = vector.extract_strided_slice %638 {offsets = [0, 384], sizes = [8, 128], strides = [1, 1]} : vector<8x512xf32> to vector<8x128xf32>
    %646 = math.tanh %645 : vector<8x128xf32>
    %647 = vector.extract_strided_slice %644 {offsets = [0, 0], sizes = [8, 128], strides = [1, 1]} : vector<8x384xf32> to vector<8x128xf32>
    %648 = vector.extract_strided_slice %644 {offsets = [0, 128], sizes = [8, 128], strides = [1, 1]} : vector<8x384xf32> to vector<8x128xf32>
    %649 = vector.extract_strided_slice %644 {offsets = [0, 256], sizes = [8, 128], strides = [1, 1]} : vector<8x384xf32> to vector<8x128xf32>
    %c0_348 = arith.constant 0 : index
    %c0_349 = arith.constant 0 : index
    %650 = vector.load %arg8[%c0_348, %c0_349] : memref<8x128xf32, #tpu.memory_space<vmem>>, vector<8x128xf32>
    %651 = arith.mulf %648, %650 : vector<8x128xf32>
    %652 = arith.mulf %647, %646 : vector<8x128xf32>
    %653 = arith.addf %651, %652 : vector<8x128xf32>
    %654 = math.tanh %653 : vector<8x128xf32>
    %655 = arith.mulf %649, %654 : vector<8x128xf32>
    %c0_350 = arith.constant 0 : index
    %c0_351 = arith.constant 0 : index
    %656 = vector.load %arg8[%c0_350, %c0_351] : memref<8x128xf32, #tpu.memory_space<vmem>>, vector<8x128xf32>
    tpu.vector_store %arg8[%c0_350, %c0_351], %653 {strides = array<i32>} : memref<8x128xf32, #tpu.memory_space<vmem>>, vector<8x128xf32>,
    %c0_352 = arith.constant 0 : index
    %c0_353 = arith.constant 0 : index
    %657 = vector.load %arg7[%c0_352, %c0_353] : memref<8x128xf32, #tpu.memory_space<vmem>>, vector<8x128xf32>
    tpu.vector_store %arg7[%c0_352, %c0_353], %655 {strides = array<i32>} : memref<8x128xf32, #tpu.memory_space<vmem>>, vector<8x128xf32>,
    %658 = arith.index_cast %633 : i32 to index
    %c384_354 = arith.constant 384 : index
    %659 = vector.load %arg6[%658, %c384_354] : memref<64x512xf32, #tpu.memory_space<vmem>>, vector<8x128xf32>
    tpu.vector_store %arg6[%658, %c384_354], %655 {strides = array<i32>} : memref<64x512xf32, #tpu.memory_space<vmem>>, vector<8x128xf32>,
    %c6_i32_355 = arith.constant 6 : i32
    %c8_i32_356 = arith.constant 8 : i32
    %660 = arith.muli %c6_i32_355, %c8_i32_356 : i32
    %661 = tpu.assume_multiple %660, 8 : i32
    %662 = arith.index_cast %661 : i32 to index
    %c0_357 = arith.constant 0 : index
    %663 = vector.load %arg9[%662, %c0_357] : memref<64x512xf32, #tpu.memory_space<vmem>>, vector<8x512xf32>
    %c0_358 = arith.constant 0 : index
    %c0_359 = arith.constant 0 : index
    %664 = vector.load %arg7[%c0_358, %c0_359] : memref<8x128xf32, #tpu.memory_space<vmem>>, vector<8x128xf32>
    %cst_360 = arith.constant dense<0.000000e+00> : vector<8x512xf32>
    %665 = tpu.matmul %664, %487, %cst_360 {dimension_numbers = #tpu.dot_dimension_numbers<[1], [0], [0], [1], [0, 0, 1, 1], [], []>} : vector<8x128xf32>, vector<128x512xf32>, vector<8x512xf32> -> vector<8x512xf32>
    %666 = arith.addf %663, %665 : vector<8x512xf32>
    %667 = vector.extract_strided_slice %666 {offsets = [0, 0], sizes = [8, 384], strides = [1, 1]} : vector<8x512xf32> to vector<8x384xf32>
    %668 = arith.negf %667 : vector<8x384xf32>
    %669 = math.exp %668 : vector<8x384xf32>
    %cst_361 = arith.constant 1.000000e+00 : f32
    %670 = vector.broadcast %cst_361 : f32 to vector<8x384xf32>
    %671 = arith.addf %670, %669 : vector<8x384xf32>
    %672 = arith.divf %670, %671 : vector<8x384xf32>
    %673 = vector.extract_strided_slice %666 {offsets = [0, 384], sizes = [8, 128], strides = [1, 1]} : vector<8x512xf32> to vector<8x128xf32>
    %674 = math.tanh %673 : vector<8x128xf32>
    %675 = vector.extract_strided_slice %672 {offsets = [0, 0], sizes = [8, 128], strides = [1, 1]} : vector<8x384xf32> to vector<8x128xf32>
    %676 = vector.extract_strided_slice %672 {offsets = [0, 128], sizes = [8, 128], strides = [1, 1]} : vector<8x384xf32> to vector<8x128xf32>
    %677 = vector.extract_strided_slice %672 {offsets = [0, 256], sizes = [8, 128], strides = [1, 1]} : vector<8x384xf32> to vector<8x128xf32>
    %c0_362 = arith.constant 0 : index
    %c0_363 = arith.constant 0 : index
    %678 = vector.load %arg8[%c0_362, %c0_363] : memref<8x128xf32, #tpu.memory_space<vmem>>, vector<8x128xf32>
    %679 = arith.mulf %676, %678 : vector<8x128xf32>
    %680 = arith.mulf %675, %674 : vector<8x128xf32>
    %681 = arith.addf %679, %680 : vector<8x128xf32>
    %682 = math.tanh %681 : vector<8x128xf32>
    %683 = arith.mulf %677, %682 : vector<8x128xf32>
    %c0_364 = arith.constant 0 : index
    %c0_365 = arith.constant 0 : index
    %684 = vector.load %arg8[%c0_364, %c0_365] : memref<8x128xf32, #tpu.memory_space<vmem>>, vector<8x128xf32>
    tpu.vector_store %arg8[%c0_364, %c0_365], %681 {strides = array<i32>} : memref<8x128xf32, #tpu.memory_space<vmem>>, vector<8x128xf32>,
    %c0_366 = arith.constant 0 : index
    %c0_367 = arith.constant 0 : index
    %685 = vector.load %arg7[%c0_366, %c0_367] : memref<8x128xf32, #tpu.memory_space<vmem>>, vector<8x128xf32>
    tpu.vector_store %arg7[%c0_366, %c0_367], %683 {strides = array<i32>} : memref<8x128xf32, #tpu.memory_space<vmem>>, vector<8x128xf32>,
    %686 = arith.index_cast %661 : i32 to index
    %c384_368 = arith.constant 384 : index
    %687 = vector.load %arg6[%686, %c384_368] : memref<64x512xf32, #tpu.memory_space<vmem>>, vector<8x128xf32>
    tpu.vector_store %arg6[%686, %c384_368], %683 {strides = array<i32>} : memref<64x512xf32, #tpu.memory_space<vmem>>, vector<8x128xf32>,
    %c7_i32_369 = arith.constant 7 : i32
    %c8_i32_370 = arith.constant 8 : i32
    %688 = arith.muli %c7_i32_369, %c8_i32_370 : i32
    %689 = tpu.assume_multiple %688, 8 : i32
    %690 = arith.index_cast %689 : i32 to index
    %c0_371 = arith.constant 0 : index
    %691 = vector.load %arg9[%690, %c0_371] : memref<64x512xf32, #tpu.memory_space<vmem>>, vector<8x512xf32>
    %c0_372 = arith.constant 0 : index
    %c0_373 = arith.constant 0 : index
    %692 = vector.load %arg7[%c0_372, %c0_373] : memref<8x128xf32, #tpu.memory_space<vmem>>, vector<8x128xf32>
    %cst_374 = arith.constant dense<0.000000e+00> : vector<8x512xf32>
    %693 = tpu.matmul %692, %487, %cst_374 {dimension_numbers = #tpu.dot_dimension_numbers<[1], [0], [0], [1], [0, 0, 1, 1], [], []>} : vector<8x128xf32>, vector<128x512xf32>, vector<8x512xf32> -> vector<8x512xf32>
    %694 = arith.addf %691, %693 : vector<8x512xf32>
    %695 = vector.extract_strided_slice %694 {offsets = [0, 0], sizes = [8, 384], strides = [1, 1]} : vector<8x512xf32> to vector<8x384xf32>
    %696 = arith.negf %695 : vector<8x384xf32>
    %697 = math.exp %696 : vector<8x384xf32>
    %cst_375 = arith.constant 1.000000e+00 : f32
    %698 = vector.broadcast %cst_375 : f32 to vector<8x384xf32>
    %699 = arith.addf %698, %697 : vector<8x384xf32>
    %700 = arith.divf %698, %699 : vector<8x384xf32>
    %701 = vector.extract_strided_slice %694 {offsets = [0, 384], sizes = [8, 128], strides = [1, 1]} : vector<8x512xf32> to vector<8x128xf32>
    %702 = math.tanh %701 : vector<8x128xf32>
    %703 = vector.extract_strided_slice %700 {offsets = [0, 0], sizes = [8, 128], strides = [1, 1]} : vector<8x384xf32> to vector<8x128xf32>
    %704 = vector.extract_strided_slice %700 {offsets = [0, 128], sizes = [8, 128], strides = [1, 1]} : vector<8x384xf32> to vector<8x128xf32>
    %705 = vector.extract_strided_slice %700 {offsets = [0, 256], sizes = [8, 128], strides = [1, 1]} : vector<8x384xf32> to vector<8x128xf32>
    %c0_376 = arith.constant 0 : index
    %c0_377 = arith.constant 0 : index
    %706 = vector.load %arg8[%c0_376, %c0_377] : memref<8x128xf32, #tpu.memory_space<vmem>>, vector<8x128xf32>
    %707 = arith.mulf %704, %706 : vector<8x128xf32>
    %708 = arith.mulf %703, %702 : vector<8x128xf32>
    %709 = arith.addf %707, %708 : vector<8x128xf32>
    %710 = math.tanh %709 : vector<8x128xf32>
    %711 = arith.mulf %705, %710 : vector<8x128xf32>
    %c0_378 = arith.constant 0 : index
    %c0_379 = arith.constant 0 : index
    %712 = vector.load %arg8[%c0_378, %c0_379] : memref<8x128xf32, #tpu.memory_space<vmem>>, vector<8x128xf32>
    tpu.vector_store %arg8[%c0_378, %c0_379], %709 {strides = array<i32>} : memref<8x128xf32, #tpu.memory_space<vmem>>, vector<8x128xf32>,
    %c0_380 = arith.constant 0 : index
    %c0_381 = arith.constant 0 : index
    %713 = vector.load %arg7[%c0_380, %c0_381] : memref<8x128xf32, #tpu.memory_space<vmem>>, vector<8x128xf32>
    tpu.vector_store %arg7[%c0_380, %c0_381], %711 {strides = array<i32>} : memref<8x128xf32, #tpu.memory_space<vmem>>, vector<8x128xf32>,
    %714 = arith.index_cast %689 : i32 to index
    %c384_382 = arith.constant 384 : index
    %715 = vector.load %arg6[%714, %c384_382] : memref<64x512xf32, #tpu.memory_space<vmem>>, vector<8x128xf32>
    tpu.vector_store %arg6[%714, %c384_382], %711 {strides = array<i32>} : memref<64x512xf32, #tpu.memory_space<vmem>>, vector<8x128xf32>,
    %c8_i32_383 = arith.constant 8 : i32
    return
  }
}

</mosaic_0001>

<bundles_post_ra>
// kernel: dense_rnn_forward.1
= control target key start
LH: loop header
LB: loop body
LE: loop exit
PB: predicated region body
PF: predicated region fallthrough
CT: control target
= control target key end

     0   :  { %v8846_v3 = vmov 0.0   ;;  %s12179_s1 = inlined_call_operand.vmem [shape: f32[128,512], index: 1, kind: input, shape index: {}]   ;;  %s12180_s0 = inlined_call_operand.vmem [shape: f32[64,128], index: 0, kind: input, shape index: {}]   ;;  %s12181_s6 = inlined_call_operand.vmem [shape: f32[64,512], index: 6, kind: output, shape index: {}]   ;;  %s12182_s4 = inlined_call_operand.vmem [shape: f32[3,128,512], index: 4, kind: input, shape index: {}]   ;;  %s12183_s5 = inlined_call_operand.vmem [shape: f32[3,1,512], index: 5, kind: input, shape index: {}]   ;;  %s12184_s2 = inlined_call_operand.vmem [shape: f32[256,512], index: 2, kind: input, shape index: {}]   ;;  %s12185_s3 = inlined_call_operand.vmem [shape: f32[384,512], index: 3, kind: input, shape index: {}]  }
   0x1   :  { %v48_v0 = vld [vmem:[%s12179_s1 + $0x8] sm:$0xff]  ;;  %v50_v2 = vld [vmem:[%s12179_s1 + $0x18] sm:$0xff]  ;;  %197 = vmatprep.mubr.f32.mxu0 %v8846_v3  ;;  %310 = vmatprep.mubr.f32.mxu1 %v8846_v3  ;;  %v47_v6 = vld [vmem:[%s12179_s1] sm:$0xff] }
   0x2   :  { %v52_v1 = vld [vmem:[%s12179_s1 + $0x28] sm:$0xff]  ;;  %v54_v5 = vld [vmem:[%s12179_s1 + $0x38] sm:$0xff]  ;;  %v51_v7 = vld [vmem:[%s12179_s1 + $0x20] sm:$0xff] }
   0x3   :  { %v6316_v4 = vpack.c.bf16 %v52_v1, %v48_v0  ;;  %v6348_v8 = vpack.c.bf16 %v54_v5, %v50_v2  ;;  %v6318_v9 = vpack.c.bf16 %v51_v7, %v47_v6  ;;  %v49_v10 = vld [vmem:[%s12179_s1 + $0x10] sm:$0xff]  ;;  %v56_v12 = vld [vmem:[%s12179_s1 + $0x48] sm:$0xff]  ;;  %v58_v15 = vld [vmem:[%s12179_s1 + $0x58] sm:$0xff] }
   0x4   :  { %v53_v11 = vld [vmem:[%s12179_s1 + $0x30] sm:$0xff]  ;;  %v60_v14 = vld [vmem:[%s12179_s1 + $0x68] sm:$0xff]  ;;  %v62_v16 = vld [vmem:[%s12179_s1 + $0x78] sm:$0xff] }
   0x5   :  { %6317 = vmatprep.subr.bf16.mxu0 %v6316_v4  ;;  %v6350_v13 = vpack.c.bf16 %v53_v11, %v49_v10  ;;  %6349 = vmatprep.subr.bf16.mxu1 %v6348_v8  ;;  %v6320_v17 = vpack.c.bf16 %v60_v14, %v56_v12  ;;  %v6352_v18 = vpack.c.bf16 %v62_v16, %v58_v15  ;;  %v55_v19 = vld [vmem:[%s12179_s1 + $0x40] sm:$0xff]  ;;  %v57_v21 = vld [vmem:[%s12179_s1 + $0x50] sm:$0xff]  ;;  %v64_v24 = vld [vmem:[%s12179_s1 + $0x88] sm:$0xff] }
   0x6   :  { %6319 = vmatpush1.bf16.msra.mxu0 %v6318_v9  ;;  %v59_v20 = vld [vmem:[%s12179_s1 + $0x60] sm:$0xff]  ;;  %v61_v23 = vld [vmem:[%s12179_s1 + $0x70] sm:$0xff]  ;;  %v68_v25 = vld [vmem:[%s12179_s1 + $0xa8] sm:$0xff] }
   0x7   :  { %6351 = vmatpush1.bf16.msra.mxu1 %v6350_v13  ;;  %v6322_v22 = vpack.c.bf16 %v59_v20, %v55_v19  ;;  %6321 = vmatprep.subr.bf16.mxu0 %v6320_v17  ;;  %v6354_v26 = vpack.c.bf16 %v61_v23, %v57_v21  ;;  %v6324_v27 = vpack.c.bf16 %v68_v25, %v64_v24  ;;  %v66_v28 = vld [vmem:[%s12179_s1 + $0x98] sm:$0xff]  ;;  %v63_v30 = vld [vmem:[%s12179_s1 + $0x80] sm:$0xff]  ;;  %v65_v33 = vld [vmem:[%s12179_s1 + $0x90] sm:$0xff] }
   0x8   :  { %6353 = vmatprep.subr.bf16.mxu1 %v6352_v18  ;;  %v70_v29 = vld [vmem:[%s12179_s1 + $0xb8] sm:$0xff]  ;;  %v67_v32 = vld [vmem:[%s12179_s1 + $0xa0] sm:$0xff]  ;;  %v69_v34 = vld [vmem:[%s12179_s1 + $0xb0] sm:$0xff] }
   0x9   :  { %v6356_v31 = vpack.c.bf16 %v70_v29, %v66_v28  ;;  %v6326_v35 = vpack.c.bf16 %v67_v32, %v63_v30  ;;  %v72_v36 = vld [vmem:[%s12179_s1 + $0xc8] sm:$0xff]  ;;  %v74_v38 = vld [vmem:[%s12179_s1 + $0xd8] sm:$0xff]  ;;  %v6358_v39 = vpack.c.bf16 %v69_v34, %v65_v33  ;;  %v71_v42 = vld [vmem:[%s12179_s1 + $0xc0] sm:$0xff] }
   0xa   :  { %6323 = vmatpush1.bf16.msra.mxu0 %v6322_v22  ;;  %v76_v37 = vld [vmem:[%s12179_s1 + $0xe8] sm:$0xff]  ;;  %v78_v41 = vld [vmem:[%s12179_s1 + $0xf8] sm:$0xff]  ;;  %v75_v43 = vld [vmem:[%s12179_s1 + $0xe0] sm:$0xff] }
   0xb   :  { %6355 = vmatpush1.bf16.msra.mxu1 %v6354_v26  ;;  %6325 = vmatprep.subr.bf16.mxu0 %v6324_v27  ;;  %v6328_v40 = vpack.c.bf16 %v76_v37, %v72_v36  ;;  %v6360_v44 = vpack.c.bf16 %v78_v41, %v74_v38  ;;  %v73_v45 = vld [vmem:[%s12179_s1 + $0xd0] sm:$0xff]  ;;  %v80_v47 = vld [vmem:[%s12179_s1 + $0x108] sm:$0xff]  ;;  %v82_v49 = vld [vmem:[%s12179_s1 + $0x118] sm:$0xff]  ;;  %v6330_v51 = vpack.c.bf16 %v75_v43, %v71_v42 }
   0xc   :  { %6357 = vmatprep.subr.bf16.mxu1 %v6356_v31  ;;  %v77_v46 = vld [vmem:[%s12179_s1 + $0xf0] sm:$0xff]  ;;  %v84_v48 = vld [vmem:[%s12179_s1 + $0x128] sm:$0xff]  ;;  %v86_v50 = vld [vmem:[%s12179_s1 + $0x138] sm:$0xff] }
   0xd   :  { %v6362_v52 = vpack.c.bf16 %v77_v46, %v73_v45  ;;  %v6332_v53 = vpack.c.bf16 %v84_v48, %v80_v47  ;;  %v79_v54 = vld [vmem:[%s12179_s1 + $0x100] sm:$0xff]  ;;  %v81_v56 = vld [vmem:[%s12179_s1 + $0x110] sm:$0xff]  ;;  %v6364_v57 = vpack.c.bf16 %v86_v50, %v82_v49  ;;  %v88_v59 = vld [vmem:[%s12179_s1 + $0x148] sm:$0xff] }
   0xe   :  { %6327 = vmatpush1.bf16.msra.mxu0 %v6326_v35  ;;  %v83_v55 = vld [vmem:[%s12179_s1 + $0x120] sm:$0xff]  ;;  %v85_v58 = vld [vmem:[%s12179_s1 + $0x130] sm:$0xff]  ;;  %v92_v60 = vld [vmem:[%s12179_s1 + $0x168] sm:$0xff] }
   0xf   :  { %6359 = vmatpush1.bf16.msra.mxu1 %v6358_v39  ;;  %6329 = vmatprep.subr.bf16.mxu0 %v6328_v40  ;;  %v90_v61 = vld [vmem:[%s12179_s1 + $0x158] sm:$0xff]  ;;  %v6334_v63 = vpack.c.bf16 %v83_v55, %v79_v54  ;;  %v6366_v0 = vpack.c.bf16 %v85_v58, %v81_v56  ;;  %v6336_v1 = vpack.c.bf16 %v92_v60, %v88_v59  ;;  %v87_v2 = vld [vmem:[%s12179_s1 + $0x140] sm:$0xff]  ;;  %v89_v5 = vld [vmem:[%s12179_s1 + $0x150] sm:$0xff] }
  0x10   :  { %6361 = vmatprep.subr.bf16.mxu1 %v6360_v44  ;;  %v94_v62 = vld [vmem:[%s12179_s1 + $0x178] sm:$0xff]  ;;  %v91_v4 = vld [vmem:[%s12179_s1 + $0x160] sm:$0xff]  ;;  %v93_v7 = vld [vmem:[%s12179_s1 + $0x170] sm:$0xff] }
  0x11   :  { %v6368_v6 = vpack.c.bf16 %v94_v62, %v90_v61  ;;  %v96_v8 = vld [vmem:[%s12179_s1 + $0x188] sm:$0xff]  ;;  %v98_v10 = vld [vmem:[%s12179_s1 + $0x198] sm:$0xff]  ;;  %v6338_v12 = vpack.c.bf16 %v91_v4, %v87_v2  ;;  %v95_v13 = vld [vmem:[%s12179_s1 + $0x180] sm:$0xff]  ;;  %v6370_v14 = vpack.c.bf16 %v93_v7, %v89_v5 }
  0x12   :  { %6331 = vmatpush1.bf16.msra.mxu0 %v6330_v51  ;;  %v100_v9 = vld [vmem:[%s12179_s1 + $0x1a8] sm:$0xff]  ;;  %v102_v11 = vld [vmem:[%s12179_s1 + $0x1b8] sm:$0xff]  ;;  %v99_v16 = vld [vmem:[%s12179_s1 + $0x1a0] sm:$0xff] }
  0x13   :  { %6363 = vmatpush1.bf16.msra.mxu1 %v6362_v52  ;;  %6333 = vmatprep.subr.bf16.mxu0 %v6332_v53  ;;  %v6340_v15 = vpack.c.bf16 %v100_v9, %v96_v8  ;;  %v97_v17 = vld [vmem:[%s12179_s1 + $0x190] sm:$0xff]  ;;  %v9052_v18 = vld [vmem:[%s12180_s0] sm:$0xff]  ;;  %v6372_v19 = vpack.c.bf16 %v102_v11, %v98_v10  ;;  %v104_v21 = vld [vmem:[%s12179_s1 + $0x1c8] sm:$0xff]  ;;  %v6342_v25 = vpack.c.bf16 %v99_v16, %v95_v13 }
  0x14   :  { %6365 = vmatprep.subr.bf16.mxu1 %v6364_v57  ;;  %v101_v20 = vld [vmem:[%s12179_s1 + $0x1b0] sm:$0xff]  ;;  %v108_v22 = vld [vmem:[%s12179_s1 + $0x1e8] sm:$0xff]  ;;  %31 = vst [vmem:[%s12181_s6] sm:$0xff] %v9052_v18  ;;  %v106_v23 = vld [vmem:[%s12179_s1 + $0x1d8] sm:$0xff] }
  0x15   :  { %v110_v24 = vld [vmem:[%s12179_s1 + $0x1f8] sm:$0xff]  ;;  %v9076_v26 = vld [vmem:[%s12180_s0 + $0x8] sm:$0xff]  ;;  %v6374_v27 = vpack.c.bf16 %v101_v20, %v97_v17  ;;  %v6344_v28 = vpack.c.bf16 %v108_v22, %v104_v21  ;;  %v103_v29 = vld [vmem:[%s12179_s1 + $0x1c0] sm:$0xff] }
  0x16   :  { %6335 = vmatpush1.bf16.msra.mxu0 %v6334_v63  ;;  %v107_v30 = vld [vmem:[%s12179_s1 + $0x1e0] sm:$0xff]  ;;  %v105_v31 = vld [vmem:[%s12179_s1 + $0x1d0] sm:$0xff]  ;;  %32 = vst [vmem:[%s12181_s6 + $0x20] sm:$0xff] %v9076_v26  ;;  %v6376_v32 = vpack.c.bf16 %v110_v24, %v106_v23  ;;  %v392_v34 = vld [vmem:[%s12182_s4 + $0x8] sm:$0xff] }
  0x17   :  { %6367 = vmatpush1.bf16.msra.mxu1 %v6366_v0  ;;  %6337 = vmatprep.subr.bf16.mxu0 %v6336_v1  ;;  %v109_v33 = vld [vmem:[%s12179_s1 + $0x1f0] sm:$0xff]  ;;  %v396_v35 = vld [vmem:[%s12182_s4 + $0x28] sm:$0xff]  ;;  %v394_v36 = vld [vmem:[%s12182_s4 + $0x18] sm:$0xff]  ;;  %v6346_v39 = vpack.c.bf16 %v107_v30, %v103_v29 }
  0x18   :  { %6369 = vmatprep.subr.bf16.mxu1 %v6368_v6  ;;  %v398_v37 = vld [vmem:[%s12182_s4 + $0x38] sm:$0xff]  ;;  %v9109_v38 = vld [vmem:[%s12180_s0 + $0x10] sm:$0xff]  ;;  %v6378_v40 = vpack.c.bf16 %v109_v33, %v105_v31  ;;  %v9115_v41 = vpack.c.bf16 %v396_v35, %v392_v34  ;;  %v391_v42 = vld [vmem:[%s12182_s4] sm:$0xff] }
  0x19   :  { %33 = vst [vmem:[%s12181_s6 + $0x40] sm:$0xff] %v9109_v38  ;;  %v395_v43 = vld [vmem:[%s12182_s4 + $0x20] sm:$0xff]  ;;  %v9123_v44 = vpack.c.bf16 %v398_v37, %v394_v36  ;;  %v393_v45 = vld [vmem:[%s12182_s4 + $0x10] sm:$0xff]  ;;  %v9134_v47 = vld [vmem:[%s12180_s0 + $0x18] sm:$0xff] }
  0x1a   :  { %6339 = vmatpush1.bf16.msra.mxu0 %v6338_v12  ;;  %v397_v46 = vld [vmem:[%s12182_s4 + $0x30] sm:$0xff]  ;;  %v400_v48 = vld [vmem:[%s12182_s4 + $0x48] sm:$0xff]  ;;  %34 = vst [vmem:[%s12181_s6 + $0x60] sm:$0xff] %v9134_v47  ;;  %v9146_v50 = vpack.c.bf16 %v395_v43, %v391_v42  ;;  %v402_v51 = vld [vmem:[%s12182_s4 + $0x58] sm:$0xff] }
  0x1b   :  { %6371 = vmatpush1.bf16.msra.mxu1 %v6370_v14  ;;  %6341 = vmatprep.subr.bf16.mxu0 %v6340_v15  ;;  %v404_v49 = vld [vmem:[%s12182_s4 + $0x68] sm:$0xff]  ;;  %v406_v52 = vld [vmem:[%s12182_s4 + $0x78] sm:$0xff]  ;;  %v9155_v53 = vpack.c.bf16 %v397_v46, %v393_v45  ;;  %v399_v54 = vld [vmem:[%s12182_s4 + $0x40] sm:$0xff] }
  0x1c   :  { %6373 = vmatprep.subr.bf16.mxu1 %v6372_v19  ;;  %v403_v55 = vld [vmem:[%s12182_s4 + $0x60] sm:$0xff]  ;;  %v9169_v57 = vpack.c.bf16 %v404_v49, %v400_v48  ;;  %v401_v58 = vld [vmem:[%s12182_s4 + $0x50] sm:$0xff]  ;;  %v9182_v60 = vpack.c.bf16 %v406_v52, %v402_v51  ;;  %v408_v61 = vld [vmem:[%s12182_s4 + $0x88] sm:$0xff] }
  0x1d   :  { %v9166_v56 = vld [vmem:[%s12180_s0 + $0x20] sm:$0xff]  ;;  %v405_v59 = vld [vmem:[%s12182_s4 + $0x70] sm:$0xff]  ;;  %v412_v62 = vld [vmem:[%s12182_s4 + $0xa8] sm:$0xff]  ;;  %v9192_v63 = vpack.c.bf16 %v403_v55, %v399_v54 }
  0x1e   :  { %6343 = vmatpush1.bf16.msra.mxu0 %v6342_v25  ;;  %35 = vst [vmem:[%s12181_s6 + $0x80] sm:$0xff] %v9166_v56  ;;  %v410_v0 = vld [vmem:[%s12182_s4 + $0x98] sm:$0xff]  ;;  %v9203_v2 = vld [vmem:[%s12180_s0 + $0x28] sm:$0xff]  ;;  %v9207_v4 = vpack.c.bf16 %v405_v59, %v401_v58  ;;  %v407_v5 = vld [vmem:[%s12182_s4 + $0x80] sm:$0xff]  ;;  %v9221_v7 = vpack.c.bf16 %v412_v62, %v408_v61 }
  0x1f   :  { %6375 = vmatpush1.bf16.msra.mxu1 %v6374_v27  ;;  %6345 = vmatprep.subr.bf16.mxu0 %v6344_v28  ;;  %v414_v1 = vld [vmem:[%s12182_s4 + $0xb8] sm:$0xff]  ;;  %v411_v6 = vld [vmem:[%s12182_s4 + $0xa0] sm:$0xff]  ;;  %36 = vst [vmem:[%s12181_s6 + $0xa0] sm:$0xff] %v9203_v2  ;;  %v409_v8 = vld [vmem:[%s12182_s4 + $0x90] sm:$0xff] }
  0x20   :  { %6377 = vmatprep.subr.bf16.mxu1 %v6376_v32  ;;  %v413_v9 = vld [vmem:[%s12182_s4 + $0xb0] sm:$0xff]  ;;  %v9231_v10 = vpack.c.bf16 %v414_v1, %v410_v0  ;;  %v416_v11 = vld [vmem:[%s12182_s4 + $0xc8] sm:$0xff]  ;;  %v9246_v14 = vpack.c.bf16 %v411_v6, %v407_v5  ;;  %v418_v15 = vld [vmem:[%s12182_s4 + $0xd8] sm:$0xff] }
  0x21   :  { %v420_v12 = vld [vmem:[%s12182_s4 + $0xe8] sm:$0xff]  ;;  %v9242_v13 = vld [vmem:[%s12180_s0 + $0x30] sm:$0xff]  ;;  %v422_v16 = vld [vmem:[%s12182_s4 + $0xf8] sm:$0xff]  ;;  %v9260_v17 = vpack.c.bf16 %v413_v9, %v409_v8 }
  0x22   :  { %6347 = vmatpush1.bf16.msra.mxu0 %v6346_v39  ;;  %37 = vst [vmem:[%s12181_s6 + $0xc0] sm:$0xff] %v9242_v13  ;;  %v419_v19 = vld [vmem:[%s12182_s4 + $0xe0] sm:$0xff]  ;;  %v9270_v20 = vpack.c.bf16 %v420_v12, %v416_v11  ;;  %v417_v21 = vld [vmem:[%s12182_s4 + $0xd0] sm:$0xff]  ;;  %v9281_v23 = vld [vmem:[%s12180_s0 + $0x38] sm:$0xff]  ;;  %v9285_v24 = vpack.c.bf16 %v422_v16, %v418_v15 }
  0x23   :  { %6379 = vmatpush1.bf16.msra.mxu1 %v6378_v40  ;;  %6381 = vmatprep.subr.bf16.mxu0 %v9115_v41  ;;  %v421_v22 = vld [vmem:[%s12182_s4 + $0xf0] sm:$0xff]  ;;  %v424_v25 = vld [vmem:[%s12182_s4 + $0x108] sm:$0xff]  ;;  %38 = vst [vmem:[%s12181_s6 + $0xe0] sm:$0xff] %v9281_v23  ;;  %v426_v28 = vld [vmem:[%s12182_s4 + $0x118] sm:$0xff] }
  0x24   :  { %6413 = vmatprep.subr.bf16.mxu1 %v9123_v44  ;;  %v430_v29 = vld [vmem:[%s12182_s4 + $0x138] sm:$0xff]  ;;  %v9309_v30 = vpack.c.bf16 %v421_v22, %v417_v21  ;;  %v423_v31 = vld [vmem:[%s12182_s4 + $0x100] sm:$0xff]  ;;  %v425_v34 = vld [vmem:[%s12182_s4 + $0x110] sm:$0xff] }
  0x25   :  { %198 = vmatmul.mubr.f32.vlgmr.msra.gmra.mrb[0].mxu0 %v9052_v18  ;;  %v427_v32 = vld [vmem:[%s12182_s4 + $0x120] sm:$0xff]  ;;  %v429_v35 = vld [vmem:[%s12182_s4 + $0x130] sm:$0xff]  ;;  %v9329_v36 = vpack.c.bf16 %v430_v29, %v426_v28  ;;  %v432_v37 = vld [vmem:[%s12182_s4 + $0x148] sm:$0xff] }
  0x26   :  { %311 = vmatmul.mubr.f32.vlgmr.msra.gmra.mrb[0].mxu1 %v9052_v18  ;;  %6383 = vmatpush1.bf16.msra.mxu0 %v9146_v50  ;;  %v415_v18 = vld [vmem:[%s12182_s4 + $0xc0] sm:$0xff]  ;;  %v9339_v39 = vpack.c.bf16 %v427_v32, %v423_v31  ;;  %v434_v40 = vld [vmem:[%s12182_s4 + $0x158] sm:$0xff]  ;;  %v9349_v43 = vpack.c.bf16 %v429_v35, %v425_v34  ;;  %v433_v48 = vld [vmem:[%s12182_s4 + $0x150] sm:$0xff] }
  0x27   :  { %6415 = vmatpush1.bf16.msra.mxu1 %v9155_v53  ;;  %203 = vmatprep.mubr.f32.mxu0 %v8846_v3  ;;  %v9299_v27 = vpack.c.bf16 %v419_v19, %v415_v18  ;;  %v438_v42 = vld [vmem:[%s12182_s4 + $0x178] sm:$0xff]  ;;  %v431_v45 = vld [vmem:[%s12182_s4 + $0x140] sm:$0xff]  ;;  %v437_v49 = vld [vmem:[%s12182_s4 + $0x170] sm:$0xff] }
  0x28   :  { %316 = vmatprep.mubr.f32.mxu1 %v8846_v3  ;;  %6385 = vmatprep.subr.bf16.mxu0 %v9169_v57  ;;  %v435_v46 = vld [vmem:[%s12182_s4 + $0x160] sm:$0xff]  ;;  %v9369_v51 = vpack.c.bf16 %v438_v42, %v434_v40  ;;  %v440_v52 = vld [vmem:[%s12182_s4 + $0x188] sm:$0xff]  ;;  %v442_v58 = vld [vmem:[%s12182_s4 + $0x198] sm:$0xff]  ;;  %v9389_v61 = vpack.c.bf16 %v437_v49, %v433_v48 }
  0x29   :  { %204 = vmatmul.mubr.f32.gmra.mrb[2].mxu0 %v9076_v26  ;;  %6417 = vmatprep.subr.bf16.mxu1 %v9182_v60  ;;  %v444_v54 = vld [vmem:[%s12182_s4 + $0x1a8] sm:$0xff]  ;;  %v9379_v55 = vpack.c.bf16 %v435_v46, %v431_v45  ;;  %v446_v59 = vld [vmem:[%s12182_s4 + $0x1b8] sm:$0xff]  ;;  %v443_v62 = vld [vmem:[%s12182_s4 + $0x1a0] sm:$0xff] }
  0x2a   :  { %317 = vmatmul.mubr.f32.gmra.mrb[2].mxu1 %v9076_v26  ;;  %6387 = vmatpush1.bf16.msra.mxu0 %v9192_v63  ;;  %v428_v26 = vld [vmem:[%s12182_s4 + $0x128] sm:$0xff]  ;;  %v9399_v0 = vpack.c.bf16 %v444_v54, %v440_v52  ;;  %v441_v1 = vld [vmem:[%s12182_s4 + $0x190] sm:$0xff]  ;;  %v9409_v6 = vpack.c.bf16 %v446_v59, %v442_v58  ;;  %v450_v12 = vld [vmem:[%s12182_s4 + $0x1d8] sm:$0xff] }
  0x2b   :  { %6419 = vmatpush1.bf16.msra.mxu1 %v9207_v4  ;;  %209 = vmatprep.mubr.f32.mxu0 %v8846_v3  ;;  %v9319_v33 = vpack.c.bf16 %v428_v26, %v424_v25  ;;  %v445_v5 = vld [vmem:[%s12182_s4 + $0x1b0] sm:$0xff]  ;;  %v448_v8 = vld [vmem:[%s12182_s4 + $0x1c8] sm:$0xff]  ;;  %v454_v15 = vld [vmem:[%s12182_s4 + $0x1f8] sm:$0xff] }
  0x2c   :  { %322 = vmatprep.mubr.f32.mxu1 %v8846_v3  ;;  %6389 = vmatprep.subr.bf16.mxu0 %v9221_v7  ;;  %v452_v9 = vld [vmem:[%s12182_s4 + $0x1e8] sm:$0xff]  ;;  %v9429_v16 = vpack.c.bf16 %v445_v5, %v441_v1  ;;  %v451_v18 = vld [vmem:[%s12182_s4 + $0x1e0] sm:$0xff]  ;;  %v449_v21 = vld [vmem:[%s12182_s4 + $0x1d0] sm:$0xff]  ;;  %v9449_v25 = vpack.c.bf16 %v454_v15, %v450_v12 }
  0x2d   :  { %210 = vmatmul.mubr.f32.gmra.mrb[4].mxu0 %v9109_v38  ;;  %6421 = vmatprep.subr.bf16.mxu1 %v9231_v10  ;;  %v9439_v19 = vpack.c.bf16 %v452_v9, %v448_v8  ;;  %v453_v22 = vld [vmem:[%s12182_s4 + $0x1f0] sm:$0xff]  ;;  %v111_v31 = vld [vmem:[%s12183_s5] sm:$0xf] }
  0x2e   :  { %323 = vmatmul.mubr.f32.gmra.mrb[4].mxu1 %v9109_v38  ;;  %6391 = vmatpush1.bf16.msra.mxu0 %v9246_v14  ;;  %v436_v38 = vld [vmem:[%s12182_s4 + $0x168] sm:$0xff]  ;;  %v9457_v28 = vpack.c.bf16 %v453_v22, %v449_v21 }
  0x2f   :  { %6423 = vmatpush1.bf16.msra.mxu1 %v9260_v17  ;;  %215 = vmatprep.mubr.f32.mxu0 %v8846_v3 }
  0x30   :  { %328 = vmatprep.mubr.f32.mxu1 %v8846_v3  ;;  %6393 = vmatprep.subr.bf16.mxu0 %v9270_v20 }
  0x31   :  { %216 = vmatmul.mubr.f32.gmra.mrb[6].mxu0 %v9134_v47  ;;  %6425 = vmatprep.subr.bf16.mxu1 %v9285_v24 }
  0x32   :  { %329 = vmatmul.mubr.f32.gmra.mrb[6].mxu1 %v9134_v47  ;;  %6395 = vmatpush1.bf16.msra.mxu0 %v9299_v27  ;;  %v9359_v47 = vpack.c.bf16 %v436_v38, %v432_v37 }
  0x33   :  { %6427 = vmatpush1.bf16.msra.mxu1 %v9309_v30  ;;  %221 = vmatprep.mubr.f32.mxu0 %v8846_v3 }
  0x34   :  { %334 = vmatprep.mubr.f32.mxu1 %v8846_v3  ;;  %6397 = vmatprep.subr.bf16.mxu0 %v9319_v33 }
  0x35   :  { %222 = vmatmul.mubr.f32.gmra.mrb[8].mxu0 %v9166_v56  ;;  %6429 = vmatprep.subr.bf16.mxu1 %v9329_v36 }
  0x36   :  { %335 = vmatmul.mubr.f32.gmra.mrb[8].mxu1 %v9166_v56  ;;  %6399 = vmatpush1.bf16.msra.mxu0 %v9339_v39  ;;  %v439_v56 = vld [vmem:[%s12182_s4 + $0x180] sm:$0xff] }
  0x37   :  { %6431 = vmatpush1.bf16.msra.mxu1 %v9349_v43  ;;  %227 = vmatprep.mubr.f32.mxu0 %v8846_v3  ;;  %v9419_v11 = vpack.c.bf16 %v443_v62, %v439_v56 }
  0x38   :  { %340 = vmatprep.mubr.f32.mxu1 %v8846_v3  ;;  %6401 = vmatprep.subr.bf16.mxu0 %v9359_v47 }
  0x39   :  { %228 = vmatmul.mubr.f32.gmra.mrb[10].mxu0 %v9203_v2  ;;  %6433 = vmatprep.subr.bf16.mxu1 %v9369_v51 }
  0x3a   :  { %341 = vmatmul.mubr.f32.gmra.mrb[10].mxu1 %v9203_v2  ;;  %6403 = vmatpush1.bf16.msra.mxu0 %v9379_v55  ;;  %v447_v2 = vld [vmem:[%s12182_s4 + $0x1c0] sm:$0xff] }
  0x3b   :  { %6435 = vmatpush1.bf16.msra.mxu1 %v9389_v61  ;;  %233 = vmatprep.mubr.f32.mxu0 %v8846_v3  ;;  %v9453_v26 = vpack.c.bf16 %v451_v18, %v447_v2 }
  0x3c   :  { %346 = vmatprep.mubr.f32.mxu1 %v8846_v3  ;;  %6405 = vmatprep.subr.bf16.mxu0 %v9399_v0 }
  0x3d   :  { %234 = vmatmul.mubr.f32.gmra.mrb[12].mxu0 %v9242_v13  ;;  %6437 = vmatprep.subr.bf16.mxu1 %v9409_v6 }
  0x3e   :  { %347 = vmatmul.mubr.f32.gmra.mrb[12].mxu1 %v9242_v13  ;;  %6407 = vmatpush1.bf16.msra.mxu0 %v9419_v11  ;;  %v113_v13 = vlaneseq }
  0x3f   :  { %6439 = vmatpush1.bf16.msra.mxu1 %v9429_v16  ;;  %239 = vmatprep.mubr.f32.mxu0 %v8846_v3 }
  0x40   :  { %352 = vmatprep.mubr.f32.mxu1 %v8846_v3  ;;  %6409 = vmatprep.subr.bf16.mxu0 %v9439_v19 }
  0x41   :  { %240 = vmatmul.mubr.f32.gmra.mrb[14].mxu0 %v9281_v23  ;;  %6441 = vmatprep.subr.bf16.mxu1 %v9449_v25 }
  0x42   :  { %353 = vmatmul.mubr.f32.gmra.mrb[14].mxu1 %v9281_v23  ;;  %6411 = vmatpush1.bf16.msra.mxu0 %v9453_v26  ;;  %v114_v23 = vshrl.u32 %v113_v13, 7 }
  0x43   :  { %6443 = vmatpush1.bf16.msra.mxu1 %v9457_v28  ;;  %529 = vmatprep.mubr.f32.mxu0 %v8846_v3 }
  0x44   :  { %600 = vmatprep.mubr.f32.mxu1 %v8846_v3  ;;  %6445 = vmatprep.subr.bf16.mxu0 %v9115_v41  ;;  %v9506_v29 = vsub.s32 0, %v114_v23  ;;  %v9511_v32 = vsub.s32 1, %v114_v23  ;;  %v9519_v38 = vsub.s32 2, %v114_v23  ;;  %v9526_v58 = vsub.s32 3, %v114_v23 }
  0x45   :  { %530 = vmatmul.mubr.f32.vlgmr.msra.gmra.mrb[0].mxu0 %v8846_v3  ;;  %6477 = vmatprep.subr.bf16.mxu1 %v9123_v44 }
  0x46   :  { %601 = vmatmul.mubr.f32.vlgmr.msra.gmra.mrb[0].mxu1 %v8846_v3  ;;  %6447 = vmatpush1.bf16.msra.mxu0 %v9146_v50  ;;  %v9514_v34 = vrot.slane %v111_v31, %v9506_v29  ;;  %v9517_v35 = vrot.slane %v111_v31, %v9511_v32  ;;  %v9524_v52 = vrot.slane %v111_v31, %v9519_v38 }
  0x47   :  { %6479 = vmatpush1.bf16.msra.mxu1 %v9155_v53  ;;  %6449 = vmatprep.subr.bf16.mxu0 %v9169_v57  ;;  %v9530_v56 = vrot.slane %v111_v31, %v9526_v58 }
  0x48   :  { %6481 = vmatprep.subr.bf16.mxu1 %v9182_v60  ;;  %713 = vmatprep.mubr.f32.mxu0 %v8846_v3 }
  0x49   :  { %784 = vmatprep.mubr.f32.mxu1 %v8846_v3 }
  0x4a   :  { %6451 = vmatpush1.bf16.msra.mxu0 %v9192_v63 }
  0x4b   :  { %6483 = vmatpush1.bf16.msra.mxu1 %v9207_v4  ;;  %6453 = vmatprep.subr.bf16.mxu0 %v9221_v7 }
  0x4c   :  { %6485 = vmatprep.subr.bf16.mxu1 %v9231_v10 }
  0x4e   :  { %6455 = vmatpush1.bf16.msra.mxu0 %v9246_v14 }
  0x4f   :  { %6487 = vmatpush1.bf16.msra.mxu1 %v9260_v17  ;;  %6457 = vmatprep.subr.bf16.mxu0 %v9270_v20 }
  0x50   :  { %6489 = vmatprep.subr.bf16.mxu1 %v9285_v24 }
  0x52   :  { %6459 = vmatpush1.bf16.msra.mxu0 %v9299_v27 }
  0x53   :  { %6491 = vmatpush1.bf16.msra.mxu1 %v9309_v30  ;;  %6461 = vmatprep.subr.bf16.mxu0 %v9319_v33 }
  0x54   :  { %6493 = vmatprep.subr.bf16.mxu1 %v9329_v36 }
  0x56   :  { %6463 = vmatpush1.bf16.msra.mxu0 %v9339_v39 }
  0x57   :  { %6495 = vmatpush1.bf16.msra.mxu1 %v9349_v43  ;;  %6465 = vmatprep.subr.bf16.mxu0 %v9359_v47 }
  0x58   :  { %6497 = vmatprep.subr.bf16.mxu1 %v9369_v51 }
  0x5a   :  { %6467 = vmatpush1.bf16.msra.mxu0 %v9379_v55 }
  0x5b   :  { %6499 = vmatpush1.bf16.msra.mxu1 %v9389_v61  ;;  %6469 = vmatprep.subr.bf16.mxu0 %v9399_v0 }
  0x5c   :  { %6501 = vmatprep.subr.bf16.mxu1 %v9409_v6 }
  0x5e   :  { %6471 = vmatpush1.bf16.msra.mxu0 %v9419_v11 }
  0x5f   :  { %6503 = vmatpush1.bf16.msra.mxu1 %v9429_v16  ;;  %6473 = vmatprep.subr.bf16.mxu0 %v9439_v19 }
  0x60   :  { %6505 = vmatprep.subr.bf16.mxu1 %v9449_v25 }
  0x62   :  { %6475 = vmatpush1.bf16.msra.mxu0 %v9453_v26 }
  0x63   :  { %6507 = vmatpush1.bf16.msra.mxu1 %v9457_v28  ;;  %6509 = vmatprep.subr.bf16.mxu0 %v9115_v41 }
  0x64   :  { %6541 = vmatprep.subr.bf16.mxu1 %v9123_v44 }
 0x118   :  { %v531_v37 = vpop.f32.mrb[0].mxu0 }
 0x119   :  { %v8236_v40 = vadd.f32 %v531_v37, %v9514_v34  ;;  %v602_v42 = vpop.f32.mrb[0].mxu1  ;;  %v533_v45 = vpop.f32.mrb[1].mxu0 }
 0x11a   :  { %v8237_v46 = vadd.f32 %v533_v45, %v9517_v35  ;;  %v604_v48 = vpop.f32.mrb[1].mxu1  ;;  %v8252_v59 = vadd.f32 %v602_v42, %v9524_v52 }
 0x11b   :  { %v6093_v49 = vmul.f32 -1.442695, %v8236_v40  ;;  %v8253_v1 = vadd.f32 %v604_v48, %v9530_v56 }
 0x11c   :  { %v6094_v54 = vmul.f32 -1.442695, %v8237_v46  ;;  %v6095_v62 = vmul.f32 -1.442695, %v8252_v59 }
 0x11d   :  { %8461 = vpow2.f32 %v6093_v49 }
 0x11e   :  { %8463 = vpow2.f32 %v6094_v54 }
 0x11f   :  { %8465 = vpow2.f32 %v6095_v62 }
 0x120   :  { %8467 = vtanh.f32 %v8253_v1 }
 0x127   :  { %v8462_v5 = vpop.eup %8461 }
 0x128   :  { %v620_v8 = vadd.f32 1.0, %v8462_v5  ;;  %v8464_v9 = vpop.eup %8463 }
 0x129   :  { %v621_v12 = vadd.f32 1.0, %v8464_v9  ;;  %v8466_v15 = vpop.eup %8465 }
 0x12a   :  { %8469 = vrcp.f32 %v620_v8  ;;  %v8468_v2 = vpop.eup %8467  ;;  %v622_v13 = vadd.f32 1.0, %v8466_v15 }
 0x12b   :  { %8471 = vrcp.f32 %v621_v12 }
 0x12c   :  { %8473 = vrcp.f32 %v622_v13 }
 0x134   :  { %v8470_v18 = vpop.eup %8469 }
 0x135   :  { %v632_v21 = vmul.f32 %v8470_v18, %v8468_v2  ;;  %v8472_v22 = vpop.eup %8471 }
 0x136   :  { %v631_v23 = vmul.f32 0.0, %v8472_v22  ;;  %v8474_v37 = vpop.eup %8473 }
 0x138   :  { %v9533_v31 = vadd.f32 %v632_v21, %v631_v23 }
 0x13a   :  { %8475 = vtanh.f32 %v9533_v31 }
 0x144   :  { %v8476_v40 = vpop.eup %8475 }
 0x145   :  { %v9536_v42 = vmul.f32 %v8476_v40, %v8474_v37 }
 0x147   :  { %640 = vst [vmem:[%s12181_s6 + $0x8] sm:$0xff] %v9536_v42  ;;  %714 = vmatmul.mubr.f32.vlgmr.msra.gmra.mrb[2].mxu0 %v9536_v42  ;;  %785 = vmatmul.mubr.f32.vlgmr.msra.gmra.mrb[2].mxu1 %v9536_v42 }
 0x148   :  { %6511 = vmatpush1.bf16.msra.mxu0 %v9146_v50  ;;  %6543 = vmatpush1.bf16.msra.mxu1 %v9155_v53 }
 0x149   :  { %6513 = vmatprep.subr.bf16.mxu0 %v9169_v57  ;;  %6545 = vmatprep.subr.bf16.mxu1 %v9182_v60 }
 0x14a   :  { %897 = vmatprep.mubr.f32.mxu0 %v8846_v3  ;;  %968 = vmatprep.mubr.f32.mxu1 %v8846_v3 }
 0x14c   :  { %6515 = vmatpush1.bf16.msra.mxu0 %v9192_v63  ;;  %6547 = vmatpush1.bf16.msra.mxu1 %v9207_v4 }
 0x14d   :  { %6517 = vmatprep.subr.bf16.mxu0 %v9221_v7  ;;  %6549 = vmatprep.subr.bf16.mxu1 %v9231_v10 }
 0x150   :  { %6519 = vmatpush1.bf16.msra.mxu0 %v9246_v14  ;;  %6551 = vmatpush1.bf16.msra.mxu1 %v9260_v17 }
 0x151   :  { %6521 = vmatprep.subr.bf16.mxu0 %v9270_v20  ;;  %6553 = vmatprep.subr.bf16.mxu1 %v9285_v24 }
 0x154   :  { %6523 = vmatpush1.bf16.msra.mxu0 %v9299_v27  ;;  %6555 = vmatpush1.bf16.msra.mxu1 %v9309_v30 }
 0x155   :  { %6525 = vmatprep.subr.bf16.mxu0 %v9319_v33  ;;  %6557 = vmatprep.subr.bf16.mxu1 %v9329_v36 }
 0x158   :  { %6527 = vmatpush1.bf16.msra.mxu0 %v9339_v39  ;;  %6559 = vmatpush1.bf16.msra.mxu1 %v9349_v43 }
 0x159   :  { %6529 = vmatprep.subr.bf16.mxu0 %v9359_v47  ;;  %6561 = vmatprep.subr.bf16.mxu1 %v9369_v51 }
 0x15c   :  { %6531 = vmatpush1.bf16.msra.mxu0 %v9379_v55  ;;  %6563 = vmatpush1.bf16.msra.mxu1 %v9389_v61 }
 0x15d   :  { %6533 = vmatprep.subr.bf16.mxu0 %v9399_v0  ;;  %6565 = vmatprep.subr.bf16.mxu1 %v9409_v6 }
 0x160   :  { %6535 = vmatpush1.bf16.msra.mxu0 %v9419_v11  ;;  %6567 = vmatpush1.bf16.msra.mxu1 %v9429_v16 }
 0x161   :  { %6537 = vmatprep.subr.bf16.mxu0 %v9439_v19  ;;  %6569 = vmatprep.subr.bf16.mxu1 %v9449_v25 }
 0x164   :  { %6539 = vmatpush1.bf16.msra.mxu0 %v9453_v26  ;;  %6571 = vmatpush1.bf16.msra.mxu1 %v9457_v28 }
 0x165   :  { %6573 = vmatprep.subr.bf16.mxu0 %v9115_v41  ;;  %6605 = vmatprep.subr.bf16.mxu1 %v9123_v44 }
 0x21a   :  { %v715_v45 = vpop.f32.mrb[2].mxu0  ;;  %v786_v46 = vpop.f32.mrb[2].mxu1 }
 0x21b   :  { %v8238_v48 = vadd.f32 %v715_v45, %v9514_v34  ;;  %v717_v49 = vpop.f32.mrb[3].mxu0  ;;  %v788_v54 = vpop.f32.mrb[3].mxu1  ;;  %v8254_v5 = vadd.f32 %v786_v46, %v9524_v52 }
 0x21c   :  { %v8239_v59 = vadd.f32 %v717_v49, %v9517_v35  ;;  %v8255_v8 = vadd.f32 %v788_v54, %v9530_v56 }
 0x21d   :  { %v6096_v62 = vmul.f32 -1.442695, %v8238_v48  ;;  %v6098_v9 = vmul.f32 -1.442695, %v8254_v5 }
 0x21e   :  { %v6097_v1 = vmul.f32 -1.442695, %v8239_v59 }
 0x21f   :  { %8477 = vpow2.f32 %v6096_v62 }
 0x220   :  { %8479 = vpow2.f32 %v6097_v1 }
 0x221   :  { %8481 = vtanh.f32 %v8255_v8 }
 0x222   :  { %8483 = vpow2.f32 %v6098_v9 }
 0x229   :  { %v8478_v12 = vpop.eup %8477 }
 0x22a   :  { %v804_v15 = vadd.f32 1.0, %v8478_v12  ;;  %v8480_v2 = vpop.eup %8479 }
 0x22b   :  { %v805_v18 = vadd.f32 1.0, %v8480_v2  ;;  %v8482_v21 = vpop.eup %8481 }
 0x22c   :  { %8485 = vrcp.f32 %v804_v15  ;;  %v8484_v22 = vpop.eup %8483 }
 0x22d   :  { %8487 = vrcp.f32 %v805_v18  ;;  %v806_v40 = vadd.f32 1.0, %v8484_v22 }
 0x22f   :  { %8489 = vrcp.f32 %v806_v40 }
 0x236   :  { %v8486_v13 = vpop.eup %8485 }
 0x237   :  { %v816_v23 = vmul.f32 %v8486_v13, %v8482_v21  ;;  %v8488_v37 = vpop.eup %8487 }
 0x238   :  { %v815_v45 = vmul.f32 %v8488_v37, %v9533_v31 }
 0x239   :  { %v8490_v48 = vpop.eup %8489 }
 0x23a   :  { %v9583_v46 = vadd.f32 %v816_v23, %v815_v45 }
 0x23c   :  { %8491 = vtanh.f32 %v9583_v46 }
 0x246   :  { %v8492_v49 = vpop.eup %8491 }
 0x247   :  { %v819_v54 = vmul.f32 %v8492_v49, %v8490_v48 }
 0x249   :  { %6099 = vst [vmem:[%s12181_s6 + $0x28] sm:$0xff] %v819_v54  ;;  %898 = vmatmul.mubr.f32.vlgmr.msra.gmra.mrb[4].mxu0 %v819_v54  ;;  %969 = vmatmul.mubr.f32.vlgmr.msra.gmra.mrb[4].mxu1 %v819_v54 }
 0x24a   :  { %6575 = vmatpush1.bf16.msra.mxu0 %v9146_v50  ;;  %6607 = vmatpush1.bf16.msra.mxu1 %v9155_v53 }
 0x24b   :  { %6577 = vmatprep.subr.bf16.mxu0 %v9169_v57  ;;  %6609 = vmatprep.subr.bf16.mxu1 %v9182_v60 }
 0x24c   :  { %1081 = vmatprep.mubr.f32.mxu0 %v8846_v3  ;;  %1152 = vmatprep.mubr.f32.mxu1 %v8846_v3 }
 0x24e   :  { %6579 = vmatpush1.bf16.msra.mxu0 %v9192_v63  ;;  %6611 = vmatpush1.bf16.msra.mxu1 %v9207_v4 }
 0x24f   :  { %6581 = vmatprep.subr.bf16.mxu0 %v9221_v7  ;;  %6613 = vmatprep.subr.bf16.mxu1 %v9231_v10 }
 0x252   :  { %6583 = vmatpush1.bf16.msra.mxu0 %v9246_v14  ;;  %6615 = vmatpush1.bf16.msra.mxu1 %v9260_v17 }
 0x253   :  { %6585 = vmatprep.subr.bf16.mxu0 %v9270_v20  ;;  %6617 = vmatprep.subr.bf16.mxu1 %v9285_v24 }
 0x256   :  { %6587 = vmatpush1.bf16.msra.mxu0 %v9299_v27  ;;  %6619 = vmatpush1.bf16.msra.mxu1 %v9309_v30 }
 0x257   :  { %6589 = vmatprep.subr.bf16.mxu0 %v9319_v33  ;;  %6621 = vmatprep.subr.bf16.mxu1 %v9329_v36 }
 0x25a   :  { %6591 = vmatpush1.bf16.msra.mxu0 %v9339_v39  ;;  %6623 = vmatpush1.bf16.msra.mxu1 %v9349_v43 }
 0x25b   :  { %6593 = vmatprep.subr.bf16.mxu0 %v9359_v47  ;;  %6625 = vmatprep.subr.bf16.mxu1 %v9369_v51 }
 0x25e   :  { %6595 = vmatpush1.bf16.msra.mxu0 %v9379_v55  ;;  %6627 = vmatpush1.bf16.msra.mxu1 %v9389_v61 }
 0x25f   :  { %6597 = vmatprep.subr.bf16.mxu0 %v9399_v0  ;;  %6629 = vmatprep.subr.bf16.mxu1 %v9409_v6 }
 0x262   :  { %6599 = vmatpush1.bf16.msra.mxu0 %v9419_v11  ;;  %6631 = vmatpush1.bf16.msra.mxu1 %v9429_v16 }
 0x263   :  { %6601 = vmatprep.subr.bf16.mxu0 %v9439_v19  ;;  %6633 = vmatprep.subr.bf16.mxu1 %v9449_v25 }
 0x266   :  { %6603 = vmatpush1.bf16.msra.mxu0 %v9453_v26  ;;  %6635 = vmatpush1.bf16.msra.mxu1 %v9457_v28 }
 0x267   :  { %6637 = vmatprep.subr.bf16.mxu0 %v9115_v41  ;;  %6669 = vmatprep.subr.bf16.mxu1 %v9123_v44 }
 0x31c   :  { %v899_v31 = vpop.f32.mrb[4].mxu0  ;;  %v970_v59 = vpop.f32.mrb[4].mxu1 }
 0x31d   :  { %v8240_v62 = vadd.f32 %v899_v31, %v9514_v34  ;;  %v901_v1 = vpop.f32.mrb[5].mxu0  ;;  %v972_v5 = vpop.f32.mrb[5].mxu1  ;;  %v8256_v15 = vadd.f32 %v970_v59, %v9524_v52 }
 0x31e   :  { %v8241_v8 = vadd.f32 %v901_v1, %v9517_v35  ;;  %v8257_v2 = vadd.f32 %v972_v5, %v9530_v56 }
 0x31f   :  { %v6100_v9 = vmul.f32 -1.442695, %v8240_v62  ;;  %v6102_v18 = vmul.f32 -1.442695, %v8256_v15 }
 0x320   :  { %v6101_v12 = vmul.f32 -1.442695, %v8241_v8 }
 0x321   :  { %8493 = vpow2.f32 %v6100_v9 }
 0x322   :  { %8495 = vpow2.f32 %v6101_v12 }
 0x323   :  { %8497 = vtanh.f32 %v8257_v2 }
 0x324   :  { %8499 = vpow2.f32 %v6102_v18 }
 0x32b   :  { %v8494_v21 = vpop.eup %8493 }
 0x32c   :  { %v988_v22 = vadd.f32 1.0, %v8494_v21  ;;  %v8496_v13 = vpop.eup %8495 }
 0x32d   :  { %v989_v23 = vadd.f32 1.0, %v8496_v13  ;;  %v8498_v37 = vpop.eup %8497 }
 0x32e   :  { %8501 = vrcp.f32 %v988_v22  ;;  %v8500_v40 = vpop.eup %8499 }
 0x32f   :  { %8503 = vrcp.f32 %v989_v23  ;;  %v990_v54 = vadd.f32 1.0, %v8500_v40 }
 0x331   :  { %8505 = vrcp.f32 %v990_v54 }
 0x338   :  { %v8502_v45 = vpop.eup %8501 }
 0x339   :  { %v1000_v48 = vmul.f32 %v8502_v45, %v8498_v37  ;;  %v8504_v49 = vpop.eup %8503 }
 0x33a   :  { %v999_v31 = vmul.f32 %v8504_v49, %v9583_v46 }
 0x33b   :  { %v8506_v62 = vpop.eup %8505 }
 0x33c   :  { %v9628_v59 = vadd.f32 %v1000_v48, %v999_v31 }
 0x33e   :  { %8507 = vtanh.f32 %v9628_v59 }
 0x348   :  { %v8508_v1 = vpop.eup %8507 }
 0x349   :  { %v1003_v5 = vmul.f32 %v8508_v1, %v8506_v62 }
 0x34b   :  { %6103 = vst [vmem:[%s12181_s6 + $0x48] sm:$0xff] %v1003_v5  ;;  %1082 = vmatmul.mubr.f32.vlgmr.msra.gmra.mrb[6].mxu0 %v1003_v5  ;;  %1153 = vmatmul.mubr.f32.vlgmr.msra.gmra.mrb[6].mxu1 %v1003_v5 }
 0x34c   :  { %6639 = vmatpush1.bf16.msra.mxu0 %v9146_v50  ;;  %6671 = vmatpush1.bf16.msra.mxu1 %v9155_v53 }
 0x34d   :  { %6641 = vmatprep.subr.bf16.mxu0 %v9169_v57  ;;  %6673 = vmatprep.subr.bf16.mxu1 %v9182_v60 }
 0x34e   :  { %1265 = vmatprep.mubr.f32.mxu0 %v8846_v3  ;;  %1336 = vmatprep.mubr.f32.mxu1 %v8846_v3 }
 0x350   :  { %6643 = vmatpush1.bf16.msra.mxu0 %v9192_v63  ;;  %6675 = vmatpush1.bf16.msra.mxu1 %v9207_v4 }
 0x351   :  { %6645 = vmatprep.subr.bf16.mxu0 %v9221_v7  ;;  %6677 = vmatprep.subr.bf16.mxu1 %v9231_v10 }
 0x354   :  { %6647 = vmatpush1.bf16.msra.mxu0 %v9246_v14  ;;  %6679 = vmatpush1.bf16.msra.mxu1 %v9260_v17 }
 0x355   :  { %6649 = vmatprep.subr.bf16.mxu0 %v9270_v20  ;;  %6681 = vmatprep.subr.bf16.mxu1 %v9285_v24 }
 0x358   :  { %6651 = vmatpush1.bf16.msra.mxu0 %v9299_v27  ;;  %6683 = vmatpush1.bf16.msra.mxu1 %v9309_v30 }
 0x359   :  { %6653 = vmatprep.subr.bf16.mxu0 %v9319_v33  ;;  %6685 = vmatprep.subr.bf16.mxu1 %v9329_v36 }
 0x35c   :  { %6655 = vmatpush1.bf16.msra.mxu0 %v9339_v39  ;;  %6687 = vmatpush1.bf16.msra.mxu1 %v9349_v43 }
 0x35d   :  { %6657 = vmatprep.subr.bf16.mxu0 %v9359_v47  ;;  %6689 = vmatprep.subr.bf16.mxu1 %v9369_v51 }
 0x360   :  { %6659 = vmatpush1.bf16.msra.mxu0 %v9379_v55  ;;  %6691 = vmatpush1.bf16.msra.mxu1 %v9389_v61 }
 0x361   :  { %6661 = vmatprep.subr.bf16.mxu0 %v9399_v0  ;;  %6693 = vmatprep.subr.bf16.mxu1 %v9409_v6 }
 0x364   :  { %6663 = vmatpush1.bf16.msra.mxu0 %v9419_v11  ;;  %6695 = vmatpush1.bf16.msra.mxu1 %v9429_v16 }
 0x365   :  { %6665 = vmatprep.subr.bf16.mxu0 %v9439_v19  ;;  %6697 = vmatprep.subr.bf16.mxu1 %v9449_v25 }
 0x368   :  { %6667 = vmatpush1.bf16.msra.mxu0 %v9453_v26  ;;  %6699 = vmatpush1.bf16.msra.mxu1 %v9457_v28 }
 0x369   :  { %6701 = vmatprep.subr.bf16.mxu0 %v9115_v41  ;;  %6733 = vmatprep.subr.bf16.mxu1 %v9123_v44 }
 0x41e   :  { %v1083_v46 = vpop.f32.mrb[6].mxu0  ;;  %v1154_v8 = vpop.f32.mrb[6].mxu1 }
 0x41f   :  { %v8242_v9 = vadd.f32 %v1083_v46, %v9514_v34  ;;  %v1085_v12 = vpop.f32.mrb[7].mxu0  ;;  %v1156_v15 = vpop.f32.mrb[7].mxu1  ;;  %v8258_v22 = vadd.f32 %v1154_v8, %v9524_v52 }
 0x420   :  { %v8243_v2 = vadd.f32 %v1085_v12, %v9517_v35  ;;  %v8259_v13 = vadd.f32 %v1156_v15, %v9530_v56 }
 0x421   :  { %v6104_v18 = vmul.f32 -1.442695, %v8242_v9  ;;  %v6106_v23 = vmul.f32 -1.442695, %v8258_v22 }
 0x422   :  { %v6105_v21 = vmul.f32 -1.442695, %v8243_v2 }
 0x423   :  { %8509 = vpow2.f32 %v6104_v18 }
 0x424   :  { %8511 = vpow2.f32 %v6105_v21 }
 0x425   :  { %8513 = vtanh.f32 %v8259_v13 }
 0x426   :  { %8515 = vpow2.f32 %v6106_v23 }
 0x42d   :  { %v8510_v37 = vpop.eup %8509 }
 0x42e   :  { %v1172_v40 = vadd.f32 1.0, %v8510_v37  ;;  %v8512_v45 = vpop.eup %8511 }
 0x42f   :  { %v1173_v48 = vadd.f32 1.0, %v8512_v45  ;;  %v8514_v49 = vpop.eup %8513 }
 0x430   :  { %8517 = vrcp.f32 %v1172_v40  ;;  %v8516_v54 = vpop.eup %8515 }
 0x431   :  { %8519 = vrcp.f32 %v1173_v48  ;;  %v1174_v5 = vadd.f32 1.0, %v8516_v54 }
 0x433   :  { %8521 = vrcp.f32 %v1174_v5 }
 0x43a   :  { %v8518_v31 = vpop.eup %8517 }
 0x43b   :  { %v1184_v62 = vmul.f32 %v8518_v31, %v8514_v49  ;;  %v8520_v1 = vpop.eup %8519 }
 0x43c   :  { %v1183_v46 = vmul.f32 %v8520_v1, %v9628_v59 }
 0x43d   :  { %v8522_v9 = vpop.eup %8521 }
 0x43e   :  { %v9673_v8 = vadd.f32 %v1184_v62, %v1183_v46 }
 0x440   :  { %8523 = vtanh.f32 %v9673_v8 }
 0x44a   :  { %v8524_v12 = vpop.eup %8523 }
 0x44b   :  { %v9676_v15 = vmul.f32 %v8524_v12, %v8522_v9 }
 0x44d   :  { %6107 = vst [vmem:[%s12181_s6 + $0x68] sm:$0xff] %v9676_v15  ;;  %1266 = vmatmul.mubr.f32.vlgmr.msra.gmra.mrb[8].mxu0 %v9676_v15  ;;  %1337 = vmatmul.mubr.f32.vlgmr.msra.gmra.mrb[8].mxu1 %v9676_v15 }
 0x44e   :  { %6703 = vmatpush1.bf16.msra.mxu0 %v9146_v50  ;;  %6735 = vmatpush1.bf16.msra.mxu1 %v9155_v53 }
 0x44f   :  { %6705 = vmatprep.subr.bf16.mxu0 %v9169_v57  ;;  %6737 = vmatprep.subr.bf16.mxu1 %v9182_v60 }
 0x450   :  { %1449 = vmatprep.mubr.f32.mxu0 %v8846_v3  ;;  %1520 = vmatprep.mubr.f32.mxu1 %v8846_v3 }
 0x452   :  { %6707 = vmatpush1.bf16.msra.mxu0 %v9192_v63  ;;  %6739 = vmatpush1.bf16.msra.mxu1 %v9207_v4 }
 0x453   :  { %6709 = vmatprep.subr.bf16.mxu0 %v9221_v7  ;;  %6741 = vmatprep.subr.bf16.mxu1 %v9231_v10 }
 0x456   :  { %6711 = vmatpush1.bf16.msra.mxu0 %v9246_v14  ;;  %6743 = vmatpush1.bf16.msra.mxu1 %v9260_v17 }
 0x457   :  { %6713 = vmatprep.subr.bf16.mxu0 %v9270_v20  ;;  %6745 = vmatprep.subr.bf16.mxu1 %v9285_v24 }
 0x45a   :  { %6715 = vmatpush1.bf16.msra.mxu0 %v9299_v27  ;;  %6747 = vmatpush1.bf16.msra.mxu1 %v9309_v30 }
 0x45b   :  { %6717 = vmatprep.subr.bf16.mxu0 %v9319_v33  ;;  %6749 = vmatprep.subr.bf16.mxu1 %v9329_v36 }
 0x45e   :  { %6719 = vmatpush1.bf16.msra.mxu0 %v9339_v39  ;;  %6751 = vmatpush1.bf16.msra.mxu1 %v9349_v43 }
 0x45f   :  { %6721 = vmatprep.subr.bf16.mxu0 %v9359_v47  ;;  %6753 = vmatprep.subr.bf16.mxu1 %v9369_v51 }
 0x462   :  { %6723 = vmatpush1.bf16.msra.mxu0 %v9379_v55  ;;  %6755 = vmatpush1.bf16.msra.mxu1 %v9389_v61 }
 0x463   :  { %6725 = vmatprep.subr.bf16.mxu0 %v9399_v0  ;;  %6757 = vmatprep.subr.bf16.mxu1 %v9409_v6 }
 0x466   :  { %6727 = vmatpush1.bf16.msra.mxu0 %v9419_v11  ;;  %6759 = vmatpush1.bf16.msra.mxu1 %v9429_v16 }
 0x467   :  { %6729 = vmatprep.subr.bf16.mxu0 %v9439_v19  ;;  %6761 = vmatprep.subr.bf16.mxu1 %v9449_v25 }
 0x46a   :  { %6731 = vmatpush1.bf16.msra.mxu0 %v9453_v26  ;;  %6763 = vmatpush1.bf16.msra.mxu1 %v9457_v28 }
 0x46b   :  { %6765 = vmatprep.subr.bf16.mxu0 %v9115_v41  ;;  %6797 = vmatprep.subr.bf16.mxu1 %v9123_v44 }
 0x520   :  { %v1267_v59 = vpop.f32.mrb[8].mxu0  ;;  %v1338_v2 = vpop.f32.mrb[8].mxu1 }
 0x521   :  { %v8244_v18 = vadd.f32 %v1267_v59, %v9514_v34  ;;  %v1269_v21 = vpop.f32.mrb[9].mxu0  ;;  %v1340_v22 = vpop.f32.mrb[9].mxu1  ;;  %v8260_v40 = vadd.f32 %v1338_v2, %v9524_v52 }
 0x522   :  { %v8245_v13 = vadd.f32 %v1269_v21, %v9517_v35  ;;  %v8261_v45 = vadd.f32 %v1340_v22, %v9530_v56 }
 0x523   :  { %v6108_v23 = vmul.f32 -1.442695, %v8244_v18  ;;  %v6110_v48 = vmul.f32 -1.442695, %v8260_v40 }
 0x524   :  { %v6109_v37 = vmul.f32 -1.442695, %v8245_v13 }
 0x525   :  { %8525 = vpow2.f32 %v6108_v23 }
 0x526   :  { %8527 = vpow2.f32 %v6109_v37 }
 0x527   :  { %8529 = vtanh.f32 %v8261_v45 }
 0x528   :  { %8531 = vpow2.f32 %v6110_v48 }
 0x52f   :  { %v8526_v49 = vpop.eup %8525 }
 0x530   :  { %v1356_v54 = vadd.f32 1.0, %v8526_v49  ;;  %v8528_v31 = vpop.eup %8527 }
 0x531   :  { %v1357_v62 = vadd.f32 1.0, %v8528_v31  ;;  %v8530_v1 = vpop.eup %8529 }
 0x532   :  { %8533 = vrcp.f32 %v1356_v54  ;;  %v8532_v5 = vpop.eup %8531 }
 0x533   :  { %8535 = vrcp.f32 %v1357_v62  ;;  %v1358_v59 = vadd.f32 1.0, %v8532_v5 }
 0x535   :  { %8537 = vrcp.f32 %v1358_v59 }
 0x53c   :  { %v8534_v46 = vpop.eup %8533 }
 0x53d   :  { %v1368_v9 = vmul.f32 %v8534_v46, %v8530_v1  ;;  %v8536_v12 = vpop.eup %8535 }
 0x53e   :  { %v1367_v18 = vmul.f32 %v8536_v12, %v9673_v8 }
 0x53f   :  { %v8538_v21 = vpop.eup %8537 }
 0x540   :  { %v9723_v2 = vadd.f32 %v1368_v9, %v1367_v18 }
 0x542   :  { %8539 = vtanh.f32 %v9723_v2 }
 0x54c   :  { %v8540_v22 = vpop.eup %8539 }
 0x54d   :  { %v9726_v13 = vmul.f32 %v8540_v22, %v8538_v21 }
 0x54f   :  { %6111 = vst [vmem:[%s12181_s6 + $0x88] sm:$0xff] %v9726_v13  ;;  %1450 = vmatmul.mubr.f32.vlgmr.msra.gmra.mrb[10].mxu0 %v9726_v13  ;;  %1521 = vmatmul.mubr.f32.vlgmr.msra.gmra.mrb[10].mxu1 %v9726_v13 }
 0x550   :  { %6767 = vmatpush1.bf16.msra.mxu0 %v9146_v50  ;;  %6799 = vmatpush1.bf16.msra.mxu1 %v9155_v53 }
 0x551   :  { %6769 = vmatprep.subr.bf16.mxu0 %v9169_v57  ;;  %6801 = vmatprep.subr.bf16.mxu1 %v9182_v60 }
 0x552   :  { %1633 = vmatprep.mubr.f32.mxu0 %v8846_v3  ;;  %1704 = vmatprep.mubr.f32.mxu1 %v8846_v3 }
 0x554   :  { %6771 = vmatpush1.bf16.msra.mxu0 %v9192_v63  ;;  %6803 = vmatpush1.bf16.msra.mxu1 %v9207_v4 }
 0x555   :  { %6773 = vmatprep.subr.bf16.mxu0 %v9221_v7  ;;  %6805 = vmatprep.subr.bf16.mxu1 %v9231_v10 }
 0x558   :  { %6775 = vmatpush1.bf16.msra.mxu0 %v9246_v14  ;;  %6807 = vmatpush1.bf16.msra.mxu1 %v9260_v17 }
 0x559   :  { %6777 = vmatprep.subr.bf16.mxu0 %v9270_v20  ;;  %6809 = vmatprep.subr.bf16.mxu1 %v9285_v24 }
 0x55c   :  { %6779 = vmatpush1.bf16.msra.mxu0 %v9299_v27  ;;  %6811 = vmatpush1.bf16.msra.mxu1 %v9309_v30 }
 0x55d   :  { %6781 = vmatprep.subr.bf16.mxu0 %v9319_v33  ;;  %6813 = vmatprep.subr.bf16.mxu1 %v9329_v36 }
 0x560   :  { %6783 = vmatpush1.bf16.msra.mxu0 %v9339_v39  ;;  %6815 = vmatpush1.bf16.msra.mxu1 %v9349_v43 }
 0x561   :  { %6785 = vmatprep.subr.bf16.mxu0 %v9359_v47  ;;  %6817 = vmatprep.subr.bf16.mxu1 %v9369_v51 }
 0x564   :  { %6787 = vmatpush1.bf16.msra.mxu0 %v9379_v55  ;;  %6819 = vmatpush1.bf16.msra.mxu1 %v9389_v61 }
 0x565   :  { %6789 = vmatprep.subr.bf16.mxu0 %v9399_v0  ;;  %6821 = vmatprep.subr.bf16.mxu1 %v9409_v6 }
 0x568   :  { %6791 = vmatpush1.bf16.msra.mxu0 %v9419_v11  ;;  %6823 = vmatpush1.bf16.msra.mxu1 %v9429_v16 }
 0x569   :  { %6793 = vmatprep.subr.bf16.mxu0 %v9439_v19  ;;  %6825 = vmatprep.subr.bf16.mxu1 %v9449_v25 }
 0x56c   :  { %6795 = vmatpush1.bf16.msra.mxu0 %v9453_v26  ;;  %6827 = vmatpush1.bf16.msra.mxu1 %v9457_v28 }
 0x56d   :  { %6829 = vmatprep.subr.bf16.mxu0 %v9115_v41  ;;  %6861 = vmatprep.subr.bf16.mxu1 %v9123_v44 }
 0x622   :  { %v1451_v8 = vpop.f32.mrb[10].mxu0  ;;  %v1522_v23 = vpop.f32.mrb[10].mxu1 }
 0x623   :  { %v8246_v37 = vadd.f32 %v1451_v8, %v9514_v34  ;;  %v1453_v40 = vpop.f32.mrb[11].mxu0  ;;  %v1524_v45 = vpop.f32.mrb[11].mxu1  ;;  %v8262_v31 = vadd.f32 %v1522_v23, %v9524_v52 }
 0x624   :  { %v8247_v48 = vadd.f32 %v1453_v40, %v9517_v35  ;;  %v8263_v62 = vadd.f32 %v1524_v45, %v9530_v56 }
 0x625   :  { %v6112_v49 = vmul.f32 -1.442695, %v8246_v37  ;;  %v6114_v1 = vmul.f32 -1.442695, %v8262_v31 }
 0x626   :  { %v6113_v54 = vmul.f32 -1.442695, %v8247_v48  ;;  %v1947_v48 = vld [vmem:[%s12184_s2 + $0x10] sm:$0xff] }
 0x627   :  { %8541 = vpow2.f32 %v6112_v49  ;;  %v1951_v49 = vld [vmem:[%s12184_s2 + $0x30] sm:$0xff] }
 0x628   :  { %8543 = vpow2.f32 %v6113_v54  ;;  %v1954_v54 = vld [vmem:[%s12184_s2 + $0x48] sm:$0xff] }
 0x629   :  { %8545 = vtanh.f32 %v8263_v62  ;;  %v1958_v62 = vld [vmem:[%s12184_s2 + $0x68] sm:$0xff] }
 0x62a   :  { %8547 = vpow2.f32 %v6114_v1  ;;  %v1956_v1 = vld [vmem:[%s12184_s2 + $0x58] sm:$0xff] }
 0x631   :  { %v8542_v41 = vpop.eup %8541 }
 0x632   :  { %v1540_v5 = vadd.f32 1.0, %v8542_v41  ;;  %v8544_v44 = vpop.eup %8543  ;;  %v1960_v41 = vld [vmem:[%s12184_s2 + $0x78] sm:$0xff] }
 0x633   :  { %v1541_v46 = vadd.f32 1.0, %v8544_v44  ;;  %v8546_v9 = vpop.eup %8545 }
 0x634   :  { %8549 = vrcp.f32 %v1540_v5  ;;  %v8548_v12 = vpop.eup %8547 }
 0x635   :  { %8551 = vrcp.f32 %v1541_v46  ;;  %v1542_v22 = vadd.f32 1.0, %v8548_v12  ;;  %v6958_v46 = vpack.c.bf16 %v1951_v49, %v1947_v48  ;;  %v1957_v12 = vld [vmem:[%s12184_s2 + $0x60] sm:$0xff]  ;;  %v1979_v48 = vld [vmem:[%s12184_s2 + $0x110] sm:$0xff] }
 0x636   :  { %v1983_v49 = vld [vmem:[%s12184_s2 + $0x130] sm:$0xff] }
 0x637   :  { %8553 = vrcp.f32 %v1542_v22  ;;  %v1962_v22 = vld [vmem:[%s12184_s2 + $0x88] sm:$0xff] }
 0x63e   :  { %v8550_v59 = vpop.eup %8549 }
 0x63f   :  { %v1552_v18 = vmul.f32 %v8550_v59, %v8546_v9  ;;  %v8552_v21 = vpop.eup %8551  ;;  %v1953_v9 = vld [vmem:[%s12184_s2 + $0x40] sm:$0xff] }
 0x640   :  { %v1551_v8 = vmul.f32 %v8552_v21, %v9723_v2  ;;  %v1949_v2 = vld [vmem:[%s12184_s2 + $0x20] sm:$0xff]  ;;  %v1959_v21 = vld [vmem:[%s12184_s2 + $0x70] sm:$0xff] }
 0x641   :  { %v8554_v37 = vpop.eup %8553 }
 0x642   :  { %v9773_v23 = vadd.f32 %v1552_v18, %v1551_v8  ;;  %v1955_v18 = vld [vmem:[%s12184_s2 + $0x50] sm:$0xff]  ;;  %v6896_v8 = vpack.c.bf16 %v1958_v62, %v1954_v54  ;;  %v1986_v54 = vld [vmem:[%s12184_s2 + $0x148] sm:$0xff]  ;;  %v1988_v62 = vld [vmem:[%s12184_s2 + $0x158] sm:$0xff] }
 0x644   :  { %8555 = vtanh.f32 %v9773_v23 }
 0x64e   :  { %v8556_v40 = vpop.eup %8555 }
 0x64f   :  { %v9776_v45 = vmul.f32 %v8556_v40, %v8554_v37  ;;  %v1966_v37 = vld [vmem:[%s12184_s2 + $0xa8] sm:$0xff]  ;;  %v1964_v40 = vld [vmem:[%s12184_s2 + $0x98] sm:$0xff] }
 0x651   :  { %6115 = vst [vmem:[%s12181_s6 + $0xa8] sm:$0xff] %v9776_v45  ;;  %1634 = vmatmul.mubr.f32.vlgmr.msra.gmra.mrb[12].mxu0 %v9776_v45  ;;  %1705 = vmatmul.mubr.f32.vlgmr.msra.gmra.mrb[12].mxu1 %v9776_v45 }
 0x652   :  { %6831 = vmatpush1.bf16.msra.mxu0 %v9146_v50  ;;  %6863 = vmatpush1.bf16.msra.mxu1 %v9155_v53  ;;  %v1946_v50 = vld [vmem:[%s12184_s2 + $0x8] sm:$0xff] }
 0x653   :  { %6833 = vmatprep.subr.bf16.mxu0 %v9169_v57  ;;  %6865 = vmatprep.subr.bf16.mxu1 %v9182_v60  ;;  %v1950_v53 = vld [vmem:[%s12184_s2 + $0x28] sm:$0xff]  ;;  %v1948_v57 = vld [vmem:[%s12184_s2 + $0x18] sm:$0xff] }
 0x654   :  { %1817 = vmatprep.mubr.f32.mxu0 %v8846_v3  ;;  %1888 = vmatprep.mubr.f32.mxu1 %v8846_v3  ;;  %v6892_v60 = vpack.c.bf16 %v1950_v53, %v1946_v50  ;;  %v1968_v50 = vld [vmem:[%s12184_s2 + $0xb8] sm:$0xff]  ;;  %v6898_v53 = vpack.c.bf16 %v1957_v12, %v1953_v9 }
 0x656   :  { %6835 = vmatpush1.bf16.msra.mxu0 %v9192_v63  ;;  %6867 = vmatpush1.bf16.msra.mxu1 %v9207_v4  ;;  %v1952_v63 = vld [vmem:[%s12184_s2 + $0x38] sm:$0xff] }
 0x657   :  { %6837 = vmatprep.subr.bf16.mxu0 %v9221_v7  ;;  %6869 = vmatprep.subr.bf16.mxu1 %v9231_v10  ;;  %v6956_v4 = vpack.c.bf16 %v1952_v63, %v1948_v57  ;;  %v6962_v57 = vpack.c.bf16 %v1959_v21, %v1955_v18  ;;  %v1965_v63 = vld [vmem:[%s12184_s2 + $0xa0] sm:$0xff]  ;;  %v1987_v18 = vld [vmem:[%s12184_s2 + $0x150] sm:$0xff] }
 0x658   :  { %v1991_v21 = vld [vmem:[%s12184_s2 + $0x170] sm:$0xff] }
 0x65a   :  { %6839 = vmatpush1.bf16.msra.mxu0 %v9246_v14  ;;  %6871 = vmatpush1.bf16.msra.mxu1 %v9260_v17 }
 0x65b   :  { %6841 = vmatprep.subr.bf16.mxu0 %v9270_v20  ;;  %6873 = vmatprep.subr.bf16.mxu1 %v9285_v24 }
 0x65e   :  { %6843 = vmatpush1.bf16.msra.mxu0 %v9299_v27  ;;  %6875 = vmatpush1.bf16.msra.mxu1 %v9309_v30 }
 0x65f   :  { %6845 = vmatprep.subr.bf16.mxu0 %v9319_v33  ;;  %6877 = vmatprep.subr.bf16.mxu1 %v9329_v36 }
 0x662   :  { %6847 = vmatpush1.bf16.msra.mxu0 %v9339_v39  ;;  %6879 = vmatpush1.bf16.msra.mxu1 %v9349_v43 }
 0x663   :  { %6849 = vmatprep.subr.bf16.mxu0 %v9359_v47  ;;  %6881 = vmatprep.subr.bf16.mxu1 %v9369_v51 }
 0x666   :  { %6851 = vmatpush1.bf16.msra.mxu0 %v9379_v55  ;;  %6883 = vmatpush1.bf16.msra.mxu1 %v9389_v61 }
 0x667   :  { %6853 = vmatprep.subr.bf16.mxu0 %v9399_v0  ;;  %6885 = vmatprep.subr.bf16.mxu1 %v9409_v6 }
 0x66a   :  { %6855 = vmatpush1.bf16.msra.mxu0 %v9419_v11  ;;  %6887 = vmatpush1.bf16.msra.mxu1 %v9429_v16 }
 0x66b   :  { %6857 = vmatprep.subr.bf16.mxu0 %v9439_v19  ;;  %6889 = vmatprep.subr.bf16.mxu1 %v9449_v25 }
 0x66e   :  { %6859 = vmatpush1.bf16.msra.mxu0 %v9453_v26  ;;  %6891 = vmatpush1.bf16.msra.mxu1 %v9457_v28  ;;  %v1945_v28 = vld [vmem:[%s12184_s2] sm:$0xff] }
 0x66f   :  { %6893 = vmatprep.subr.bf16.mxu0 %v6892_v60  ;;  %6957 = vmatprep.subr.bf16.mxu1 %v6956_v4  ;;  %v6894_v44 = vpack.c.bf16 %v1949_v2, %v1945_v28  ;;  %v1961_v60 = vld [vmem:[%s12184_s2 + $0x80] sm:$0xff]  ;;  %v6900_v4 = vpack.c.bf16 %v1966_v37, %v1962_v22  ;;  %v1994_v22 = vld [vmem:[%s12184_s2 + $0x188] sm:$0xff]  ;;  %v2000_v37 = vld [vmem:[%s12184_s2 + $0x1b8] sm:$0xff] }
 0x724   :  { %v1635_v7 = vpop.f32.mrb[12].mxu0  ;;  %v1706_v10 = vpop.f32.mrb[12].mxu1 }
 0x725   :  { %v8248_v14 = vadd.f32 %v1635_v7, %v9514_v34  ;;  %v1637_v17 = vpop.f32.mrb[13].mxu0  ;;  %v1708_v20 = vpop.f32.mrb[13].mxu1  ;;  %v8264_v33 = vadd.f32 %v1706_v10, %v9524_v52  ;;  %v6964_v7 = vpack.c.bf16 %v1968_v50, %v1964_v40  ;;  %v1963_v10 = vld [vmem:[%s12184_s2 + $0x90] sm:$0xff]  ;;  %v6978_v50 = vpack.c.bf16 %v1991_v21, %v1987_v18  ;;  %v2026_v18 = vld [vmem:[%s12184_s2 + $0x288] sm:$0xff] }
 0x726   :  { %v8249_v24 = vadd.f32 %v1637_v17, %v9517_v35  ;;  %v8265_v36 = vadd.f32 %v1708_v20, %v9530_v56  ;;  %v1970_v17 = vld [vmem:[%s12184_s2 + $0xc8] sm:$0xff]  ;;  %v1972_v20 = vld [vmem:[%s12184_s2 + $0xd8] sm:$0xff] }
 0x727   :  { %v6116_v27 = vmul.f32 -1.442695, %v8248_v14  ;;  %v6118_v39 = vmul.f32 -1.442695, %v8264_v33  ;;  %v1967_v14 = vld [vmem:[%s12184_s2 + $0xb0] sm:$0xff]  ;;  %v1969_v33 = vld [vmem:[%s12184_s2 + $0xc0] sm:$0xff] }
 0x728   :  { %v6117_v30 = vmul.f32 -1.442695, %v8249_v24  ;;  %v1976_v24 = vld [vmem:[%s12184_s2 + $0xf8] sm:$0xff]  ;;  %v2030_v21 = vld [vmem:[%s12184_s2 + $0x2a8] sm:$0xff] }
 0x729   :  { %8557 = vpow2.f32 %v6116_v27  ;;  %v6902_v27 = vpack.c.bf16 %v1965_v63, %v1961_v60 }
 0x72a   :  { %8559 = vpow2.f32 %v6117_v30  ;;  %v6966_v30 = vpack.c.bf16 %v1967_v14, %v1963_v10  ;;  %v2002_v10 = vld [vmem:[%s12184_s2 + $0x1c8] sm:$0xff] }
 0x72b   :  { %8561 = vtanh.f32 %v8265_v36  ;;  %v1973_v36 = vld [vmem:[%s12184_s2 + $0xe0] sm:$0xff]  ;;  %v2006_v14 = vld [vmem:[%s12184_s2 + $0x1e8] sm:$0xff] }
 0x72c   :  { %8563 = vpow2.f32 %v6118_v39 }
 0x733   :  { %v8558_v43 = vpop.eup %8557 }
 0x734   :  { %v1724_v47 = vadd.f32 1.0, %v8558_v43  ;;  %v8560_v51 = vpop.eup %8559  ;;  %v6968_v43 = vpack.c.bf16 %v1976_v24, %v1972_v20 }
 0x735   :  { %v1725_v55 = vadd.f32 1.0, %v8560_v51  ;;  %v8562_v61 = vpop.eup %8561  ;;  %v1975_v51 = vld [vmem:[%s12184_s2 + $0xf0] sm:$0xff] }
 0x736   :  { %8565 = vrcp.f32 %v1724_v47  ;;  %v8564_v0 = vpop.eup %8563  ;;  %v1971_v47 = vld [vmem:[%s12184_s2 + $0xd0] sm:$0xff] }
 0x737   :  { %8567 = vrcp.f32 %v1725_v55  ;;  %v1726_v19 = vadd.f32 1.0, %v8564_v0  ;;  %v1978_v55 = vld [vmem:[%s12184_s2 + $0x108] sm:$0xff]  ;;  %v1980_v0 = vld [vmem:[%s12184_s2 + $0x118] sm:$0xff] }
 0x739   :  { %8569 = vrcp.f32 %v1726_v19  ;;  %v1977_v19 = vld [vmem:[%s12184_s2 + $0x100] sm:$0xff] }
 0x740   :  { %v8566_v6 = vpop.eup %8565 }
 0x741   :  { %v1736_v11 = vmul.f32 %v8566_v6, %v8562_v61  ;;  %v8568_v16 = vpop.eup %8567  ;;  %v1982_v61 = vld [vmem:[%s12184_s2 + $0x128] sm:$0xff]  ;;  %v1984_v6 = vld [vmem:[%s12184_s2 + $0x138] sm:$0xff] }
 0x742   :  { %v1735_v25 = vmul.f32 %v8568_v16, %v9773_v23  ;;  %v6960_v23 = vpack.c.bf16 %v1960_v41, %v1956_v1  ;;  %v6970_v16 = vpack.c.bf16 %v1975_v51, %v1971_v47  ;;  %v6908_v28 = vpack.c.bf16 %v1982_v61, %v1978_v55  ;;  %v1992_v1 = vld [vmem:[%s12184_s2 + $0x178] sm:$0xff]  ;;  %v2010_v47 = vld [vmem:[%s12184_s2 + $0x208] sm:$0xff] }
 0x743   :  { %v8570_v31 = vpop.eup %8569  ;;  %v6972_v2 = vpack.c.bf16 %v1984_v6, %v1980_v0  ;;  %v6976_v12 = vpack.c.bf16 %v1992_v1, %v1988_v62  ;;  %v2014_v51 = vld [vmem:[%s12184_s2 + $0x228] sm:$0xff]  ;;  %v2012_v55 = vld [vmem:[%s12184_s2 + $0x218] sm:$0xff] }
 0x744   :  { %v9833_v26 = vadd.f32 %v1736_v11, %v1735_v25  ;;  %v6906_v11 = vpack.c.bf16 %v1973_v36, %v1969_v33  ;;  %v1981_v25 = vld [vmem:[%s12184_s2 + $0x120] sm:$0xff]  ;;  %v6920_v33 = vpack.c.bf16 %v2006_v14, %v2002_v10  ;;  %v2016_v61 = vld [vmem:[%s12184_s2 + $0x238] sm:$0xff] }
 0x745   :  { %v6910_v41 = vpack.c.bf16 %v1981_v25, %v1977_v19  ;;  %v6924_v19 = vpack.c.bf16 %v2014_v51, %v2010_v47  ;;  %v6988_v25 = vpack.c.bf16 %v2016_v61, %v2012_v55  ;;  %v2036_v10 = vld [vmem:[%s12184_s2 + $0x2d8] sm:$0xff] }
 0x746   :  { %8571 = vtanh.f32 %v9833_v26  ;;  %v2040_v14 = vld [vmem:[%s12184_s2 + $0x2f8] sm:$0xff] }
 0x747   :  { %v2044_v47 = vld [vmem:[%s12184_s2 + $0x318] sm:$0xff] }
 0x748   :  { %v2048_v51 = vld [vmem:[%s12184_s2 + $0x338] sm:$0xff] }
 0x750   :  { %v8572_v5 = vpop.eup %8571 }
 0x751   :  { %v9866_v59 = vmul.f32 %v8572_v5, %v8570_v31  ;;  %v1990_v31 = vld [vmem:[%s12184_s2 + $0x168] sm:$0xff]  ;;  %v6974_v5 = vpack.c.bf16 %v1983_v49, %v1979_v48 }
 0x752   :  { %v6912_v9 = vpack.c.bf16 %v1990_v31, %v1986_v54  ;;  %v2018_v48 = vld [vmem:[%s12184_s2 + $0x248] sm:$0xff]  ;;  %v2020_v54 = vld [vmem:[%s12184_s2 + $0x258] sm:$0xff] }
 0x753   :  { %6119 = vst [vmem:[%s12181_s6 + $0xc8] sm:$0xff] %v9866_v59  ;;  %1818 = vmatmul.mubr.f32.vlgmr.msra.gmra.mrb[14].mxu0 %v9866_v59  ;;  %1889 = vmatmul.mubr.f32.vlgmr.msra.gmra.mrb[14].mxu1 %v9866_v59  ;;  %v2022_v49 = vld [vmem:[%s12184_s2 + $0x268] sm:$0xff]  ;;  %v2024_v31 = vld [vmem:[%s12184_s2 + $0x278] sm:$0xff] }
 0x754   :  { %6895 = vmatpush1.bf16.msra.mxu0 %v6894_v44  ;;  %6959 = vmatpush1.bf16.msra.mxu1 %v6958_v46  ;;  %v1985_v44 = vld [vmem:[%s12184_s2 + $0x140] sm:$0xff] }
 0x755   :  { %2160 = vmatprep.mubr.f32.mxu0 %v9536_v42  ;;  %2273 = vmatprep.mubr.f32.mxu1 %v9536_v42  ;;  %v1974_v42 = vld [vmem:[%s12184_s2 + $0xe8] sm:$0xff]  ;;  %v1989_v46 = vld [vmem:[%s12184_s2 + $0x160] sm:$0xff] }
 0x756   :  { %6897 = vmatprep.subr.bf16.mxu0 %v6896_v8  ;;  %6961 = vmatprep.subr.bf16.mxu1 %v6960_v23  ;;  %v6904_v39 = vpack.c.bf16 %v1974_v42, %v1970_v17  ;;  %v1998_v8 = vld [vmem:[%s12184_s2 + $0x1a8] sm:$0xff]  ;;  %v1996_v23 = vld [vmem:[%s12184_s2 + $0x198] sm:$0xff]  ;;  %v6914_v40 = vpack.c.bf16 %v1989_v46, %v1985_v44  ;;  %v6928_v44 = vpack.c.bf16 %v2022_v49, %v2018_v48 }
 0x757   :  { %v6916_v60 = vpack.c.bf16 %v1998_v8, %v1994_v22  ;;  %v6980_v63 = vpack.c.bf16 %v2000_v37, %v1996_v23  ;;  %v2004_v17 = vld [vmem:[%s12184_s2 + $0x1d8] sm:$0xff]  ;;  %v6992_v46 = vpack.c.bf16 %v2024_v31, %v2020_v54 }
 0x758   :  { %6899 = vmatpush1.bf16.msra.mxu0 %v6898_v53  ;;  %6963 = vmatpush1.bf16.msra.mxu1 %v6962_v57  ;;  %v1993_v53 = vld [vmem:[%s12184_s2 + $0x180] sm:$0xff]  ;;  %v2008_v42 = vld [vmem:[%s12184_s2 + $0x1f8] sm:$0xff] }
 0x759   :  { %6901 = vmatprep.subr.bf16.mxu0 %v6900_v4  ;;  %6965 = vmatprep.subr.bf16.mxu1 %v6964_v7  ;;  %v1997_v57 = vld [vmem:[%s12184_s2 + $0x1a0] sm:$0xff]  ;;  %v1995_v4 = vld [vmem:[%s12184_s2 + $0x190] sm:$0xff]  ;;  %v6984_v36 = vpack.c.bf16 %v2008_v42, %v2004_v17  ;;  %v2028_v22 = vld [vmem:[%s12184_s2 + $0x298] sm:$0xff] }
 0x75a   :  { %v1999_v7 = vld [vmem:[%s12184_s2 + $0x1b0] sm:$0xff]  ;;  %v6918_v20 = vpack.c.bf16 %v1997_v57, %v1993_v53  ;;  %v2032_v8 = vld [vmem:[%s12184_s2 + $0x2b8] sm:$0xff]  ;;  %v6932_v53 = vpack.c.bf16 %v2030_v21, %v2026_v18 }
 0x75b   :  { %v6982_v24 = vpack.c.bf16 %v1999_v7, %v1995_v4  ;;  %v6996_v57 = vpack.c.bf16 %v2032_v8, %v2028_v22  ;;  %v2034_v4 = vld [vmem:[%s12184_s2 + $0x2c8] sm:$0xff]  ;;  %v2052_v48 = vld [vmem:[%s12184_s2 + $0x358] sm:$0xff] }
 0x75c   :  { %6903 = vmatpush1.bf16.msra.mxu0 %v6902_v27  ;;  %6967 = vmatpush1.bf16.msra.mxu1 %v6966_v30  ;;  %v2001_v27 = vld [vmem:[%s12184_s2 + $0x1c0] sm:$0xff]  ;;  %v2038_v7 = vld [vmem:[%s12184_s2 + $0x2e8] sm:$0xff]  ;;  %v2056_v49 = vld [vmem:[%s12184_s2 + $0x378] sm:$0xff] }
 0x75d   :  { %6905 = vmatprep.subr.bf16.mxu0 %v6904_v39  ;;  %6969 = vmatprep.subr.bf16.mxu1 %v6968_v43  ;;  %v2005_v30 = vld [vmem:[%s12184_s2 + $0x1e0] sm:$0xff]  ;;  %v2003_v39 = vld [vmem:[%s12184_s2 + $0x1d0] sm:$0xff]  ;;  %v2060_v18 = vld [vmem:[%s12184_s2 + $0x398] sm:$0xff] }
 0x75e   :  { %v2007_v43 = vld [vmem:[%s12184_s2 + $0x1f0] sm:$0xff]  ;;  %v6922_v0 = vpack.c.bf16 %v2005_v30, %v2001_v27  ;;  %v6936_v27 = vpack.c.bf16 %v2038_v7, %v2034_v4  ;;  %v7000_v30 = vpack.c.bf16 %v2040_v14, %v2036_v10  ;;  %v2064_v21 = vld [vmem:[%s12184_s2 + $0x3b8] sm:$0xff] }
 0x75f   :  { %v6986_v6 = vpack.c.bf16 %v2007_v43, %v2003_v39  ;;  %v2042_v39 = vld [vmem:[%s12184_s2 + $0x308] sm:$0xff]  ;;  %v2068_v4 = vld [vmem:[%s12184_s2 + $0x3d8] sm:$0xff] }
 0x760   :  { %6907 = vmatpush1.bf16.msra.mxu0 %v6906_v11  ;;  %6971 = vmatpush1.bf16.msra.mxu1 %v6970_v16  ;;  %v2009_v11 = vld [vmem:[%s12184_s2 + $0x200] sm:$0xff]  ;;  %v2046_v43 = vld [vmem:[%s12184_s2 + $0x328] sm:$0xff]  ;;  %v2072_v7 = vld [vmem:[%s12184_s2 + $0x3f8] sm:$0xff] }
 0x761   :  { %6909 = vmatprep.subr.bf16.mxu0 %v6908_v28  ;;  %6973 = vmatprep.subr.bf16.mxu1 %v6972_v2  ;;  %v2013_v16 = vld [vmem:[%s12184_s2 + $0x220] sm:$0xff]  ;;  %v2011_v28 = vld [vmem:[%s12184_s2 + $0x210] sm:$0xff] }
 0x762   :  { %v2015_v2 = vld [vmem:[%s12184_s2 + $0x230] sm:$0xff]  ;;  %v6926_v62 = vpack.c.bf16 %v2013_v16, %v2009_v11  ;;  %v6940_v11 = vpack.c.bf16 %v2046_v43, %v2042_v39  ;;  %v7004_v16 = vpack.c.bf16 %v2048_v51, %v2044_v47  ;;  %v1929_v39 = vld [vmem:[%s12181_s6] sm:$0xff]  ;;  %v1932_v43 = vld [vmem:[%s12181_s6 + $0x28] sm:$0xff] }
 0x763   :  { %v6990_v1 = vpack.c.bf16 %v2015_v2, %v2011_v28  ;;  %v2050_v28 = vld [vmem:[%s12184_s2 + $0x348] sm:$0xff]  ;;  %v1931_v47 = vld [vmem:[%s12181_s6 + $0x20] sm:$0xff] }
 0x764   :  { %6911 = vmatpush1.bf16.msra.mxu0 %v6910_v41  ;;  %6975 = vmatpush1.bf16.msra.mxu1 %v6974_v5  ;;  %v2017_v41 = vld [vmem:[%s12184_s2 + $0x240] sm:$0xff]  ;;  %v2054_v2 = vld [vmem:[%s12184_s2 + $0x368] sm:$0xff] }
 0x765   :  { %6913 = vmatprep.subr.bf16.mxu0 %v6912_v9  ;;  %6977 = vmatprep.subr.bf16.mxu1 %v6976_v12  ;;  %v2021_v5 = vld [vmem:[%s12184_s2 + $0x260] sm:$0xff]  ;;  %v2019_v9 = vld [vmem:[%s12184_s2 + $0x250] sm:$0xff]  ;;  %v1934_v51 = vld [vmem:[%s12181_s6 + $0x48] sm:$0xff] }
 0x766   :  { %v2023_v12 = vld [vmem:[%s12184_s2 + $0x270] sm:$0xff]  ;;  %v6930_v23 = vpack.c.bf16 %v2021_v5, %v2017_v41  ;;  %v6944_v41 = vpack.c.bf16 %v2054_v2, %v2050_v28  ;;  %v7008_v5 = vpack.c.bf16 %v2056_v49, %v2052_v48 }
 0x767   :  { %v6994_v37 = vpack.c.bf16 %v2023_v12, %v2019_v9  ;;  %v2058_v9 = vld [vmem:[%s12184_s2 + $0x388] sm:$0xff]  ;;  %v6127_v2 = vld [vmem:[%s12182_s4 + $0x210] sm:$0xff] }
 0x768   :  { %6915 = vmatpush1.bf16.msra.mxu0 %v6914_v40  ;;  %6979 = vmatpush1.bf16.msra.mxu1 %v6978_v50  ;;  %v2025_v40 = vld [vmem:[%s12184_s2 + $0x280] sm:$0xff]  ;;  %v2062_v12 = vld [vmem:[%s12184_s2 + $0x3a8] sm:$0xff]  ;;  %v6131_v48 = vld [vmem:[%s12182_s4 + $0x230] sm:$0xff] }
 0x769   :  { %6917 = vmatprep.subr.bf16.mxu0 %v6916_v60  ;;  %6981 = vmatprep.subr.bf16.mxu1 %v6980_v63  ;;  %v2029_v50 = vld [vmem:[%s12184_s2 + $0x2a0] sm:$0xff]  ;;  %v2027_v60 = vld [vmem:[%s12184_s2 + $0x290] sm:$0xff]  ;;  %v10281_v49 = vpack.c.bf16 %v6131_v48, %v6127_v2  ;;  %v6166_v2 = vld [vmem:[%s12182_s4 + $0x348] sm:$0xff] }
 0x76a   :  { %v2031_v63 = vld [vmem:[%s12184_s2 + $0x2b0] sm:$0xff]  ;;  %v6934_v17 = vpack.c.bf16 %v2029_v50, %v2025_v40  ;;  %v6948_v40 = vpack.c.bf16 %v2062_v12, %v2058_v9  ;;  %v7012_v50 = vpack.c.bf16 %v2064_v21, %v2060_v18  ;;  %v6170_v48 = vld [vmem:[%s12182_s4 + $0x368] sm:$0xff] }
 0x76b   :  { %v6998_v42 = vpack.c.bf16 %v2031_v63, %v2027_v60  ;;  %v2066_v60 = vld [vmem:[%s12184_s2 + $0x3c8] sm:$0xff]  ;;  %v6135_v12 = vld [vmem:[%s12182_s4 + $0x250] sm:$0xff] }
 0x76c   :  { %6919 = vmatpush1.bf16.msra.mxu0 %v6918_v20  ;;  %6983 = vmatpush1.bf16.msra.mxu1 %v6982_v24  ;;  %v2033_v20 = vld [vmem:[%s12184_s2 + $0x2c0] sm:$0xff]  ;;  %v2070_v63 = vld [vmem:[%s12184_s2 + $0x3e8] sm:$0xff]  ;;  %v6139_v18 = vld [vmem:[%s12182_s4 + $0x270] sm:$0xff] }
 0x76d   :  { %6921 = vmatprep.subr.bf16.mxu0 %v6920_v33  ;;  %6985 = vmatprep.subr.bf16.mxu1 %v6984_v36  ;;  %v2037_v24 = vld [vmem:[%s12184_s2 + $0x2e0] sm:$0xff]  ;;  %v2035_v33 = vld [vmem:[%s12184_s2 + $0x2d0] sm:$0xff]  ;;  %v10317_v21 = vpack.c.bf16 %v6139_v18, %v6135_v12 }
 0x76e   :  { %v2039_v36 = vld [vmem:[%s12184_s2 + $0x2f0] sm:$0xff]  ;;  %v6938_v55 = vpack.c.bf16 %v2037_v24, %v2033_v20  ;;  %v7016_v20 = vpack.c.bf16 %v2072_v7, %v2068_v4  ;;  %v2069_v24 = vld [vmem:[%s12184_s2 + $0x3e0] sm:$0xff] }
 0x76f   :  { %v7002_v61 = vpack.c.bf16 %v2039_v36, %v2035_v33  ;;  %v6147_v4 = vld [vmem:[%s12182_s4 + $0x2b0] sm:$0xff] }
 0x770   :  { %6923 = vmatpush1.bf16.msra.mxu0 %v6922_v0  ;;  %6987 = vmatpush1.bf16.msra.mxu1 %v6986_v6  ;;  %v2041_v0 = vld [vmem:[%s12184_s2 + $0x300] sm:$0xff]  ;;  %v6167_v18 = vld [vmem:[%s12182_s4 + $0x350] sm:$0xff] }
 0x771   :  { %6925 = vmatprep.subr.bf16.mxu0 %v6924_v19  ;;  %6989 = vmatprep.subr.bf16.mxu1 %v6988_v25  ;;  %v2045_v6 = vld [vmem:[%s12184_s2 + $0x320] sm:$0xff]  ;;  %v2043_v19 = vld [vmem:[%s12184_s2 + $0x310] sm:$0xff] }
 0x772   :  { %v2047_v25 = vld [vmem:[%s12184_s2 + $0x330] sm:$0xff]  ;;  %v6942_v54 = vpack.c.bf16 %v2045_v6, %v2041_v0  ;;  %v1937_v0 = vld [vmem:[%s12181_s6 + $0x80] sm:$0xff]  ;;  %v6130_v6 = vld [vmem:[%s12182_s4 + $0x228] sm:$0xff] }
 0x773   :  { %v7006_v31 = vpack.c.bf16 %v2047_v25, %v2043_v19  ;;  %v6129_v19 = vld [vmem:[%s12182_s4 + $0x220] sm:$0xff] }
 0x774   :  { %6927 = vmatpush1.bf16.msra.mxu0 %v6926_v62  ;;  %6991 = vmatpush1.bf16.msra.mxu1 %v6990_v1  ;;  %v2049_v62 = vld [vmem:[%s12184_s2 + $0x340] sm:$0xff] }
 0x775   :  { %6929 = vmatprep.subr.bf16.mxu0 %v6928_v44  ;;  %6993 = vmatprep.subr.bf16.mxu1 %v6992_v46  ;;  %v2053_v1 = vld [vmem:[%s12184_s2 + $0x360] sm:$0xff]  ;;  %v2051_v44 = vld [vmem:[%s12184_s2 + $0x350] sm:$0xff] }
 0x776   :  { %v2055_v46 = vld [vmem:[%s12184_s2 + $0x370] sm:$0xff]  ;;  %v6946_v22 = vpack.c.bf16 %v2053_v1, %v2049_v62  ;;  %v6136_v62 = vld [vmem:[%s12182_s4 + $0x258] sm:$0xff] }
 0x777   :  { %v7010_v8 = vpack.c.bf16 %v2055_v46, %v2051_v44  ;;  %v6137_v44 = vld [vmem:[%s12182_s4 + $0x260] sm:$0xff] }
 0x778   :  { %6931 = vmatpush1.bf16.msra.mxu0 %v6930_v23  ;;  %6995 = vmatpush1.bf16.msra.mxu1 %v6994_v37  ;;  %v2057_v23 = vld [vmem:[%s12184_s2 + $0x380] sm:$0xff] }
 0x779   :  { %6933 = vmatprep.subr.bf16.mxu0 %v6932_v53  ;;  %6997 = vmatprep.subr.bf16.mxu1 %v6996_v57  ;;  %v2061_v37 = vld [vmem:[%s12184_s2 + $0x3a0] sm:$0xff]  ;;  %v2059_v53 = vld [vmem:[%s12184_s2 + $0x390] sm:$0xff] }
 0x77a   :  { %v2063_v57 = vld [vmem:[%s12184_s2 + $0x3b0] sm:$0xff]  ;;  %v6950_v10 = vpack.c.bf16 %v2061_v37, %v2057_v23  ;;  %v6144_v23 = vld [vmem:[%s12182_s4 + $0x298] sm:$0xff] }
 0x77b   :  { %v7014_v14 = vpack.c.bf16 %v2063_v57, %v2059_v53  ;;  %v6145_v53 = vld [vmem:[%s12182_s4 + $0x2a0] sm:$0xff] }
 0x77c   :  { %6935 = vmatpush1.bf16.msra.mxu0 %v6934_v17  ;;  %6999 = vmatpush1.bf16.msra.mxu1 %v6998_v42  ;;  %v2065_v17 = vld [vmem:[%s12184_s2 + $0x3c0] sm:$0xff]  ;;  %v6952_v42 = vpack.c.bf16 %v2070_v63, %v2066_v60  ;;  %v6143_v63 = vld [vmem:[%s12182_s4 + $0x290] sm:$0xff] }
 0x77d   :  { %6937 = vmatprep.subr.bf16.mxu0 %v6936_v27  ;;  %7001 = vmatprep.subr.bf16.mxu1 %v7000_v30  ;;  %v2067_v27 = vld [vmem:[%s12184_s2 + $0x3d0] sm:$0xff]  ;;  %v6954_v33 = vpack.c.bf16 %v2069_v24, %v2065_v17  ;;  %v10353_v7 = vpack.c.bf16 %v6147_v4, %v6143_v63  ;;  %v6152_v17 = vld [vmem:[%s12182_s4 + $0x2d8] sm:$0xff]  ;;  %v6149_v24 = vld [vmem:[%s12182_s4 + $0x2c0] sm:$0xff] }
 0x77e   :  { %v2071_v30 = vld [vmem:[%s12184_s2 + $0x3f0] sm:$0xff]  ;;  %v6180_v63 = vld [vmem:[%s12182_s4 + $0x3b8] sm:$0xff]  ;;  %v6173_v4 = vld [vmem:[%s12182_s4 + $0x380] sm:$0xff] }
 0x77f   :  { %v7018_v36 = vpack.c.bf16 %v2071_v30, %v2067_v27  ;;  %v6153_v27 = vld [vmem:[%s12182_s4 + $0x2e0] sm:$0xff] }
 0x780   :  { %6939 = vmatpush1.bf16.msra.mxu0 %v6938_v55  ;;  %7003 = vmatpush1.bf16.msra.mxu1 %v7002_v61  ;;  %v1933_v55 = vld [vmem:[%s12181_s6 + $0x40] sm:$0xff] }
 0x781   :  { %6941 = vmatprep.subr.bf16.mxu0 %v6940_v11  ;;  %7005 = vmatprep.subr.bf16.mxu1 %v7004_v16  ;;  %v1935_v61 = vld [vmem:[%s12181_s6 + $0x60] sm:$0xff]  ;;  %v6132_v16 = vld [vmem:[%s12182_s4 + $0x238] sm:$0xff] }
 0x784   :  { %6943 = vmatpush1.bf16.msra.mxu0 %v6942_v54  ;;  %7007 = vmatpush1.bf16.msra.mxu1 %v7006_v31  ;;  %v6134_v54 = vld [vmem:[%s12182_s4 + $0x248] sm:$0xff] }
 0x785   :  { %6945 = vmatprep.subr.bf16.mxu0 %v6944_v41  ;;  %7009 = vmatprep.subr.bf16.mxu1 %v7008_v5  ;;  %v6138_v31 = vld [vmem:[%s12182_s4 + $0x268] sm:$0xff]  ;;  %v6140_v41 = vld [vmem:[%s12182_s4 + $0x278] sm:$0xff]  ;;  %v6133_v5 = vld [vmem:[%s12182_s4 + $0x240] sm:$0xff] }
 0x786   :  { %v10295_v1 = vpack.c.bf16 %v6138_v31, %v6134_v54  ;;  %v10306_v46 = vpack.c.bf16 %v6140_v41, %v6136_v62  ;;  %v10308_v9 = vpack.c.bf16 %v6137_v44, %v6133_v5  ;;  %v6168_v54 = vld [vmem:[%s12182_s4 + $0x358] sm:$0xff]  ;;  %v10439_v31 = vpack.c.bf16 %v6170_v48, %v6166_v2  ;;  %v6165_v41 = vld [vmem:[%s12182_s4 + $0x340] sm:$0xff]  ;;  %v6183_v2 = vld [vmem:[%s12182_s4 + $0x3d0] sm:$0xff] }
 0x787   :  { %v6172_v62 = vld [vmem:[%s12182_s4 + $0x378] sm:$0xff]  ;;  %v6169_v5 = vld [vmem:[%s12182_s4 + $0x360] sm:$0xff]  ;;  %v6187_v48 = vld [vmem:[%s12182_s4 + $0x3f0] sm:$0xff] }
 0x788   :  { %6947 = vmatpush1.bf16.msra.mxu0 %v6946_v22  ;;  %7011 = vmatpush1.bf16.msra.mxu1 %v7010_v8  ;;  %v6142_v22 = vld [vmem:[%s12182_s4 + $0x288] sm:$0xff]  ;;  %v10450_v44 = vpack.c.bf16 %v6172_v62, %v6168_v54  ;;  %v10452_v12 = vpack.c.bf16 %v6169_v5, %v6165_v41  ;;  %v10536_v54 = vpack.c.bf16 %v6187_v48, %v6183_v2 }
 0x789   :  { %6949 = vmatprep.subr.bf16.mxu0 %v6948_v40  ;;  %7013 = vmatprep.subr.bf16.mxu1 %v7012_v50  ;;  %v6146_v8 = vld [vmem:[%s12182_s4 + $0x2a8] sm:$0xff]  ;;  %v6148_v40 = vld [vmem:[%s12182_s4 + $0x2b8] sm:$0xff]  ;;  %v6141_v50 = vld [vmem:[%s12182_s4 + $0x280] sm:$0xff] }
 0x78a   :  { %v10331_v37 = vpack.c.bf16 %v6146_v8, %v6142_v22  ;;  %v10342_v57 = vpack.c.bf16 %v6148_v40, %v6144_v23  ;;  %v10344_v60 = vpack.c.bf16 %v6145_v53, %v6141_v50  ;;  %v6171_v22 = vld [vmem:[%s12182_s4 + $0x370] sm:$0xff]  ;;  %v6174_v23 = vld [vmem:[%s12182_s4 + $0x388] sm:$0xff]  ;;  %v6176_v50 = vld [vmem:[%s12182_s4 + $0x398] sm:$0xff] }
 0x78b   :  { %v10461_v8 = vpack.c.bf16 %v6171_v22, %v6167_v18  ;;  %v6178_v40 = vld [vmem:[%s12182_s4 + $0x3a8] sm:$0xff] }
 0x78c   :  { %6951 = vmatpush1.bf16.msra.mxu0 %v6950_v10  ;;  %7015 = vmatpush1.bf16.msra.mxu1 %v7014_v14  ;;  %v6150_v10 = vld [vmem:[%s12182_s4 + $0x2c8] sm:$0xff]  ;;  %v10475_v53 = vpack.c.bf16 %v6178_v40, %v6174_v23 }
 0x78d   :  { %6953 = vmatprep.subr.bf16.mxu0 %v6952_v42  ;;  %7017 = vmatprep.subr.bf16.mxu1 %v7016_v20  ;;  %v6154_v14 = vld [vmem:[%s12182_s4 + $0x2e8] sm:$0xff]  ;;  %v6156_v20 = vld [vmem:[%s12182_s4 + $0x2f8] sm:$0xff] }
 0x78e   :  { %v10367_v42 = vpack.c.bf16 %v6154_v14, %v6150_v10  ;;  %v10378_v30 = vpack.c.bf16 %v6156_v20, %v6152_v17  ;;  %v6177_v10 = vld [vmem:[%s12182_s4 + $0x3a0] sm:$0xff]  ;;  %v10489_v17 = vpack.c.bf16 %v6180_v63, %v6176_v50 }
 0x78f   :  { %v1941_v14 = vld [vmem:[%s12181_s6 + $0xc0] sm:$0xff]  ;;  %v10491_v20 = vpack.c.bf16 %v6177_v10, %v6173_v4 }
 0x790   :  { %6955 = vmatpush1.bf16.msra.mxu0 %v6954_v33  ;;  %7019 = vmatpush1.bf16.msra.mxu1 %v7018_v36  ;;  %v10380_v33 = vpack.c.bf16 %v6153_v27, %v6149_v24  ;;  %v6151_v36 = vld [vmem:[%s12182_s4 + $0x2d0] sm:$0xff] }
 0x791   :  { %v6175_v24 = vld [vmem:[%s12182_s4 + $0x390] sm:$0xff] }
 0x792   :  { %v6179_v27 = vld [vmem:[%s12182_s4 + $0x3b0] sm:$0xff] }
 0x793   :  { %2161 = vmatmul.mubr.f32.vlgmr.msra.gmra.mrb[16].mxu0 %v1929_v39  ;;  %2274 = vmatmul.mubr.f32.vlgmr.msra.gmra.mrb[16].mxu1 %v1929_v39  ;;  %v6155_v39 = vld [vmem:[%s12182_s4 + $0x2f0] sm:$0xff] }
 0x794   :  { %2166 = vmatprep.mubr.f32.mxu0 %v1932_v43  ;;  %2279 = vmatprep.mubr.f32.mxu1 %v1932_v43  ;;  %v10389_v43 = vpack.c.bf16 %v6155_v39, %v6151_v36  ;;  %v10499_v36 = vpack.c.bf16 %v6179_v27, %v6175_v24  ;;  %v6182_v39 = vld [vmem:[%s12182_s4 + $0x3c8] sm:$0xff] }
 0x797   :  { %2167 = vmatmul.mubr.f32.gmra.mrb[18].mxu0 %v1931_v47  ;;  %2280 = vmatmul.mubr.f32.gmra.mrb[18].mxu1 %v1931_v47  ;;  %v6158_v47 = vld [vmem:[%s12182_s4 + $0x308] sm:$0xff] }
 0x798   :  { %2172 = vmatprep.mubr.f32.mxu0 %v1934_v51  ;;  %2285 = vmatprep.mubr.f32.mxu1 %v1934_v51  ;;  %v6162_v51 = vld [vmem:[%s12182_s4 + $0x328] sm:$0xff] }
 0x79b   :  { %2173 = vmatmul.mubr.f32.gmra.mrb[20].mxu0 %v1933_v55  ;;  %2286 = vmatmul.mubr.f32.gmra.mrb[20].mxu1 %v1933_v55  ;;  %v6160_v55 = vld [vmem:[%s12182_s4 + $0x318] sm:$0xff] }
 0x79c   :  { %2178 = vmatprep.mubr.f32.mxu0 %v9676_v15  ;;  %2291 = vmatprep.mubr.f32.mxu1 %v9676_v15  ;;  %v1939_v15 = vld [vmem:[%s12181_s6 + $0xa0] sm:$0xff] }
 0x79f   :  { %2179 = vmatmul.mubr.f32.gmra.mrb[22].mxu0 %v1935_v61  ;;  %2292 = vmatmul.mubr.f32.gmra.mrb[22].mxu1 %v1935_v61  ;;  %v10403_v61 = vpack.c.bf16 %v6162_v51, %v6158_v47  ;;  %v6186_v47 = vld [vmem:[%s12182_s4 + $0x3e8] sm:$0xff]  ;;  %v6184_v51 = vld [vmem:[%s12182_s4 + $0x3d8] sm:$0xff] }
 0x7a0   :  { %2184 = vmatprep.mubr.f32.mxu0 %v9726_v13  ;;  %2297 = vmatprep.mubr.f32.mxu1 %v9726_v13  ;;  %v6126_v13 = vld [vmem:[%s12182_s4 + $0x208] sm:$0xff] }
 0x7a1   :  { %v10259_v11 = vpack.c.bf16 %v6130_v6, %v6126_v13  ;;  %v6161_v13 = vld [vmem:[%s12182_s4 + $0x320] sm:$0xff] }
 0x7a3   :  { %2185 = vmatmul.mubr.f32.gmra.mrb[24].mxu0 %v1937_v0  ;;  %2298 = vmatmul.mubr.f32.gmra.mrb[24].mxu1 %v1937_v0  ;;  %v6164_v0 = vld [vmem:[%s12182_s4 + $0x338] sm:$0xff] }
 0x7a4   :  { %2190 = vmatprep.mubr.f32.mxu0 %v9776_v45  ;;  %2303 = vmatprep.mubr.f32.mxu1 %v9776_v45  ;;  %v6128_v45 = vld [vmem:[%s12182_s4 + $0x218] sm:$0xff]  ;;  %v10414_v6 = vpack.c.bf16 %v6164_v0, %v6160_v55  ;;  %v10514_v55 = vpack.c.bf16 %v6186_v47, %v6182_v39 }
 0x7a5   :  { %v10270_v25 = vpack.c.bf16 %v6132_v16, %v6128_v45  ;;  %7021 = vmatprep.subr.bf16.mxu0 %v10259_v11  ;;  %v6159_v16 = vld [vmem:[%s12182_s4 + $0x310] sm:$0xff]  ;;  %v6188_v0 = vld [vmem:[%s12182_s4 + $0x3f8] sm:$0xff] }
 0x7a7   :  { %2191 = vmatmul.mubr.f32.gmra.mrb[26].mxu0 %v1939_v15  ;;  %2304 = vmatmul.mubr.f32.gmra.mrb[26].mxu1 %v1939_v15  ;;  %v6157_v15 = vld [vmem:[%s12182_s4 + $0x300] sm:$0xff] }
 0x7a8   :  { %2196 = vmatprep.mubr.f32.mxu0 %v9866_v59  ;;  %2309 = vmatprep.mubr.f32.mxu1 %v9866_v59  ;;  %v6125_v59 = vld [vmem:[%s12182_s4 + $0x200] sm:$0xff]  ;;  %v10416_v45 = vpack.c.bf16 %v6161_v13, %v6157_v15 }
 0x7a9   :  { %v10272_v28 = vpack.c.bf16 %v6129_v19, %v6125_v59  ;;  %7053 = vmatprep.subr.bf16.mxu1 %v10270_v25  ;;  %v6163_v59 = vld [vmem:[%s12182_s4 + $0x330] sm:$0xff]  ;;  %v6181_v15 = vld [vmem:[%s12182_s4 + $0x3c0] sm:$0xff] }
 0x7aa   :  { %7055 = vmatpush1.bf16.msra.mxu1 %v10281_v49  ;;  %v10425_v19 = vpack.c.bf16 %v6163_v59, %v6159_v16  ;;  %v6185_v13 = vld [vmem:[%s12182_s4 + $0x3e0] sm:$0xff]  ;;  %v10525_v16 = vpack.c.bf16 %v6188_v0, %v6184_v51 }
 0x7ab   :  { %7023 = vmatpush1.bf16.msra.mxu0 %v10272_v28  ;;  %7057 = vmatprep.subr.bf16.mxu1 %v10306_v46  ;;  %v10527_v59 = vpack.c.bf16 %v6185_v13, %v6181_v15 }
 0x7ac   :  { %7025 = vmatprep.subr.bf16.mxu0 %v10295_v1  ;;  %2197 = vmatmul.mubr.f32.gmra.mrb[28].mxu0 %v1941_v14 }
 0x7ad   :  { %2310 = vmatmul.mubr.f32.gmra.mrb[28].mxu1 %v1941_v14 }
 0x7ae   :  { %7059 = vmatpush1.bf16.msra.mxu1 %v10317_v21 }
 0x7af   :  { %7027 = vmatpush1.bf16.msra.mxu0 %v10308_v9  ;;  %7061 = vmatprep.subr.bf16.mxu1 %v10342_v57 }
 0x7b0   :  { %7029 = vmatprep.subr.bf16.mxu0 %v10331_v37 }
 0x7b2   :  { %7063 = vmatpush1.bf16.msra.mxu1 %v10353_v7 }
 0x7b3   :  { %7031 = vmatpush1.bf16.msra.mxu0 %v10344_v60  ;;  %7065 = vmatprep.subr.bf16.mxu1 %v10378_v30 }
 0x7b4   :  { %7033 = vmatprep.subr.bf16.mxu0 %v10367_v42 }
 0x7b6   :  { %7067 = vmatpush1.bf16.msra.mxu1 %v10389_v43 }
 0x7b7   :  { %7035 = vmatpush1.bf16.msra.mxu0 %v10380_v33  ;;  %7069 = vmatprep.subr.bf16.mxu1 %v10414_v6 }
 0x7b8   :  { %7037 = vmatprep.subr.bf16.mxu0 %v10403_v61 }
 0x7ba   :  { %7071 = vmatpush1.bf16.msra.mxu1 %v10425_v19 }
 0x7bb   :  { %7039 = vmatpush1.bf16.msra.mxu0 %v10416_v45  ;;  %7073 = vmatprep.subr.bf16.mxu1 %v10450_v44 }
 0x7bc   :  { %7041 = vmatprep.subr.bf16.mxu0 %v10439_v31 }
 0x7be   :  { %7075 = vmatpush1.bf16.msra.mxu1 %v10461_v8 }
 0x7bf   :  { %7043 = vmatpush1.bf16.msra.mxu0 %v10452_v12  ;;  %7077 = vmatprep.subr.bf16.mxu1 %v10489_v17 }
 0x7c0   :  { %7045 = vmatprep.subr.bf16.mxu0 %v10475_v53 }
 0x7c2   :  { %7079 = vmatpush1.bf16.msra.mxu1 %v10499_v36 }
 0x7c3   :  { %7047 = vmatpush1.bf16.msra.mxu0 %v10491_v20  ;;  %7081 = vmatprep.subr.bf16.mxu1 %v10525_v16 }
 0x7c4   :  { %7049 = vmatprep.subr.bf16.mxu0 %v10514_v55 }
 0x7c6   :  { %7083 = vmatpush1.bf16.msra.mxu1 %v10536_v54 }
 0x7c7   :  { %7051 = vmatpush1.bf16.msra.mxu0 %v10527_v59  ;;  %7117 = vmatprep.subr.bf16.mxu1 %v10270_v25 }
 0x7c8   :  { %7085 = vmatprep.subr.bf16.mxu0 %v10259_v11 }
 0x826   :  { %v1819_v62 = vpop.f32.mrb[14].mxu0  ;;  %v1890_v41 = vpop.f32.mrb[14].mxu1 }
 0x827   :  { %v8250_v5 = vadd.f32 %v1819_v62, %v9514_v34  ;;  %v1821_v18 = vpop.f32.mrb[15].mxu0  ;;  %v1892_v22 = vpop.f32.mrb[15].mxu1  ;;  %v8266_v63 = vadd.f32 %v1890_v41, %v9524_v52  ;;  %v1943_v62 = vld [vmem:[%s12181_s6 + $0xe0] sm:$0xff] }
 0x828   :  { %v8251_v23 = vadd.f32 %v1821_v18, %v9517_v35  ;;  %v8267_v4 = vadd.f32 %v1892_v22, %v9530_v56 }
 0x829   :  { %v6120_v40 = vmul.f32 -1.442695, %v8250_v5  ;;  %v6122_v10 = vmul.f32 -1.442695, %v8266_v63 }
 0x82a   :  { %v6121_v50 = vmul.f32 -1.442695, %v8251_v23 }
 0x82b   :  { %8573 = vpow2.f32 %v6120_v40 }
 0x82c   :  { %8575 = vpow2.f32 %v6121_v50 }
 0x82d   :  { %8577 = vtanh.f32 %v8267_v4 }
 0x82e   :  { %8579 = vpow2.f32 %v6122_v10 }
 0x835   :  { %v8574_v14 = vpop.eup %8573 }
 0x836   :  { %v1908_v24 = vadd.f32 1.0, %v8574_v14  ;;  %v8576_v27 = vpop.eup %8575 }
 0x837   :  { %v1909_v34 = vadd.f32 1.0, %v8576_v27  ;;  %v8578_v39 = vpop.eup %8577 }
 0x838   :  { %8581 = vrcp.f32 %v1908_v24  ;;  %v8580_v47 = vpop.eup %8579 }
 0x839   :  { %8583 = vrcp.f32 %v1909_v34  ;;  %v1910_v15 = vadd.f32 1.0, %v8580_v47 }
 0x83b   :  { %8585 = vrcp.f32 %v1910_v15 }
 0x842   :  { %v8582_v35 = vpop.eup %8581 }
 0x843   :  { %v1920_v51 = vmul.f32 %v8582_v35, %v8578_v39  ;;  %v8584_v0 = vpop.eup %8583 }
 0x844   :  { %v1919_v13 = vmul.f32 %v8584_v0, %v9833_v26  ;;  %v6124_v26 = vld [vmem:[%s12183_s5 + $0x4] sm:$0xf] }
 0x845   :  { %v8586_v56 = vpop.eup %8585  ;;  %v10596_v41 = vrot.slane %v6124_v26, %v9506_v29  ;;  %v10599_v5 = vrot.slane %v6124_v26, %v9511_v32  ;;  %v10604_v14 = vrot.slane %v6124_v26, %v9519_v38  ;;  %v10607_v24 = vrot.slane %v6124_v26, %v9526_v58 }
 0x846   :  { %v1921_v52 = vadd.f32 %v1920_v51, %v1919_v13 }
 0x848   :  { %8587 = vtanh.f32 %v1921_v52 }
 0x852   :  { %v8588_v2 = vpop.eup %8587 }
 0x853   :  { %v1923_v48 = vmul.f32 %v8588_v2, %v8586_v56 }
 0x855   :  { %6123 = vst [vmem:[%s12181_s6 + $0xe8] sm:$0xff] %v1923_v48  ;;  %2202 = vmatprep.mubr.f32.mxu0 %v1923_v48  ;;  %2315 = vmatprep.mubr.f32.mxu1 %v1923_v48 }
 0x856   :  { %2203 = vmatmul.mubr.f32.gmra.mrb[30].mxu0 %v1943_v62  ;;  %2316 = vmatmul.mubr.f32.gmra.mrb[30].mxu1 %v1943_v62 }
 0x857   :  { %2490 = vmatprep.mubr.f32.mxu0 %v8846_v3  ;;  %2561 = vmatprep.mubr.f32.mxu1 %v8846_v3 }
 0x85a   :  { %2491 = vmatmul.mubr.f32.vlgmr.msra.gmra.mrb[16].mxu0 %v8846_v3  ;;  %2562 = vmatmul.mubr.f32.vlgmr.msra.gmra.mrb[16].mxu1 %v8846_v3 }
 0x85b   :  { %7087 = vmatpush1.bf16.msra.mxu0 %v10272_v28  ;;  %7119 = vmatpush1.bf16.msra.mxu1 %v10281_v49 }
 0x85c   :  { %7089 = vmatprep.subr.bf16.mxu0 %v10295_v1  ;;  %7121 = vmatprep.subr.bf16.mxu1 %v10306_v46 }
 0x85d   :  { %2669 = vmatprep.mubr.f32.mxu0 %v8846_v3  ;;  %2740 = vmatprep.mubr.f32.mxu1 %v8846_v3 }
 0x85f   :  { %7091 = vmatpush1.bf16.msra.mxu0 %v10308_v9  ;;  %7123 = vmatpush1.bf16.msra.mxu1 %v10317_v21 }
 0x860   :  { %7093 = vmatprep.subr.bf16.mxu0 %v10331_v37  ;;  %7125 = vmatprep.subr.bf16.mxu1 %v10342_v57 }
 0x863   :  { %7095 = vmatpush1.bf16.msra.mxu0 %v10344_v60  ;;  %7127 = vmatpush1.bf16.msra.mxu1 %v10353_v7 }
 0x864   :  { %7097 = vmatprep.subr.bf16.mxu0 %v10367_v42  ;;  %7129 = vmatprep.subr.bf16.mxu1 %v10378_v30 }
 0x867   :  { %7099 = vmatpush1.bf16.msra.mxu0 %v10380_v33  ;;  %7131 = vmatpush1.bf16.msra.mxu1 %v10389_v43 }
 0x868   :  { %7101 = vmatprep.subr.bf16.mxu0 %v10403_v61  ;;  %7133 = vmatprep.subr.bf16.mxu1 %v10414_v6 }
 0x86b   :  { %7103 = vmatpush1.bf16.msra.mxu0 %v10416_v45  ;;  %7135 = vmatpush1.bf16.msra.mxu1 %v10425_v19 }
 0x86c   :  { %7105 = vmatprep.subr.bf16.mxu0 %v10439_v31  ;;  %7137 = vmatprep.subr.bf16.mxu1 %v10450_v44 }
 0x86f   :  { %7107 = vmatpush1.bf16.msra.mxu0 %v10452_v12  ;;  %7139 = vmatpush1.bf16.msra.mxu1 %v10461_v8 }
 0x870   :  { %7109 = vmatprep.subr.bf16.mxu0 %v10475_v53  ;;  %7141 = vmatprep.subr.bf16.mxu1 %v10489_v17 }
 0x873   :  { %7111 = vmatpush1.bf16.msra.mxu0 %v10491_v20  ;;  %7143 = vmatpush1.bf16.msra.mxu1 %v10499_v36 }
 0x874   :  { %7113 = vmatprep.subr.bf16.mxu0 %v10514_v55  ;;  %7145 = vmatprep.subr.bf16.mxu1 %v10525_v16 }
 0x877   :  { %7115 = vmatpush1.bf16.msra.mxu0 %v10527_v59  ;;  %7147 = vmatpush1.bf16.msra.mxu1 %v10536_v54 }
 0x878   :  { %7149 = vmatprep.subr.bf16.mxu0 %v10259_v11  ;;  %7181 = vmatprep.subr.bf16.mxu1 %v10270_v25 }
 0x92d   :  { %v2492_v18 = vpop.f32.mrb[16].mxu0  ;;  %v2563_v22 = vpop.f32.mrb[16].mxu1 }
 0x92e   :  { %v8268_v23 = vadd.f32 %v2492_v18, %v10596_v41  ;;  %v2494_v40 = vpop.f32.mrb[17].mxu0  ;;  %v2565_v50 = vpop.f32.mrb[17].mxu1  ;;  %v8284_v27 = vadd.f32 %v2563_v22, %v10604_v14 }
 0x92f   :  { %v8269_v63 = vadd.f32 %v2494_v40, %v10599_v5  ;;  %v8285_v34 = vadd.f32 %v2565_v50, %v10607_v24 }
 0x930   :  { %v6189_v4 = vmul.f32 -1.442695, %v8268_v23  ;;  %v6191_v39 = vmul.f32 -1.442695, %v8284_v27 }
 0x931   :  { %v6190_v10 = vmul.f32 -1.442695, %v8269_v63 }
 0x932   :  { %8589 = vpow2.f32 %v6189_v4 }
 0x933   :  { %8591 = vpow2.f32 %v6190_v10 }
 0x934   :  { %8593 = vtanh.f32 %v8285_v34 }
 0x935   :  { %8595 = vpow2.f32 %v6191_v39 }
 0x93c   :  { %v8590_v47 = vpop.eup %8589 }
 0x93d   :  { %v2581_v35 = vadd.f32 1.0, %v8590_v47  ;;  %v8592_v51 = vpop.eup %8591 }
 0x93e   :  { %v2582_v0 = vadd.f32 1.0, %v8592_v51  ;;  %v8594_v15 = vpop.eup %8593 }
 0x93f   :  { %8597 = vrcp.f32 %v2581_v35  ;;  %v8596_v13 = vpop.eup %8595 }
 0x940   :  { %8599 = vrcp.f32 %v2582_v0  ;;  %v2583_v48 = vadd.f32 1.0, %v8596_v13 }
 0x942   :  { %8601 = vrcp.f32 %v2583_v48 }
 0x949   :  { %v8598_v52 = vpop.eup %8597 }
 0x94a   :  { %v2593_v56 = vmul.f32 %v8598_v52, %v8594_v15  ;;  %v8600_v2 = vpop.eup %8599 }
 0x94b   :  { %v2592_v62 = vmul.f32 0.0, %v8600_v2 }
 0x94c   :  { %v8602_v18 = vpop.eup %8601 }
 0x94d   :  { %v10611_v26 = vadd.f32 %v2593_v56, %v2592_v62 }
 0x94f   :  { %8603 = vtanh.f32 %v10611_v26 }
 0x959   :  { %v8604_v22 = vpop.eup %8603 }
 0x95a   :  { %v2596_v23 = vmul.f32 %v8604_v22, %v8602_v18 }
 0x95c   :  { %2599 = vst [vmem:[%s12181_s6 + $0x10] sm:$0xff] %v2596_v23  ;;  %2670 = vmatmul.mubr.f32.vlgmr.msra.gmra.mrb[18].mxu0 %v2596_v23  ;;  %2741 = vmatmul.mubr.f32.vlgmr.msra.gmra.mrb[18].mxu1 %v2596_v23 }
 0x95d   :  { %7151 = vmatpush1.bf16.msra.mxu0 %v10272_v28  ;;  %7183 = vmatpush1.bf16.msra.mxu1 %v10281_v49 }
 0x95e   :  { %7153 = vmatprep.subr.bf16.mxu0 %v10295_v1  ;;  %7185 = vmatprep.subr.bf16.mxu1 %v10306_v46 }
 0x95f   :  { %2848 = vmatprep.mubr.f32.mxu0 %v8846_v3  ;;  %2919 = vmatprep.mubr.f32.mxu1 %v8846_v3 }
 0x961   :  { %7155 = vmatpush1.bf16.msra.mxu0 %v10308_v9  ;;  %7187 = vmatpush1.bf16.msra.mxu1 %v10317_v21 }
 0x962   :  { %7157 = vmatprep.subr.bf16.mxu0 %v10331_v37  ;;  %7189 = vmatprep.subr.bf16.mxu1 %v10342_v57 }
 0x965   :  { %7159 = vmatpush1.bf16.msra.mxu0 %v10344_v60  ;;  %7191 = vmatpush1.bf16.msra.mxu1 %v10353_v7 }
 0x966   :  { %7161 = vmatprep.subr.bf16.mxu0 %v10367_v42  ;;  %7193 = vmatprep.subr.bf16.mxu1 %v10378_v30 }
 0x969   :  { %7163 = vmatpush1.bf16.msra.mxu0 %v10380_v33  ;;  %7195 = vmatpush1.bf16.msra.mxu1 %v10389_v43 }
 0x96a   :  { %7165 = vmatprep.subr.bf16.mxu0 %v10403_v61  ;;  %7197 = vmatprep.subr.bf16.mxu1 %v10414_v6 }
 0x96d   :  { %7167 = vmatpush1.bf16.msra.mxu0 %v10416_v45  ;;  %7199 = vmatpush1.bf16.msra.mxu1 %v10425_v19 }
 0x96e   :  { %7169 = vmatprep.subr.bf16.mxu0 %v10439_v31  ;;  %7201 = vmatprep.subr.bf16.mxu1 %v10450_v44 }
 0x971   :  { %7171 = vmatpush1.bf16.msra.mxu0 %v10452_v12  ;;  %7203 = vmatpush1.bf16.msra.mxu1 %v10461_v8 }
 0x972   :  { %7173 = vmatprep.subr.bf16.mxu0 %v10475_v53  ;;  %7205 = vmatprep.subr.bf16.mxu1 %v10489_v17 }
 0x975   :  { %7175 = vmatpush1.bf16.msra.mxu0 %v10491_v20  ;;  %7207 = vmatpush1.bf16.msra.mxu1 %v10499_v36 }
 0x976   :  { %7177 = vmatprep.subr.bf16.mxu0 %v10514_v55  ;;  %7209 = vmatprep.subr.bf16.mxu1 %v10525_v16 }
 0x979   :  { %7179 = vmatpush1.bf16.msra.mxu0 %v10527_v59  ;;  %7211 = vmatpush1.bf16.msra.mxu1 %v10536_v54 }
 0x97a   :  { %7213 = vmatprep.subr.bf16.mxu0 %v10259_v11  ;;  %7245 = vmatprep.subr.bf16.mxu1 %v10270_v25 }
 0xa2f   :  { %v2671_v40 = vpop.f32.mrb[18].mxu0  ;;  %v2742_v50 = vpop.f32.mrb[18].mxu1 }
 0xa30   :  { %v8270_v63 = vadd.f32 %v2671_v40, %v10596_v41  ;;  %v2673_v4 = vpop.f32.mrb[19].mxu0  ;;  %v2744_v10 = vpop.f32.mrb[19].mxu1  ;;  %v8286_v47 = vadd.f32 %v2742_v50, %v10604_v14 }
 0xa31   :  { %v8271_v27 = vadd.f32 %v2673_v4, %v10599_v5  ;;  %v8287_v35 = vadd.f32 %v2744_v10, %v10607_v24 }
 0xa32   :  { %v6192_v34 = vmul.f32 -1.442695, %v8270_v63  ;;  %v6194_v51 = vmul.f32 -1.442695, %v8286_v47 }
 0xa33   :  { %v6193_v39 = vmul.f32 -1.442695, %v8271_v27 }
 0xa34   :  { %8605 = vpow2.f32 %v6192_v34 }
 0xa35   :  { %8607 = vpow2.f32 %v6193_v39 }
 0xa36   :  { %8609 = vtanh.f32 %v8287_v35 }
 0xa37   :  { %8611 = vpow2.f32 %v6194_v51 }
 0xa3e   :  { %v8606_v0 = vpop.eup %8605 }
 0xa3f   :  { %v2760_v15 = vadd.f32 1.0, %v8606_v0  ;;  %v8608_v13 = vpop.eup %8607 }
 0xa40   :  { %v2761_v52 = vadd.f32 1.0, %v8608_v13  ;;  %v8610_v56 = vpop.eup %8609 }
 0xa41   :  { %8613 = vrcp.f32 %v2760_v15  ;;  %v8612_v2 = vpop.eup %8611 }
 0xa42   :  { %8615 = vrcp.f32 %v2761_v52  ;;  %v2762_v22 = vadd.f32 1.0, %v8612_v2 }
 0xa44   :  { %8617 = vrcp.f32 %v2762_v22 }
 0xa4b   :  { %v8614_v48 = vpop.eup %8613 }
 0xa4c   :  { %v2772_v62 = vmul.f32 %v8614_v48, %v8610_v56  ;;  %v8616_v18 = vpop.eup %8615 }
 0xa4d   :  { %v2771_v23 = vmul.f32 %v8616_v18, %v10611_v26 }
 0xa4e   :  { %v8618_v50 = vpop.eup %8617 }
 0xa4f   :  { %v10656_v40 = vadd.f32 %v2772_v62, %v2771_v23 }
 0xa51   :  { %8619 = vtanh.f32 %v10656_v40 }
 0xa5b   :  { %v8620_v63 = vpop.eup %8619 }
 0xa5c   :  { %v2775_v4 = vmul.f32 %v8620_v63, %v8618_v50 }
 0xa5e   :  { %6195 = vst [vmem:[%s12181_s6 + $0x30] sm:$0xff] %v2775_v4  ;;  %2849 = vmatmul.mubr.f32.vlgmr.msra.gmra.mrb[20].mxu0 %v2775_v4  ;;  %2920 = vmatmul.mubr.f32.vlgmr.msra.gmra.mrb[20].mxu1 %v2775_v4 }
 0xa5f   :  { %7215 = vmatpush1.bf16.msra.mxu0 %v10272_v28  ;;  %7247 = vmatpush1.bf16.msra.mxu1 %v10281_v49 }
 0xa60   :  { %7217 = vmatprep.subr.bf16.mxu0 %v10295_v1  ;;  %7249 = vmatprep.subr.bf16.mxu1 %v10306_v46 }
 0xa61   :  { %3027 = vmatprep.mubr.f32.mxu0 %v8846_v3  ;;  %3098 = vmatprep.mubr.f32.mxu1 %v8846_v3 }
 0xa63   :  { %7219 = vmatpush1.bf16.msra.mxu0 %v10308_v9  ;;  %7251 = vmatpush1.bf16.msra.mxu1 %v10317_v21 }
 0xa64   :  { %7221 = vmatprep.subr.bf16.mxu0 %v10331_v37  ;;  %7253 = vmatprep.subr.bf16.mxu1 %v10342_v57 }
 0xa67   :  { %7223 = vmatpush1.bf16.msra.mxu0 %v10344_v60  ;;  %7255 = vmatpush1.bf16.msra.mxu1 %v10353_v7 }
 0xa68   :  { %7225 = vmatprep.subr.bf16.mxu0 %v10367_v42  ;;  %7257 = vmatprep.subr.bf16.mxu1 %v10378_v30 }
 0xa6b   :  { %7227 = vmatpush1.bf16.msra.mxu0 %v10380_v33  ;;  %7259 = vmatpush1.bf16.msra.mxu1 %v10389_v43 }
 0xa6c   :  { %7229 = vmatprep.subr.bf16.mxu0 %v10403_v61  ;;  %7261 = vmatprep.subr.bf16.mxu1 %v10414_v6 }
 0xa6f   :  { %7231 = vmatpush1.bf16.msra.mxu0 %v10416_v45  ;;  %7263 = vmatpush1.bf16.msra.mxu1 %v10425_v19 }
 0xa70   :  { %7233 = vmatprep.subr.bf16.mxu0 %v10439_v31  ;;  %7265 = vmatprep.subr.bf16.mxu1 %v10450_v44 }
 0xa73   :  { %7235 = vmatpush1.bf16.msra.mxu0 %v10452_v12  ;;  %7267 = vmatpush1.bf16.msra.mxu1 %v10461_v8 }
 0xa74   :  { %7237 = vmatprep.subr.bf16.mxu0 %v10475_v53  ;;  %7269 = vmatprep.subr.bf16.mxu1 %v10489_v17 }
 0xa77   :  { %7239 = vmatpush1.bf16.msra.mxu0 %v10491_v20  ;;  %7271 = vmatpush1.bf16.msra.mxu1 %v10499_v36 }
 0xa78   :  { %7241 = vmatprep.subr.bf16.mxu0 %v10514_v55  ;;  %7273 = vmatprep.subr.bf16.mxu1 %v10525_v16 }
 0xa7b   :  { %7243 = vmatpush1.bf16.msra.mxu0 %v10527_v59  ;;  %7275 = vmatpush1.bf16.msra.mxu1 %v10536_v54 }
 0xa7c   :  { %7277 = vmatprep.subr.bf16.mxu0 %v10259_v11  ;;  %7309 = vmatprep.subr.bf16.mxu1 %v10270_v25 }
 0xb31   :  { %v2850_v26 = vpop.f32.mrb[20].mxu0  ;;  %v2921_v10 = vpop.f32.mrb[20].mxu1 }
 0xb32   :  { %v8272_v27 = vadd.f32 %v2850_v26, %v10596_v41  ;;  %v2852_v34 = vpop.f32.mrb[21].mxu0  ;;  %v2923_v39 = vpop.f32.mrb[21].mxu1  ;;  %v8288_v0 = vadd.f32 %v2921_v10, %v10604_v14 }
 0xb33   :  { %v8273_v47 = vadd.f32 %v2852_v34, %v10599_v5  ;;  %v8289_v15 = vadd.f32 %v2923_v39, %v10607_v24 }
 0xb34   :  { %v6196_v35 = vmul.f32 -1.442695, %v8272_v27  ;;  %v6198_v13 = vmul.f32 -1.442695, %v8288_v0 }
 0xb35   :  { %v6197_v51 = vmul.f32 -1.442695, %v8273_v47 }
 0xb36   :  { %8621 = vpow2.f32 %v6196_v35 }
 0xb37   :  { %8623 = vpow2.f32 %v6197_v51 }
 0xb38   :  { %8625 = vtanh.f32 %v8289_v15 }
 0xb39   :  { %8627 = vpow2.f32 %v6198_v13 }
 0xb40   :  { %v8622_v52 = vpop.eup %8621 }
 0xb41   :  { %v2939_v56 = vadd.f32 1.0, %v8622_v52  ;;  %v8624_v2 = vpop.eup %8623 }
 0xb42   :  { %v2940_v48 = vadd.f32 1.0, %v8624_v2  ;;  %v8626_v62 = vpop.eup %8625 }
 0xb43   :  { %8629 = vrcp.f32 %v2939_v56  ;;  %v8628_v18 = vpop.eup %8627 }
 0xb44   :  { %8631 = vrcp.f32 %v2940_v48  ;;  %v2941_v63 = vadd.f32 1.0, %v8628_v18 }
 0xb46   :  { %8633 = vrcp.f32 %v2941_v63 }
 0xb4d   :  { %v8630_v22 = vpop.eup %8629 }
 0xb4e   :  { %v2951_v23 = vmul.f32 %v8630_v22, %v8626_v62  ;;  %v8632_v50 = vpop.eup %8631 }
 0xb4f   :  { %v2950_v4 = vmul.f32 %v8632_v50, %v10656_v40 }
 0xb50   :  { %v8634_v10 = vpop.eup %8633 }
 0xb51   :  { %v10701_v26 = vadd.f32 %v2951_v23, %v2950_v4 }
 0xb53   :  { %8635 = vtanh.f32 %v10701_v26 }
 0xb5d   :  { %v8636_v27 = vpop.eup %8635 }
 0xb5e   :  { %v2954_v34 = vmul.f32 %v8636_v27, %v8634_v10 }
 0xb60   :  { %6199 = vst [vmem:[%s12181_s6 + $0x50] sm:$0xff] %v2954_v34  ;;  %3028 = vmatmul.mubr.f32.vlgmr.msra.gmra.mrb[22].mxu0 %v2954_v34  ;;  %3099 = vmatmul.mubr.f32.vlgmr.msra.gmra.mrb[22].mxu1 %v2954_v34 }
 0xb61   :  { %7279 = vmatpush1.bf16.msra.mxu0 %v10272_v28  ;;  %7311 = vmatpush1.bf16.msra.mxu1 %v10281_v49 }
 0xb62   :  { %7281 = vmatprep.subr.bf16.mxu0 %v10295_v1  ;;  %7313 = vmatprep.subr.bf16.mxu1 %v10306_v46 }
 0xb63   :  { %3206 = vmatprep.mubr.f32.mxu0 %v8846_v3  ;;  %3277 = vmatprep.mubr.f32.mxu1 %v8846_v3 }
 0xb65   :  { %7283 = vmatpush1.bf16.msra.mxu0 %v10308_v9  ;;  %7315 = vmatpush1.bf16.msra.mxu1 %v10317_v21 }
 0xb66   :  { %7285 = vmatprep.subr.bf16.mxu0 %v10331_v37  ;;  %7317 = vmatprep.subr.bf16.mxu1 %v10342_v57 }
 0xb69   :  { %7287 = vmatpush1.bf16.msra.mxu0 %v10344_v60  ;;  %7319 = vmatpush1.bf16.msra.mxu1 %v10353_v7 }
 0xb6a   :  { %7289 = vmatprep.subr.bf16.mxu0 %v10367_v42  ;;  %7321 = vmatprep.subr.bf16.mxu1 %v10378_v30 }
 0xb6d   :  { %7291 = vmatpush1.bf16.msra.mxu0 %v10380_v33  ;;  %7323 = vmatpush1.bf16.msra.mxu1 %v10389_v43 }
 0xb6e   :  { %7293 = vmatprep.subr.bf16.mxu0 %v10403_v61  ;;  %7325 = vmatprep.subr.bf16.mxu1 %v10414_v6 }
 0xb71   :  { %7295 = vmatpush1.bf16.msra.mxu0 %v10416_v45  ;;  %7327 = vmatpush1.bf16.msra.mxu1 %v10425_v19 }
 0xb72   :  { %7297 = vmatprep.subr.bf16.mxu0 %v10439_v31  ;;  %7329 = vmatprep.subr.bf16.mxu1 %v10450_v44 }
 0xb75   :  { %7299 = vmatpush1.bf16.msra.mxu0 %v10452_v12  ;;  %7331 = vmatpush1.bf16.msra.mxu1 %v10461_v8 }
 0xb76   :  { %7301 = vmatprep.subr.bf16.mxu0 %v10475_v53  ;;  %7333 = vmatprep.subr.bf16.mxu1 %v10489_v17 }
 0xb79   :  { %7303 = vmatpush1.bf16.msra.mxu0 %v10491_v20  ;;  %7335 = vmatpush1.bf16.msra.mxu1 %v10499_v36 }
 0xb7a   :  { %7305 = vmatprep.subr.bf16.mxu0 %v10514_v55  ;;  %7337 = vmatprep.subr.bf16.mxu1 %v10525_v16 }
 0xb7d   :  { %7307 = vmatpush1.bf16.msra.mxu0 %v10527_v59  ;;  %7339 = vmatpush1.bf16.msra.mxu1 %v10536_v54 }
 0xb7e   :  { %7341 = vmatprep.subr.bf16.mxu0 %v10259_v11  ;;  %7373 = vmatprep.subr.bf16.mxu1 %v10270_v25 }
 0xc33   :  { %v3029_v40 = vpop.f32.mrb[22].mxu0  ;;  %v3100_v39 = vpop.f32.mrb[22].mxu1 }
 0xc34   :  { %v8274_v47 = vadd.f32 %v3029_v40, %v10596_v41  ;;  %v3031_v35 = vpop.f32.mrb[23].mxu0  ;;  %v3102_v51 = vpop.f32.mrb[23].mxu1  ;;  %v8290_v52 = vadd.f32 %v3100_v39, %v10604_v14 }
 0xc35   :  { %v8275_v0 = vadd.f32 %v3031_v35, %v10599_v5  ;;  %v8291_v56 = vadd.f32 %v3102_v51, %v10607_v24 }
 0xc36   :  { %v6200_v15 = vmul.f32 -1.442695, %v8274_v47  ;;  %v6202_v2 = vmul.f32 -1.442695, %v8290_v52 }
 0xc37   :  { %v6201_v13 = vmul.f32 -1.442695, %v8275_v0 }
 0xc38   :  { %8637 = vpow2.f32 %v6200_v15 }
 0xc39   :  { %8639 = vpow2.f32 %v6201_v13 }
 0xc3a   :  { %8641 = vtanh.f32 %v8291_v56 }
 0xc3b   :  { %8643 = vpow2.f32 %v6202_v2 }
 0xc42   :  { %v8638_v48 = vpop.eup %8637 }
 0xc43   :  { %v3118_v62 = vadd.f32 1.0, %v8638_v48  ;;  %v8640_v18 = vpop.eup %8639 }
 0xc44   :  { %v3119_v22 = vadd.f32 1.0, %v8640_v18  ;;  %v8642_v23 = vpop.eup %8641 }
 0xc45   :  { %8645 = vrcp.f32 %v3118_v62  ;;  %v8644_v50 = vpop.eup %8643 }
 0xc46   :  { %8647 = vrcp.f32 %v3119_v22  ;;  %v3120_v27 = vadd.f32 1.0, %v8644_v50 }
 0xc48   :  { %8649 = vrcp.f32 %v3120_v27 }
 0xc4f   :  { %v8646_v63 = vpop.eup %8645 }
 0xc50   :  { %v3130_v4 = vmul.f32 %v8646_v63, %v8642_v23  ;;  %v8648_v10 = vpop.eup %8647 }
 0xc51   :  { %v3129_v34 = vmul.f32 %v8648_v10, %v10701_v26 }
 0xc52   :  { %v8650_v39 = vpop.eup %8649 }
 0xc53   :  { %v10746_v40 = vadd.f32 %v3130_v4, %v3129_v34 }
 0xc55   :  { %8651 = vtanh.f32 %v10746_v40 }
 0xc5f   :  { %v8652_v47 = vpop.eup %8651 }
 0xc60   :  { %v3133_v35 = vmul.f32 %v8652_v47, %v8650_v39 }
 0xc62   :  { %6203 = vst [vmem:[%s12181_s6 + $0x70] sm:$0xff] %v3133_v35  ;;  %3207 = vmatmul.mubr.f32.vlgmr.msra.gmra.mrb[24].mxu0 %v3133_v35  ;;  %3278 = vmatmul.mubr.f32.vlgmr.msra.gmra.mrb[24].mxu1 %v3133_v35 }
 0xc63   :  { %7343 = vmatpush1.bf16.msra.mxu0 %v10272_v28  ;;  %7375 = vmatpush1.bf16.msra.mxu1 %v10281_v49 }
 0xc64   :  { %7345 = vmatprep.subr.bf16.mxu0 %v10295_v1  ;;  %7377 = vmatprep.subr.bf16.mxu1 %v10306_v46 }
 0xc65   :  { %3385 = vmatprep.mubr.f32.mxu0 %v8846_v3  ;;  %3456 = vmatprep.mubr.f32.mxu1 %v8846_v3 }
 0xc67   :  { %7347 = vmatpush1.bf16.msra.mxu0 %v10308_v9  ;;  %7379 = vmatpush1.bf16.msra.mxu1 %v10317_v21 }
 0xc68   :  { %7349 = vmatprep.subr.bf16.mxu0 %v10331_v37  ;;  %7381 = vmatprep.subr.bf16.mxu1 %v10342_v57 }
 0xc6b   :  { %7351 = vmatpush1.bf16.msra.mxu0 %v10344_v60  ;;  %7383 = vmatpush1.bf16.msra.mxu1 %v10353_v7 }
 0xc6c   :  { %7353 = vmatprep.subr.bf16.mxu0 %v10367_v42  ;;  %7385 = vmatprep.subr.bf16.mxu1 %v10378_v30 }
 0xc6f   :  { %7355 = vmatpush1.bf16.msra.mxu0 %v10380_v33  ;;  %7387 = vmatpush1.bf16.msra.mxu1 %v10389_v43 }
 0xc70   :  { %7357 = vmatprep.subr.bf16.mxu0 %v10403_v61  ;;  %7389 = vmatprep.subr.bf16.mxu1 %v10414_v6 }
 0xc73   :  { %7359 = vmatpush1.bf16.msra.mxu0 %v10416_v45  ;;  %7391 = vmatpush1.bf16.msra.mxu1 %v10425_v19 }
 0xc74   :  { %7361 = vmatprep.subr.bf16.mxu0 %v10439_v31  ;;  %7393 = vmatprep.subr.bf16.mxu1 %v10450_v44 }
 0xc77   :  { %7363 = vmatpush1.bf16.msra.mxu0 %v10452_v12  ;;  %7395 = vmatpush1.bf16.msra.mxu1 %v10461_v8 }
 0xc78   :  { %7365 = vmatprep.subr.bf16.mxu0 %v10475_v53  ;;  %7397 = vmatprep.subr.bf16.mxu1 %v10489_v17 }
 0xc7b   :  { %7367 = vmatpush1.bf16.msra.mxu0 %v10491_v20  ;;  %7399 = vmatpush1.bf16.msra.mxu1 %v10499_v36 }
 0xc7c   :  { %7369 = vmatprep.subr.bf16.mxu0 %v10514_v55  ;;  %7401 = vmatprep.subr.bf16.mxu1 %v10525_v16 }
 0xc7f   :  { %7371 = vmatpush1.bf16.msra.mxu0 %v10527_v59  ;;  %7403 = vmatpush1.bf16.msra.mxu1 %v10536_v54 }
 0xc80   :  { %7405 = vmatprep.subr.bf16.mxu0 %v10259_v11  ;;  %7437 = vmatprep.subr.bf16.mxu1 %v10270_v25 }
 0xd35   :  { %v3208_v26 = vpop.f32.mrb[24].mxu0  ;;  %v3279_v51 = vpop.f32.mrb[24].mxu1 }
 0xd36   :  { %v8276_v0 = vadd.f32 %v3208_v26, %v10596_v41  ;;  %v3210_v15 = vpop.f32.mrb[25].mxu0  ;;  %v3281_v13 = vpop.f32.mrb[25].mxu1  ;;  %v8292_v48 = vadd.f32 %v3279_v51, %v10604_v14 }
 0xd37   :  { %v8277_v52 = vadd.f32 %v3210_v15, %v10599_v5  ;;  %v8293_v62 = vadd.f32 %v3281_v13, %v10607_v24 }
 0xd38   :  { %v6204_v56 = vmul.f32 -1.442695, %v8276_v0  ;;  %v6206_v18 = vmul.f32 -1.442695, %v8292_v48 }
 0xd39   :  { %v6205_v2 = vmul.f32 -1.442695, %v8277_v52 }
 0xd3a   :  { %8653 = vpow2.f32 %v6204_v56 }
 0xd3b   :  { %8655 = vpow2.f32 %v6205_v2 }
 0xd3c   :  { %8657 = vtanh.f32 %v8293_v62 }
 0xd3d   :  { %8659 = vpow2.f32 %v6206_v18 }
 0xd44   :  { %v8654_v22 = vpop.eup %8653 }
 0xd45   :  { %v3297_v23 = vadd.f32 1.0, %v8654_v22  ;;  %v8656_v50 = vpop.eup %8655 }
 0xd46   :  { %v3298_v63 = vadd.f32 1.0, %v8656_v50  ;;  %v8658_v4 = vpop.eup %8657 }
 0xd47   :  { %8661 = vrcp.f32 %v3297_v23  ;;  %v8660_v10 = vpop.eup %8659 }
 0xd48   :  { %8663 = vrcp.f32 %v3298_v63  ;;  %v3299_v47 = vadd.f32 1.0, %v8660_v10 }
 0xd4a   :  { %8665 = vrcp.f32 %v3299_v47 }
 0xd51   :  { %v8662_v27 = vpop.eup %8661 }
 0xd52   :  { %v3309_v34 = vmul.f32 %v8662_v27, %v8658_v4  ;;  %v8664_v39 = vpop.eup %8663 }
 0xd53   :  { %v3308_v35 = vmul.f32 %v8664_v39, %v10746_v40 }
 0xd54   :  { %v8666_v51 = vpop.eup %8665 }
 0xd55   :  { %v10791_v26 = vadd.f32 %v3309_v34, %v3308_v35 }
 0xd57   :  { %8667 = vtanh.f32 %v10791_v26 }
 0xd61   :  { %v8668_v0 = vpop.eup %8667 }
 0xd62   :  { %v3312_v15 = vmul.f32 %v8668_v0, %v8666_v51 }
 0xd64   :  { %6207 = vst [vmem:[%s12181_s6 + $0x90] sm:$0xff] %v3312_v15  ;;  %3386 = vmatmul.mubr.f32.vlgmr.msra.gmra.mrb[26].mxu0 %v3312_v15  ;;  %3457 = vmatmul.mubr.f32.vlgmr.msra.gmra.mrb[26].mxu1 %v3312_v15 }
 0xd65   :  { %7407 = vmatpush1.bf16.msra.mxu0 %v10272_v28  ;;  %7439 = vmatpush1.bf16.msra.mxu1 %v10281_v49 }
 0xd66   :  { %7409 = vmatprep.subr.bf16.mxu0 %v10295_v1  ;;  %7441 = vmatprep.subr.bf16.mxu1 %v10306_v46 }
 0xd67   :  { %3564 = vmatprep.mubr.f32.mxu0 %v8846_v3  ;;  %3635 = vmatprep.mubr.f32.mxu1 %v8846_v3 }
 0xd69   :  { %7411 = vmatpush1.bf16.msra.mxu0 %v10308_v9  ;;  %7443 = vmatpush1.bf16.msra.mxu1 %v10317_v21 }
 0xd6a   :  { %7413 = vmatprep.subr.bf16.mxu0 %v10331_v37  ;;  %7445 = vmatprep.subr.bf16.mxu1 %v10342_v57 }
 0xd6d   :  { %7415 = vmatpush1.bf16.msra.mxu0 %v10344_v60  ;;  %7447 = vmatpush1.bf16.msra.mxu1 %v10353_v7 }
 0xd6e   :  { %7417 = vmatprep.subr.bf16.mxu0 %v10367_v42  ;;  %7449 = vmatprep.subr.bf16.mxu1 %v10378_v30 }
 0xd71   :  { %7419 = vmatpush1.bf16.msra.mxu0 %v10380_v33  ;;  %7451 = vmatpush1.bf16.msra.mxu1 %v10389_v43 }
 0xd72   :  { %7421 = vmatprep.subr.bf16.mxu0 %v10403_v61  ;;  %7453 = vmatprep.subr.bf16.mxu1 %v10414_v6 }
 0xd75   :  { %7423 = vmatpush1.bf16.msra.mxu0 %v10416_v45  ;;  %7455 = vmatpush1.bf16.msra.mxu1 %v10425_v19 }
 0xd76   :  { %7425 = vmatprep.subr.bf16.mxu0 %v10439_v31  ;;  %7457 = vmatprep.subr.bf16.mxu1 %v10450_v44 }
 0xd79   :  { %7427 = vmatpush1.bf16.msra.mxu0 %v10452_v12  ;;  %7459 = vmatpush1.bf16.msra.mxu1 %v10461_v8 }
 0xd7a   :  { %7429 = vmatprep.subr.bf16.mxu0 %v10475_v53  ;;  %7461 = vmatprep.subr.bf16.mxu1 %v10489_v17 }
 0xd7d   :  { %7431 = vmatpush1.bf16.msra.mxu0 %v10491_v20  ;;  %7463 = vmatpush1.bf16.msra.mxu1 %v10499_v36 }
 0xd7e   :  { %7433 = vmatprep.subr.bf16.mxu0 %v10514_v55  ;;  %7465 = vmatprep.subr.bf16.mxu1 %v10525_v16 }
 0xd81   :  { %7435 = vmatpush1.bf16.msra.mxu0 %v10527_v59  ;;  %7467 = vmatpush1.bf16.msra.mxu1 %v10536_v54 }
 0xd82   :  { %7469 = vmatprep.subr.bf16.mxu0 %v10259_v11  ;;  %7501 = vmatprep.subr.bf16.mxu1 %v10270_v25 }
 0xe37   :  { %v3387_v40 = vpop.f32.mrb[26].mxu0  ;;  %v3458_v13 = vpop.f32.mrb[26].mxu1 }
 0xe38   :  { %v8278_v52 = vadd.f32 %v3387_v40, %v10596_v41  ;;  %v3389_v56 = vpop.f32.mrb[27].mxu0  ;;  %v3460_v2 = vpop.f32.mrb[27].mxu1  ;;  %v8294_v22 = vadd.f32 %v3458_v13, %v10604_v14 }
 0xe39   :  { %v8279_v48 = vadd.f32 %v3389_v56, %v10599_v5  ;;  %v8295_v23 = vadd.f32 %v3460_v2, %v10607_v24  ;;  %v3883_v56 = vld [vmem:[%s12185_s3 + $0x30] sm:$0xff]  ;;  %v3886_v2 = vld [vmem:[%s12185_s3 + $0x48] sm:$0xff] }
 0xe3a   :  { %v6208_v62 = vmul.f32 -1.442695, %v8278_v52  ;;  %v6210_v50 = vmul.f32 -1.442695, %v8294_v22  ;;  %v3879_v52 = vld [vmem:[%s12185_s3 + $0x10] sm:$0xff]  ;;  %v3892_v22 = vld [vmem:[%s12185_s3 + $0x78] sm:$0xff] }
 0xe3b   :  { %v6209_v18 = vmul.f32 -1.442695, %v8279_v48 }
 0xe3c   :  { %8669 = vpow2.f32 %v6208_v62  ;;  %v3890_v62 = vld [vmem:[%s12185_s3 + $0x68] sm:$0xff] }
 0xe3d   :  { %8671 = vpow2.f32 %v6209_v18  ;;  %v3888_v18 = vld [vmem:[%s12185_s3 + $0x58] sm:$0xff] }
 0xe3e   :  { %8673 = vtanh.f32 %v8295_v23 }
 0xe3f   :  { %8675 = vpow2.f32 %v6210_v50 }
 0xe46   :  { %v8670_v11 = vpop.eup %8669 }
 0xe47   :  { %v3476_v63 = vadd.f32 1.0, %v8670_v11  ;;  %v8672_v25 = vpop.eup %8671  ;;  %v7630_v11 = vpack.c.bf16 %v3883_v56, %v3879_v52  ;;  %v3918_v52 = vld [vmem:[%s12185_s3 + $0x148] sm:$0xff] }
 0xe48   :  { %v3477_v4 = vadd.f32 1.0, %v8672_v25  ;;  %v8674_v10 = vpop.eup %8673  ;;  %v3889_v25 = vld [vmem:[%s12185_s3 + $0x60] sm:$0xff]  ;;  %v3922_v56 = vld [vmem:[%s12185_s3 + $0x168] sm:$0xff] }
 0xe49   :  { %8677 = vrcp.f32 %v3476_v63  ;;  %v8676_v27 = vpop.eup %8675  ;;  %v3885_v63 = vld [vmem:[%s12185_s3 + $0x40] sm:$0xff] }
 0xe4a   :  { %8679 = vrcp.f32 %v3477_v4  ;;  %v3478_v35 = vadd.f32 1.0, %v8676_v27  ;;  %v3891_v27 = vld [vmem:[%s12185_s3 + $0x70] sm:$0xff] }
 0xe4c   :  { %8681 = vrcp.f32 %v3478_v35  ;;  %v3898_v35 = vld [vmem:[%s12185_s3 + $0xa8] sm:$0xff] }
 0xe53   :  { %v8678_v34 = vpop.eup %8677 }
 0xe54   :  { %v3488_v39 = vmul.f32 %v8678_v34, %v8674_v10  ;;  %v8680_v47 = vpop.eup %8679  ;;  %v3887_v10 = vld [vmem:[%s12185_s3 + $0x50] sm:$0xff]  ;;  %v3894_v34 = vld [vmem:[%s12185_s3 + $0x88] sm:$0xff] }
 0xe55   :  { %v3487_v51 = vmul.f32 %v8680_v47, %v10791_v26  ;;  %v3881_v26 = vld [vmem:[%s12185_s3 + $0x20] sm:$0xff]  ;;  %v7632_v47 = vpack.c.bf16 %v3892_v22, %v3888_v18 }
 0xe56   :  { %v8682_v15 = vpop.eup %8681  ;;  %v3917_v22 = vld [vmem:[%s12185_s3 + $0x140] sm:$0xff] }
 0xe57   :  { %v10836_v0 = vadd.f32 %v3488_v39, %v3487_v51  ;;  %v7536_v39 = vpack.c.bf16 %v3890_v62, %v3886_v2  ;;  %v3896_v51 = vld [vmem:[%s12185_s3 + $0x98] sm:$0xff] }
 0xe58   :  { %v3920_v2 = vld [vmem:[%s12185_s3 + $0x158] sm:$0xff] }
 0xe59   :  { %8683 = vtanh.f32 %v10836_v0 }
 0xe63   :  { %v8684_v40 = vpop.eup %8683 }
 0xe64   :  { %v3491_v13 = vmul.f32 %v8684_v40, %v8682_v15  ;;  %v3854_v15 = vld [vmem:[%s12181_s6 + $0x8] sm:$0xff]  ;;  %v7538_v40 = vpack.c.bf16 %v3889_v25, %v3885_v63  ;;  %v3919_v63 = vld [vmem:[%s12185_s3 + $0x150] sm:$0xff] }
 0xe65   :  { %v3923_v25 = vld [vmem:[%s12185_s3 + $0x170] sm:$0xff] }
 0xe66   :  { %6211 = vst [vmem:[%s12181_s6 + $0xb0] sm:$0xff] %v3491_v13  ;;  %3565 = vmatmul.mubr.f32.vlgmr.msra.gmra.mrb[28].mxu0 %v3491_v13  ;;  %3636 = vmatmul.mubr.f32.vlgmr.msra.gmra.mrb[28].mxu1 %v3491_v13  ;;  %v7634_v13 = vpack.c.bf16 %v3891_v27, %v3887_v10  ;;  %v3930_v10 = vld [vmem:[%s12185_s3 + $0x1a8] sm:$0xff]  ;;  %v3928_v27 = vld [vmem:[%s12185_s3 + $0x198] sm:$0xff] }
 0xe67   :  { %7471 = vmatpush1.bf16.msra.mxu0 %v10272_v28  ;;  %7503 = vmatpush1.bf16.msra.mxu1 %v10281_v49  ;;  %v3878_v28 = vld [vmem:[%s12185_s3 + $0x8] sm:$0xff] }
 0xe68   :  { %7473 = vmatprep.subr.bf16.mxu0 %v10295_v1  ;;  %7505 = vmatprep.subr.bf16.mxu1 %v10306_v46  ;;  %v3882_v49 = vld [vmem:[%s12185_s3 + $0x28] sm:$0xff]  ;;  %v3880_v1 = vld [vmem:[%s12185_s3 + $0x18] sm:$0xff] }
 0xe69   :  { %3743 = vmatprep.mubr.f32.mxu0 %v8846_v3  ;;  %3814 = vmatprep.mubr.f32.mxu1 %v8846_v3  ;;  %v7532_v46 = vpack.c.bf16 %v3882_v49, %v3878_v28  ;;  %v3893_v28 = vld [vmem:[%s12185_s3 + $0x80] sm:$0xff] }
 0xe6a   :  { %v3897_v49 = vld [vmem:[%s12185_s3 + $0xa0] sm:$0xff] }
 0xe6b   :  { %7475 = vmatpush1.bf16.msra.mxu0 %v10308_v9  ;;  %7507 = vmatpush1.bf16.msra.mxu1 %v10317_v21  ;;  %v3884_v9 = vld [vmem:[%s12185_s3 + $0x38] sm:$0xff] }
 0xe6c   :  { %7477 = vmatprep.subr.bf16.mxu0 %v10331_v37  ;;  %7509 = vmatprep.subr.bf16.mxu1 %v10342_v57  ;;  %v7628_v21 = vpack.c.bf16 %v3884_v9, %v3880_v1  ;;  %v7540_v1 = vpack.c.bf16 %v3898_v35, %v3894_v34  ;;  %v3895_v9 = vld [vmem:[%s12185_s3 + $0x90] sm:$0xff]  ;;  %v3932_v34 = vld [vmem:[%s12185_s3 + $0x1b8] sm:$0xff]  ;;  %v3925_v35 = vld [vmem:[%s12185_s3 + $0x180] sm:$0xff] }
 0xe6f   :  { %7479 = vmatpush1.bf16.msra.mxu0 %v10344_v60  ;;  %7511 = vmatpush1.bf16.msra.mxu1 %v10353_v7 }
 0xe70   :  { %7481 = vmatprep.subr.bf16.mxu0 %v10367_v42  ;;  %7513 = vmatprep.subr.bf16.mxu1 %v10378_v30 }
 0xe73   :  { %7483 = vmatpush1.bf16.msra.mxu0 %v10380_v33  ;;  %7515 = vmatpush1.bf16.msra.mxu1 %v10389_v43 }
 0xe74   :  { %7485 = vmatprep.subr.bf16.mxu0 %v10403_v61  ;;  %7517 = vmatprep.subr.bf16.mxu1 %v10414_v6 }
 0xe77   :  { %7487 = vmatpush1.bf16.msra.mxu0 %v10416_v45  ;;  %7519 = vmatpush1.bf16.msra.mxu1 %v10425_v19 }
 0xe78   :  { %7489 = vmatprep.subr.bf16.mxu0 %v10439_v31  ;;  %7521 = vmatprep.subr.bf16.mxu1 %v10450_v44 }
 0xe7b   :  { %7491 = vmatpush1.bf16.msra.mxu0 %v10452_v12  ;;  %7523 = vmatpush1.bf16.msra.mxu1 %v10461_v8 }
 0xe7c   :  { %7493 = vmatprep.subr.bf16.mxu0 %v10475_v53  ;;  %7525 = vmatprep.subr.bf16.mxu1 %v10489_v17 }
 0xe7f   :  { %7495 = vmatpush1.bf16.msra.mxu0 %v10491_v20  ;;  %7527 = vmatpush1.bf16.msra.mxu1 %v10499_v36 }
 0xe80   :  { %7497 = vmatprep.subr.bf16.mxu0 %v10514_v55  ;;  %7529 = vmatprep.subr.bf16.mxu1 %v10525_v16 }
 0xe83   :  { %7499 = vmatpush1.bf16.msra.mxu0 %v10527_v59  ;;  %7531 = vmatpush1.bf16.msra.mxu1 %v10536_v54  ;;  %v3877_v54 = vld [vmem:[%s12185_s3] sm:$0xff] }
 0xe84   :  { %7533 = vmatprep.subr.bf16.mxu0 %v7532_v46  ;;  %7629 = vmatprep.subr.bf16.mxu1 %v7628_v21  ;;  %v7534_v50 = vpack.c.bf16 %v3881_v26, %v3877_v54  ;;  %v3899_v21 = vld [vmem:[%s12185_s3 + $0xb0] sm:$0xff] }
 0xe85   :  { %v3911_v54 = vld [vmem:[%s12185_s3 + $0x110] sm:$0xff] }
 0xe86   :  { %v3915_v26 = vld [vmem:[%s12185_s3 + $0x130] sm:$0xff] }
 0xe87   :  { %v7646_v18 = vpack.c.bf16 %v3915_v26, %v3911_v54 }
 0xf39   :  { %v3566_v37 = vpop.f32.mrb[28].mxu0  ;;  %v3637_v57 = vpop.f32.mrb[28].mxu1 }
 0xf3a   :  { %v8280_v60 = vadd.f32 %v3566_v37, %v10596_v41  ;;  %v3568_v7 = vpop.f32.mrb[29].mxu0  ;;  %v3639_v42 = vpop.f32.mrb[29].mxu1  ;;  %v8296_v61 = vadd.f32 %v3637_v57, %v10604_v14  ;;  %v3902_v37 = vld [vmem:[%s12185_s3 + $0xc8] sm:$0xff] }
 0xf3b   :  { %v8281_v30 = vadd.f32 %v3568_v7, %v10599_v5  ;;  %v8297_v6 = vadd.f32 %v3639_v42, %v10607_v24  ;;  %v3906_v57 = vld [vmem:[%s12185_s3 + $0xe8] sm:$0xff]  ;;  %v3908_v7 = vld [vmem:[%s12185_s3 + $0xf8] sm:$0xff]  ;;  %v7542_v42 = vpack.c.bf16 %v3897_v49, %v3893_v28 }
 0xf3c   :  { %v6212_v33 = vmul.f32 -1.442695, %v8280_v60  ;;  %v6214_v45 = vmul.f32 -1.442695, %v8296_v61  ;;  %v3904_v60 = vld [vmem:[%s12185_s3 + $0xd8] sm:$0xff]  ;;  %v7544_v61 = vpack.c.bf16 %v3906_v57, %v3902_v37  ;;  %v3934_v28 = vld [vmem:[%s12185_s3 + $0x1c8] sm:$0xff] }
 0xf3d   :  { %v6213_v43 = vmul.f32 -1.442695, %v8281_v30  ;;  %v7638_v30 = vpack.c.bf16 %v3899_v21, %v3895_v9  ;;  %v3938_v49 = vld [vmem:[%s12185_s3 + $0x1e8] sm:$0xff]  ;;  %v3933_v37 = vld [vmem:[%s12185_s3 + $0x1c0] sm:$0xff] }
 0xf3e   :  { %8685 = vpow2.f32 %v6212_v33  ;;  %v3901_v33 = vld [vmem:[%s12185_s3 + $0xc0] sm:$0xff] }
 0xf3f   :  { %8687 = vpow2.f32 %v6213_v43  ;;  %v3905_v43 = vld [vmem:[%s12185_s3 + $0xe0] sm:$0xff] }
 0xf40   :  { %8689 = vtanh.f32 %v8297_v6  ;;  %v7640_v6 = vpack.c.bf16 %v3908_v7, %v3904_v60  ;;  %v3937_v57 = vld [vmem:[%s12185_s3 + $0x1e0] sm:$0xff]  ;;  %v7560_v60 = vpack.c.bf16 %v3938_v49, %v3934_v28 }
 0xf41   :  { %8691 = vpow2.f32 %v6214_v45  ;;  %v3903_v45 = vld [vmem:[%s12185_s3 + $0xd0] sm:$0xff]  ;;  %v3965_v28 = vld [vmem:[%s12185_s3 + $0x2c0] sm:$0xff] }
 0xf42   :  { %v3969_v49 = vld [vmem:[%s12185_s3 + $0x2e0] sm:$0xff] }
 0xf48   :  { %v8686_v19 = vpop.eup %8685 }
 0xf49   :  { %v3655_v31 = vadd.f32 1.0, %v8686_v19  ;;  %v8688_v44 = vpop.eup %8687  ;;  %v3907_v19 = vld [vmem:[%s12185_s3 + $0xf0] sm:$0xff] }
 0xf4a   :  { %v3656_v12 = vadd.f32 1.0, %v8688_v44  ;;  %v8690_v8 = vpop.eup %8689  ;;  %v3914_v44 = vld [vmem:[%s12185_s3 + $0x128] sm:$0xff] }
 0xf4b   :  { %8693 = vrcp.f32 %v3655_v31  ;;  %v8692_v53 = vpop.eup %8691  ;;  %v3910_v31 = vld [vmem:[%s12185_s3 + $0x108] sm:$0xff] }
 0xf4c   :  { %8695 = vrcp.f32 %v3656_v12  ;;  %v3657_v55 = vadd.f32 1.0, %v8692_v53  ;;  %v3912_v12 = vld [vmem:[%s12185_s3 + $0x118] sm:$0xff]  ;;  %v7546_v53 = vpack.c.bf16 %v3905_v43, %v3901_v33  ;;  %v3942_v33 = vld [vmem:[%s12185_s3 + $0x208] sm:$0xff] }
 0xf4d   :  { %v3946_v43 = vld [vmem:[%s12185_s3 + $0x228] sm:$0xff] }
 0xf4e   :  { %8697 = vrcp.f32 %v3657_v55  ;;  %v7548_v55 = vpack.c.bf16 %v3914_v44, %v3910_v31  ;;  %v3941_v31 = vld [vmem:[%s12185_s3 + $0x200] sm:$0xff] }
 0xf4f   :  { %v3945_v44 = vld [vmem:[%s12185_s3 + $0x220] sm:$0xff] }
 0xf50   :  { %v7566_v54 = vpack.c.bf16 %v3945_v44, %v3941_v31  ;;  %v3982_v31 = vld [vmem:[%s12185_s3 + $0x348] sm:$0xff] }
 0xf51   :  { %v3986_v44 = vld [vmem:[%s12185_s3 + $0x368] sm:$0xff] }
 0xf55   :  { %v8694_v17 = vpop.eup %8693 }
 0xf56   :  { %v3667_v20 = vmul.f32 %v8694_v17, %v8690_v8  ;;  %v8696_v36 = vpop.eup %8695  ;;  %v3916_v8 = vld [vmem:[%s12185_s3 + $0x138] sm:$0xff]  ;;  %v7642_v17 = vpack.c.bf16 %v3907_v19, %v3903_v45  ;;  %v7562_v45 = vpack.c.bf16 %v3937_v57, %v3933_v37  ;;  %v3974_v37 = vld [vmem:[%s12185_s3 + $0x308] sm:$0xff] }
 0xf57   :  { %v3666_v16 = vmul.f32 %v8696_v36, %v10836_v0  ;;  %v3900_v0 = vld [vmem:[%s12185_s3 + $0xb8] sm:$0xff]  ;;  %v3913_v36 = vld [vmem:[%s12185_s3 + $0x120] sm:$0xff]  ;;  %v3978_v57 = vld [vmem:[%s12185_s3 + $0x328] sm:$0xff] }
 0xf58   :  { %v8698_v48 = vpop.eup %8697  ;;  %v7636_v46 = vpack.c.bf16 %v3900_v0, %v3896_v51  ;;  %v3929_v51 = vld [vmem:[%s12185_s3 + $0x1a0] sm:$0xff] }
 0xf59   :  { %v10891_v59 = vadd.f32 %v3667_v20, %v3666_v16  ;;  %v3909_v20 = vld [vmem:[%s12185_s3 + $0x100] sm:$0xff]  ;;  %v7644_v16 = vpack.c.bf16 %v3916_v8, %v3912_v12  ;;  %v7558_v9 = vpack.c.bf16 %v3929_v51, %v3925_v35  ;;  %v7564_v12 = vpack.c.bf16 %v3946_v43, %v3942_v33  ;;  %v3966_v35 = vld [vmem:[%s12185_s3 + $0x2c8] sm:$0xff] }
 0xf5a   :  { %v7550_v62 = vpack.c.bf16 %v3913_v36, %v3909_v20  ;;  %v3950_v20 = vld [vmem:[%s12185_s3 + $0x248] sm:$0xff]  ;;  %v3973_v33 = vld [vmem:[%s12185_s3 + $0x300] sm:$0xff] }
 0xf5b   :  { %8699 = vtanh.f32 %v10891_v59  ;;  %v3954_v36 = vld [vmem:[%s12185_s3 + $0x268] sm:$0xff]  ;;  %v3977_v43 = vld [vmem:[%s12185_s3 + $0x320] sm:$0xff] }
 0xf5c   :  { %v3970_v51 = vld [vmem:[%s12185_s3 + $0x2e8] sm:$0xff] }
 0xf65   :  { %v8700_v23 = vpop.eup %8699 }
 0xf66   :  { %v3670_v4 = vmul.f32 %v8700_v23, %v8698_v48  ;;  %v3924_v48 = vld [vmem:[%s12185_s3 + $0x178] sm:$0xff]  ;;  %v3921_v23 = vld [vmem:[%s12185_s3 + $0x160] sm:$0xff] }
 0xf68   :  { %6215 = vst [vmem:[%s12181_s6 + $0xd0] sm:$0xff] %v3670_v4  ;;  %3744 = vmatmul.mubr.f32.vlgmr.msra.gmra.mrb[30].mxu0 %v3670_v4  ;;  %3815 = vmatmul.mubr.f32.vlgmr.msra.gmra.mrb[30].mxu1 %v3670_v4  ;;  %v3926_v4 = vld [vmem:[%s12185_s3 + $0x188] sm:$0xff] }
 0xf69   :  { %7535 = vmatpush1.bf16.msra.mxu0 %v7534_v50  ;;  %7631 = vmatpush1.bf16.msra.mxu1 %v7630_v11  ;;  %v7552_v50 = vpack.c.bf16 %v3922_v56, %v3918_v52  ;;  %v7648_v11 = vpack.c.bf16 %v3924_v48, %v3920_v2  ;;  %v7556_v0 = vpack.c.bf16 %v3930_v10, %v3926_v4  ;;  %v3949_v52 = vld [vmem:[%s12185_s3 + $0x240] sm:$0xff] }
 0xf6a   :  { %4156 = vmatprep.mubr.f32.mxu0 %v3854_v15  ;;  %4382 = vmatprep.mubr.f32.mxu1 %v3854_v15  ;;  %v7652_v15 = vpack.c.bf16 %v3932_v34, %v3928_v27  ;;  %v3953_v56 = vld [vmem:[%s12185_s3 + $0x260] sm:$0xff]  ;;  %v7568_v2 = vpack.c.bf16 %v3954_v36, %v3950_v20 }
 0xf6b   :  { %7537 = vmatprep.subr.bf16.mxu0 %v7536_v39  ;;  %7633 = vmatprep.subr.bf16.mxu1 %v7632_v47  ;;  %v7554_v39 = vpack.c.bf16 %v3921_v23, %v3917_v22  ;;  %v7650_v47 = vpack.c.bf16 %v3923_v25, %v3919_v63  ;;  %v3958_v22 = vld [vmem:[%s12185_s3 + $0x288] sm:$0xff]  ;;  %v7570_v63 = vpack.c.bf16 %v3953_v56, %v3949_v52  ;;  %v3957_v4 = vld [vmem:[%s12185_s3 + $0x280] sm:$0xff] }
 0xf6c   :  { %v3962_v23 = vld [vmem:[%s12185_s3 + $0x2a8] sm:$0xff]  ;;  %v3961_v10 = vld [vmem:[%s12185_s3 + $0x2a0] sm:$0xff] }
 0xf6d   :  { %7539 = vmatpush1.bf16.msra.mxu0 %v7538_v40  ;;  %7635 = vmatpush1.bf16.msra.mxu1 %v7634_v13  ;;  %v3927_v40 = vld [vmem:[%s12185_s3 + $0x190] sm:$0xff]  ;;  %v7572_v27 = vpack.c.bf16 %v3962_v23, %v3958_v22  ;;  %v3981_v20 = vld [vmem:[%s12185_s3 + $0x340] sm:$0xff]  ;;  %v3990_v52 = vld [vmem:[%s12185_s3 + $0x388] sm:$0xff] }
 0xf6e   :  { %7541 = vmatprep.subr.bf16.mxu0 %v7540_v1  ;;  %7637 = vmatprep.subr.bf16.mxu1 %v7636_v46  ;;  %v3931_v13 = vld [vmem:[%s12185_s3 + $0x1b0] sm:$0xff]  ;;  %v3936_v1 = vld [vmem:[%s12185_s3 + $0x1d8] sm:$0xff]  ;;  %v3985_v36 = vld [vmem:[%s12185_s3 + $0x360] sm:$0xff] }
 0xf6f   :  { %v3940_v46 = vld [vmem:[%s12185_s3 + $0x1f8] sm:$0xff]  ;;  %v7654_v21 = vpack.c.bf16 %v3931_v13, %v3927_v40  ;;  %v7574_v40 = vpack.c.bf16 %v3961_v10, %v3957_v4  ;;  %v3994_v56 = vld [vmem:[%s12185_s3 + $0x3a8] sm:$0xff]  ;;  %v3989_v22 = vld [vmem:[%s12185_s3 + $0x380] sm:$0xff] }
 0xf70   :  { %v7656_v7 = vpack.c.bf16 %v3940_v46, %v3936_v1  ;;  %v7576_v1 = vpack.c.bf16 %v3970_v51, %v3966_v35  ;;  %v3993_v23 = vld [vmem:[%s12185_s3 + $0x3a0] sm:$0xff]  ;;  %v3998_v4 = vld [vmem:[%s12185_s3 + $0x3c8] sm:$0xff] }
 0xf71   :  { %7543 = vmatpush1.bf16.msra.mxu0 %v7542_v42  ;;  %7639 = vmatpush1.bf16.msra.mxu1 %v7638_v30  ;;  %v3935_v42 = vld [vmem:[%s12185_s3 + $0x1d0] sm:$0xff]  ;;  %v4002_v10 = vld [vmem:[%s12185_s3 + $0x3e8] sm:$0xff]  ;;  %v3997_v35 = vld [vmem:[%s12185_s3 + $0x3c0] sm:$0xff] }
 0xf72   :  { %7545 = vmatprep.subr.bf16.mxu0 %v7544_v61  ;;  %7641 = vmatprep.subr.bf16.mxu1 %v7640_v6  ;;  %v3939_v30 = vld [vmem:[%s12185_s3 + $0x1f0] sm:$0xff]  ;;  %v3944_v61 = vld [vmem:[%s12185_s3 + $0x218] sm:$0xff]  ;;  %v4001_v51 = vld [vmem:[%s12185_s3 + $0x3e0] sm:$0xff] }
 0xf73   :  { %v3948_v6 = vld [vmem:[%s12185_s3 + $0x238] sm:$0xff]  ;;  %v7658_v19 = vpack.c.bf16 %v3939_v30, %v3935_v42  ;;  %v7578_v42 = vpack.c.bf16 %v3969_v49, %v3965_v28  ;;  %v4006_v28 = vld [vmem:[%s12185_s3 + $0x408] sm:$0xff] }
 0xf74   :  { %v7660_v8 = vpack.c.bf16 %v3948_v6, %v3944_v61  ;;  %v7580_v61 = vpack.c.bf16 %v3978_v57, %v3974_v37  ;;  %v4010_v49 = vld [vmem:[%s12185_s3 + $0x428] sm:$0xff] }
 0xf75   :  { %7547 = vmatpush1.bf16.msra.mxu0 %v7546_v53  ;;  %7643 = vmatpush1.bf16.msra.mxu1 %v7642_v17  ;;  %v3943_v53 = vld [vmem:[%s12185_s3 + $0x210] sm:$0xff]  ;;  %v7596_v37 = vpack.c.bf16 %v4010_v49, %v4006_v28  ;;  %v4038_v28 = vld [vmem:[%s12185_s3 + $0x508] sm:$0xff] }
 0xf76   :  { %7549 = vmatprep.subr.bf16.mxu0 %v7548_v55  ;;  %7645 = vmatprep.subr.bf16.mxu1 %v7644_v16  ;;  %v3947_v17 = vld [vmem:[%s12185_s3 + $0x230] sm:$0xff]  ;;  %v3952_v55 = vld [vmem:[%s12185_s3 + $0x258] sm:$0xff]  ;;  %v4042_v49 = vld [vmem:[%s12185_s3 + $0x528] sm:$0xff] }
 0xf77   :  { %v3956_v16 = vld [vmem:[%s12185_s3 + $0x278] sm:$0xff]  ;;  %v7662_v26 = vpack.c.bf16 %v3947_v17, %v3943_v53  ;;  %v7582_v53 = vpack.c.bf16 %v3977_v43, %v3973_v33  ;;  %v4014_v33 = vld [vmem:[%s12185_s3 + $0x448] sm:$0xff] }
 0xf78   :  { %v7664_v48 = vpack.c.bf16 %v3956_v16, %v3952_v55  ;;  %v7584_v55 = vpack.c.bf16 %v3986_v44, %v3982_v31  ;;  %v4018_v43 = vld [vmem:[%s12185_s3 + $0x468] sm:$0xff] }
 0xf79   :  { %7551 = vmatpush1.bf16.msra.mxu0 %v7550_v62  ;;  %7647 = vmatpush1.bf16.msra.mxu1 %v7646_v18  ;;  %v3951_v62 = vld [vmem:[%s12185_s3 + $0x250] sm:$0xff]  ;;  %v3857_v31 = vld [vmem:[%s12181_s6 + $0x28] sm:$0xff] }
 0xf7a   :  { %7553 = vmatprep.subr.bf16.mxu0 %v7552_v50  ;;  %7649 = vmatprep.subr.bf16.mxu1 %v7648_v11  ;;  %v3955_v18 = vld [vmem:[%s12185_s3 + $0x270] sm:$0xff]  ;;  %v3960_v50 = vld [vmem:[%s12185_s3 + $0x298] sm:$0xff] }
 0xf7b   :  { %v3964_v11 = vld [vmem:[%s12185_s3 + $0x2b8] sm:$0xff]  ;;  %v7666_v25 = vpack.c.bf16 %v3955_v18, %v3951_v62  ;;  %v7586_v62 = vpack.c.bf16 %v3985_v36, %v3981_v20  ;;  %v4015_v20 = vld [vmem:[%s12185_s3 + $0x450] sm:$0xff] }
 0xf7c   :  { %v7668_v34 = vpack.c.bf16 %v3964_v11, %v3960_v50  ;;  %v7588_v50 = vpack.c.bf16 %v3994_v56, %v3990_v52  ;;  %v4019_v36 = vld [vmem:[%s12185_s3 + $0x470] sm:$0xff]  ;;  %v3856_v52 = vld [vmem:[%s12181_s6 + $0x20] sm:$0xff] }
 0xf7d   :  { %7555 = vmatpush1.bf16.msra.mxu0 %v7554_v39  ;;  %7651 = vmatpush1.bf16.msra.mxu1 %v7650_v47  ;;  %v3959_v39 = vld [vmem:[%s12185_s3 + $0x290] sm:$0xff] }
 0xf7e   :  { %7557 = vmatprep.subr.bf16.mxu0 %v7556_v0  ;;  %7653 = vmatprep.subr.bf16.mxu1 %v7652_v15  ;;  %v3963_v47 = vld [vmem:[%s12185_s3 + $0x2b0] sm:$0xff]  ;;  %v3968_v0 = vld [vmem:[%s12185_s3 + $0x2d8] sm:$0xff] }
 0xf7f   :  { %v3972_v15 = vld [vmem:[%s12185_s3 + $0x2f8] sm:$0xff]  ;;  %v7670_v13 = vpack.c.bf16 %v3963_v47, %v3959_v39  ;;  %v7590_v39 = vpack.c.bf16 %v3993_v23, %v3989_v22 }
 0xf80   :  { %v7672_v46 = vpack.c.bf16 %v3972_v15, %v3968_v0  ;;  %v7592_v0 = vpack.c.bf16 %v4002_v10, %v3998_v4  ;;  %v4032_v4 = vld [vmem:[%s12185_s3 + $0x4d8] sm:$0xff] }
 0xf81   :  { %7559 = vmatpush1.bf16.msra.mxu0 %v7558_v9  ;;  %7655 = vmatpush1.bf16.msra.mxu1 %v7654_v21  ;;  %v3967_v9 = vld [vmem:[%s12185_s3 + $0x2d0] sm:$0xff]  ;;  %v4036_v10 = vld [vmem:[%s12185_s3 + $0x4f8] sm:$0xff] }
 0xf82   :  { %7561 = vmatprep.subr.bf16.mxu0 %v7560_v60  ;;  %7657 = vmatprep.subr.bf16.mxu1 %v7656_v7  ;;  %v3971_v21 = vld [vmem:[%s12185_s3 + $0x2f0] sm:$0xff]  ;;  %v3976_v60 = vld [vmem:[%s12185_s3 + $0x318] sm:$0xff] }
 0xf83   :  { %v3980_v7 = vld [vmem:[%s12185_s3 + $0x338] sm:$0xff]  ;;  %v7674_v30 = vpack.c.bf16 %v3971_v21, %v3967_v9  ;;  %v7594_v9 = vpack.c.bf16 %v4001_v51, %v3997_v35  ;;  %v4029_v35 = vld [vmem:[%s12185_s3 + $0x4c0] sm:$0xff] }
 0xf84   :  { %v7676_v6 = vpack.c.bf16 %v3980_v7, %v3976_v60  ;;  %v4005_v60 = vld [vmem:[%s12185_s3 + $0x400] sm:$0xff] }
 0xf85   :  { %7563 = vmatpush1.bf16.msra.mxu0 %v7562_v45  ;;  %7659 = vmatpush1.bf16.msra.mxu1 %v7658_v19  ;;  %v3975_v45 = vld [vmem:[%s12185_s3 + $0x310] sm:$0xff]  ;;  %v4009_v7 = vld [vmem:[%s12185_s3 + $0x420] sm:$0xff] }
 0xf86   :  { %7565 = vmatprep.subr.bf16.mxu0 %v7564_v12  ;;  %7661 = vmatprep.subr.bf16.mxu1 %v7660_v8  ;;  %v3979_v19 = vld [vmem:[%s12185_s3 + $0x330] sm:$0xff]  ;;  %v3984_v12 = vld [vmem:[%s12185_s3 + $0x358] sm:$0xff]  ;;  %v4033_v51 = vld [vmem:[%s12185_s3 + $0x4e0] sm:$0xff] }
 0xf87   :  { %v3988_v8 = vld [vmem:[%s12185_s3 + $0x378] sm:$0xff]  ;;  %v7678_v17 = vpack.c.bf16 %v3979_v19, %v3975_v45  ;;  %v3853_v45 = vld [vmem:[%s12181_s6] sm:$0xff]  ;;  %v7598_v19 = vpack.c.bf16 %v4009_v7, %v4005_v60 }
 0xf88   :  { %v7680_v16 = vpack.c.bf16 %v3988_v8, %v3984_v12  ;;  %v4013_v12 = vld [vmem:[%s12185_s3 + $0x440] sm:$0xff] }
 0xf89   :  { %7567 = vmatpush1.bf16.msra.mxu0 %v7566_v54  ;;  %7663 = vmatpush1.bf16.msra.mxu1 %v7662_v26  ;;  %v3983_v54 = vld [vmem:[%s12185_s3 + $0x350] sm:$0xff]  ;;  %v4017_v8 = vld [vmem:[%s12185_s3 + $0x460] sm:$0xff] }
 0xf8a   :  { %7569 = vmatprep.subr.bf16.mxu0 %v7568_v2  ;;  %7665 = vmatprep.subr.bf16.mxu1 %v7664_v48  ;;  %v3987_v26 = vld [vmem:[%s12185_s3 + $0x370] sm:$0xff]  ;;  %v3992_v2 = vld [vmem:[%s12185_s3 + $0x398] sm:$0xff]  ;;  %v7602_v56 = vpack.c.bf16 %v4017_v8, %v4013_v12  ;;  %v4037_v60 = vld [vmem:[%s12185_s3 + $0x500] sm:$0xff] }
 0xf8b   :  { %v3996_v48 = vld [vmem:[%s12185_s3 + $0x3b8] sm:$0xff]  ;;  %v7682_v18 = vpack.c.bf16 %v3987_v26, %v3983_v54  ;;  %v4041_v7 = vld [vmem:[%s12185_s3 + $0x520] sm:$0xff]  ;;  %v3869_v12 = vld [vmem:[%s12181_s6 + $0xa8] sm:$0xff] }
 0xf8c   :  { %v7684_v11 = vpack.c.bf16 %v3996_v48, %v3992_v2  ;;  %v4024_v54 = vld [vmem:[%s12185_s3 + $0x498] sm:$0xff]  ;;  %v3860_v2 = vld [vmem:[%s12181_s6 + $0x48] sm:$0xff]  ;;  %v7698_v48 = vpack.c.bf16 %v4019_v36, %v4015_v20 }
 0xf8d   :  { %7571 = vmatpush1.bf16.msra.mxu0 %v7570_v63  ;;  %7667 = vmatpush1.bf16.msra.mxu1 %v7666_v25  ;;  %v3991_v63 = vld [vmem:[%s12185_s3 + $0x390] sm:$0xff]  ;;  %v4028_v26 = vld [vmem:[%s12185_s3 + $0x4b8] sm:$0xff] }
 0xf8e   :  { %7573 = vmatprep.subr.bf16.mxu0 %v7572_v27  ;;  %7669 = vmatprep.subr.bf16.mxu1 %v7668_v34  ;;  %v3995_v25 = vld [vmem:[%s12185_s3 + $0x3b0] sm:$0xff]  ;;  %v4000_v27 = vld [vmem:[%s12185_s3 + $0x3d8] sm:$0xff]  ;;  %v7700_v23 = vpack.c.bf16 %v4028_v26, %v4024_v54  ;;  %v4054_v54 = vld [vmem:[%s12185_s3 + $0x588] sm:$0xff] }
 0xf8f   :  { %v4004_v34 = vld [vmem:[%s12185_s3 + $0x3f8] sm:$0xff]  ;;  %v7686_v47 = vpack.c.bf16 %v3995_v25, %v3991_v63  ;;  %v4030_v63 = vld [vmem:[%s12185_s3 + $0x4c8] sm:$0xff] }
 0xf90   :  { %v7688_v15 = vpack.c.bf16 %v4004_v34, %v4000_v27  ;;  %v4034_v25 = vld [vmem:[%s12185_s3 + $0x4e8] sm:$0xff]  ;;  %v3859_v27 = vld [vmem:[%s12181_s6 + $0x40] sm:$0xff] }
 0xf91   :  { %7575 = vmatpush1.bf16.msra.mxu0 %v7574_v40  ;;  %7671 = vmatpush1.bf16.msra.mxu1 %v7670_v13  ;;  %v3999_v40 = vld [vmem:[%s12185_s3 + $0x3d0] sm:$0xff]  ;;  %v4058_v26 = vld [vmem:[%s12185_s3 + $0x5a8] sm:$0xff] }
 0xf92   :  { %7577 = vmatprep.subr.bf16.mxu0 %v7576_v1  ;;  %7673 = vmatprep.subr.bf16.mxu1 %v7672_v46  ;;  %v4003_v13 = vld [vmem:[%s12185_s3 + $0x3f0] sm:$0xff]  ;;  %v4008_v1 = vld [vmem:[%s12185_s3 + $0x418] sm:$0xff] }
 0xf93   :  { %v4012_v46 = vld [vmem:[%s12185_s3 + $0x438] sm:$0xff]  ;;  %v7690_v21 = vpack.c.bf16 %v4003_v13, %v3999_v40  ;;  %v4031_v40 = vld [vmem:[%s12185_s3 + $0x4d0] sm:$0xff] }
 0xf94   :  { %v7692_v57 = vpack.c.bf16 %v4012_v46, %v4008_v1  ;;  %v4035_v13 = vld [vmem:[%s12185_s3 + $0x4f0] sm:$0xff]  ;;  %v4040_v1 = vld [vmem:[%s12185_s3 + $0x518] sm:$0xff] }
 0xf95   :  { %7579 = vmatpush1.bf16.msra.mxu0 %v7578_v42  ;;  %7675 = vmatpush1.bf16.msra.mxu1 %v7674_v30  ;;  %v4007_v42 = vld [vmem:[%s12185_s3 + $0x410] sm:$0xff]  ;;  %v4044_v46 = vld [vmem:[%s12185_s3 + $0x538] sm:$0xff] }
 0xf96   :  { %7581 = vmatprep.subr.bf16.mxu0 %v7580_v61  ;;  %7677 = vmatprep.subr.bf16.mxu1 %v7676_v6  ;;  %v4011_v30 = vld [vmem:[%s12185_s3 + $0x430] sm:$0xff]  ;;  %v4016_v61 = vld [vmem:[%s12185_s3 + $0x458] sm:$0xff] }
 0xf97   :  { %v4020_v6 = vld [vmem:[%s12185_s3 + $0x478] sm:$0xff]  ;;  %v7694_v44 = vpack.c.bf16 %v4011_v30, %v4007_v42  ;;  %v7612_v42 = vpack.c.bf16 %v4042_v49, %v4038_v28  ;;  %v7708_v30 = vpack.c.bf16 %v4044_v46, %v4040_v1  ;;  %v4067_v28 = vld [vmem:[%s12185_s3 + $0x5f0] sm:$0xff]  ;;  %v3875_v49 = vld [vmem:[%s12181_s6 + $0xe8] sm:$0xff] }
 0xf98   :  { %v3874_v1 = vld [vmem:[%s12181_s6 + $0xe0] sm:$0xff] }
 0xf99   :  { %7583 = vmatpush1.bf16.msra.mxu0 %v7582_v53  ;;  %7679 = vmatpush1.bf16.msra.mxu1 %v7678_v17  ;;  %v7600_v53 = vpack.c.bf16 %v4018_v43, %v4014_v33  ;;  %v7696_v17 = vpack.c.bf16 %v4020_v6, %v4016_v61  ;;  %v4039_v33 = vld [vmem:[%s12185_s3 + $0x510] sm:$0xff]  ;;  %v4046_v61 = vld [vmem:[%s12185_s3 + $0x548] sm:$0xff] }
 0xf9a   :  { %7585 = vmatprep.subr.bf16.mxu0 %v7584_v55  ;;  %7681 = vmatprep.subr.bf16.mxu1 %v7680_v16  ;;  %v4022_v55 = vld [vmem:[%s12185_s3 + $0x488] sm:$0xff]  ;;  %v4043_v43 = vld [vmem:[%s12185_s3 + $0x530] sm:$0xff] }
 0xf9b   :  { %v4026_v16 = vld [vmem:[%s12185_s3 + $0x4a8] sm:$0xff]  ;;  %v7710_v8 = vpack.c.bf16 %v4043_v43, %v4039_v33  ;;  %v6221_v33 = vld [vmem:[%s12182_s4 + $0x400] sm:$0xff] }
 0xf9c   :  { %v7604_v22 = vpack.c.bf16 %v4026_v16, %v4022_v55  ;;  %v4050_v6 = vld [vmem:[%s12185_s3 + $0x568] sm:$0xff]  ;;  %v4047_v55 = vld [vmem:[%s12185_s3 + $0x550] sm:$0xff]  ;;  %v6225_v43 = vld [vmem:[%s12182_s4 + $0x420] sm:$0xff] }
 0xf9d   :  { %7587 = vmatpush1.bf16.msra.mxu0 %v7586_v62  ;;  %7683 = vmatpush1.bf16.msra.mxu1 %v7682_v18  ;;  %v4021_v62 = vld [vmem:[%s12185_s3 + $0x480] sm:$0xff]  ;;  %v7616_v20 = vpack.c.bf16 %v4050_v6, %v4046_v61  ;;  %v4051_v16 = vld [vmem:[%s12185_s3 + $0x570] sm:$0xff] }
 0xf9e   :  { %7589 = vmatprep.subr.bf16.mxu0 %v7588_v50  ;;  %7685 = vmatprep.subr.bf16.mxu1 %v7684_v11  ;;  %v4025_v18 = vld [vmem:[%s12185_s3 + $0x4a0] sm:$0xff]  ;;  %v4023_v50 = vld [vmem:[%s12185_s3 + $0x490] sm:$0xff] }
 0xf9f   :  { %v4027_v11 = vld [vmem:[%s12185_s3 + $0x4b0] sm:$0xff]  ;;  %v7606_v34 = vpack.c.bf16 %v4025_v18, %v4021_v62  ;;  %v3872_v62 = vld [vmem:[%s12181_s6 + $0xc8] sm:$0xff]  ;;  %v7714_v18 = vpack.c.bf16 %v4051_v16, %v4047_v55  ;;  %v6233_v55 = vld [vmem:[%s12182_s4 + $0x460] sm:$0xff] }
 0xfa0   :  { %v3861_v61 = vld [vmem:[%s12181_s6 + $0x50] sm:$0xff] }
 0xfa1   :  { %7591 = vmatpush1.bf16.msra.mxu0 %v7590_v39  ;;  %7687 = vmatpush1.bf16.msra.mxu1 %v7686_v47  ;;  %v3863_v39 = vld [vmem:[%s12181_s6 + $0x68] sm:$0xff]  ;;  %v7702_v47 = vpack.c.bf16 %v4027_v11, %v4023_v50  ;;  %v7620_v50 = vpack.c.bf16 %v4058_v26, %v4054_v54  ;;  %v3864_v16 = vld [vmem:[%s12181_s6 + $0x70] sm:$0xff] }
 0xfa2   :  { %7593 = vmatprep.subr.bf16.mxu0 %v7592_v0  ;;  %7689 = vmatprep.subr.bf16.mxu1 %v7688_v15  ;;  %v7608_v0 = vpack.c.bf16 %v4034_v25, %v4030_v63  ;;  %v7704_v15 = vpack.c.bf16 %v4036_v10, %v4032_v4  ;;  %v4055_v63 = vld [vmem:[%s12185_s3 + $0x590] sm:$0xff]  ;;  %v4062_v4 = vld [vmem:[%s12185_s3 + $0x5c8] sm:$0xff] }
 0xfa3   :  { %v4059_v25 = vld [vmem:[%s12185_s3 + $0x5b0] sm:$0xff]  ;;  %v4066_v10 = vld [vmem:[%s12185_s3 + $0x5e8] sm:$0xff] }
 0xfa5   :  { %7595 = vmatpush1.bf16.msra.mxu0 %v7594_v9  ;;  %7691 = vmatpush1.bf16.msra.mxu1 %v7690_v21  ;;  %v3862_v9 = vld [vmem:[%s12181_s6 + $0x60] sm:$0xff]  ;;  %v7610_v21 = vpack.c.bf16 %v4033_v51, %v4029_v35  ;;  %v7718_v35 = vpack.c.bf16 %v4059_v25, %v4055_v63  ;;  %v3867_v63 = vld [vmem:[%s12181_s6 + $0x90] sm:$0xff] }
 0xfa6   :  { %7597 = vmatprep.subr.bf16.mxu0 %v7596_v37  ;;  %7693 = vmatprep.subr.bf16.mxu1 %v7692_v57  ;;  %v3866_v37 = vld [vmem:[%s12181_s6 + $0x88] sm:$0xff]  ;;  %v7706_v57 = vpack.c.bf16 %v4035_v13, %v4031_v40  ;;  %v4061_v51 = vld [vmem:[%s12185_s3 + $0x5c0] sm:$0xff]  ;;  %v4063_v13 = vld [vmem:[%s12185_s3 + $0x5d0] sm:$0xff] }
 0xfa8   :  { %4157 = vmatmul.mubr.f32.vlgmr.msra.gmra.mrb[32].mxu0 %v3853_v45  ;;  %4383 = vmatmul.mubr.f32.vlgmr.msra.gmra.mrb[32].mxu1 %v3853_v45  ;;  %v4048_v45 = vld [vmem:[%s12185_s3 + $0x558] sm:$0xff] }
 0xfa9   :  { %4162 = vmatprep.mubr.f32.mxu0 %v3857_v31  ;;  %7599 = vmatpush1.bf16.msra.mxu0 %v7598_v19  ;;  %v4052_v19 = vld [vmem:[%s12185_s3 + $0x578] sm:$0xff] }
 0xfaa   :  { %4388 = vmatprep.mubr.f32.mxu1 %v3857_v31  ;;  %7695 = vmatpush1.bf16.msra.mxu1 %v7694_v44  ;;  %v3865_v31 = vld [vmem:[%s12181_s6 + $0x80] sm:$0xff]  ;;  %v7614_v44 = vpack.c.bf16 %v4041_v7, %v4037_v60  ;;  %v7712_v36 = vpack.c.bf16 %v4052_v19, %v4048_v45  ;;  %v6226_v60 = vld [vmem:[%s12182_s4 + $0x428] sm:$0xff]  ;;  %v6224_v7 = vld [vmem:[%s12182_s4 + $0x418] sm:$0xff]  ;;  %v11546_v45 = vpack.c.bf16 %v6225_v43, %v6221_v33 }
 0xfab   :  { %7601 = vmatprep.subr.bf16.mxu0 %v7600_v53  ;;  %7697 = vmatprep.subr.bf16.mxu1 %v7696_v17  ;;  %v4045_v53 = vld [vmem:[%s12185_s3 + $0x540] sm:$0xff]  ;;  %v6223_v19 = vld [vmem:[%s12182_s4 + $0x410] sm:$0xff] }
 0xfac   :  { %4163 = vmatmul.mubr.f32.gmra.mrb[34].mxu0 %v3856_v52  ;;  %4389 = vmatmul.mubr.f32.gmra.mrb[34].mxu1 %v3856_v52  ;;  %v4049_v17 = vld [vmem:[%s12185_s3 + $0x560] sm:$0xff]  ;;  %v4056_v52 = vld [vmem:[%s12185_s3 + $0x598] sm:$0xff] }
 0xfad   :  { %4168 = vmatprep.mubr.f32.mxu0 %v3860_v2  ;;  %7603 = vmatpush1.bf16.msra.mxu0 %v7602_v56  ;;  %v4060_v56 = vld [vmem:[%s12185_s3 + $0x5b8] sm:$0xff]  ;;  %v6257_v33 = vld [vmem:[%s12182_s4 + $0x520] sm:$0xff] }
 0xfae   :  { %4394 = vmatprep.mubr.f32.mxu1 %v3860_v2  ;;  %7699 = vmatpush1.bf16.msra.mxu1 %v7698_v48  ;;  %v3868_v2 = vld [vmem:[%s12181_s6 + $0xa0] sm:$0xff]  ;;  %v7618_v48 = vpack.c.bf16 %v4049_v17, %v4045_v53  ;;  %v7716_v11 = vpack.c.bf16 %v4060_v56, %v4056_v52  ;;  %v6232_v53 = vld [vmem:[%s12182_s4 + $0x458] sm:$0xff]  ;;  %v6231_v52 = vld [vmem:[%s12182_s4 + $0x450] sm:$0xff] }
 0xfaf   :  { %7605 = vmatprep.subr.bf16.mxu0 %v7604_v22  ;;  %7701 = vmatprep.subr.bf16.mxu1 %v7700_v23  ;;  %v4053_v22 = vld [vmem:[%s12185_s3 + $0x580] sm:$0xff]  ;;  %v6235_v56 = vld [vmem:[%s12182_s4 + $0x470] sm:$0xff] }
 0xfb0   :  { %4169 = vmatmul.mubr.f32.gmra.mrb[36].mxu0 %v3859_v27  ;;  %4395 = vmatmul.mubr.f32.gmra.mrb[36].mxu1 %v3859_v27  ;;  %v4057_v23 = vld [vmem:[%s12185_s3 + $0x5a0] sm:$0xff]  ;;  %v4064_v27 = vld [vmem:[%s12185_s3 + $0x5d8] sm:$0xff] }
 0xfb1   :  { %4174 = vmatprep.mubr.f32.mxu0 %v3863_v39  ;;  %7607 = vmatpush1.bf16.msra.mxu0 %v7606_v34  ;;  %v4068_v34 = vld [vmem:[%s12185_s3 + $0x5f8] sm:$0xff] }
 0xfb2   :  { %4400 = vmatprep.mubr.f32.mxu1 %v3863_v39  ;;  %7703 = vmatpush1.bf16.msra.mxu1 %v7702_v47  ;;  %v3871_v39 = vld [vmem:[%s12181_s6 + $0xc0] sm:$0xff]  ;;  %v7622_v47 = vpack.c.bf16 %v4057_v23, %v4053_v22  ;;  %v7720_v40 = vpack.c.bf16 %v4068_v34, %v4064_v27  ;;  %v6244_v23 = vld [vmem:[%s12182_s4 + $0x4b8] sm:$0xff]  ;;  %v6243_v27 = vld [vmem:[%s12182_s4 + $0x4b0] sm:$0xff] }
 0xfb3   :  { %7609 = vmatprep.subr.bf16.mxu0 %v7608_v0  ;;  %7705 = vmatprep.subr.bf16.mxu1 %v7704_v15  ;;  %v4065_v0 = vld [vmem:[%s12185_s3 + $0x5e0] sm:$0xff]  ;;  %v7624_v15 = vpack.c.bf16 %v4066_v10, %v4062_v4  ;;  %v6239_v10 = vld [vmem:[%s12182_s4 + $0x490] sm:$0xff] }
 0xfb4   :  { %4175 = vmatmul.mubr.f32.gmra.mrb[38].mxu0 %v3862_v9  ;;  %4401 = vmatmul.mubr.f32.gmra.mrb[38].mxu1 %v3862_v9  ;;  %v7626_v46 = vpack.c.bf16 %v4065_v0, %v4061_v51  ;;  %v7722_v9 = vpack.c.bf16 %v4067_v28, %v4063_v13  ;;  %v11637_v34 = vpack.c.bf16 %v6243_v27, %v6239_v10  ;;  %v6252_v0 = vld [vmem:[%s12182_s4 + $0x4f8] sm:$0xff]  ;;  %v3870_v13 = vld [vmem:[%s12181_s6 + $0xb0] sm:$0xff] }
 0xfb5   :  { %4180 = vmatprep.mubr.f32.mxu0 %v3866_v37  ;;  %7611 = vmatpush1.bf16.msra.mxu0 %v7610_v21  ;;  %v3855_v21 = vld [vmem:[%s12181_s6 + $0x10] sm:$0xff]  ;;  %v6272_v10 = vld [vmem:[%s12182_s4 + $0x598] sm:$0xff] }
 0xfb6   :  { %4406 = vmatprep.mubr.f32.mxu1 %v3866_v37  ;;  %7707 = vmatpush1.bf16.msra.mxu1 %v7706_v57  ;;  %v3858_v37 = vld [vmem:[%s12181_s6 + $0x30] sm:$0xff]  ;;  %v6222_v57 = vld [vmem:[%s12182_s4 + $0x408] sm:$0xff] }
 0xfb7   :  { %7613 = vmatprep.subr.bf16.mxu0 %v7612_v42  ;;  %7709 = vmatprep.subr.bf16.mxu1 %v7708_v30  ;;  %v11530_v42 = vpack.c.bf16 %v6226_v60, %v6222_v57  ;;  %v6228_v30 = vld [vmem:[%s12182_s4 + $0x438] sm:$0xff] }
 0xfb8   :  { %4181 = vmatmul.mubr.f32.gmra.mrb[40].mxu0 %v3865_v31  ;;  %4407 = vmatmul.mubr.f32.gmra.mrb[40].mxu1 %v3865_v31  ;;  %v11544_v6 = vpack.c.bf16 %v6228_v30, %v6224_v7  ;;  %v6227_v31 = vld [vmem:[%s12182_s4 + $0x430] sm:$0xff]  ;;  %v6256_v57 = vld [vmem:[%s12182_s4 + $0x518] sm:$0xff]  ;;  %v6253_v30 = vld [vmem:[%s12182_s4 + $0x500] sm:$0xff] }
 0xfb9   :  { %4186 = vmatprep.mubr.f32.mxu0 %v3869_v12  ;;  %7615 = vmatpush1.bf16.msra.mxu0 %v7614_v44  ;;  %v11555_v44 = vpack.c.bf16 %v6227_v31, %v6223_v19  ;;  %v6260_v7 = vld [vmem:[%s12182_s4 + $0x538] sm:$0xff]  ;;  %v6255_v19 = vld [vmem:[%s12182_s4 + $0x510] sm:$0xff] }
 0xfba   :  { %4412 = vmatprep.mubr.f32.mxu1 %v3869_v12  ;;  %7711 = vmatpush1.bf16.msra.mxu1 %v7710_v8  ;;  %v6230_v12 = vld [vmem:[%s12182_s4 + $0x448] sm:$0xff]  ;;  %v11705_v43 = vpack.c.bf16 %v6260_v7, %v6256_v57  ;;  %v6259_v31 = vld [vmem:[%s12182_s4 + $0x530] sm:$0xff]  ;;  %v6284_v7 = vld [vmem:[%s12182_s4 + $0x5f8] sm:$0xff] }
 0xfbb   :  { %7617 = vmatprep.subr.bf16.mxu0 %v7616_v20  ;;  %7713 = vmatprep.subr.bf16.mxu1 %v7712_v36  ;;  %v6234_v8 = vld [vmem:[%s12182_s4 + $0x468] sm:$0xff]  ;;  %v6236_v20 = vld [vmem:[%s12182_s4 + $0x478] sm:$0xff]  ;;  %v6229_v36 = vld [vmem:[%s12182_s4 + $0x440] sm:$0xff] }
 0xfbc   :  { %4187 = vmatmul.mubr.f32.gmra.mrb[42].mxu0 %v3868_v2  ;;  %4413 = vmatmul.mubr.f32.gmra.mrb[42].mxu1 %v3868_v2  ;;  %v11569_v17 = vpack.c.bf16 %v6234_v8, %v6230_v12  ;;  %v11585_v54 = vpack.c.bf16 %v6236_v20, %v6232_v53  ;;  %v11587_v26 = vpack.c.bf16 %v6233_v55, %v6229_v36  ;;  %v8845_v12 = vld [vmem:[%s12181_s6 + $0xd0] sm:$0xff]  ;;  %v6262_v53 = vld [vmem:[%s12182_s4 + $0x548] sm:$0xff]  ;;  %v6264_v36 = vld [vmem:[%s12182_s4 + $0x558] sm:$0xff] }
 0xfbd   :  { %4192 = vmatprep.mubr.f32.mxu0 %v3872_v62  ;;  %7619 = vmatpush1.bf16.msra.mxu0 %v7618_v48  ;;  %v11596_v2 = vpack.c.bf16 %v6235_v56, %v6231_v52  ;;  %v6238_v48 = vld [vmem:[%s12182_s4 + $0x488] sm:$0xff]  ;;  %v11719_v8 = vpack.c.bf16 %v6259_v31, %v6255_v19  ;;  %v6261_v52 = vld [vmem:[%s12182_s4 + $0x540] sm:$0xff] }
 0xfbe   :  { %4418 = vmatprep.mubr.f32.mxu1 %v3872_v62  ;;  %7715 = vmatpush1.bf16.msra.mxu1 %v7714_v18  ;;  %v6242_v62 = vld [vmem:[%s12182_s4 + $0x4a8] sm:$0xff]  ;;  %v6240_v18 = vld [vmem:[%s12182_s4 + $0x498] sm:$0xff]  ;;  %v6265_v56 = vld [vmem:[%s12182_s4 + $0x560] sm:$0xff] }
 0xfbf   :  { %7621 = vmatprep.subr.bf16.mxu0 %v7620_v50  ;;  %7717 = vmatprep.subr.bf16.mxu1 %v7716_v11  ;;  %v11610_v22 = vpack.c.bf16 %v6242_v62, %v6238_v48  ;;  %v6237_v50 = vld [vmem:[%s12182_s4 + $0x480] sm:$0xff]  ;;  %v11626_v25 = vpack.c.bf16 %v6244_v23, %v6240_v18  ;;  %v6266_v20 = vld [vmem:[%s12182_s4 + $0x568] sm:$0xff]  ;;  %v11748_v62 = vpack.c.bf16 %v6265_v56, %v6261_v52  ;;  %v6263_v18 = vld [vmem:[%s12182_s4 + $0x550] sm:$0xff] }
 0xfc0   :  { %4193 = vmatmul.mubr.f32.gmra.mrb[44].mxu0 %v3871_v39  ;;  %4419 = vmatmul.mubr.f32.gmra.mrb[44].mxu1 %v3871_v39  ;;  %v6241_v11 = vld [vmem:[%s12182_s4 + $0x4a0] sm:$0xff]  ;;  %v6246_v39 = vld [vmem:[%s12182_s4 + $0x4c8] sm:$0xff]  ;;  %v11731_v55 = vpack.c.bf16 %v6266_v20, %v6262_v53  ;;  %v6267_v23 = vld [vmem:[%s12182_s4 + $0x570] sm:$0xff] }
 0xfc1   :  { %4198 = vmatprep.mubr.f32.mxu0 %v3875_v49  ;;  %7623 = vmatpush1.bf16.msra.mxu0 %v7622_v47  ;;  %v11628_v4 = vpack.c.bf16 %v6241_v11, %v6237_v50  ;;  %v6250_v47 = vld [vmem:[%s12182_s4 + $0x4e8] sm:$0xff]  ;;  %v11757_v50 = vpack.c.bf16 %v6267_v23, %v6263_v18  ;;  %v6283_v53 = vld [vmem:[%s12182_s4 + $0x5f0] sm:$0xff] }
 0xfc2   :  { %4424 = vmatprep.mubr.f32.mxu1 %v3875_v49  ;;  %7719 = vmatpush1.bf16.msra.mxu1 %v7718_v35  ;;  %v6248_v35 = vld [vmem:[%s12182_s4 + $0x4d8] sm:$0xff]  ;;  %v11651_v51 = vpack.c.bf16 %v6250_v47, %v6246_v39  ;;  %v6270_v11 = vld [vmem:[%s12182_s4 + $0x588] sm:$0xff]  ;;  %v6269_v47 = vld [vmem:[%s12182_s4 + $0x580] sm:$0xff] }
 0xfc3   :  { %7625 = vmatprep.subr.bf16.mxu0 %v7624_v15  ;;  %7721 = vmatprep.subr.bf16.mxu1 %v7720_v40  ;;  %v6245_v15 = vld [vmem:[%s12182_s4 + $0x4c0] sm:$0xff]  ;;  %v11667_v28 = vpack.c.bf16 %v6252_v0, %v6248_v35  ;;  %v6276_v39 = vld [vmem:[%s12182_s4 + $0x5b8] sm:$0xff] }
 0xfc4   :  { %4199 = vmatmul.mubr.f32.gmra.mrb[46].mxu0 %v3874_v1  ;;  %4425 = vmatmul.mubr.f32.gmra.mrb[46].mxu1 %v3874_v1  ;;  %v6249_v40 = vld [vmem:[%s12182_s4 + $0x4e0] sm:$0xff]  ;;  %v6247_v1 = vld [vmem:[%s12182_s4 + $0x4d0] sm:$0xff]  ;;  %v11782_v0 = vpack.c.bf16 %v6276_v39, %v6272_v10 }
 0xfc5   :  { %7627 = vmatpush1.bf16.msra.mxu0 %v7626_v46  ;;  %4269 = vmatprep.mubr.f32.mxu0 %v8846_v3  ;;  %v11669_v49 = vpack.c.bf16 %v6249_v40, %v6245_v15  ;;  %v6251_v46 = vld [vmem:[%s12182_s4 + $0x4f0] sm:$0xff]  ;;  %v6273_v35 = vld [vmem:[%s12182_s4 + $0x5a0] sm:$0xff] }
 0xfc6   :  { %7723 = vmatpush1.bf16.msra.mxu1 %v7722_v9  ;;  %4495 = vmatprep.mubr.f32.mxu1 %v8846_v3  ;;  %v11678_v9 = vpack.c.bf16 %v6251_v46, %v6247_v1  ;;  %v11784_v15 = vpack.c.bf16 %v6273_v35, %v6269_v47  ;;  %v6271_v40 = vld [vmem:[%s12182_s4 + $0x590] sm:$0xff]  ;;  %v6278_v46 = vld [vmem:[%s12182_s4 + $0x5c8] sm:$0xff] }
 0xfc7   :  { %7725 = vmatprep.subr.bf16.mxu0 %v11530_v42  ;;  %7757 = vmatprep.subr.bf16.mxu1 %v11544_v6 }
 0xfc8   :  { %4270 = vmatmul.mubr.f32.vlgmr.msra.gmra.mrb[32].mxu0 %v3855_v21 }
 0xfc9   :  { %4496 = vmatmul.mubr.f32.vlgmr.msra.gmra.mrb[32].mxu1 %v3855_v21  ;;  %4275 = vmatprep.mubr.f32.mxu0 %v8846_v3  ;;  %v6254_v21 = vld [vmem:[%s12182_s4 + $0x508] sm:$0xff] }
 0xfca   :  { %4501 = vmatprep.mubr.f32.mxu1 %v8846_v3  ;;  %7727 = vmatpush1.bf16.msra.mxu0 %v11546_v45 }
 0xfcb   :  { %7759 = vmatpush1.bf16.msra.mxu1 %v11555_v44  ;;  %7729 = vmatprep.subr.bf16.mxu0 %v11569_v17 }
 0xfcc   :  { %4276 = vmatmul.mubr.f32.gmra.mrb[34].mxu0 %v3858_v37  ;;  %7761 = vmatprep.subr.bf16.mxu1 %v11585_v54 }
 0xfcd   :  { %4502 = vmatmul.mubr.f32.gmra.mrb[34].mxu1 %v3858_v37  ;;  %4281 = vmatprep.mubr.f32.mxu0 %v8846_v3  ;;  %v6258_v37 = vld [vmem:[%s12182_s4 + $0x528] sm:$0xff] }
 0xfce   :  { %4507 = vmatprep.mubr.f32.mxu1 %v8846_v3  ;;  %7731 = vmatpush1.bf16.msra.mxu0 %v11587_v26  ;;  %v11692_v60 = vpack.c.bf16 %v6258_v37, %v6254_v21  ;;  %v6282_v21 = vld [vmem:[%s12182_s4 + $0x5e8] sm:$0xff]  ;;  %v6280_v37 = vld [vmem:[%s12182_s4 + $0x5d8] sm:$0xff] }
 0xfcf   :  { %7763 = vmatpush1.bf16.msra.mxu1 %v11596_v2  ;;  %7733 = vmatprep.subr.bf16.mxu0 %v11610_v22  ;;  %v11805_v57 = vpack.c.bf16 %v6282_v21, %v6278_v46  ;;  %v11818_v19 = vpack.c.bf16 %v6284_v7, %v6280_v37 }
 0xfd0   :  { %4282 = vmatmul.mubr.f32.gmra.mrb[36].mxu0 %v3861_v61  ;;  %7765 = vmatprep.subr.bf16.mxu1 %v11626_v25 }
 0xfd1   :  { %4508 = vmatmul.mubr.f32.gmra.mrb[36].mxu1 %v3861_v61  ;;  %4287 = vmatprep.mubr.f32.mxu0 %v8846_v3  ;;  %v11707_v61 = vpack.c.bf16 %v6257_v33, %v6253_v30  ;;  %v6277_v30 = vld [vmem:[%s12182_s4 + $0x5c0] sm:$0xff] }
 0xfd2   :  { %4513 = vmatprep.mubr.f32.mxu1 %v8846_v3  ;;  %7735 = vmatpush1.bf16.msra.mxu0 %v11628_v4  ;;  %v6281_v33 = vld [vmem:[%s12182_s4 + $0x5e0] sm:$0xff] }
 0xfd3   :  { %7767 = vmatpush1.bf16.msra.mxu1 %v11637_v34  ;;  %7737 = vmatprep.subr.bf16.mxu0 %v11651_v51  ;;  %v11820_v31 = vpack.c.bf16 %v6281_v33, %v6277_v30 }
 0xfd4   :  { %4288 = vmatmul.mubr.f32.gmra.mrb[38].mxu0 %v3864_v16  ;;  %7769 = vmatprep.subr.bf16.mxu1 %v11667_v28 }
 0xfd5   :  { %4514 = vmatmul.mubr.f32.gmra.mrb[38].mxu1 %v3864_v16  ;;  %4293 = vmatprep.mubr.f32.mxu0 %v8846_v3  ;;  %v6268_v16 = vld [vmem:[%s12182_s4 + $0x578] sm:$0xff] }
 0xfd6   :  { %4519 = vmatprep.mubr.f32.mxu1 %v8846_v3  ;;  %7739 = vmatpush1.bf16.msra.mxu0 %v11669_v49  ;;  %v11746_v48 = vpack.c.bf16 %v6268_v16, %v6264_v36 }
 0xfd7   :  { %7771 = vmatpush1.bf16.msra.mxu1 %v11678_v9  ;;  %7741 = vmatprep.subr.bf16.mxu0 %v11692_v60 }
 0xfd8   :  { %4294 = vmatmul.mubr.f32.gmra.mrb[40].mxu0 %v3867_v63  ;;  %7773 = vmatprep.subr.bf16.mxu1 %v11705_v43 }
 0xfd9   :  { %4520 = vmatmul.mubr.f32.gmra.mrb[40].mxu1 %v3867_v63  ;;  %4299 = vmatprep.mubr.f32.mxu0 %v8846_v3  ;;  %v6274_v63 = vld [vmem:[%s12182_s4 + $0x5a8] sm:$0xff] }
 0xfda   :  { %4525 = vmatprep.mubr.f32.mxu1 %v8846_v3  ;;  %7743 = vmatpush1.bf16.msra.mxu0 %v11707_v61  ;;  %v11769_v27 = vpack.c.bf16 %v6274_v63, %v6270_v11 }
 0xfdb   :  { %7775 = vmatpush1.bf16.msra.mxu1 %v11719_v8  ;;  %7745 = vmatprep.subr.bf16.mxu0 %v11731_v55 }
 0xfdc   :  { %4300 = vmatmul.mubr.f32.gmra.mrb[42].mxu0 %v3870_v13  ;;  %7777 = vmatprep.subr.bf16.mxu1 %v11746_v48 }
 0xfdd   :  { %4526 = vmatmul.mubr.f32.gmra.mrb[42].mxu1 %v3870_v13  ;;  %4305 = vmatprep.mubr.f32.mxu0 %v8846_v3  ;;  %v6275_v13 = vld [vmem:[%s12182_s4 + $0x5b0] sm:$0xff] }
 0xfde   :  { %4531 = vmatprep.mubr.f32.mxu1 %v8846_v3  ;;  %7747 = vmatpush1.bf16.msra.mxu0 %v11748_v62  ;;  %v11793_v1 = vpack.c.bf16 %v6275_v13, %v6271_v40 }
 0xfdf   :  { %7779 = vmatpush1.bf16.msra.mxu1 %v11757_v50  ;;  %7749 = vmatprep.subr.bf16.mxu0 %v11769_v27 }
 0xfe0   :  { %4306 = vmatmul.mubr.f32.gmra.mrb[44].mxu0 %v8845_v12  ;;  %7781 = vmatprep.subr.bf16.mxu1 %v11782_v0 }
 0xfe1   :  { %4532 = vmatmul.mubr.f32.gmra.mrb[44].mxu1 %v8845_v12  ;;  %4311 = vmatprep.mubr.f32.mxu0 %v8846_v3  ;;  %v6279_v12 = vld [vmem:[%s12182_s4 + $0x5d0] sm:$0xff] }
 0xfe2   :  { %4537 = vmatprep.mubr.f32.mxu1 %v8846_v3  ;;  %7751 = vmatpush1.bf16.msra.mxu0 %v11784_v15  ;;  %v11829_v20 = vpack.c.bf16 %v6283_v53, %v6279_v12 }
 0xfe3   :  { %7783 = vmatpush1.bf16.msra.mxu1 %v11793_v1  ;;  %7753 = vmatprep.subr.bf16.mxu0 %v11805_v57 }
 0xfe4   :  { %7785 = vmatprep.subr.bf16.mxu1 %v11818_v19 }
 0xfe6   :  { %7755 = vmatpush1.bf16.msra.mxu0 %v11820_v31 }
 0xfe7   :  { %7787 = vmatpush1.bf16.msra.mxu1 %v11829_v20  ;;  %7789 = vmatprep.subr.bf16.mxu0 %v11530_v42 }
 0xfe8   :  { %7821 = vmatprep.subr.bf16.mxu1 %v11544_v6 }
0x103b   :  { %v3745_v36 = vpop.f32.mrb[30].mxu0  ;;  %v3816_v16 = vpop.f32.mrb[30].mxu1 }
0x103c   :  { %v8282_v52 = vadd.f32 %v3745_v36, %v10596_v41  ;;  %v3747_v56 = vpop.f32.mrb[31].mxu0  ;;  %v3818_v18 = vpop.f32.mrb[31].mxu1  ;;  %v8298_v10 = vadd.f32 %v3816_v16, %v10604_v14 }
0x103d   :  { %v8283_v23 = vadd.f32 %v3747_v56, %v10599_v5  ;;  %v8299_v39 = vadd.f32 %v3818_v18, %v10607_v24 }
0x103e   :  { %v6216_v11 = vmul.f32 -1.442695, %v8282_v52  ;;  %v6218_v47 = vmul.f32 -1.442695, %v8298_v10 }
0x103f   :  { %v6217_v63 = vmul.f32 -1.442695, %v8283_v23 }
0x1040   :  { %8701 = vpow2.f32 %v6216_v11 }
0x1041   :  { %8703 = vpow2.f32 %v6217_v63 }
0x1042   :  { %8705 = vtanh.f32 %v8299_v39 }
0x1043   :  { %8707 = vpow2.f32 %v6218_v47 }
0x104a   :  { %v8702_v35 = vpop.eup %8701 }
0x104b   :  { %v3834_v40 = vadd.f32 1.0, %v8702_v35  ;;  %v8704_v13 = vpop.eup %8703 }
0x104c   :  { %v3835_v41 = vadd.f32 1.0, %v8704_v13  ;;  %v8706_v46 = vpop.eup %8705 }
0x104d   :  { %8709 = vrcp.f32 %v3834_v40  ;;  %v8708_v21 = vpop.eup %8707 }
0x104e   :  { %8711 = vrcp.f32 %v3835_v41  ;;  %v3836_v30 = vadd.f32 1.0, %v8708_v21 }
0x1050   :  { %8713 = vrcp.f32 %v3836_v30 }
0x1057   :  { %v8710_v5 = vpop.eup %8709 }
0x1058   :  { %v3846_v37 = vmul.f32 %v8710_v5, %v8706_v46  ;;  %v8712_v7 = vpop.eup %8711 }
0x1059   :  { %v3845_v33 = vmul.f32 %v8712_v7, %v10891_v59  ;;  %v6220_v59 = vld [vmem:[%s12183_s5 + $0x8] sm:$0xf] }
0x105a   :  { %v8714_v24 = vpop.eup %8713  ;;  %v11886_v36 = vrot.slane %v6220_v59, %v9506_v29  ;;  %v11889_v16 = vrot.slane %v6220_v59, %v9511_v32  ;;  %v11894_v47 = vrot.slane %v6220_v59, %v9519_v38  ;;  %v11897_v29 = vrot.slane %v6220_v59, %v9526_v58 }
0x105b   :  { %v3847_v14 = vadd.f32 %v3846_v37, %v3845_v33 }
0x105d   :  { %8715 = vtanh.f32 %v3847_v14 }
0x1067   :  { %v8716_v12 = vpop.eup %8715 }
0x1068   :  { %v3849_v53 = vmul.f32 %v8716_v12, %v8714_v24 }
0x106a   :  { %6219 = vst [vmem:[%s12181_s6 + $0xf0] sm:$0xff] %v3849_v53  ;;  %4312 = vmatmul.mubr.f32.gmra.mrb[46].mxu0 %v3849_v53  ;;  %4538 = vmatmul.mubr.f32.gmra.mrb[46].mxu1 %v3849_v53 }
0x106b   :  { %4712 = vmatprep.mubr.f32.mxu0 %v8846_v3  ;;  %4783 = vmatprep.mubr.f32.mxu1 %v8846_v3 }
0x106e   :  { %4713 = vmatmul.mubr.f32.vlgmr.msra.gmra.mrb[32].mxu0 %v8846_v3  ;;  %4784 = vmatmul.mubr.f32.vlgmr.msra.gmra.mrb[32].mxu1 %v8846_v3 }
0x106f   :  { %7791 = vmatpush1.bf16.msra.mxu0 %v11546_v45  ;;  %7823 = vmatpush1.bf16.msra.mxu1 %v11555_v44 }
0x1070   :  { %7793 = vmatprep.subr.bf16.mxu0 %v11569_v17  ;;  %7825 = vmatprep.subr.bf16.mxu1 %v11585_v54 }
0x1071   :  { %4891 = vmatprep.mubr.f32.mxu0 %v8846_v3  ;;  %4962 = vmatprep.mubr.f32.mxu1 %v8846_v3 }
0x1073   :  { %7795 = vmatpush1.bf16.msra.mxu0 %v11587_v26  ;;  %7827 = vmatpush1.bf16.msra.mxu1 %v11596_v2 }
0x1074   :  { %7797 = vmatprep.subr.bf16.mxu0 %v11610_v22  ;;  %7829 = vmatprep.subr.bf16.mxu1 %v11626_v25 }
0x1077   :  { %7799 = vmatpush1.bf16.msra.mxu0 %v11628_v4  ;;  %7831 = vmatpush1.bf16.msra.mxu1 %v11637_v34 }
0x1078   :  { %7801 = vmatprep.subr.bf16.mxu0 %v11651_v51  ;;  %7833 = vmatprep.subr.bf16.mxu1 %v11667_v28 }
0x107b   :  { %7803 = vmatpush1.bf16.msra.mxu0 %v11669_v49  ;;  %7835 = vmatpush1.bf16.msra.mxu1 %v11678_v9 }
0x107c   :  { %7805 = vmatprep.subr.bf16.mxu0 %v11692_v60  ;;  %7837 = vmatprep.subr.bf16.mxu1 %v11705_v43 }
0x107f   :  { %7807 = vmatpush1.bf16.msra.mxu0 %v11707_v61  ;;  %7839 = vmatpush1.bf16.msra.mxu1 %v11719_v8 }
0x1080   :  { %7809 = vmatprep.subr.bf16.mxu0 %v11731_v55  ;;  %7841 = vmatprep.subr.bf16.mxu1 %v11746_v48 }
0x1083   :  { %7811 = vmatpush1.bf16.msra.mxu0 %v11748_v62  ;;  %7843 = vmatpush1.bf16.msra.mxu1 %v11757_v50 }
0x1084   :  { %7813 = vmatprep.subr.bf16.mxu0 %v11769_v27  ;;  %7845 = vmatprep.subr.bf16.mxu1 %v11782_v0 }
0x1087   :  { %7815 = vmatpush1.bf16.msra.mxu0 %v11784_v15  ;;  %7847 = vmatpush1.bf16.msra.mxu1 %v11793_v1 }
0x1088   :  { %7817 = vmatprep.subr.bf16.mxu0 %v11805_v57  ;;  %7849 = vmatprep.subr.bf16.mxu1 %v11818_v19 }
0x108b   :  { %7819 = vmatpush1.bf16.msra.mxu0 %v11820_v31  ;;  %7851 = vmatpush1.bf16.msra.mxu1 %v11829_v20 }
0x108c   :  { %7853 = vmatprep.subr.bf16.mxu0 %v11530_v42  ;;  %7885 = vmatprep.subr.bf16.mxu1 %v11544_v6 }
0x1141   :  { %v4714_v52 = vpop.f32.mrb[32].mxu0  ;;  %v4785_v56 = vpop.f32.mrb[32].mxu1 }
0x1142   :  { %v8300_v18 = vadd.f32 %v4714_v52, %v11886_v36  ;;  %v4716_v23 = vpop.f32.mrb[33].mxu0  ;;  %v4787_v11 = vpop.f32.mrb[33].mxu1  ;;  %v8316_v32 = vadd.f32 %v4785_v56, %v11894_v47 }
0x1143   :  { %v8301_v63 = vadd.f32 %v4716_v23, %v11889_v16  ;;  %v8317_v35 = vadd.f32 %v4787_v11, %v11897_v29 }
0x1144   :  { %v6285_v10 = vmul.f32 -1.442695, %v8300_v18  ;;  %v6287_v40 = vmul.f32 -1.442695, %v8316_v32 }
0x1145   :  { %v6286_v39 = vmul.f32 -1.442695, %v8301_v63 }
0x1146   :  { %8717 = vpow2.f32 %v6285_v10 }
0x1147   :  { %8719 = vpow2.f32 %v6286_v39 }
0x1148   :  { %8721 = vtanh.f32 %v8317_v35 }
0x1149   :  { %8723 = vpow2.f32 %v6287_v40 }
0x1150   :  { %v8718_v13 = vpop.eup %8717 }
0x1151   :  { %v4803_v41 = vadd.f32 1.0, %v8718_v13  ;;  %v8720_v46 = vpop.eup %8719 }
0x1152   :  { %v4804_v21 = vadd.f32 1.0, %v8720_v46  ;;  %v8722_v5 = vpop.eup %8721 }
0x1153   :  { %8725 = vrcp.f32 %v4803_v41  ;;  %v8724_v38 = vpop.eup %8723 }
0x1154   :  { %8727 = vrcp.f32 %v4804_v21  ;;  %v4805_v58 = vadd.f32 1.0, %v8724_v38 }
0x1156   :  { %8729 = vrcp.f32 %v4805_v58 }
0x115d   :  { %v8726_v37 = vpop.eup %8725 }
0x115e   :  { %v4815_v7 = vmul.f32 %v8726_v37, %v8722_v5  ;;  %v8728_v30 = vpop.eup %8727 }
0x115f   :  { %v4814_v33 = vmul.f32 0.0, %v8728_v30 }
0x1160   :  { %v8730_v24 = vpop.eup %8729 }
0x1161   :  { %v11901_v14 = vadd.f32 %v4815_v7, %v4814_v33 }
0x1163   :  { %8731 = vtanh.f32 %v11901_v14 }
0x116d   :  { %v8732_v12 = vpop.eup %8731 }
0x116e   :  { %v4818_v53 = vmul.f32 %v8732_v12, %v8730_v24 }
0x1170   :  { %4821 = vst [vmem:[%s12181_s6 + $0x18] sm:$0xff] %v4818_v53  ;;  %4892 = vmatmul.mubr.f32.vlgmr.msra.gmra.mrb[34].mxu0 %v4818_v53  ;;  %4963 = vmatmul.mubr.f32.vlgmr.msra.gmra.mrb[34].mxu1 %v4818_v53 }
0x1171   :  { %7855 = vmatpush1.bf16.msra.mxu0 %v11546_v45  ;;  %7887 = vmatpush1.bf16.msra.mxu1 %v11555_v44 }
0x1172   :  { %7857 = vmatprep.subr.bf16.mxu0 %v11569_v17  ;;  %7889 = vmatprep.subr.bf16.mxu1 %v11585_v54 }
0x1173   :  { %5070 = vmatprep.mubr.f32.mxu0 %v8846_v3  ;;  %5141 = vmatprep.mubr.f32.mxu1 %v8846_v3 }
0x1175   :  { %7859 = vmatpush1.bf16.msra.mxu0 %v11587_v26  ;;  %7891 = vmatpush1.bf16.msra.mxu1 %v11596_v2 }
0x1176   :  { %7861 = vmatprep.subr.bf16.mxu0 %v11610_v22  ;;  %7893 = vmatprep.subr.bf16.mxu1 %v11626_v25 }
0x1179   :  { %7863 = vmatpush1.bf16.msra.mxu0 %v11628_v4  ;;  %7895 = vmatpush1.bf16.msra.mxu1 %v11637_v34 }
0x117a   :  { %7865 = vmatprep.subr.bf16.mxu0 %v11651_v51  ;;  %7897 = vmatprep.subr.bf16.mxu1 %v11667_v28 }
0x117d   :  { %7867 = vmatpush1.bf16.msra.mxu0 %v11669_v49  ;;  %7899 = vmatpush1.bf16.msra.mxu1 %v11678_v9 }
0x117e   :  { %7869 = vmatprep.subr.bf16.mxu0 %v11692_v60  ;;  %7901 = vmatprep.subr.bf16.mxu1 %v11705_v43 }
0x1181   :  { %7871 = vmatpush1.bf16.msra.mxu0 %v11707_v61  ;;  %7903 = vmatpush1.bf16.msra.mxu1 %v11719_v8 }
0x1182   :  { %7873 = vmatprep.subr.bf16.mxu0 %v11731_v55  ;;  %7905 = vmatprep.subr.bf16.mxu1 %v11746_v48 }
0x1185   :  { %7875 = vmatpush1.bf16.msra.mxu0 %v11748_v62  ;;  %7907 = vmatpush1.bf16.msra.mxu1 %v11757_v50 }
0x1186   :  { %7877 = vmatprep.subr.bf16.mxu0 %v11769_v27  ;;  %7909 = vmatprep.subr.bf16.mxu1 %v11782_v0 }
0x1189   :  { %7879 = vmatpush1.bf16.msra.mxu0 %v11784_v15  ;;  %7911 = vmatpush1.bf16.msra.mxu1 %v11793_v1 }
0x118a   :  { %7881 = vmatprep.subr.bf16.mxu0 %v11805_v57  ;;  %7913 = vmatprep.subr.bf16.mxu1 %v11818_v19 }
0x118d   :  { %7883 = vmatpush1.bf16.msra.mxu0 %v11820_v31  ;;  %7915 = vmatpush1.bf16.msra.mxu1 %v11829_v20 }
0x118e   :  { %7917 = vmatprep.subr.bf16.mxu0 %v11530_v42  ;;  %7949 = vmatprep.subr.bf16.mxu1 %v11544_v6 }
0x1243   :  { %v4893_v59 = vpop.f32.mrb[34].mxu0  ;;  %v4964_v52 = vpop.f32.mrb[34].mxu1 }
0x1244   :  { %v8302_v56 = vadd.f32 %v4893_v59, %v11886_v36  ;;  %v4895_v18 = vpop.f32.mrb[35].mxu0  ;;  %v4966_v23 = vpop.f32.mrb[35].mxu1  ;;  %v8318_v39 = vadd.f32 %v4964_v52, %v11894_v47 }
0x1245   :  { %v8303_v11 = vadd.f32 %v4895_v18, %v11889_v16  ;;  %v8319_v32 = vadd.f32 %v4966_v23, %v11897_v29 }
0x1246   :  { %v6288_v63 = vmul.f32 -1.442695, %v8302_v56  ;;  %v6290_v35 = vmul.f32 -1.442695, %v8318_v39 }
0x1247   :  { %v6289_v10 = vmul.f32 -1.442695, %v8303_v11 }
0x1248   :  { %8733 = vpow2.f32 %v6288_v63 }
0x1249   :  { %8735 = vpow2.f32 %v6289_v10 }
0x124a   :  { %8737 = vtanh.f32 %v8319_v32 }
0x124b   :  { %8739 = vpow2.f32 %v6290_v35 }
0x1252   :  { %v8734_v40 = vpop.eup %8733 }
0x1253   :  { %v4982_v13 = vadd.f32 1.0, %v8734_v40  ;;  %v8736_v41 = vpop.eup %8735 }
0x1254   :  { %v4983_v46 = vadd.f32 1.0, %v8736_v41  ;;  %v8738_v21 = vpop.eup %8737 }
0x1255   :  { %8741 = vrcp.f32 %v4982_v13  ;;  %v8740_v5 = vpop.eup %8739 }
0x1256   :  { %8743 = vrcp.f32 %v4983_v46  ;;  %v4984_v30 = vadd.f32 1.0, %v8740_v5 }
0x1258   :  { %8745 = vrcp.f32 %v4984_v30 }
0x125f   :  { %v8742_v38 = vpop.eup %8741 }
0x1260   :  { %v4994_v37 = vmul.f32 %v8742_v38, %v8738_v21  ;;  %v8744_v7 = vpop.eup %8743 }
0x1261   :  { %v4993_v58 = vmul.f32 %v8744_v7, %v11901_v14 }
0x1262   :  { %v8746_v24 = vpop.eup %8745 }
0x1263   :  { %v11946_v33 = vadd.f32 %v4994_v37, %v4993_v58 }
0x1265   :  { %8747 = vtanh.f32 %v11946_v33 }
0x126f   :  { %v8748_v12 = vpop.eup %8747 }
0x1270   :  { %v4997_v53 = vmul.f32 %v8748_v12, %v8746_v24 }
0x1272   :  { %6291 = vst [vmem:[%s12181_s6 + $0x38] sm:$0xff] %v4997_v53  ;;  %5071 = vmatmul.mubr.f32.vlgmr.msra.gmra.mrb[36].mxu0 %v4997_v53  ;;  %5142 = vmatmul.mubr.f32.vlgmr.msra.gmra.mrb[36].mxu1 %v4997_v53 }
0x1273   :  { %7919 = vmatpush1.bf16.msra.mxu0 %v11546_v45  ;;  %7951 = vmatpush1.bf16.msra.mxu1 %v11555_v44 }
0x1274   :  { %7921 = vmatprep.subr.bf16.mxu0 %v11569_v17  ;;  %7953 = vmatprep.subr.bf16.mxu1 %v11585_v54 }
0x1275   :  { %5249 = vmatprep.mubr.f32.mxu0 %v8846_v3  ;;  %5320 = vmatprep.mubr.f32.mxu1 %v8846_v3 }
0x1277   :  { %7923 = vmatpush1.bf16.msra.mxu0 %v11587_v26  ;;  %7955 = vmatpush1.bf16.msra.mxu1 %v11596_v2 }
0x1278   :  { %7925 = vmatprep.subr.bf16.mxu0 %v11610_v22  ;;  %7957 = vmatprep.subr.bf16.mxu1 %v11626_v25 }
0x127b   :  { %7927 = vmatpush1.bf16.msra.mxu0 %v11628_v4  ;;  %7959 = vmatpush1.bf16.msra.mxu1 %v11637_v34 }
0x127c   :  { %7929 = vmatprep.subr.bf16.mxu0 %v11651_v51  ;;  %7961 = vmatprep.subr.bf16.mxu1 %v11667_v28 }
0x127f   :  { %7931 = vmatpush1.bf16.msra.mxu0 %v11669_v49  ;;  %7963 = vmatpush1.bf16.msra.mxu1 %v11678_v9 }
0x1280   :  { %7933 = vmatprep.subr.bf16.mxu0 %v11692_v60  ;;  %7965 = vmatprep.subr.bf16.mxu1 %v11705_v43 }
0x1283   :  { %7935 = vmatpush1.bf16.msra.mxu0 %v11707_v61  ;;  %7967 = vmatpush1.bf16.msra.mxu1 %v11719_v8 }
0x1284   :  { %7937 = vmatprep.subr.bf16.mxu0 %v11731_v55  ;;  %7969 = vmatprep.subr.bf16.mxu1 %v11746_v48 }
0x1287   :  { %7939 = vmatpush1.bf16.msra.mxu0 %v11748_v62  ;;  %7971 = vmatpush1.bf16.msra.mxu1 %v11757_v50 }
0x1288   :  { %7941 = vmatprep.subr.bf16.mxu0 %v11769_v27  ;;  %7973 = vmatprep.subr.bf16.mxu1 %v11782_v0 }
0x128b   :  { %7943 = vmatpush1.bf16.msra.mxu0 %v11784_v15  ;;  %7975 = vmatpush1.bf16.msra.mxu1 %v11793_v1 }
0x128c   :  { %7945 = vmatprep.subr.bf16.mxu0 %v11805_v57  ;;  %7977 = vmatprep.subr.bf16.mxu1 %v11818_v19 }
0x128f   :  { %7947 = vmatpush1.bf16.msra.mxu0 %v11820_v31  ;;  %7979 = vmatpush1.bf16.msra.mxu1 %v11829_v20 }
0x1290   :  { %7981 = vmatprep.subr.bf16.mxu0 %v11530_v42  ;;  %8013 = vmatprep.subr.bf16.mxu1 %v11544_v6 }
0x1345   :  { %v5072_v14 = vpop.f32.mrb[36].mxu0  ;;  %v5143_v59 = vpop.f32.mrb[36].mxu1 }
0x1346   :  { %v8304_v52 = vadd.f32 %v5072_v14, %v11886_v36  ;;  %v5074_v56 = vpop.f32.mrb[37].mxu0  ;;  %v5145_v18 = vpop.f32.mrb[37].mxu1  ;;  %v8320_v10 = vadd.f32 %v5143_v59, %v11894_v47 }
0x1347   :  { %v8305_v23 = vadd.f32 %v5074_v56, %v11889_v16  ;;  %v8321_v39 = vadd.f32 %v5145_v18, %v11897_v29 }
0x1348   :  { %v6292_v11 = vmul.f32 -1.442695, %v8304_v52  ;;  %v6294_v32 = vmul.f32 -1.442695, %v8320_v10 }
0x1349   :  { %v6293_v63 = vmul.f32 -1.442695, %v8305_v23 }
0x134a   :  { %8749 = vpow2.f32 %v6292_v11 }
0x134b   :  { %8751 = vpow2.f32 %v6293_v63 }
0x134c   :  { %8753 = vtanh.f32 %v8321_v39 }
0x134d   :  { %8755 = vpow2.f32 %v6294_v32 }
0x1354   :  { %v8750_v35 = vpop.eup %8749 }
0x1355   :  { %v5161_v40 = vadd.f32 1.0, %v8750_v35  ;;  %v8752_v13 = vpop.eup %8751 }
0x1356   :  { %v5162_v41 = vadd.f32 1.0, %v8752_v13  ;;  %v8754_v46 = vpop.eup %8753 }
0x1357   :  { %8757 = vrcp.f32 %v5161_v40  ;;  %v8756_v21 = vpop.eup %8755 }
0x1358   :  { %8759 = vrcp.f32 %v5162_v41  ;;  %v5163_v7 = vadd.f32 1.0, %v8756_v21 }
0x135a   :  { %8761 = vrcp.f32 %v5163_v7 }
0x1361   :  { %v8758_v5 = vpop.eup %8757 }
0x1362   :  { %v5173_v38 = vmul.f32 %v8758_v5, %v8754_v46  ;;  %v8760_v37 = vpop.eup %8759 }
0x1363   :  { %v5172_v30 = vmul.f32 %v8760_v37, %v11946_v33 }
0x1364   :  { %v8762_v24 = vpop.eup %8761 }
0x1365   :  { %v11991_v58 = vadd.f32 %v5173_v38, %v5172_v30 }
0x1367   :  { %8763 = vtanh.f32 %v11991_v58 }
0x1371   :  { %v8764_v12 = vpop.eup %8763 }
0x1372   :  { %v5176_v53 = vmul.f32 %v8764_v12, %v8762_v24 }
0x1374   :  { %6295 = vst [vmem:[%s12181_s6 + $0x58] sm:$0xff] %v5176_v53  ;;  %5250 = vmatmul.mubr.f32.vlgmr.msra.gmra.mrb[38].mxu0 %v5176_v53  ;;  %5321 = vmatmul.mubr.f32.vlgmr.msra.gmra.mrb[38].mxu1 %v5176_v53 }
0x1375   :  { %7983 = vmatpush1.bf16.msra.mxu0 %v11546_v45  ;;  %8015 = vmatpush1.bf16.msra.mxu1 %v11555_v44 }
0x1376   :  { %7985 = vmatprep.subr.bf16.mxu0 %v11569_v17  ;;  %8017 = vmatprep.subr.bf16.mxu1 %v11585_v54 }
0x1377   :  { %5428 = vmatprep.mubr.f32.mxu0 %v8846_v3  ;;  %5499 = vmatprep.mubr.f32.mxu1 %v8846_v3 }
0x1379   :  { %7987 = vmatpush1.bf16.msra.mxu0 %v11587_v26  ;;  %8019 = vmatpush1.bf16.msra.mxu1 %v11596_v2 }
0x137a   :  { %7989 = vmatprep.subr.bf16.mxu0 %v11610_v22  ;;  %8021 = vmatprep.subr.bf16.mxu1 %v11626_v25 }
0x137d   :  { %7991 = vmatpush1.bf16.msra.mxu0 %v11628_v4  ;;  %8023 = vmatpush1.bf16.msra.mxu1 %v11637_v34 }
0x137e   :  { %7993 = vmatprep.subr.bf16.mxu0 %v11651_v51  ;;  %8025 = vmatprep.subr.bf16.mxu1 %v11667_v28 }
0x1381   :  { %7995 = vmatpush1.bf16.msra.mxu0 %v11669_v49  ;;  %8027 = vmatpush1.bf16.msra.mxu1 %v11678_v9 }
0x1382   :  { %7997 = vmatprep.subr.bf16.mxu0 %v11692_v60  ;;  %8029 = vmatprep.subr.bf16.mxu1 %v11705_v43 }
0x1385   :  { %7999 = vmatpush1.bf16.msra.mxu0 %v11707_v61  ;;  %8031 = vmatpush1.bf16.msra.mxu1 %v11719_v8 }
0x1386   :  { %8001 = vmatprep.subr.bf16.mxu0 %v11731_v55  ;;  %8033 = vmatprep.subr.bf16.mxu1 %v11746_v48 }
0x1389   :  { %8003 = vmatpush1.bf16.msra.mxu0 %v11748_v62  ;;  %8035 = vmatpush1.bf16.msra.mxu1 %v11757_v50 }
0x138a   :  { %8005 = vmatprep.subr.bf16.mxu0 %v11769_v27  ;;  %8037 = vmatprep.subr.bf16.mxu1 %v11782_v0 }
0x138d   :  { %8007 = vmatpush1.bf16.msra.mxu0 %v11784_v15  ;;  %8039 = vmatpush1.bf16.msra.mxu1 %v11793_v1 }
0x138e   :  { %8009 = vmatprep.subr.bf16.mxu0 %v11805_v57  ;;  %8041 = vmatprep.subr.bf16.mxu1 %v11818_v19 }
0x1391   :  { %8011 = vmatpush1.bf16.msra.mxu0 %v11820_v31  ;;  %8043 = vmatpush1.bf16.msra.mxu1 %v11829_v20 }
0x1392   :  { %8045 = vmatprep.subr.bf16.mxu0 %v11530_v42  ;;  %8077 = vmatprep.subr.bf16.mxu1 %v11544_v6 }
0x1447   :  { %v5251_v33 = vpop.f32.mrb[38].mxu0  ;;  %v5322_v14 = vpop.f32.mrb[38].mxu1 }
0x1448   :  { %v8306_v59 = vadd.f32 %v5251_v33, %v11886_v36  ;;  %v5253_v52 = vpop.f32.mrb[39].mxu0  ;;  %v5324_v56 = vpop.f32.mrb[39].mxu1  ;;  %v8322_v63 = vadd.f32 %v5322_v14, %v11894_v47 }
0x1449   :  { %v8307_v18 = vadd.f32 %v5253_v52, %v11889_v16  ;;  %v8323_v10 = vadd.f32 %v5324_v56, %v11897_v29 }
0x144a   :  { %v6296_v23 = vmul.f32 -1.442695, %v8306_v59  ;;  %v6298_v39 = vmul.f32 -1.442695, %v8322_v63 }
0x144b   :  { %v6297_v11 = vmul.f32 -1.442695, %v8307_v18 }
0x144c   :  { %8765 = vpow2.f32 %v6296_v23 }
0x144d   :  { %8767 = vpow2.f32 %v6297_v11 }
0x144e   :  { %8769 = vtanh.f32 %v8323_v10 }
0x144f   :  { %8771 = vpow2.f32 %v6298_v39 }
0x1456   :  { %v8766_v32 = vpop.eup %8765 }
0x1457   :  { %v5340_v35 = vadd.f32 1.0, %v8766_v32  ;;  %v8768_v40 = vpop.eup %8767 }
0x1458   :  { %v5341_v13 = vadd.f32 1.0, %v8768_v40  ;;  %v8770_v41 = vpop.eup %8769 }
0x1459   :  { %8773 = vrcp.f32 %v5340_v35  ;;  %v8772_v46 = vpop.eup %8771 }
0x145a   :  { %8775 = vrcp.f32 %v5341_v13  ;;  %v5342_v37 = vadd.f32 1.0, %v8772_v46 }
0x145c   :  { %8777 = vrcp.f32 %v5342_v37 }
0x1463   :  { %v8774_v21 = vpop.eup %8773 }
0x1464   :  { %v5352_v5 = vmul.f32 %v8774_v21, %v8770_v41  ;;  %v8776_v38 = vpop.eup %8775 }
0x1465   :  { %v5351_v7 = vmul.f32 %v8776_v38, %v11991_v58 }
0x1466   :  { %v8778_v24 = vpop.eup %8777 }
0x1467   :  { %v12036_v30 = vadd.f32 %v5352_v5, %v5351_v7 }
0x1469   :  { %8779 = vtanh.f32 %v12036_v30 }
0x1473   :  { %v8780_v12 = vpop.eup %8779 }
0x1474   :  { %v5355_v53 = vmul.f32 %v8780_v12, %v8778_v24 }
0x1476   :  { %6299 = vst [vmem:[%s12181_s6 + $0x78] sm:$0xff] %v5355_v53  ;;  %5429 = vmatmul.mubr.f32.vlgmr.msra.gmra.mrb[40].mxu0 %v5355_v53  ;;  %5500 = vmatmul.mubr.f32.vlgmr.msra.gmra.mrb[40].mxu1 %v5355_v53 }
0x1477   :  { %8047 = vmatpush1.bf16.msra.mxu0 %v11546_v45  ;;  %8079 = vmatpush1.bf16.msra.mxu1 %v11555_v44 }
0x1478   :  { %8049 = vmatprep.subr.bf16.mxu0 %v11569_v17  ;;  %8081 = vmatprep.subr.bf16.mxu1 %v11585_v54 }
0x1479   :  { %5607 = vmatprep.mubr.f32.mxu0 %v8846_v3  ;;  %5678 = vmatprep.mubr.f32.mxu1 %v8846_v3 }
0x147b   :  { %8051 = vmatpush1.bf16.msra.mxu0 %v11587_v26  ;;  %8083 = vmatpush1.bf16.msra.mxu1 %v11596_v2 }
0x147c   :  { %8053 = vmatprep.subr.bf16.mxu0 %v11610_v22  ;;  %8085 = vmatprep.subr.bf16.mxu1 %v11626_v25 }
0x147f   :  { %8055 = vmatpush1.bf16.msra.mxu0 %v11628_v4  ;;  %8087 = vmatpush1.bf16.msra.mxu1 %v11637_v34 }
0x1480   :  { %8057 = vmatprep.subr.bf16.mxu0 %v11651_v51  ;;  %8089 = vmatprep.subr.bf16.mxu1 %v11667_v28 }
0x1483   :  { %8059 = vmatpush1.bf16.msra.mxu0 %v11669_v49  ;;  %8091 = vmatpush1.bf16.msra.mxu1 %v11678_v9 }
0x1484   :  { %8061 = vmatprep.subr.bf16.mxu0 %v11692_v60  ;;  %8093 = vmatprep.subr.bf16.mxu1 %v11705_v43 }
0x1487   :  { %8063 = vmatpush1.bf16.msra.mxu0 %v11707_v61  ;;  %8095 = vmatpush1.bf16.msra.mxu1 %v11719_v8 }
0x1488   :  { %8065 = vmatprep.subr.bf16.mxu0 %v11731_v55  ;;  %8097 = vmatprep.subr.bf16.mxu1 %v11746_v48 }
0x148b   :  { %8067 = vmatpush1.bf16.msra.mxu0 %v11748_v62  ;;  %8099 = vmatpush1.bf16.msra.mxu1 %v11757_v50 }
0x148c   :  { %8069 = vmatprep.subr.bf16.mxu0 %v11769_v27  ;;  %8101 = vmatprep.subr.bf16.mxu1 %v11782_v0 }
0x148f   :  { %8071 = vmatpush1.bf16.msra.mxu0 %v11784_v15  ;;  %8103 = vmatpush1.bf16.msra.mxu1 %v11793_v1 }
0x1490   :  { %8073 = vmatprep.subr.bf16.mxu0 %v11805_v57  ;;  %8105 = vmatprep.subr.bf16.mxu1 %v11818_v19 }
0x1493   :  { %8075 = vmatpush1.bf16.msra.mxu0 %v11820_v31  ;;  %8107 = vmatpush1.bf16.msra.mxu1 %v11829_v20 }
0x1494   :  { %8109 = vmatprep.subr.bf16.mxu0 %v11530_v42  ;;  %8141 = vmatprep.subr.bf16.mxu1 %v11544_v6 }
0x1549   :  { %v5430_v58 = vpop.f32.mrb[40].mxu0  ;;  %v5501_v33 = vpop.f32.mrb[40].mxu1 }
0x154a   :  { %v8308_v14 = vadd.f32 %v5430_v58, %v11886_v36  ;;  %v5432_v59 = vpop.f32.mrb[41].mxu0  ;;  %v5503_v52 = vpop.f32.mrb[41].mxu1  ;;  %v8324_v11 = vadd.f32 %v5501_v33, %v11894_v47 }
0x154b   :  { %v8309_v56 = vadd.f32 %v5432_v59, %v11889_v16  ;;  %v8325_v63 = vadd.f32 %v5503_v52, %v11897_v29 }
0x154c   :  { %v6300_v18 = vmul.f32 -1.442695, %v8308_v14  ;;  %v6302_v10 = vmul.f32 -1.442695, %v8324_v11 }
0x154d   :  { %v6301_v23 = vmul.f32 -1.442695, %v8309_v56 }
0x154e   :  { %8781 = vpow2.f32 %v6300_v18 }
0x154f   :  { %8783 = vpow2.f32 %v6301_v23 }
0x1550   :  { %8785 = vtanh.f32 %v8325_v63 }
0x1551   :  { %8787 = vpow2.f32 %v6302_v10 }
0x1558   :  { %v8782_v39 = vpop.eup %8781 }
0x1559   :  { %v5519_v32 = vadd.f32 1.0, %v8782_v39  ;;  %v8784_v35 = vpop.eup %8783 }
0x155a   :  { %v5520_v40 = vadd.f32 1.0, %v8784_v35  ;;  %v8786_v13 = vpop.eup %8785 }
0x155b   :  { %8789 = vrcp.f32 %v5519_v32  ;;  %v8788_v41 = vpop.eup %8787 }
0x155c   :  { %8791 = vrcp.f32 %v5520_v40  ;;  %v5521_v38 = vadd.f32 1.0, %v8788_v41 }
0x155e   :  { %8793 = vrcp.f32 %v5521_v38 }
0x1565   :  { %v8790_v46 = vpop.eup %8789 }
0x1566   :  { %v5531_v21 = vmul.f32 %v8790_v46, %v8786_v13  ;;  %v8792_v5 = vpop.eup %8791 }
0x1567   :  { %v5530_v37 = vmul.f32 %v8792_v5, %v12036_v30 }
0x1568   :  { %v8794_v24 = vpop.eup %8793 }
0x1569   :  { %v12081_v7 = vadd.f32 %v5531_v21, %v5530_v37 }
0x156b   :  { %8795 = vtanh.f32 %v12081_v7 }
0x1575   :  { %v8796_v12 = vpop.eup %8795 }
0x1576   :  { %v5534_v53 = vmul.f32 %v8796_v12, %v8794_v24 }
0x1578   :  { %6303 = vst [vmem:[%s12181_s6 + $0x98] sm:$0xff] %v5534_v53  ;;  %5608 = vmatmul.mubr.f32.vlgmr.msra.gmra.mrb[42].mxu0 %v5534_v53  ;;  %5679 = vmatmul.mubr.f32.vlgmr.msra.gmra.mrb[42].mxu1 %v5534_v53 }
0x1579   :  { %8111 = vmatpush1.bf16.msra.mxu0 %v11546_v45  ;;  %8143 = vmatpush1.bf16.msra.mxu1 %v11555_v44 }
0x157a   :  { %8113 = vmatprep.subr.bf16.mxu0 %v11569_v17  ;;  %8145 = vmatprep.subr.bf16.mxu1 %v11585_v54 }
0x157b   :  { %5786 = vmatprep.mubr.f32.mxu0 %v8846_v3  ;;  %5857 = vmatprep.mubr.f32.mxu1 %v8846_v3 }
0x157d   :  { %8115 = vmatpush1.bf16.msra.mxu0 %v11587_v26  ;;  %8147 = vmatpush1.bf16.msra.mxu1 %v11596_v2 }
0x157e   :  { %8117 = vmatprep.subr.bf16.mxu0 %v11610_v22  ;;  %8149 = vmatprep.subr.bf16.mxu1 %v11626_v25 }
0x1581   :  { %8119 = vmatpush1.bf16.msra.mxu0 %v11628_v4  ;;  %8151 = vmatpush1.bf16.msra.mxu1 %v11637_v34 }
0x1582   :  { %8121 = vmatprep.subr.bf16.mxu0 %v11651_v51  ;;  %8153 = vmatprep.subr.bf16.mxu1 %v11667_v28 }
0x1585   :  { %8123 = vmatpush1.bf16.msra.mxu0 %v11669_v49  ;;  %8155 = vmatpush1.bf16.msra.mxu1 %v11678_v9 }
0x1586   :  { %8125 = vmatprep.subr.bf16.mxu0 %v11692_v60  ;;  %8157 = vmatprep.subr.bf16.mxu1 %v11705_v43 }
0x1589   :  { %8127 = vmatpush1.bf16.msra.mxu0 %v11707_v61  ;;  %8159 = vmatpush1.bf16.msra.mxu1 %v11719_v8 }
0x158a   :  { %8129 = vmatprep.subr.bf16.mxu0 %v11731_v55  ;;  %8161 = vmatprep.subr.bf16.mxu1 %v11746_v48 }
0x158d   :  { %8131 = vmatpush1.bf16.msra.mxu0 %v11748_v62  ;;  %8163 = vmatpush1.bf16.msra.mxu1 %v11757_v50 }
0x158e   :  { %8133 = vmatprep.subr.bf16.mxu0 %v11769_v27  ;;  %8165 = vmatprep.subr.bf16.mxu1 %v11782_v0 }
0x1591   :  { %8135 = vmatpush1.bf16.msra.mxu0 %v11784_v15  ;;  %8167 = vmatpush1.bf16.msra.mxu1 %v11793_v1 }
0x1592   :  { %8137 = vmatprep.subr.bf16.mxu0 %v11805_v57  ;;  %8169 = vmatprep.subr.bf16.mxu1 %v11818_v19 }
0x1595   :  { %8139 = vmatpush1.bf16.msra.mxu0 %v11820_v31  ;;  %8171 = vmatpush1.bf16.msra.mxu1 %v11829_v20 }
0x1596   :  { %8173 = vmatprep.subr.bf16.mxu0 %v11530_v42  ;;  %8205 = vmatprep.subr.bf16.mxu1 %v11544_v6 }
0x164b   :  { %v5609_v30 = vpop.f32.mrb[42].mxu0  ;;  %v5680_v58 = vpop.f32.mrb[42].mxu1 }
0x164c   :  { %v8310_v33 = vadd.f32 %v5609_v30, %v11886_v36  ;;  %v5611_v14 = vpop.f32.mrb[43].mxu0  ;;  %v5682_v59 = vpop.f32.mrb[43].mxu1  ;;  %v8326_v23 = vadd.f32 %v5680_v58, %v11894_v47 }
0x164d   :  { %v8311_v52 = vadd.f32 %v5611_v14, %v11889_v16  ;;  %v8327_v11 = vadd.f32 %v5682_v59, %v11897_v29 }
0x164e   :  { %v6304_v56 = vmul.f32 -1.442695, %v8310_v33  ;;  %v6306_v63 = vmul.f32 -1.442695, %v8326_v23 }
0x164f   :  { %v6305_v18 = vmul.f32 -1.442695, %v8311_v52 }
0x1650   :  { %8797 = vpow2.f32 %v6304_v56 }
0x1651   :  { %8799 = vpow2.f32 %v6305_v18 }
0x1652   :  { %8801 = vtanh.f32 %v8327_v11 }
0x1653   :  { %8803 = vpow2.f32 %v6306_v63 }
0x165a   :  { %v8798_v42 = vpop.eup %8797 }
0x165b   :  { %v5698_v10 = vadd.f32 1.0, %v8798_v42  ;;  %v8800_v6 = vpop.eup %8799 }
0x165c   :  { %v5699_v39 = vadd.f32 1.0, %v8800_v6  ;;  %v8802_v32 = vpop.eup %8801 }
0x165d   :  { %8805 = vrcp.f32 %v5698_v10  ;;  %v8804_v35 = vpop.eup %8803 }
0x165e   :  { %8807 = vrcp.f32 %v5699_v39  ;;  %v5700_v46 = vadd.f32 1.0, %v8804_v35 }
0x1660   :  { %8809 = vrcp.f32 %v5700_v46 }
0x1667   :  { %v8806_v40 = vpop.eup %8805 }
0x1668   :  { %v5710_v13 = vmul.f32 %v8806_v40, %v8802_v32  ;;  %v8808_v41 = vpop.eup %8807 }
0x1669   :  { %v5709_v21 = vmul.f32 %v8808_v41, %v12081_v7 }
0x166a   :  { %v8810_v38 = vpop.eup %8809 }
0x166b   :  { %v12126_v5 = vadd.f32 %v5710_v13, %v5709_v21 }
0x166d   :  { %8811 = vtanh.f32 %v12126_v5 }
0x1677   :  { %v8812_v37 = vpop.eup %8811 }
0x1678   :  { %v5713_v24 = vmul.f32 %v8812_v37, %v8810_v38 }
0x167a   :  { %6307 = vst [vmem:[%s12181_s6 + $0xb8] sm:$0xff] %v5713_v24  ;;  %5787 = vmatmul.mubr.f32.vlgmr.msra.gmra.mrb[44].mxu0 %v5713_v24  ;;  %5858 = vmatmul.mubr.f32.vlgmr.msra.gmra.mrb[44].mxu1 %v5713_v24 }
0x167b   :  { %8175 = vmatpush1.bf16.msra.mxu0 %v11546_v45  ;;  %8207 = vmatpush1.bf16.msra.mxu1 %v11555_v44 }
0x167c   :  { %8177 = vmatprep.subr.bf16.mxu0 %v11569_v17  ;;  %8209 = vmatprep.subr.bf16.mxu1 %v11585_v54 }
0x167d   :  { %5965 = vmatprep.mubr.f32.mxu0 %v8846_v3  ;;  %6036 = vmatprep.mubr.f32.mxu1 %v8846_v3 }
0x167f   :  { %8179 = vmatpush1.bf16.msra.mxu0 %v11587_v26  ;;  %8211 = vmatpush1.bf16.msra.mxu1 %v11596_v2 }
0x1680   :  { %8181 = vmatprep.subr.bf16.mxu0 %v11610_v22  ;;  %8213 = vmatprep.subr.bf16.mxu1 %v11626_v25 }
0x1683   :  { %8183 = vmatpush1.bf16.msra.mxu0 %v11628_v4  ;;  %8215 = vmatpush1.bf16.msra.mxu1 %v11637_v34 }
0x1684   :  { %8185 = vmatprep.subr.bf16.mxu0 %v11651_v51  ;;  %8217 = vmatprep.subr.bf16.mxu1 %v11667_v28 }
0x1687   :  { %8187 = vmatpush1.bf16.msra.mxu0 %v11669_v49  ;;  %8219 = vmatpush1.bf16.msra.mxu1 %v11678_v9 }
0x1688   :  { %8189 = vmatprep.subr.bf16.mxu0 %v11692_v60  ;;  %8221 = vmatprep.subr.bf16.mxu1 %v11705_v43 }
0x168b   :  { %8191 = vmatpush1.bf16.msra.mxu0 %v11707_v61  ;;  %8223 = vmatpush1.bf16.msra.mxu1 %v11719_v8 }
0x168c   :  { %8193 = vmatprep.subr.bf16.mxu0 %v11731_v55  ;;  %8225 = vmatprep.subr.bf16.mxu1 %v11746_v48 }
0x168f   :  { %8195 = vmatpush1.bf16.msra.mxu0 %v11748_v62  ;;  %8227 = vmatpush1.bf16.msra.mxu1 %v11757_v50 }
0x1690   :  { %8197 = vmatprep.subr.bf16.mxu0 %v11769_v27  ;;  %8229 = vmatprep.subr.bf16.mxu1 %v11782_v0 }
0x1693   :  { %8199 = vmatpush1.bf16.msra.mxu0 %v11784_v15  ;;  %8231 = vmatpush1.bf16.msra.mxu1 %v11793_v1 }
0x1694   :  { %8201 = vmatprep.subr.bf16.mxu0 %v11805_v57  ;;  %8233 = vmatprep.subr.bf16.mxu1 %v11818_v19 }
0x1697   :  { %8203 = vmatpush1.bf16.msra.mxu0 %v11820_v31  ;;  %8235 = vmatpush1.bf16.msra.mxu1 %v11829_v20 }
0x174d   :  { %v5788_v3 = vpop.f32.mrb[44].mxu0  ;;  %v5859_v45 = vpop.f32.mrb[44].mxu1 }
0x174e   :  { %v8312_v44 = vadd.f32 %v5788_v3, %v11886_v36  ;;  %v5790_v17 = vpop.f32.mrb[45].mxu0  ;;  %v5861_v54 = vpop.f32.mrb[45].mxu1  ;;  %v8328_v25 = vadd.f32 %v5859_v45, %v11894_v47 }
0x174f   :  { %v8313_v26 = vadd.f32 %v5790_v17, %v11889_v16  ;;  %v8329_v4 = vadd.f32 %v5861_v54, %v11897_v29 }
0x1750   :  { %v6308_v2 = vmul.f32 -1.442695, %v8312_v44  ;;  %v6310_v34 = vmul.f32 -1.442695, %v8328_v25 }
0x1751   :  { %v6309_v22 = vmul.f32 -1.442695, %v8313_v26 }
0x1752   :  { %8813 = vpow2.f32 %v6308_v2 }
0x1753   :  { %8815 = vpow2.f32 %v6309_v22 }
0x1754   :  { %8817 = vtanh.f32 %v8329_v4 }
0x1755   :  { %8819 = vpow2.f32 %v6310_v34 }
0x175c   :  { %v8814_v51 = vpop.eup %8813 }
0x175d   :  { %v5877_v28 = vadd.f32 1.0, %v8814_v51  ;;  %v8816_v49 = vpop.eup %8815 }
0x175e   :  { %v5878_v9 = vadd.f32 1.0, %v8816_v49  ;;  %v8818_v60 = vpop.eup %8817 }
0x175f   :  { %8821 = vrcp.f32 %v5877_v28  ;;  %v8820_v43 = vpop.eup %8819 }
0x1760   :  { %8823 = vrcp.f32 %v5878_v9  ;;  %v5879_v48 = vadd.f32 1.0, %v8820_v43 }
0x1762   :  { %8825 = vrcp.f32 %v5879_v48 }
0x1769   :  { %v8822_v61 = vpop.eup %8821 }
0x176a   :  { %v5889_v8 = vmul.f32 %v8822_v61, %v8818_v60  ;;  %v8824_v55 = vpop.eup %8823 }
0x176b   :  { %v5888_v62 = vmul.f32 %v8824_v55, %v12126_v5 }
0x176c   :  { %v8826_v27 = vpop.eup %8825 }
0x176d   :  { %v5890_v50 = vadd.f32 %v5889_v8, %v5888_v62 }
0x176f   :  { %8827 = vtanh.f32 %v5890_v50 }
0x1779   :  { %v8828_v0 = vpop.eup %8827 }
0x177a   :  { %v5892_v15 = vmul.f32 %v8828_v0, %v8826_v27 }
0x177c   :  { %6311 = vst [vmem:[%s12181_s6 + $0xd8] sm:$0xff] %v5892_v15  ;;  %5966 = vmatmul.mubr.f32.vlgmr.msra.gmra.mrb[46].mxu0 %v5892_v15  ;;  %6037 = vmatmul.mubr.f32.vlgmr.msra.gmra.mrb[46].mxu1 %v5892_v15 }
0x184f   :  { %v5967_v1 = vpop.f32.mrb[46].mxu0  ;;  %v6038_v57 = vpop.f32.mrb[46].mxu1 }
0x1850   :  { %v8314_v19 = vadd.f32 %v5967_v1, %v11886_v36  ;;  %v5969_v31 = vpop.f32.mrb[47].mxu0  ;;  %v6040_v20 = vpop.f32.mrb[47].mxu1  ;;  %v8330_v30 = vadd.f32 %v6038_v57, %v11894_v47 }
0x1851   :  { %v8315_v7 = vadd.f32 %v5969_v31, %v11889_v16  ;;  %v8331_v58 = vadd.f32 %v6040_v20, %v11897_v29 }
0x1852   :  { %v6312_v12 = vmul.f32 -1.442695, %v8314_v19  ;;  %v6314_v33 = vmul.f32 -1.442695, %v8330_v30 }
0x1853   :  { %v6313_v53 = vmul.f32 -1.442695, %v8315_v7 }
0x1854   :  { %8829 = vpow2.f32 %v6312_v12 }
0x1855   :  { %8831 = vpow2.f32 %v6313_v53 }
0x1856   :  { %8833 = vtanh.f32 %v8331_v58 }
0x1857   :  { %8835 = vpow2.f32 %v6314_v33 }
0x185e   :  { %v8830_v14 = vpop.eup %8829 }
0x185f   :  { %v6056_v59 = vadd.f32 1.0, %v8830_v14  ;;  %v8832_v52 = vpop.eup %8831 }
0x1860   :  { %v6057_v36 = vadd.f32 1.0, %v8832_v52  ;;  %v8834_v56 = vpop.eup %8833 }
0x1861   :  { %8837 = vrcp.f32 %v6056_v59  ;;  %v8836_v18 = vpop.eup %8835 }
0x1862   :  { %8839 = vrcp.f32 %v6057_v36  ;;  %v6058_v63 = vadd.f32 1.0, %v8836_v18 }
0x1864   :  { %8841 = vrcp.f32 %v6058_v63 }
0x186b   :  { %v8838_v16 = vpop.eup %8837 }
0x186c   :  { %v6068_v23 = vmul.f32 %v8838_v16, %v8834_v56  ;;  %v8840_v11 = vpop.eup %8839 }
0x186d   :  { %v6067_v42 = vmul.f32 %v8840_v11, %v5890_v50 }
0x186e   :  { %v8842_v47 = vpop.eup %8841 }
0x186f   :  { %v6069_v10 = vadd.f32 %v6068_v23, %v6067_v42 }
0x1871   :  { %8843 = vtanh.f32 %v6069_v10 }
0x187b   :  { %v8844_v29 = vpop.eup %8843 }
0x187c   :  { %v6071_v6 = vmul.f32 %v8844_v29, %v8842_v47 }
0x187e   :  { %6315 = vst [vmem:[%s12181_s6 + $0xf8] sm:$0xff] %v6071_v6 }

</bundles_post_ra>
